<compile_context>
chip_gen: v5e
topology: v5e:2x2
jax: 0.10.0
libtpu: 0.0.40
codegen_flags: <defaults>
</compile_context>

<pallas_src>
import math

import jax
import jax.numpy as jnp
from jax.experimental import pallas as pl
from jax.experimental.pallas import tpu as pltpu

IN_DIM = 6000
H1, H2, H3, OUT_DIM = 768, 512, 256, 60

TN = 256                 # W1 output-column slab streamed per grid step
N_STEPS = H1 // TN       # 3


def _prelu(h, a):
    # PReLU with a single shared slope (PyTorch nn.PReLU() default).
    return jnp.where(h >= 0.0, h, a * h)


# ---------------------------------------------------------------------------
# Single fused kernel.
#   step n (n = 0..2): h1[:, n*256:(n+1)*256] = PReLU(x @ W1[:, slab] + b1)
#   last step        : out = (PReLU(PReLU(h1@W2+b2)@W3+b3)) @ W4 + b4
# W1 is the only large, streamed operand; x / W2 / W3 / W4 / biases use
# constant index maps so they are DMA'd once and stay resident in VMEM.
# ---------------------------------------------------------------------------
def encoder_kernel(x_ref, w1_ref, b1_ref, w2_ref, b2_ref, w3_ref, b3_ref,
                   w4_ref, b4_ref, a_ref, o_ref, h1_ref):
    n = pl.program_id(0)

    # ----- layer 1 on one 256-wide column slab of W1 -----------------------
    xb = x_ref[...].astype(jnp.bfloat16)                   # cast in-kernel
    h = jnp.dot(xb, w1_ref[...], preferred_element_type=jnp.float32)
    h = _prelu(h + b1_ref[...], a_ref[0])
    col = pl.multiple_of(n * TN, TN)                       # 128-aligned lanes
    h1_ref[:, pl.ds(col, TN)] = h                          # f32 scratch slab

    # ----- tiny tail (layers 2..4), once h1 is complete ---------------------
    @pl.when(n == pl.num_programs(0) - 1)
    def _():
        t = jnp.dot(h1_ref[...].astype(jnp.bfloat16), w2_ref[...],
                    preferred_element_type=jnp.float32)
        t = _prelu(t + b2_ref[...], a_ref[1]).astype(jnp.bfloat16)
        t = jnp.dot(t, w3_ref[...], preferred_element_type=jnp.float32)
        t = _prelu(t + b3_ref[...], a_ref[2]).astype(jnp.bfloat16)
        o_ref[...] = (jnp.dot(t, w4_ref[...],
                              preferred_element_type=jnp.float32)
                      + b4_ref[...]).astype(o_ref.dtype)


def encoder_forward(x, params):
    B, K = x.shape
    assert K == IN_DIM
    # Sublane-friendly batch (no-op for B a multiple of 8).
    B_pad = max(8, -(-B // 8) * 8)
    if B_pad != B:
        x = jnp.pad(x, ((0, B_pad - B), (0, 0)))

    out = pl.pallas_call(
        encoder_kernel,
        out_shape=jax.ShapeDtypeStruct((B_pad, OUT_DIM), jnp.float32),
        grid_spec=pltpu.PrefetchScalarGridSpec(
            num_scalar_prefetch=0,
            grid=(N_STEPS,),
            in_specs=[
                pl.BlockSpec((B_pad, IN_DIM), lambda n: (0, 0)),     # x (resident)
                pl.BlockSpec((IN_DIM, TN), lambda n: (0, n)),        # W1 slab
                pl.BlockSpec((1, TN), lambda n: (0, n)),             # b1 slab
                pl.BlockSpec((H1, H2), lambda n: (0, 0)),            # W2 (resident)
                pl.BlockSpec((1, H2), lambda n: (0, 0)),             # b2
                pl.BlockSpec((H2, H3), lambda n: (0, 0)),            # W3
                pl.BlockSpec((1, H3), lambda n: (0, 0)),             # b3
                pl.BlockSpec((H3, OUT_DIM), lambda n: (0, 0)),       # W4
                pl.BlockSpec((1, OUT_DIM), lambda n: (0, 0)),        # b4
                pl.BlockSpec(memory_space=pltpu.MemorySpace.SMEM),   # PReLU slopes
            ],
            out_specs=pl.BlockSpec((B_pad, OUT_DIM), lambda n: (0, 0)),
            scratch_shapes=[pltpu.VMEM((B_pad, H1), jnp.float32)],   # h1
        ),
        compiler_params=pltpu.CompilerParams(
            dimension_semantics=("arbitrary",),
            vmem_limit_bytes=32 << 20,
        ),
    )(x, params["w1"], params["b1"], params["w2"], params["b2"],
      params["w3"], params["b3"], params["w4"], params["b4"],
      params["prelu_a"])

    return out[:B]


def init_params(key):
    """PyTorch-style init U(-1/sqrt(fan_in), 1/sqrt(fan_in)); weights stored
    bf16 (no padding needed), biases f32."""
    dims = [IN_DIM, H1, H2, H3, OUT_DIM]
    params = {}
    keys = jax.random.split(key, 2 * (len(dims) - 1))
    for i in range(len(dims) - 1):
        fan_in, fan_out = dims[i], dims[i + 1]
        bound = 1.0 / math.sqrt(fan_in)
        w = jax.random.uniform(keys[2 * i], (fan_in, fan_out),
                               jnp.float32, -bound, bound)
        b = jax.random.uniform(keys[2 * i + 1], (1, fan_out),
                               jnp.float32, -bound, bound)
        params[f"w{i + 1}"] = w.astype(jnp.bfloat16)
        params[f"b{i + 1}"] = b
    # nn.PReLU() default: one shared slope per layer, initialized to 0.25.
    params["prelu_a"] = jnp.full((3,), 0.25, dtype=jnp.float32)
    return params


def encoder_reference(x, p):
    """f32 reference using the same (bf16-stored) weights, upcast to f32."""
    h = _prelu(x @ p["w1"].astype(jnp.float32) + p["b1"], p["prelu_a"][0])
    h = _prelu(h @ p["w2"].astype(jnp.float32) + p["b2"], p["prelu_a"][1])
    h = _prelu(h @ p["w3"].astype(jnp.float32) + p["b3"], p["prelu_a"][2])
    return h @ p["w4"].astype(jnp.float32) + p["b4"]


if __name__ == "__main__":
    key = jax.random.PRNGKey(0)
    kx, kp = jax.random.split(key)
    B = 8
    x = jax.random.normal(kx, (B, IN_DIM), dtype=jnp.float32)
    params = init_params(kp)

    fwd = jax.jit(encoder_forward)
    y = jax.block_until_ready(fwd(x, params))

    y_ref = encoder_reference(x, params)
    assert y.shape == (B, OUT_DIM)
    # bf16 inputs / weights with f32 accumulation -> ~0.1-1% deviation vs f32.
    assert jnp.allclose(y, y_ref, atol=1e-2, rtol=1e-2), "mismatch vs JAX reference"
    print("KERNEL_OK")
</pallas_src>

<mosaic_0001>
module attributes {stable_mosaic.version = 11 : i64} {
  func.func @encoder_kernel(%arg0: i32, %arg1: memref<8x6000xf32, #tpu.memory_space<vmem>>, %arg2: memref<6000x256xbf16, #tpu.memory_space<vmem>>, %arg3: memref<1x256xf32, #tpu.memory_space<vmem>>, %arg4: memref<768x512xbf16, #tpu.memory_space<vmem>>, %arg5: memref<1x512xf32, #tpu.memory_space<vmem>>, %arg6: memref<512x256xbf16, #tpu.memory_space<vmem>>, %arg7: memref<1x256xf32, #tpu.memory_space<vmem>>, %arg8: memref<256x60xbf16, #tpu.memory_space<vmem>>, %arg9: memref<1x60xf32, #tpu.memory_space<vmem>>, %arg10: memref<3xf32, #tpu.memory_space<smem>>, %arg11: memref<8x60xf32, #tpu.memory_space<vmem>>, %arg12: memref<8x768xf32, #tpu.memory_space<vmem>>) attributes {dimension_semantics = [#tpu.dimension_semantics<arbitrary>], iteration_bounds = array<i64: 3>, scalar_prefetch = 0 : i64, scratch_operands = 1 : i64, tpu.core_type = #tpu.core_type<tc>, window_params = [{pipeline_mode = #tpu.pipeline_mode<synchronous>, transform_indices = @transform_0, window_bounds = array<i64: 8, 6000>}, {transform_indices = @transform_1, window_bounds = array<i64: 6000, 256>}, {transform_indices = @transform_2, window_bounds = array<i64: 1, 256>}, {pipeline_mode = #tpu.pipeline_mode<synchronous>, transform_indices = @transform_3, window_bounds = array<i64: 768, 512>}, {pipeline_mode = #tpu.pipeline_mode<synchronous>, transform_indices = @transform_4, window_bounds = array<i64: 1, 512>}, {pipeline_mode = #tpu.pipeline_mode<synchronous>, transform_indices = @transform_5, window_bounds = array<i64: 512, 256>}, {pipeline_mode = #tpu.pipeline_mode<synchronous>, transform_indices = @transform_6, window_bounds = array<i64: 1, 256>}, {pipeline_mode = #tpu.pipeline_mode<synchronous>, transform_indices = @transform_7, window_bounds = array<i64: 256, 60>}, {pipeline_mode = #tpu.pipeline_mode<synchronous>, transform_indices = @transform_8, window_bounds = array<i64: 1, 60>}, {transform_indices = @transform_9, window_bounds = array<i64: 3>}, {pipeline_mode = #tpu.pipeline_mode<synchronous>, transform_indices = @transform_10, window_bounds = array<i64: 8, 60>}]} {
    %c0 = arith.constant 0 : index
    %c0_0 = arith.constant 0 : index
    %0 = vector.load %arg1[%c0, %c0_0] : memref<8x6000xf32, #tpu.memory_space<vmem>>, vector<8x6000xf32>
    %1 = arith.truncf %0 : vector<8x6000xf32> to vector<8x6000xbf16>
    %c0_1 = arith.constant 0 : index
    %c0_2 = arith.constant 0 : index
    %2 = vector.load %arg2[%c0_1, %c0_2] : memref<6000x256xbf16, #tpu.memory_space<vmem>>, vector<6000x256xbf16>
    %cst = arith.constant dense<0.000000e+00> : vector<8x256xf32>
    %3 = tpu.matmul %1, %2, %cst {dimension_numbers = #tpu.dot_dimension_numbers<[1], [0], [0], [1], [0, 0, 1, 1], [], []>} : vector<8x6000xbf16>, vector<6000x256xbf16>, vector<8x256xf32> -> vector<8x256xf32>
    %c0_3 = arith.constant 0 : index
    %c0_4 = arith.constant 0 : index
    %4 = vector.load %arg3[%c0_3, %c0_4] : memref<1x256xf32, #tpu.memory_space<vmem>>, vector<1x256xf32>
    %5 = vector.broadcast %4 : vector<1x256xf32> to vector<8x256xf32>
    %6 = arith.addf %3, %5 : vector<8x256xf32>
    %c0_5 = arith.constant 0 : index
    %7 = memref.load %arg10[%c0_5] : memref<3xf32, #tpu.memory_space<smem>>
    %cst_6 = arith.constant 0.000000e+00 : f32
    %8 = vector.broadcast %cst_6 : f32 to vector<8x256xf32>
    %9 = arith.cmpf oge, %6, %8 : vector<8x256xf32>
    %10 = vector.broadcast %7 : f32 to vector<8x256xf32>
    %11 = arith.mulf %10, %6 : vector<8x256xf32>
    %12 = arith.select %9, %6, %11 : vector<8x256xi1>, vector<8x256xf32>
    %c256_i32 = arith.constant 256 : i32
    %13 = arith.muli %arg0, %c256_i32 : i32
    %14 = tpu.assume_multiple %13, 256 : i32
    %c0_7 = arith.constant 0 : index
    %15 = arith.index_cast %14 : i32 to index
    %16 = vector.load %arg12[%c0_7, %15] : memref<8x768xf32, #tpu.memory_space<vmem>>, vector<8x256xf32>
    tpu.vector_store %arg12[%c0_7, %15], %12 {strides = array<i32>} : memref<8x768xf32, #tpu.memory_space<vmem>>, vector<8x256xf32>,
    %c2_i32 = arith.constant 2 : i32
    %17 = arith.cmpi eq, %arg0, %c2_i32 : i32
    %18 = arith.extui %17 : i1 to i32
    %c0_i32 = arith.constant 0 : i32
    %19 = arith.cmpi ne, %18, %c0_i32 : i32
    scf.if %19 {
      %c0_8 = arith.constant 0 : index
      %c0_9 = arith.constant 0 : index
      %20 = vector.load %arg12[%c0_8, %c0_9] : memref<8x768xf32, #tpu.memory_space<vmem>>, vector<8x768xf32>
      %21 = arith.truncf %20 : vector<8x768xf32> to vector<8x768xbf16>
      %c0_10 = arith.constant 0 : index
      %c0_11 = arith.constant 0 : index
      %22 = vector.load %arg4[%c0_10, %c0_11] : memref<768x512xbf16, #tpu.memory_space<vmem>>, vector<768x512xbf16>
      %cst_12 = arith.constant dense<0.000000e+00> : vector<8x512xf32>
      %23 = tpu.matmul %21, %22, %cst_12 {dimension_numbers = #tpu.dot_dimension_numbers<[1], [0], [0], [1], [0, 0, 1, 1], [], []>} : vector<8x768xbf16>, vector<768x512xbf16>, vector<8x512xf32> -> vector<8x512xf32>
      %c0_13 = arith.constant 0 : index
      %c0_14 = arith.constant 0 : index
      %24 = vector.load %arg5[%c0_13, %c0_14] : memref<1x512xf32, #tpu.memory_space<vmem>>, vector<1x512xf32>
      %25 = vector.broadcast %24 : vector<1x512xf32> to vector<8x512xf32>
      %26 = arith.addf %23, %25 : vector<8x512xf32>
      %c1 = arith.constant 1 : index
      %27 = memref.load %arg10[%c1] : memref<3xf32, #tpu.memory_space<smem>>
      %cst_15 = arith.constant 0.000000e+00 : f32
      %28 = vector.broadcast %cst_15 : f32 to vector<8x512xf32>
      %29 = arith.cmpf oge, %26, %28 : vector<8x512xf32>
      %30 = vector.broadcast %27 : f32 to vector<8x512xf32>
      %31 = arith.mulf %30, %26 : vector<8x512xf32>
      %32 = arith.select %29, %26, %31 : vector<8x512xi1>, vector<8x512xf32>
      %33 = arith.truncf %32 : vector<8x512xf32> to vector<8x512xbf16>
      %c0_16 = arith.constant 0 : index
      %c0_17 = arith.constant 0 : index
      %34 = vector.load %arg6[%c0_16, %c0_17] : memref<512x256xbf16, #tpu.memory_space<vmem>>, vector<512x256xbf16>
      %cst_18 = arith.constant dense<0.000000e+00> : vector<8x256xf32>
      %35 = tpu.matmul %33, %34, %cst_18 {dimension_numbers = #tpu.dot_dimension_numbers<[1], [0], [0], [1], [0, 0, 1, 1], [], []>} : vector<8x512xbf16>, vector<512x256xbf16>, vector<8x256xf32> -> vector<8x256xf32>
      %c0_19 = arith.constant 0 : index
      %c0_20 = arith.constant 0 : index
      %36 = vector.load %arg7[%c0_19, %c0_20] : memref<1x256xf32, #tpu.memory_space<vmem>>, vector<1x256xf32>
      %37 = vector.broadcast %36 : vector<1x256xf32> to vector<8x256xf32>
      %38 = arith.addf %35, %37 : vector<8x256xf32>
      %c2 = arith.constant 2 : index
      %39 = memref.load %arg10[%c2] : memref<3xf32, #tpu.memory_space<smem>>
      %cst_21 = arith.constant 0.000000e+00 : f32
      %40 = vector.broadcast %cst_21 : f32 to vector<8x256xf32>
      %41 = arith.cmpf oge, %38, %40 : vector<8x256xf32>
      %42 = vector.broadcast %39 : f32 to vector<8x256xf32>
      %43 = arith.mulf %42, %38 : vector<8x256xf32>
      %44 = arith.select %41, %38, %43 : vector<8x256xi1>, vector<8x256xf32>
      %45 = arith.truncf %44 : vector<8x256xf32> to vector<8x256xbf16>
      %c0_22 = arith.constant 0 : index
      %c0_23 = arith.constant 0 : index
      %46 = vector.load %arg8[%c0_22, %c0_23] : memref<256x60xbf16, #tpu.memory_space<vmem>>, vector<256x60xbf16>
      %cst_24 = arith.constant dense<0.000000e+00> : vector<8x60xf32>
      %47 = tpu.matmul %45, %46, %cst_24 {dimension_numbers = #tpu.dot_dimension_numbers<[1], [0], [0], [1], [0, 0, 1, 1], [], []>} : vector<8x256xbf16>, vector<256x60xbf16>, vector<8x60xf32> -> vector<8x60xf32>
      %c0_25 = arith.constant 0 : index
      %c0_26 = arith.constant 0 : index
      %48 = vector.load %arg9[%c0_25, %c0_26] : memref<1x60xf32, #tpu.memory_space<vmem>>, vector<1x60xf32>
      %49 = vector.broadcast %48 : vector<1x60xf32> to vector<8x60xf32>
      %50 = arith.addf %47, %49 : vector<8x60xf32>
      %c0_27 = arith.constant 0 : index
      %c0_28 = arith.constant 0 : index
      %51 = vector.load %arg11[%c0_27, %c0_28] : memref<8x60xf32, #tpu.memory_space<vmem>>, vector<8x60xf32>
      tpu.vector_store %arg11[%c0_27, %c0_28], %50 {strides = array<i32>} : memref<8x60xf32, #tpu.memory_space<vmem>>, vector<8x60xf32>,
    } else {
    }
    return
  }
  func.func @transform_0(%arg0: i32) -> (i32, i32) {
    %c0_i32 = arith.constant 0 : i32
    %c0_i32_0 = arith.constant 0 : i32
    %c0_i32_1 = arith.constant 0 : i32
    return %c0_i32, %c0_i32_0 : i32, i32
  }
  func.func @transform_1(%arg0: i32) -> (i32, i32) {
    %c0_i32 = arith.constant 0 : i32
    %c0_i32_0 = arith.constant 0 : i32
    return %c0_i32, %arg0 : i32, i32
  }
  func.func @transform_2(%arg0: i32) -> (i32, i32) {
    %c0_i32 = arith.constant 0 : i32
    %c0_i32_0 = arith.constant 0 : i32
    return %c0_i32, %arg0 : i32, i32
  }
  func.func @transform_3(%arg0: i32) -> (i32, i32) {
    %c0_i32 = arith.constant 0 : i32
    %c0_i32_0 = arith.constant 0 : i32
    %c0_i32_1 = arith.constant 0 : i32
    return %c0_i32, %c0_i32_0 : i32, i32
  }
  func.func @transform_4(%arg0: i32) -> (i32, i32) {
    %c0_i32 = arith.constant 0 : i32
    %c0_i32_0 = arith.constant 0 : i32
    %c0_i32_1 = arith.constant 0 : i32
    return %c0_i32, %c0_i32_0 : i32, i32
  }
  func.func @transform_5(%arg0: i32) -> (i32, i32) {
    %c0_i32 = arith.constant 0 : i32
    %c0_i32_0 = arith.constant 0 : i32
    %c0_i32_1 = arith.constant 0 : i32
    return %c0_i32, %c0_i32_0 : i32, i32
  }
  func.func @transform_6(%arg0: i32) -> (i32, i32) {
    %c0_i32 = arith.constant 0 : i32
    %c0_i32_0 = arith.constant 0 : i32
    %c0_i32_1 = arith.constant 0 : i32
    return %c0_i32, %c0_i32_0 : i32, i32
  }
  func.func @transform_7(%arg0: i32) -> (i32, i32) {
    %c0_i32 = arith.constant 0 : i32
    %c0_i32_0 = arith.constant 0 : i32
    %c0_i32_1 = arith.constant 0 : i32
    return %c0_i32, %c0_i32_0 : i32, i32
  }
  func.func @transform_8(%arg0: i32) -> (i32, i32) {
    %c0_i32 = arith.constant 0 : i32
    %c0_i32_0 = arith.constant 0 : i32
    %c0_i32_1 = arith.constant 0 : i32
    return %c0_i32, %c0_i32_0 : i32, i32
  }
  func.func @transform_9(%arg0: i32) -> i32 {
    %c0_i32 = arith.constant 0 : i32
    %c0_i32_0 = arith.constant 0 : i32
    return %c0_i32 : i32
  }
  func.func @transform_10(%arg0: i32) -> (i32, i32) {
    %c0_i32 = arith.constant 0 : i32
    %c0_i32_0 = arith.constant 0 : i32
    %c0_i32_1 = arith.constant 0 : i32
    return %c0_i32, %c0_i32_0 : i32, i32
  }
}

</mosaic_0001>

<bundles_post_ra>
// kernel: encoder_forward.1
= control target key start
LH: loop header
LB: loop body
LE: loop exit
PB: predicated region body
PF: predicated region fallthrough
CT: control target
= control target key end

     0   :  { %s16463_s0 = inlined_call_operand.hbm [shape: f32[8,6000], index: 0, kind: input, shape index: {}]   ;;  %s16464_s1 = inlined_call_operand.hbm [shape: bf16[6000,768], index: 1, kind: input, shape index: {}]   ;;  %s16465_s2 = inlined_call_operand.hbm [shape: f32[1,768], index: 2, kind: input, shape index: {}]   ;;  %s16466_s3 = inlined_call_operand.hbm [shape: bf16[768,512], index: 3, kind: input, shape index: {}]   ;;  %s16467_s4 = inlined_call_operand.hbm [shape: f32[1,512], index: 4, kind: input, shape index: {}]   ;;  %s16468_s5 = inlined_call_operand.hbm [shape: bf16[512,256], index: 5, kind: input, shape index: {}]   ;;  %s16469_s6 = inlined_call_operand.hbm [shape: f32[1,256], index: 6, kind: input, shape index: {}]   ;;  %s16470_s7 = inlined_call_operand.vmem [shape: bf16[256,60], index: 7, kind: input, shape index: {}]   ;;  %s16471_s8 = inlined_call_operand.hbm [shape: f32[1,60], index: 8, kind: input, shape index: {}]   ;;  %s16472_s9 = inlined_call_operand.hbm [shape: f32[3], index: 9, kind: input, shape index: {}]   ;;  %s16473_s10 = inlined_call_operand.hbm [shape: f32[8,60], index: 10, kind: output, shape index: {}]  }
   0x1   :  { %16488 = sst [smem:[#allocation37_spill]] %s16464_s1 }
   0x2   :  { %16489 = sst [smem:[#allocation38_spill]] %s16466_s3 }
   0x3   :  { %16490 = sst [smem:[#allocation39_spill]] %s16468_s5 }
   0x4   :  { %16491 = sst [smem:[#allocation40_spill]] %s16470_s7 }
   0x5   :  { %16492 = sst [smem:[#allocation41_spill]] %s16473_s10 }
   0x6   :  { %15 = vsyncpa [#allocation4], 0 }
   0x7   :  { %16 = vsyncpa [#allocation8], 0 }
   0x8   :  { %18 = vsyncpa [#allocation8 + $0x1], 0 }
   0x9   :  { %19 = vsyncpa [#allocation11], 0 }
   0xa   :  { %20 = vsyncpa [#allocation14], 0 }
   0xb   :  { %21 = vsyncpa [#allocation17], 0 }
   0xc   :  { %22 = vsyncpa [#allocation6], 0 }
   0xd   :  { %23 = vsyncpa [#allocation5], 0  ;;  %s14366_s13 = smov 0   ;;  %s14368_s14 = smov 0  }
   0xe   :  { %s14370_s15 = smov 0   ;;  %s14372_s16 = smov 0  }
   0xf LB: > { %s16493_s3 = sld [smem:[#allocation38_spill]]  ;;  %s14390_s20 = sadd.s32 4294967295, %s14296_s16   ;;  %s14296_s16 = sphi %s14372_s16, %s16523_s16   ;;  %s14292_s15 = sphi %s14370_s15, %s16527_s15   ;;  %s14288_s14 = sphi %s14368_s14, %s16526_s14   ;;  %s14284_s13 = sphi %s14366_s13, %s16525_s13  }
  0x10   : > { %p8680_p0 = scmp.ge.s32.totalorder %s14296_s16, 1  ;;  %p71_p1 = scmp.eq.s32.totalorder %s14390_s20, 0 }
  0x11   : > { %p275_p2 = scmp.lt.s32.totalorder %s14296_s16, 4  ;;  %s14298_s22 = smov [#allocation10]  }
  0x12   : > { %s300_s23 = sshll.u32 %s14298_s22, 4  ;;  %s16495_s5 = sld [smem:[#allocation39_spill]]  ;;  %s301_s23 = int_to_ptr.vmem [resolvable:$true] %s300_s23 }
  0x13   : > { %p14395_p3 = pnand %p8680_p0, %p275_p2  ;;  %s14299_s28 = smov [#allocation13]  }
  0x14   : > { %s326_s29 = sshll.u32 %s14299_s28, 4  ;;  %s14300_s30 = smov 256   ;;  %s327_s29 = int_to_ptr.vmem [resolvable:$true] %s326_s29 }
  0x15   : > { %s298_s19 = sshll.u32 %s16493_s3, 4  ;;  %p13862_p4 = pneg %p14395_p3  ;;  %s299_s19 = int_to_ptr.hbm [resolvable:$true] %s298_s19 }
  0x16   : > { %s14301_s11 = smov 16   ;;  %s16474_s12 = smov 128  }
  0x17   : > { %p14406_p5 = pnand %p13862_p4, %p71_p1  ;;  %s16475_s17 = smov 8  }
  0x18   : > { %s324_s26 = sshll.u32 %s16495_s5, 4  ;;  %s14418_s18 = sadd.s32 1, %s14296_s16   ;;  %s325_s26 = int_to_ptr.hbm [resolvable:$true] %s324_s26 }
  0x19   : > { %13868 = dma.hbm_to_vmem [thread:$0]  (!%p14406_p5), %s299_s19, 24576, %s301_s23, [#allocation11], %s14300_s30, %s14300_s30, %s14301_s11  }
  0x1a   : > { %13874 = dma.hbm_to_vmem [thread:$0]  (!%p14406_p5), %s325_s26, 8192, %s327_s29, [#allocation14], %s16474_s12, %s16474_s12, %s16475_s17  }
  0x1b   : > { %16497 = sst [smem:[#allocation27_spill]] %s14418_s18  ;;  %s57_s22 = sadd.s32 1, %s14292_s15 }
  0x1c   : > { %s54_s24 = ssub.s32 %s14296_s16, %s14418_s18  ;;  %p64_p6 = scmp.ne.s32.totalorder %s14292_s15, %s14288_s14 }
  0x1d   : > { %p55_p7 = scmp.eq.s32.totalorder %s54_s24, 0  ;;  %p65_p8 = scmp.eq.s32.totalorder %s14296_s16, 0 }
  0x1e   : > { %p70_p9 = scmp.ne.s32.totalorder %s14288_s14, %s14284_s13  ;;  %p13898_p10 = scmp.lt.s32.totalorder %s14296_s16, 3 }
  0x1f   : > { %s14430_s19 = scalar_select %p55_p7, %s14292_s15, %s57_s22  }
  0x20   : > { %p66_p11 = por %p65_p8, %p64_p6  ;;  %p14434_p12 = por %p71_p1, %p70_p9 }
  0x21   : > { %16498 = sst [smem:[#allocation28_spill]] %s14430_s19  ;;  %s377_s25 = sand.u32 1, %s14296_s16  }
  0x22   : > { %s16476_s26 = sand.u32 1, %s14292_s15   ;;  %s12801_s29 = sshll.u32 %s14296_s16, 3 }
  0x23   : > { %s13824_s28 = smul.u32 6000, %s16476_s26  ;;  %p14443_p13 = pnand %p13898_p10, %p66_p11 }
  0x24   : > { %s16501_s1 = sld [smem:[#allocation37_spill]]  ;;  %s14450_s3 = scalar_lea.sflag [#allocation8], %s377_s25 }
  0x25   : > { %s381_s12 = scalar_lea.vmem [#allocation7], %s13824_s28  ;;  %p14019_p2 = pneg %p14443_p13 }
  0x26   : > { %s389_s17 = sshll.u32 %s381_s12, 4  ;;  %s390_s17 = int_to_ptr.vmem [resolvable:$true] %s389_s17 }
  0x2a   : > { %s386_s22 = scalar_lea.hbm %s16501_s1, %s12801_s29  ;;  %s14022_s29 = scalar_lea.hbm %s16501_s1, 18000 }
  0x2b   : > { %s387_s24 = sshll.u32 %s386_s22, 4  ;;  %s388_s24 = int_to_ptr.hbm [resolvable:$true] %s387_s24 }
  0x2c   : > { %s14015_s5 = sshra.s32 %s388_s24, 4  ;;  %s14016_s5 = int_to_ptr.hbm [resolvable:$true] %s14015_s5 }
  0x2d   : > { %s14017_s26 = scalar_lea.hbm %s14016_s5, 6000  ;;  %p14023_p7 = scmp.lt.s32.totalorder %s14016_s5, %s16501_s1 }
  0x2e   : > { %p14018_p0 = scmp.ne.s32.totalorder %s14016_s5, %s14017_s26  ;;  %p14024_p8 = scmp.lt.s32.totalorder %s14022_s29, %s14017_s26 }
  0x30   : > { %p14020_p4 = pnand %p14019_p2, %p14018_p0  ;;  %p14025_p9 = por %p14024_p8, %p14023_p7 }
  0x32   : > { %p14021_p6 = pneg %p14020_p4 }
  0x34   : > { %p14026_p10 = pnand %p14025_p9, %p14021_p6 }
  0x36   : > { %14029 = shalt.err (!%p14026_p10)
}
  0x37   : > { %s14304_s25 = smov 384   ;;  %s16502_s22 = smov 8  }
  0x38   : > { %s16503_s19 = smov 128   ;;  %s287_s13 = sshll.u32 %s16463_s0, 4  ;;  %s288_s13 = int_to_ptr.hbm [resolvable:$true] %s287_s13 }
  0x39   : > { %13887 = dma.hbm_to_vmem [thread:$0]  (!%p14443_p13), %s388_s24, 96000, %s390_s17, %s14450_s3, %s14304_s25, %s16503_s19, %s16502_s22  }
  0x3a   : > { %s14305_s28 = smov [#allocation3]   ;;  %s313_s12 = sshll.u32 %s16467_s4, 4  ;;  %s314_s12 = int_to_ptr.hbm [resolvable:$true] %s313_s12 }
  0x3b   : > { %s289_s5 = sshll.u32 %s14305_s28, 4  ;;  %s14306_s1 = smov [#allocation12]   ;;  %s290_s5 = int_to_ptr.vmem [resolvable:$true] %s289_s5 }
  0x3c   : > { %13865 = dma.hbm_to_vmem [thread:$0]  (!%p14406_p5), %s288_s13, 6016, %s290_s5, [#allocation4]  }
  0x3d   : > { %s315_s10 = sshll.u32 %s14306_s1, 4  ;;  %s339_s18 = sshll.u32 %s16469_s6, 4  ;;  %s316_s10 = int_to_ptr.vmem [resolvable:$true] %s315_s10  ;;  %s340_s18 = int_to_ptr.hbm [resolvable:$true] %s339_s18 }
  0x3e   : > { %13871 = dma.hbm_to_vmem [thread:$0]  (!%p14406_p5), %s314_s12, 64, %s316_s10, [#allocation11]  }
  0x3f   : > { %s354_s25 = sshll.u32 %s16471_s8, 4  ;;  %s14307_s22 = smov [#allocation15]   ;;  %s355_s25 = int_to_ptr.hbm [resolvable:$true] %s354_s25 }
  0x40   : > { %s341_s11 = sshll.u32 %s14307_s22, 4  ;;  %s14308_s1 = smov [#allocation16]   ;;  %s342_s11 = int_to_ptr.vmem [resolvable:$true] %s341_s11 }
  0x41   : > { %13877 = dma.hbm_to_vmem [thread:$0]  (!%p14406_p5), %s340_s18, 32, %s342_s11, [#allocation14]  }
  0x42   : > { %s356_s7 = sshll.u32 %s14308_s1, 4  ;;  %s366_s5 = sshll.u32 %s16472_s9, 4  ;;  %s357_s7 = int_to_ptr.vmem [resolvable:$true] %s356_s7  ;;  %s367_s5 = int_to_ptr.hbm [resolvable:$true] %s366_s5 }
  0x43   : > { %13880 = dma.hbm_to_vmem [thread:$0]  (!%p14406_p5), %s355_s25, 16, %s357_s7, [#allocation17]  }
  0x44   : > { %s16504_s10 = sand.u32 1, %s14292_s15   ;;  %s14309_s29 = smov [#allocation18]  }
  0x45   : > { %s8691_s26 = sshll.u32 %s16504_s10, 1  ;;  %s8692_s12 = sshll.u32 %s14296_s16, 1 }
  0x46   : > { %13883 = dma.hbm_to_smem (!%p14406_p5), %s367_s5, 16, %s14309_s29, [#allocation6]  }
  0x47   : > { %s407_s18 = scalar_lea.hbm %s16465_s2, %s8692_s12  ;;  %s403_s24 = scalar_lea.vmem [#allocation9], %s8691_s26 }
  0x48   : > { %s411_s22 = sshll.u32 %s403_s24, 4  ;;  %s409_s11 = sshll.u32 %s407_s18, 4  ;;  %s412_s22 = int_to_ptr.vmem [resolvable:$true] %s411_s22  ;;  %s410_s11 = int_to_ptr.hbm [resolvable:$true] %s409_s11 }
  0x49   : > { %s14180_s1 = sshra.s32 %s410_s11, 4  ;;  %s14187_s16 = scalar_lea.hbm %s16465_s2, 6  ;;  %s14181_s1 = int_to_ptr.hbm [resolvable:$true] %s14180_s1 }
  0x4a   : > { %s14182_s13 = scalar_lea.hbm %s14181_s1, 2  ;;  %p14188_p5 = scmp.lt.s32.totalorder %s14181_s1, %s16465_s2 }
  0x4b   : > { %p14183_p11 = scmp.ne.s32.totalorder %s14181_s1, %s14182_s13  ;;  %p14189_p6 = scmp.lt.s32.totalorder %s14187_s16, %s14182_s13 }
  0x4d   : > { %p14185_p0 = pnand %p14183_p11, %p14019_p2  ;;  %p14190_p7 = por %p14189_p6, %p14188_p5 }
  0x4f   : > { %p14186_p4 = pneg %p14185_p0 }
  0x51   : > { %p14191_p8 = pnand %p14190_p7, %p14186_p4 }
  0x53   : > { %14194 = shalt.err (!%p14191_p8)
}
  0x54   : > { %13890 = dma.hbm_to_vmem [thread:$0]  (!%p14443_p13), %s410_s11, 32, %s412_s22, %s14450_s3  }
  0x55   : > { %420 = sbr.rel (%p14395_p3) target bundleno = 1651 (0x673), region = 60 }
  0x5a   : > { %14255 = dma.done.wait (%p71_p1), [#allocation4], 6016  }
  0x5b   : > { %14257 = vsyncadd (%p71_p1), [#allocation4], 4294961280  ;;  %s427_s5 = sand.u32 1, %s14390_s20   ;;  %s429_s10 = sand.u32 1, %s14288_s14  }
  0x5c   : > { %s13825_s26 = smul.u32 6000, %s429_s10  ;;  %s428_s29 = scalar_lea.sflag [#allocation8], %s427_s5 }
  0x5e   : > { %s14519_s12 = scalar_lea.vmem [#allocation7], %s13825_s26 }
  0x5f   : > { %14259 = dma.done.wait (%p14434_p12), %s428_s29, 96032  }
  0x60   : > { %14261 = vsyncadd (%p14434_p12), %s428_s29, 4294871264  ;;  %s14525_s3 = sshll.u32 %s429_s10, 1 }
  0x61   : > { %s441_s21 = scalar_lea.vmem [#allocation9], %s14525_s3 }
  0x62   : > { %14263 = dma.done.wait (%p71_p1), [#allocation11], 24640  }
  0x63   : > { %14265 = vsyncadd (%p71_p1), [#allocation11], 4294942656 }
  0x64   : > { %14267 = dma.done.wait (%p71_p1), [#allocation14], 8224  }
  0x65   : > { %14269 = vsyncadd (%p71_p1), [#allocation14], 4294959072 }
  0x66   : > { %14271 = dma.done.wait (%p71_p1), [#allocation17], 16  }
  0x67   : > { %14273 = vsyncadd (%p71_p1), [#allocation17], 4294967280 }
  0x68   : > { %14275 = dma.done.wait (%p71_p1), [#allocation6], 16  }
  0x69   : > { %14277 = vsyncadd (%p71_p1), [#allocation6], 4294967280 }
  0x6a   : > { %477 = sfence }
  0x6b   : > { %v8760_v0 = vld [vmem:[%s14519_s12 + $0x70] sm:$0xf]  ;;  %v12817_v1 = vld [vmem:[%s14519_s12 + $0x74] sm:$0xf0]  ;;  %v8752_v11 = vld [vmem:[%s14519_s12 + $0x60] sm:$0xf] }
  0x6c   : > { %v8888_v2 = vld [vmem:[%s14519_s12 + $0x170] sm:$0xf]  ;;  %v8761_v3 = vor.u32 %v12817_v1, %v8760_v0  ;;  %v12849_v4 = vld [vmem:[%s14519_s12 + $0x174] sm:$0xf0]  ;;  %v12815_v13 = vld [vmem:[%s14519_s12 + $0x64] sm:$0xf0] }
  0x6d   : > { %v8824_v5 = vld [vmem:[%s14519_s12 + $0xf0] sm:$0xf]  ;;  %v12833_v6 = vld [vmem:[%s14519_s12 + $0xf4] sm:$0xf0]  ;;  %v8889_v7 = vor.u32 %v12849_v4, %v8888_v2  ;;  %v8880_v14 = vld [vmem:[%s14519_s12 + $0x160] sm:$0xf]  ;;  %v8753_v16 = vor.u32 %v12815_v13, %v8752_v11 }
  0x6e   : > { %v8825_v8 = vor.u32 %v12833_v6, %v8824_v5  ;;  %v8952_v9 = vld [vmem:[%s14519_s12 + $0x1f0] sm:$0xf]  ;;  %v12865_v10 = vld [vmem:[%s14519_s12 + $0x1f4] sm:$0xf0]  ;;  %5117 = vmatpush.bf16.msra.mxu0 %v8761_v3  ;;  %v12847_v15 = vld [vmem:[%s14519_s12 + $0x164] sm:$0xf0] }
  0x6f   : > { %v8953_v12 = vor.u32 %v12865_v10, %v8952_v9  ;;  %5143 = vmatpush.bf16.msra.mxu2 %v8889_v7  ;;  %v8881_v17 = vor.u32 %v12847_v15, %v8880_v14  ;;  %v8816_v18 = vld [vmem:[%s14519_s12 + $0xe0] sm:$0xf]  ;;  %v12831_v19 = vld [vmem:[%s14519_s12 + $0xe4] sm:$0xf0]  ;;  %v8744_v23 = vld [vmem:[%s14519_s12 + $0x50] sm:$0xf] }
  0x70   : > { %5130 = vmatpush.bf16.msra.mxu1 %v8825_v8  ;;  %v8944_v20 = vld [vmem:[%s14519_s12 + $0x1e0] sm:$0xf]  ;;  %v8817_v21 = vor.u32 %v12831_v19, %v8816_v18  ;;  %v12863_v22 = vld [vmem:[%s14519_s12 + $0x1e4] sm:$0xf0]  ;;  %v12813_v24 = vld [vmem:[%s14519_s12 + $0x54] sm:$0xf0] }
  0x71   : > { %5156 = vmatpush.bf16.msra.mxu3 %v8953_v12  ;;  %v8945_v25 = vor.u32 %v12863_v22, %v8944_v20  ;;  %v8872_v26 = vld [vmem:[%s14519_s12 + $0x150] sm:$0xf]  ;;  %v12845_v27 = vld [vmem:[%s14519_s12 + $0x154] sm:$0xf0]  ;;  %v8745_v29 = vor.u32 %v12813_v24, %v8744_v23  ;;  %v8736_v35 = vld [vmem:[%s14519_s12 + $0x40] sm:$0xf] }
  0x72   : > { %v8808_v28 = vld [vmem:[%s14519_s12 + $0xd0] sm:$0xf]  ;;  %5118 = vmatpush.bf16.msra.mxu0 %v8753_v16  ;;  %v12829_v30 = vld [vmem:[%s14519_s12 + $0xd4] sm:$0xf0]  ;;  %v8873_v33 = vor.u32 %v12845_v27, %v8872_v26  ;;  %v12811_v36 = vld [vmem:[%s14519_s12 + $0x44] sm:$0xf0] }
  0x73   : > { %v8936_v31 = vld [vmem:[%s14519_s12 + $0x1d0] sm:$0xf]  ;;  %v12861_v32 = vld [vmem:[%s14519_s12 + $0x1d4] sm:$0xf0]  ;;  %5144 = vmatpush.bf16.msra.mxu2 %v8881_v17  ;;  %v8809_v34 = vor.u32 %v12829_v30, %v8808_v28  ;;  %v8864_v37 = vld [vmem:[%s14519_s12 + $0x140] sm:$0xf]  ;;  %v8737_v44 = vor.u32 %v12811_v36, %v8736_v35 }
  0x74   : > { %5131 = vmatpush.bf16.msra.mxu1 %v8817_v21  ;;  %v8937_v38 = vor.u32 %v12861_v32, %v8936_v31  ;;  %v12843_v39 = vld [vmem:[%s14519_s12 + $0x144] sm:$0xf0]  ;;  %v8800_v40 = vld [vmem:[%s14519_s12 + $0xc0] sm:$0xf]  ;;  %v8728_v47 = vld [vmem:[%s14519_s12 + $0x30] sm:$0xf] }
  0x75   : > { %5157 = vmatpush.bf16.msra.mxu3 %v8945_v25  ;;  %v12827_v41 = vld [vmem:[%s14519_s12 + $0xc4] sm:$0xf0]  ;;  %v8928_v42 = vld [vmem:[%s14519_s12 + $0x1c0] sm:$0xf]  ;;  %v8865_v45 = vor.u32 %v12843_v39, %v8864_v37  ;;  %v12809_v48 = vld [vmem:[%s14519_s12 + $0x34] sm:$0xf0] }
  0x76   : > { %v12859_v43 = vld [vmem:[%s14519_s12 + $0x1c4] sm:$0xf0]  ;;  %5119 = vmatpush.bf16.msra.mxu0 %v8745_v29  ;;  %v8801_v46 = vor.u32 %v12827_v41, %v8800_v40  ;;  %v8856_v49 = vld [vmem:[%s14519_s12 + $0x130] sm:$0xf]  ;;  %v12841_v51 = vld [vmem:[%s14519_s12 + $0x134] sm:$0xf0]  ;;  %v8729_v56 = vor.u32 %v12809_v48, %v8728_v47 }
  0x77   : > { %5145 = vmatpush.bf16.msra.mxu2 %v8873_v33  ;;  %v8929_v50 = vor.u32 %v12859_v43, %v8928_v42  ;;  %v8792_v52 = vld [vmem:[%s14519_s12 + $0xb0] sm:$0xf]  ;;  %v12825_v53 = vld [vmem:[%s14519_s12 + $0xb4] sm:$0xf0]  ;;  %v8857_v57 = vor.u32 %v12841_v51, %v8856_v49  ;;  %v8720_v59 = vld [vmem:[%s14519_s12 + $0x20] sm:$0xf] }
  0x78   : > { %5132 = vmatpush.bf16.msra.mxu1 %v8809_v34  ;;  %v8920_v54 = vld [vmem:[%s14519_s12 + $0x1b0] sm:$0xf]  ;;  %v12857_v55 = vld [vmem:[%s14519_s12 + $0x1b4] sm:$0xf0]  ;;  %v8793_v58 = vor.u32 %v12825_v53, %v8792_v52  ;;  %v12807_v60 = vld [vmem:[%s14519_s12 + $0x24] sm:$0xf0] }
  0x79   : > { %5158 = vmatpush.bf16.msra.mxu3 %v8937_v38  ;;  %v8848_v61 = vld [vmem:[%s14519_s12 + $0x120] sm:$0xf]  ;;  %v8921_v62 = vor.u32 %v12857_v55, %v8920_v54  ;;  %v12839_v63 = vld [vmem:[%s14519_s12 + $0x124] sm:$0xf0]  ;;  %v8721_v4 = vor.u32 %v12807_v60, %v8720_v59  ;;  %v8712_v7 = vld [vmem:[%s14519_s12 + $0x10] sm:$0xf] }
  0x7a   : > { %5120 = vmatpush.bf16.msra.mxu0 %v8737_v44  ;;  %v8784_v0 = vld [vmem:[%s14519_s12 + $0xa0] sm:$0xf]  ;;  %v12823_v1 = vld [vmem:[%s14519_s12 + $0xa4] sm:$0xf0]  ;;  %v8849_v5 = vor.u32 %v12839_v63, %v8848_v61  ;;  %v12805_v8 = vld [vmem:[%s14519_s12 + $0x14] sm:$0xf0] }
  0x7b   : > { %5146 = vmatpush.bf16.msra.mxu2 %v8865_v45  ;;  %v8912_v2 = vld [vmem:[%s14519_s12 + $0x1a0] sm:$0xf]  ;;  %v12855_v3 = vld [vmem:[%s14519_s12 + $0x1a4] sm:$0xf0]  ;;  %v8785_v6 = vor.u32 %v12823_v1, %v8784_v0  ;;  %v8840_v9 = vld [vmem:[%s14519_s12 + $0x110] sm:$0xf]  ;;  %v8713_v16 = vor.u32 %v12805_v8, %v8712_v7 }
  0x7c   : > { %5133 = vmatpush.bf16.msra.mxu1 %v8801_v46  ;;  %v8913_v10 = vor.u32 %v12855_v3, %v8912_v2  ;;  %v12837_v11 = vld [vmem:[%s14519_s12 + $0x114] sm:$0xf0]  ;;  %v8776_v12 = vld [vmem:[%s14519_s12 + $0x90] sm:$0xf]  ;;  %v8704_v17 = vld [vmem:[%s14519_s12] sm:$0xf] }
  0x7d   : > { %5159 = vmatpush.bf16.msra.mxu3 %v8929_v50  ;;  %v12821_v13 = vld [vmem:[%s14519_s12 + $0x94] sm:$0xf0]  ;;  %v8904_v14 = vld [vmem:[%s14519_s12 + $0x190] sm:$0xf]  ;;  %v12803_v18 = vld [vmem:[%s14519_s12 + $0x4] sm:$0xf0]  ;;  %v8841_v19 = vor.u32 %v12837_v11, %v8840_v9 }
  0x7e   : > { %5121 = vmatpush.bf16.msra.mxu0 %v8729_v56  ;;  %v12853_v15 = vld [vmem:[%s14519_s12 + $0x194] sm:$0xf0]  ;;  %v8777_v20 = vor.u32 %v12821_v13, %v8776_v12  ;;  %v8832_v21 = vld [vmem:[%s14519_s12 + $0x100] sm:$0xf]  ;;  %v12835_v22 = vld [vmem:[%s14519_s12 + $0x104] sm:$0xf0]  ;;  %v8705_v31 = vor.u32 %v12803_v18, %v8704_v17 }
  0x7f   : > { %5147 = vmatpush.bf16.msra.mxu2 %v8857_v57  ;;  %v9016_v23 = vld [vmem:[%s14519_s12 + $0x270] sm:$0xf]  ;;  %v8905_v24 = vor.u32 %v12853_v15, %v8904_v14  ;;  %v12881_v25 = vld [vmem:[%s14519_s12 + $0x274] sm:$0xf0]  ;;  %v8768_v28 = vld [vmem:[%s14519_s12 + $0x80] sm:$0xf]  ;;  %v8833_v35 = vor.u32 %v12835_v22, %v8832_v21 }
  0x80   : > { %5134 = vmatpush.bf16.msra.mxu1 %v8793_v58  ;;  %v9144_v26 = vld [vmem:[%s14519_s12 + $0x370] sm:$0xf]  ;;  %v12913_v27 = vld [vmem:[%s14519_s12 + $0x374] sm:$0xf0]  ;;  %v12819_v29 = vld [vmem:[%s14519_s12 + $0x84] sm:$0xf0]  ;;  %v9017_v36 = vor.u32 %v12881_v25, %v9016_v23 }
  0x81   : > { %5160 = vmatpush.bf16.msra.mxu3 %v8921_v62  ;;  %v8896_v30 = vld [vmem:[%s14519_s12 + $0x180] sm:$0xf]  ;;  %v12851_v32 = vld [vmem:[%s14519_s12 + $0x184] sm:$0xf0]  ;;  %v9080_v33 = vld [vmem:[%s14519_s12 + $0x2f0] sm:$0xf]  ;;  %v9145_v39 = vor.u32 %v12913_v27, %v9144_v26  ;;  %v8769_v40 = vor.u32 %v12819_v29, %v8768_v28 }
  0x82   : > { %5122 = vmatpush.bf16.msra.mxu0 %v8721_v4  ;;  %v12897_v34 = vld [vmem:[%s14519_s12 + $0x2f4] sm:$0xf0]  ;;  %v9208_v37 = vld [vmem:[%s14519_s12 + $0x3f0] sm:$0xf]  ;;  %v9008_v41 = vld [vmem:[%s14519_s12 + $0x260] sm:$0xf]  ;;  %v8897_v43 = vor.u32 %v12851_v32, %v8896_v30 }
  0x83   : > { %5148 = vmatpush.bf16.msra.mxu2 %v8849_v5  ;;  %v12929_v38 = vld [vmem:[%s14519_s12 + $0x3f4] sm:$0xf0]  ;;  %v12879_v42 = vld [vmem:[%s14519_s12 + $0x264] sm:$0xf0]  ;;  %v9081_v44 = vor.u32 %v12897_v34, %v9080_v33  ;;  %v9136_v45 = vld [vmem:[%s14519_s12 + $0x360] sm:$0xf] }
  0x84   : > { %5135 = vmatpush.bf16.msra.mxu1 %v8785_v6  ;;  %v12911_v46 = vld [vmem:[%s14519_s12 + $0x364] sm:$0xf0]  ;;  %v9209_v47 = vor.u32 %v12929_v38, %v9208_v37  ;;  %v9072_v48 = vld [vmem:[%s14519_s12 + $0x2e0] sm:$0xf]  ;;  %v9009_v50 = vor.u32 %v12879_v42, %v9008_v41  ;;  %v9000_v54 = vld [vmem:[%s14519_s12 + $0x250] sm:$0xf] }
  0x85   : > { %5161 = vmatpush.bf16.msra.mxu3 %v8913_v10  ;;  %v12895_v49 = vld [vmem:[%s14519_s12 + $0x2e4] sm:$0xf0]  ;;  %v9200_v51 = vld [vmem:[%s14519_s12 + $0x3e0] sm:$0xf]  ;;  %v9137_v53 = vor.u32 %v12911_v46, %v9136_v45  ;;  %v12877_v55 = vld [vmem:[%s14519_s12 + $0x254] sm:$0xf0] }
  0x86   : > { %5123 = vmatpush.bf16.msra.mxu0 %v8713_v16  ;;  %v12927_v52 = vld [vmem:[%s14519_s12 + $0x3e4] sm:$0xf0]  ;;  %v9073_v56 = vor.u32 %v12895_v49, %v9072_v48  ;;  %v9128_v57 = vld [vmem:[%s14519_s12 + $0x350] sm:$0xf]  ;;  %v12909_v58 = vld [vmem:[%s14519_s12 + $0x354] sm:$0xf0]  ;;  %v9001_v62 = vor.u32 %v12877_v55, %v9000_v54 }
  0x87   : > { %5149 = vmatpush.bf16.msra.mxu2 %v8841_v19  ;;  %v9201_v59 = vor.u32 %v12927_v52, %v9200_v51  ;;  %v9064_v60 = vld [vmem:[%s14519_s12 + $0x2d0] sm:$0xf]  ;;  %v12893_v61 = vld [vmem:[%s14519_s12 + $0x2d4] sm:$0xf0]  ;;  %v9129_v2 = vor.u32 %v12909_v58, %v9128_v57  ;;  %v8992_v3 = vld [vmem:[%s14519_s12 + $0x240] sm:$0xf] }
  0x88   : > { %5136 = vmatpush.bf16.msra.mxu1 %v8777_v20  ;;  %v9192_v63 = vld [vmem:[%s14519_s12 + $0x3d0] sm:$0xf]  ;;  %v12925_v0 = vld [vmem:[%s14519_s12 + $0x3d4] sm:$0xf0]  ;;  %v12875_v4 = vld [vmem:[%s14519_s12 + $0x244] sm:$0xf0]  ;;  %v9065_v7 = vor.u32 %v12893_v61, %v9064_v60 }
  0x89   : > { %5162 = vmatpush.bf16.msra.mxu3 %v8905_v24  ;;  %v515_v1 = vld [vmem:[#allocation3 + $0x10] sm:$0xff]  ;;  %v513_v6 = vld [vmem:[#allocation3] sm:$0xff]  ;;  %v9120_v8 = vld [vmem:[%s14519_s12 + $0x340] sm:$0xf]  ;;  %v9193_v12 = vor.u32 %v12925_v0, %v9192_v63  ;;  %v8993_v17 = vor.u32 %v12875_v4, %v8992_v3  ;;  %vm5113_vm0 = vcmask 916480   ;;  %s15813_s23 = sld [smem:[#allocation18]] }
  0x8a   : > { %5124 = vmatpush.bf16.msra.mxu0 %v8705_v31  ;;  %v14634_v5 = vpack.c.bf16 %v515_v1, %v515_v1  ;;  %v12907_v9 = vld [vmem:[%s14519_s12 + $0x344] sm:$0xf0]  ;;  %v14638_v10 = vpack.c.bf16 %v513_v6, %v513_v6  ;;  %v516_v11 = vld [vmem:[#allocation3 + $0x18] sm:$0xff]  ;;  %v514_v16 = vld [vmem:[#allocation3 + $0x8] sm:$0xff]  ;;  %s11704_s30 = sshll.u32 %s14390_s20, 8  ;;  %p11706_p1 = scmp.ne.s32.totalorder %s14390_s20, 2 }
  0x8b   : > { %5150 = vmatpush.bf16.msra.mxu2 %v8833_v35  ;;  %v9056_v13 = vld [vmem:[%s14519_s12 + $0x2c0] sm:$0xf]  ;;  %v12891_v14 = vld [vmem:[%s14519_s12 + $0x2c4] sm:$0xf0]  ;;  %v14643_v15 = vpack.c.bf16 %v516_v11, %v516_v11  ;;  %v14647_v20 = vpack.c.bf16 %v514_v16, %v514_v16  ;;  %v9121_v21 = vor.u32 %v12907_v9, %v9120_v8  ;;  %v8984_v22 = vld [vmem:[%s14519_s12 + $0x230] sm:$0xf] }
  0x8c   : > { %5137 = vmatpush.bf16.msra.mxu1 %v8769_v40  ;;  %v9184_v18 = vld [vmem:[%s14519_s12 + $0x3c0] sm:$0xf]  ;;  %v12923_v19 = vld [vmem:[%s14519_s12 + $0x3c4] sm:$0xf0]  ;;  %v12873_v23 = vld [vmem:[%s14519_s12 + $0x234] sm:$0xf0]  ;;  %v9057_v24 = vor.u32 %v12891_v14, %v9056_v13 }
  0x8d   : > { %5163 = vmatpush.bf16.msra.mxu3 %v8897_v43  ;;  %5125 = vmatmul.bf16.vlgmr.msra.gmra.mxu0 %v14638_v10  ;;  %v9112_v25 = vld [vmem:[%s14519_s12 + $0x330] sm:$0xf]  ;;  %v12905_v26 = vld [vmem:[%s14519_s12 + $0x334] sm:$0xf0]  ;;  %v9185_v27 = vor.u32 %v12923_v19, %v9184_v18  ;;  %v8985_v30 = vor.u32 %v12873_v23, %v8984_v22  ;;  %v8976_v34 = vld [vmem:[%s14519_s12 + $0x220] sm:$0xf] }
  0x8e   : > { %5169 = vmatpush.bf16.msrb.mxu0 %v9017_v36  ;;  %5151 = vmatmul.bf16.vlgmr.msra.gmra.mxu2 %v14634_v5  ;;  %v9048_v28 = vld [vmem:[%s14519_s12 + $0x2b0] sm:$0xf]  ;;  %v12889_v29 = vld [vmem:[%s14519_s12 + $0x2b4] sm:$0xf0]  ;;  %v9113_v33 = vor.u32 %v12905_v26, %v9112_v25  ;;  %v12871_v35 = vld [vmem:[%s14519_s12 + $0x224] sm:$0xf0] }
  0x8f   : > { %5195 = vmatpush.bf16.msrb.mxu2 %v9145_v39  ;;  %5138 = vmatmul.bf16.vlgmr.msra.gmra.mxu1 %v14647_v20  ;;  %v9176_v31 = vld [vmem:[%s14519_s12 + $0x3b0] sm:$0xf]  ;;  %v12921_v32 = vld [vmem:[%s14519_s12 + $0x3b4] sm:$0xf0]  ;;  %v9049_v36 = vor.u32 %v12889_v29, %v9048_v28  ;;  %v9104_v37 = vld [vmem:[%s14519_s12 + $0x320] sm:$0xf]  ;;  %v8977_v42 = vor.u32 %v12871_v35, %v8976_v34 }
  0x90   : > { %5182 = vmatpush.bf16.msrb.mxu1 %v9081_v44  ;;  %5164 = vmatmul.bf16.vlgmr.msra.gmra.mxu3 %v14643_v15  ;;  %v12903_v38 = vld [vmem:[%s14519_s12 + $0x324] sm:$0xf0]  ;;  %v9177_v39 = vor.u32 %v12921_v32, %v9176_v31  ;;  %v9040_v40 = vld [vmem:[%s14519_s12 + $0x2a0] sm:$0xf]  ;;  %v8968_v46 = vld [vmem:[%s14519_s12 + $0x210] sm:$0xf] }
  0x91   : > { %5208 = vmatpush.bf16.msrb.mxu3 %v9209_v47  ;;  %v12887_v41 = vld [vmem:[%s14519_s12 + $0x2a4] sm:$0xf0]  ;;  %v9168_v43 = vld [vmem:[%s14519_s12 + $0x3a0] sm:$0xf]  ;;  %v9105_v45 = vor.u32 %v12903_v38, %v9104_v37  ;;  %v12869_v47 = vld [vmem:[%s14519_s12 + $0x214] sm:$0xf0] }
  0x92   : > { %5170 = vmatpush.bf16.msrb.mxu0 %v9009_v50  ;;  %v12919_v44 = vld [vmem:[%s14519_s12 + $0x3a4] sm:$0xf0]  ;;  %v9041_v48 = vor.u32 %v12887_v41, %v9040_v40  ;;  %v9096_v49 = vld [vmem:[%s14519_s12 + $0x310] sm:$0xf]  ;;  %v12901_v50 = vld [vmem:[%s14519_s12 + $0x314] sm:$0xf0]  ;;  %v8969_v55 = vor.u32 %v12869_v47, %v8968_v46 }
  0x93   : > { %5196 = vmatpush.bf16.msrb.mxu2 %v9137_v53  ;;  %v9169_v51 = vor.u32 %v12919_v44, %v9168_v43  ;;  %v9032_v52 = vld [vmem:[%s14519_s12 + $0x290] sm:$0xf]  ;;  %v12885_v53 = vld [vmem:[%s14519_s12 + $0x294] sm:$0xf0]  ;;  %v8960_v57 = vld [vmem:[%s14519_s12 + $0x200] sm:$0xf] }
  0x94   : > { %5183 = vmatpush.bf16.msrb.mxu1 %v9073_v56  ;;  %v9160_v54 = vld [vmem:[%s14519_s12 + $0x390] sm:$0xf]  ;;  %v12917_v56 = vld [vmem:[%s14519_s12 + $0x394] sm:$0xf0]  ;;  %v12867_v58 = vld [vmem:[%s14519_s12 + $0x204] sm:$0xf0]  ;;  %v9033_v63 = vor.u32 %v12885_v53, %v9032_v52 }
  0x95   : > { %5209 = vmatpush.bf16.msrb.mxu3 %v9201_v59  ;;  %v9097_v59 = vor.u32 %v12901_v50, %v9096_v49  ;;  %v9088_v60 = vld [vmem:[%s14519_s12 + $0x300] sm:$0xf]  ;;  %v12899_v61 = vld [vmem:[%s14519_s12 + $0x304] sm:$0xf0]  ;;  %v12945_v0 = vld [vmem:[%s14519_s12 + $0x474] sm:$0xf0]  ;;  %v9161_v3 = vor.u32 %v12917_v56, %v9160_v54  ;;  %v8961_v8 = vor.u32 %v12867_v58, %v8960_v57 }
  0x96   : > { %5171 = vmatpush.bf16.msrb.mxu0 %v9001_v62  ;;  %v9272_v62 = vld [vmem:[%s14519_s12 + $0x470] sm:$0xf]  ;;  %v9024_v4 = vld [vmem:[%s14519_s12 + $0x280] sm:$0xf]  ;;  %v12883_v6 = vld [vmem:[%s14519_s12 + $0x284] sm:$0xf0]  ;;  %v9089_v13 = vor.u32 %v12899_v61, %v9088_v60 }
  0x97   : > { %5197 = vmatpush.bf16.msrb.mxu2 %v9129_v2  ;;  %v9400_v1 = vld [vmem:[%s14519_s12 + $0x570] sm:$0xf]  ;;  %v12977_v2 = vld [vmem:[%s14519_s12 + $0x574] sm:$0xf0]  ;;  %v12915_v9 = vld [vmem:[%s14519_s12 + $0x384] sm:$0xf0]  ;;  %v9273_v14 = vor.u32 %v12945_v0, %v9272_v62 }
  0x98   : > { %5184 = vmatpush.bf16.msrb.mxu1 %v9065_v7  ;;  %v9152_v7 = vld [vmem:[%s14519_s12 + $0x380] sm:$0xf]  ;;  %v9336_v11 = vld [vmem:[%s14519_s12 + $0x4f0] sm:$0xf]  ;;  %v519_v18 = vld [vmem:[#allocation3 + $0x30] sm:$0xff]  ;;  %v9401_v19 = vor.u32 %v12977_v2, %v9400_v1  ;;  %s15825_s17 = sshra.s32 %s11704_s30, 7 }
  0x99   : > { %5210 = vmatpush.bf16.msrb.mxu3 %v9193_v12  ;;  %v12961_v12 = vld [vmem:[%s14519_s12 + $0x4f4] sm:$0xf0]  ;;  %v9464_v16 = vld [vmem:[%s14519_s12 + $0x5f0] sm:$0xf]  ;;  %v9264_v22 = vld [vmem:[%s14519_s12 + $0x460] sm:$0xf]  ;;  %v9153_v25 = vor.u32 %v12915_v9, %v9152_v7 }
  0x9a   : > { %5172 = vmatpush.bf16.msrb.mxu0 %v8993_v17  ;;  %v12993_v17 = vld [vmem:[%s14519_s12 + $0x5f4] sm:$0xf0]  ;;  %v12943_v23 = vld [vmem:[%s14519_s12 + $0x464] sm:$0xf0]  ;;  %v9337_v26 = vor.u32 %v12961_v12, %v9336_v11  ;;  %v9328_v31 = vld [vmem:[%s14519_s12 + $0x4e0] sm:$0xf] }
  0x9b   : > { %5198 = vmatpush.bf16.msrb.mxu2 %v9121_v21  ;;  %v9025_v21 = vor.u32 %v12883_v6, %v9024_v4  ;;  %v12975_v28 = vld [vmem:[%s14519_s12 + $0x564] sm:$0xf0]  ;;  %v520_v34 = vld [vmem:[#allocation3 + $0x38] sm:$0xff]  ;;  %v9265_v35 = vor.u32 %v12943_v23, %v9264_v22  ;;  %v12941_v41 = vld [vmem:[%s14519_s12 + $0x454] sm:$0xf0]  ;;  %s11705_s19 = sshll.u32 %s15825_s17, 3 }
  0x9c   : > { %5185 = vmatpush.bf16.msrb.mxu1 %v9057_v24  ;;  %v518_v24 = vld [vmem:[#allocation3 + $0x28] sm:$0xff]  ;;  %v517_v29 = vld [vmem:[#allocation3 + $0x20] sm:$0xff]  ;;  %v14710_v46 = vpack.c.bf16 %v520_v34, %v520_v34  ;;  %s15855_s18 = scalar_lea.vmem [#allocation2], %s11705_s19  ;;  %s12475_s24 = sld [smem:[#allocation18 + $0x1]] (!%p11706_p1) }
  0x9d   : > { %5211 = vmatpush.bf16.msrb.mxu3 %v9185_v27  ;;  %v9392_v27 = vld [vmem:[%s14519_s12 + $0x560] sm:$0xf]  ;;  %v12959_v32 = vld [vmem:[%s14519_s12 + $0x4e4] sm:$0xf0]  ;;  %v14702_v38 = vpack.c.bf16 %v518_v24, %v518_v24  ;;  %v9256_v40 = vld [vmem:[%s14519_s12 + $0x450] sm:$0xf] }
  0x9e   : > { %5173 = vmatpush.bf16.msrb.mxu0 %v8985_v30  ;;  %v9465_v30 = vor.u32 %v12993_v17, %v9464_v16  ;;  %v12991_v37 = vld [vmem:[%s14519_s12 + $0x5e4] sm:$0xf0]  ;;  %v9329_v43 = vor.u32 %v12959_v32, %v9328_v31  ;;  %v9384_v44 = vld [vmem:[%s14519_s12 + $0x550] sm:$0xf]  ;;  %v12957_v49 = vld [vmem:[%s14519_s12 + $0x4d4] sm:$0xf0]  ;;  %v9257_v50 = vor.u32 %v12941_v41, %v9256_v40 }
  0x9f   : > { %5199 = vmatpush.bf16.msrb.mxu2 %v9113_v33  ;;  %v14698_v33 = vpack.c.bf16 %v519_v18, %v519_v18  ;;  %v12989_v52 = vld [vmem:[%s14519_s12 + $0x5d4] sm:$0xf0]  ;;  %v9248_v54 = vld [vmem:[%s14519_s12 + $0x440] sm:$0xf]  ;;  %v12971_v58 = vld [vmem:[%s14519_s12 + $0x544] sm:$0xf0] }
  0xa0   : > { %5186 = vmatpush.bf16.msrb.mxu1 %v9049_v36  ;;  %v9456_v36 = vld [vmem:[%s14519_s12 + $0x5e0] sm:$0xf]  ;;  %v12955_v61 = vld [vmem:[%s14519_s12 + $0x4c4] sm:$0xf0]  ;;  %v9240_v2 = vld [vmem:[%s14519_s12 + $0x430] sm:$0xf] }
  0xa1   : > { %5212 = vmatpush.bf16.msrb.mxu3 %v9177_v39  ;;  %v9393_v39 = vor.u32 %v12975_v28, %v9392_v27  ;;  %v9457_v47 = vor.u32 %v12991_v37, %v9456_v36  ;;  %v9376_v57 = vld [vmem:[%s14519_s12 + $0x540] sm:$0xf]  ;;  %v12987_v0 = vld [vmem:[%s14519_s12 + $0x5c4] sm:$0xf0]  ;;  %v9368_v6 = vld [vmem:[%s14519_s12 + $0x530] sm:$0xf] }
  0xa2   : > { %5174 = vmatpush.bf16.msrb.mxu0 %v8977_v42  ;;  %v14706_v42 = vpack.c.bf16 %v517_v29, %v517_v29  ;;  %v9312_v60 = vld [vmem:[%s14519_s12 + $0x4c0] sm:$0xf]  ;;  %v9377_v1 = vor.u32 %v12971_v58, %v9376_v57  ;;  %v12969_v7 = vld [vmem:[%s14519_s12 + $0x534] sm:$0xf0]  ;;  %v9304_v9 = vld [vmem:[%s14519_s12 + $0x4b0] sm:$0xf] }
  0xa3   : > { %5200 = vmatpush.bf16.msrb.mxu2 %v9105_v45  ;;  %v12973_v45 = vld [vmem:[%s14519_s12 + $0x554] sm:$0xf0]  ;;  %v9313_v4 = vor.u32 %v12955_v61, %v9312_v60  ;;  %v9369_v16 = vor.u32 %v12969_v7, %v9368_v6  ;;  %v9232_v17 = vld [vmem:[%s14519_s12 + $0x420] sm:$0xf]  ;;  %v12935_v18 = vld [vmem:[%s14519_s12 + $0x424] sm:$0xf0] }
  0xa4   : > { %5187 = vmatpush.bf16.msrb.mxu1 %v9041_v48  ;;  %v9320_v48 = vld [vmem:[%s14519_s12 + $0x4d0] sm:$0xf]  ;;  %v9385_v53 = vor.u32 %v12973_v45, %v9384_v44  ;;  %v12953_v11 = vld [vmem:[%s14519_s12 + $0x4b4] sm:$0xf0]  ;;  %v12967_v22 = vld [vmem:[%s14519_s12 + $0x524] sm:$0xf0] }
  0xa5   : > { %5213 = vmatpush.bf16.msrb.mxu3 %v9169_v51  ;;  %v9448_v51 = vld [vmem:[%s14519_s12 + $0x5d0] sm:$0xf]  ;;  %v9321_v56 = vor.u32 %v12957_v49, %v9320_v48  ;;  %v9296_v24 = vld [vmem:[%s14519_s12 + $0x4a0] sm:$0xf]  ;;  %v12983_v28 = vld [vmem:[%s14519_s12 + $0x5a4] sm:$0xf0] }
  0xa6   : > { %5175 = vmatpush.bf16.msrb.mxu0 %v8969_v55  ;;  %v12939_v55 = vld [vmem:[%s14519_s12 + $0x444] sm:$0xf0]  ;;  %v9424_v27 = vld [vmem:[%s14519_s12 + $0x5a0] sm:$0xf]  ;;  %v12933_v31 = vld [vmem:[%s14519_s12 + $0x414] sm:$0xf0] }
  0xa7   : > { %5201 = vmatpush.bf16.msrb.mxu2 %v9097_v59  ;;  %v9449_v59 = vor.u32 %v12989_v52, %v9448_v51  ;;  %v9249_v62 = vor.u32 %v12939_v55, %v9248_v54  ;;  %v9352_v34 = vld [vmem:[%s14519_s12 + $0x510] sm:$0xf]  ;;  %v9425_v36 = vor.u32 %v12983_v28, %v9424_v27  ;;  %v9216_v44 = vld [vmem:[%s14519_s12 + $0x400] sm:$0xf]  ;;  %v12963_v49 = vld [vmem:[%s14519_s12 + $0x504] sm:$0xf0] }
  0xa8   : > { %5188 = vmatpush.bf16.msrb.mxu1 %v9033_v63  ;;  %v9440_v63 = vld [vmem:[%s14519_s12 + $0x5c0] sm:$0xf]  ;;  %v9288_v37 = vld [vmem:[%s14519_s12 + $0x490] sm:$0xf]  ;;  %v13009_v52 = vld [vmem:[%s14519_s12 + $0x674] sm:$0xf0] }
  0xa9   : > { %5214 = vmatpush.bf16.msrb.mxu3 %v9161_v3  ;;  %v12937_v3 = vld [vmem:[%s14519_s12 + $0x434] sm:$0xf0]  ;;  %v9416_v41 = vld [vmem:[%s14519_s12 + $0x590] sm:$0xf]  ;;  %v9344_v48 = vld [vmem:[%s14519_s12 + $0x500] sm:$0xf] }
  0xaa   : > { %5176 = vmatpush.bf16.msrb.mxu0 %v8961_v8  ;;  %v9441_v8 = vor.u32 %v12987_v0, %v9440_v63  ;;  %v9241_v12 = vor.u32 %v12937_v3, %v9240_v2  ;;  %v9528_v51 = vld [vmem:[%s14519_s12 + $0x670] sm:$0xf]  ;;  %v13041_v55 = vld [vmem:[%s14519_s12 + $0x774] sm:$0xf0]  ;;  %v12947_v57 = vld [vmem:[%s14519_s12 + $0x484] sm:$0xf0] }
  0xab   : > { %5202 = vmatpush.bf16.msrb.mxu2 %v9089_v13  ;;  %v9432_v13 = vld [vmem:[%s14519_s12 + $0x5b0] sm:$0xf]  ;;  %v12979_v60 = vld [vmem:[%s14519_s12 + $0x584] sm:$0xf0]  ;;  %v9529_v63 = vor.u32 %v13009_v52, %v9528_v51  ;;  %v13025_v2 = vld [vmem:[%s14519_s12 + $0x6f4] sm:$0xf0] }
  0xac   : > { %5189 = vmatpush.bf16.msrb.mxu1 %v9025_v21  ;;  %v9360_v21 = vld [vmem:[%s14519_s12 + $0x520] sm:$0xf]  ;;  %v521_v61 = vld [vmem:[#allocation3 + $0x40] sm:$0xff]  ;;  %v523_v0 = vld [vmem:[#allocation3 + $0x50] sm:$0xff]  ;;  %s16521_s1 = sld [smem:[#allocation40_spill]] (!%p11706_p1) }
  0xad   : > { %5215 = vmatpush.bf16.msrb.mxu3 %v9153_v25  ;;  %5177 = vmatmul.bf16.vlgmr.msrb.gmra.mxu0 %v14706_v42  ;;  %v12951_v25 = vld [vmem:[%s14519_s12 + $0x4a4] sm:$0xf0]  ;;  %v9361_v29 = vor.u32 %v12967_v22, %v9360_v21  ;;  %v9720_v6 = vld [vmem:[%s14519_s12 + $0x7f0] sm:$0xf]  ;;  %v13057_v7 = vld [vmem:[%s14519_s12 + $0x7f4] sm:$0xf0] }
  0xae   : > { %5221 = vmatpush.bf16.msra.mxu0 %v9273_v14  ;;  %5203 = vmatmul.bf16.vlgmr.msrb.gmra.mxu2 %v14698_v33  ;;  %v12985_v14 = vld [vmem:[%s14519_s12 + $0x5b4] sm:$0xf0]  ;;  %v9297_v32 = vor.u32 %v12951_v25, %v9296_v24  ;;  %v9721_v21 = vor.u32 %v13057_v7, %v9720_v6  ;;  %v13023_v24 = vld [vmem:[%s14519_s12 + $0x6e4] sm:$0xf0]  ;;  %v9712_v27 = vld [vmem:[%s14519_s12 + $0x7e0] sm:$0xf] }
  0xaf   : > { %5247 = vmatpush.bf16.msra.mxu2 %v9401_v19  ;;  %5190 = vmatmul.bf16.vlgmr.msrb.gmra.mxu1 %v14702_v38  ;;  %v9305_v19 = vor.u32 %v12953_v11, %v9304_v9  ;;  %v9433_v23 = vor.u32 %v12985_v14, %v9432_v13  ;;  %v14768_v11 = vpack.c.bf16 %v521_v61, %v521_v61  ;;  %v9520_v13 = vld [vmem:[%s14519_s12 + $0x660] sm:$0xf]  ;;  %v13007_v14 = vld [vmem:[%s14519_s12 + $0x664] sm:$0xf0]  ;;  %v9624_v61 = vld [vmem:[%s14519_s12 + $0x730] sm:$0xf] }
  0xb0   : > { %5234 = vmatpush.bf16.msra.mxu1 %v9337_v26  ;;  %5216 = vmatmul.bf16.vlgmr.msrb.gmra.mxu3 %v14710_v46  ;;  %v9233_v26 = vor.u32 %v12935_v18, %v9232_v17  ;;  %v9648_v18 = vld [vmem:[%s14519_s12 + $0x760] sm:$0xf]  ;;  %v13055_v28 = vld [vmem:[%s14519_s12 + $0x7e4] sm:$0xf0]  ;;  %s12732_s29 = sld [smem:[#allocation18 + $0x2]] (!%p11706_p1) }
  0xb1   : > { %5260 = vmatpush.bf16.msra.mxu3 %v9465_v30  ;;  %v9224_v30 = vld [vmem:[%s14519_s12 + $0x410] sm:$0xf]  ;;  %v9568_v52 = vld [vmem:[%s14519_s12 + $0x6c0] sm:$0xf] }
  0xb2   : > { %5222 = vmatpush.bf16.msra.mxu0 %v9265_v35  ;;  %v12965_v35 = vld [vmem:[%s14519_s12 + $0x514] sm:$0xf0]  ;;  %v9225_v40 = vor.u32 %v12933_v31, %v9224_v30  ;;  %v9512_v30 = vld [vmem:[%s14519_s12 + $0x650] sm:$0xf]  ;;  %v9488_v7 = vld [vmem:[%s14519_s12 + $0x620] sm:$0xf] }
  0xb3   : > { %5248 = vmatpush.bf16.msra.mxu2 %v9393_v39  ;;  %v12949_v39 = vld [vmem:[%s14519_s12 + $0x494] sm:$0xf0]  ;;  %v9353_v45 = vor.u32 %v12965_v35, %v9352_v34  ;;  %v9640_v34 = vld [vmem:[%s14519_s12 + $0x750] sm:$0xf] }
  0xb4   : > { %5235 = vmatpush.bf16.msra.mxu1 %v9329_v43  ;;  %v12981_v43 = vld [vmem:[%s14519_s12 + $0x594] sm:$0xf0] }
  0xb5   : > { %5261 = vmatpush.bf16.msra.mxu3 %v9457_v47  ;;  %v12931_v47 = vld [vmem:[%s14519_s12 + $0x404] sm:$0xf0]  ;;  %v9417_v54 = vor.u32 %v12981_v43, %v9416_v41  ;;  %v13005_v31 = vld [vmem:[%s14519_s12 + $0x654] sm:$0xf0]  ;;  %v9704_v41 = vld [vmem:[%s14519_s12 + $0x7d0] sm:$0xf] }
  0xb6   : > { %5223 = vmatpush.bf16.msra.mxu0 %v9257_v50  ;;  %v9289_v50 = vor.u32 %v12949_v39, %v9288_v37  ;;  %v9217_v58 = vor.u32 %v12931_v47, %v9216_v44  ;;  %v13037_v35 = vld [vmem:[%s14519_s12 + $0x754] sm:$0xf0]  ;;  %v9576_v37 = vld [vmem:[%s14519_s12 + $0x6d0] sm:$0xf]  ;;  %v13003_v47 = vld [vmem:[%s14519_s12 + $0x644] sm:$0xf0] }
  0xb7   : > { %5249 = vmatpush.bf16.msra.mxu2 %v9385_v53  ;;  %v9656_v53 = vld [vmem:[%s14519_s12 + $0x770] sm:$0xf]  ;;  %v13021_v39 = vld [vmem:[%s14519_s12 + $0x6d4] sm:$0xf0]  ;;  %v9641_v44 = vor.u32 %v13037_v35, %v9640_v34 }
  0xb8   : > { %5236 = vmatpush.bf16.msra.mxu1 %v9321_v56  ;;  %v9280_v56 = vld [vmem:[%s14519_s12 + $0x480] sm:$0xf]  ;;  %v9657_v3 = vor.u32 %v13041_v55, %v9656_v53  ;;  %v13053_v43 = vld [vmem:[%s14519_s12 + $0x7d4] sm:$0xf0]  ;;  %v13019_v53 = vld [vmem:[%s14519_s12 + $0x6c4] sm:$0xf0] }
  0xb9   : > { %5262 = vmatpush.bf16.msra.mxu3 %v9449_v59  ;;  %v9408_v59 = vld [vmem:[%s14519_s12 + $0x580] sm:$0xf]  ;;  %v9705_v51 = vor.u32 %v13053_v43, %v9704_v41  ;;  %v13013_v34 = vld [vmem:[%s14519_s12 + $0x694] sm:$0xf0]  ;;  %v12995_v41 = vld [vmem:[%s14519_s12 + $0x604] sm:$0xf0] }
  0xba   : > { %5224 = vmatpush.bf16.msra.mxu0 %v9249_v62  ;;  %v9345_v62 = vor.u32 %v12963_v49, %v9344_v48  ;;  %v9409_v9 = vor.u32 %v12979_v60, %v9408_v59  ;;  %v9577_v48 = vor.u32 %v13021_v39, %v9576_v37  ;;  %v9632_v49 = vld [vmem:[%s14519_s12 + $0x740] sm:$0xf]  ;;  %v13001_v59 = vld [vmem:[%s14519_s12 + $0x634] sm:$0xf0]  ;;  %v9569_v60 = vor.u32 %v13019_v53, %v9568_v52  ;;  %v13011_v53 = vld [vmem:[%s14519_s12 + $0x684] sm:$0xf0] }
  0xbb   : > { %5250 = vmatpush.bf16.msra.mxu2 %v9377_v1  ;;  %v9592_v1 = vld [vmem:[%s14519_s12 + $0x6f0] sm:$0xf]  ;;  %v9696_v55 = vld [vmem:[%s14519_s12 + $0x7c0] sm:$0xf]  ;;  %v13045_v37 = vld [vmem:[%s14519_s12 + $0x794] sm:$0xf0] }
  0xbc   : > { %5237 = vmatpush.bf16.msra.mxu1 %v9313_v4  ;;  %v9281_v4 = vor.u32 %v12947_v57, %v9280_v56  ;;  %v9593_v17 = vor.u32 %v13025_v2, %v9592_v1  ;;  %v13051_v56 = vld [vmem:[%s14519_s12 + $0x7c4] sm:$0xf0]  ;;  %v13017_v1 = vld [vmem:[%s14519_s12 + $0x6b4] sm:$0xf0]  ;;  %v9472_v39 = vld [vmem:[%s14519_s12 + $0x600] sm:$0xf] }
  0xbd   : > { %5263 = vmatpush.bf16.msra.mxu3 %v9441_v8  ;;  %v522_v8 = vld [vmem:[#allocation3 + $0x48] sm:$0xff] }
  0xbe   : > { %5225 = vmatpush.bf16.msra.mxu0 %v9241_v12  ;;  %v524_v12 = vld [vmem:[#allocation3 + $0x58] sm:$0xff]  ;;  %v14776_v22 = vpack.c.bf16 %v522_v8, %v522_v8  ;;  %v12999_v8 = vld [vmem:[%s14519_s12 + $0x624] sm:$0xf0] }
  0xbf   : > { %5251 = vmatpush.bf16.msra.mxu2 %v9369_v16  ;;  %v14772_v16 = vpack.c.bf16 %v523_v0, %v523_v0  ;;  %v14780_v25 = vpack.c.bf16 %v524_v12, %v524_v12  ;;  %v9560_v0 = vld [vmem:[%s14519_s12 + $0x6b0] sm:$0xf]  ;;  %v9616_v12 = vld [vmem:[%s14519_s12 + $0x720] sm:$0xf] }
  0xc0   : > { %5238 = vmatpush.bf16.msra.mxu1 %v9305_v19  ;;  %v13039_v19 = vld [vmem:[%s14519_s12 + $0x764] sm:$0xf0]  ;;  %v9600_v43 = vld [vmem:[%s14519_s12 + $0x700] sm:$0xf] }
  0xc1   : > { %5264 = vmatpush.bf16.msra.mxu3 %v9433_v23  ;;  %v9584_v23 = vld [vmem:[%s14519_s12 + $0x6e0] sm:$0xf] }
  0xc2   : > { %5226 = vmatpush.bf16.msra.mxu0 %v9233_v26  ;;  %v9521_v26 = vor.u32 %v13007_v14, %v9520_v13  ;;  %v13031_v13 = vld [vmem:[%s14519_s12 + $0x724] sm:$0xf0]  ;;  %v9536_v52 = vld [vmem:[%s14519_s12 + $0x680] sm:$0xf] }
  0xc3   : > { %5252 = vmatpush.bf16.msra.mxu2 %v9361_v29  ;;  %v9649_v29 = vor.u32 %v13039_v19, %v9648_v18  ;;  %v13015_v18 = vld [vmem:[%s14519_s12 + $0x6a4] sm:$0xf0]  ;;  %v9489_v19 = vor.u32 %v12999_v8, %v9488_v7  ;;  %v528_v7 = vld [vmem:[#allocation3 + $0x78] sm:$0xff] }
  0xc4   : > { %5239 = vmatpush.bf16.msra.mxu1 %v9297_v32  ;;  %v9585_v32 = vor.u32 %v13023_v24, %v9584_v23  ;;  %v13047_v23 = vld [vmem:[%s14519_s12 + $0x7a4] sm:$0xf0]  ;;  %v9617_v24 = vor.u32 %v13031_v13, %v9616_v12  ;;  %v9776_v8 = vld [vmem:[%s14519_s12 + $0x860] sm:$0xf] }
  0xc5   : > { %5265 = vmatpush.bf16.msra.mxu3 %v9425_v36  ;;  %v9713_v36 = vor.u32 %v13055_v28, %v9712_v27  ;;  %v12997_v27 = vld [vmem:[%s14519_s12 + $0x614] sm:$0xf0] }
  0xc6   : > { %5227 = vmatpush.bf16.msra.mxu0 %v9225_v40  ;;  %v9513_v40 = vor.u32 %v13005_v31, %v9512_v30  ;;  %v13029_v30 = vld [vmem:[%s14519_s12 + $0x714] sm:$0xf0] }
  0xc7   : > { %5253 = vmatpush.bf16.msra.mxu2 %v9353_v45  ;;  %v9504_v45 = vld [vmem:[%s14519_s12 + $0x640] sm:$0xf] }
  0xc8   : > { %5240 = vmatpush.bf16.msra.mxu1 %v9289_v50  ;;  %v13035_v50 = vld [vmem:[%s14519_s12 + $0x744] sm:$0xf0] }
  0xc9   : > { %5266 = vmatpush.bf16.msra.mxu3 %v9417_v54  ;;  %v9505_v54 = vor.u32 %v13003_v47, %v9504_v45  ;;  %v9633_v57 = vor.u32 %v13035_v50, %v9632_v49  ;;  %v9784_v47 = vld [vmem:[%s14519_s12 + $0x870] sm:$0xf] }
  0xca   : > { %5228 = vmatpush.bf16.msra.mxu0 %v9217_v58  ;;  %v9496_v58 = vld [vmem:[%s14519_s12 + $0x630] sm:$0xf] }
  0xcb   : > { %5254 = vmatpush.bf16.msra.mxu2 %v9345_v62  ;;  %v13033_v62 = vld [vmem:[%s14519_s12 + $0x734] sm:$0xf0]  ;;  %v9497_v2 = vor.u32 %v13001_v59, %v9496_v58  ;;  %v9912_v49 = vld [vmem:[%s14519_s12 + $0x970] sm:$0xf] }
  0xcc   : > { %5241 = vmatpush.bf16.msra.mxu1 %v9281_v4  ;;  %v13049_v4 = vld [vmem:[%s14519_s12 + $0x7b4] sm:$0xf0]  ;;  %v9625_v6 = vor.u32 %v13033_v62, %v9624_v61  ;;  %v9848_v61 = vld [vmem:[%s14519_s12 + $0x8f0] sm:$0xf] }
  0xcd   : > { %5267 = vmatpush.bf16.msra.mxu3 %v9409_v9  ;;  %5229 = vmatmul.bf16.vlgmr.msra.gmra.mxu0 %v14768_v11  ;;  %v9561_v9 = vor.u32 %v13017_v1, %v9560_v0  ;;  %v13089_v62 = vld [vmem:[%s14519_s12 + $0x8f4] sm:$0xf0]  ;;  %v9537_v0 = vor.u32 %v13011_v53, %v9536_v52  ;;  %v9976_v1 = vld [vmem:[%s14519_s12 + $0x9f0] sm:$0xf]  ;;  %v9824_v52 = vld [vmem:[%s14519_s12 + $0x8c0] sm:$0xf] }
  0xce   : > { %5273 = vmatpush.bf16.msrb.mxu0 %v9529_v63  ;;  %5255 = vmatmul.bf16.vlgmr.msra.gmra.mxu2 %v14772_v16  ;;  %v9697_v63 = vor.u32 %v13051_v56, %v9696_v55  ;;  %v9664_v55 = vld [vmem:[%s14519_s12 + $0x780] sm:$0xf]  ;;  %v13043_v56 = vld [vmem:[%s14519_s12 + $0x784] sm:$0xf0]  ;;  %v9849_v13 = vor.u32 %v13089_v62, %v9848_v61  ;;  %v9880_v61 = vld [vmem:[%s14519_s12 + $0x930] sm:$0xf] }
  0xcf   : > { %5299 = vmatpush.bf16.msrb.mxu2 %v9657_v3  ;;  %5242 = vmatmul.bf16.vlgmr.msra.gmra.mxu1 %v14776_v22  ;;  %v9688_v3 = vld [vmem:[%s14519_s12 + $0x7b0] sm:$0xf]  ;;  %v13083_v53 = vld [vmem:[%s14519_s12 + $0x8c4] sm:$0xf0]  ;;  %v13097_v62 = vld [vmem:[%s14519_s12 + $0x934] sm:$0xf0] }
  0xd0   : > { %5286 = vmatpush.bf16.msrb.mxu1 %v9593_v17  ;;  %5268 = vmatmul.bf16.vlgmr.msra.gmra.mxu3 %v14780_v25  ;;  %v9689_v14 = vor.u32 %v13049_v4, %v9688_v3  ;;  %v9552_v17 = vld [vmem:[%s14519_s12 + $0x6a0] sm:$0xf]  ;;  %v9665_v4 = vor.u32 %v13043_v56, %v9664_v55  ;;  %v13115_v56 = vld [vmem:[%s14519_s12 + $0x9c4] sm:$0xf0] }
  0xd1   : > { %5312 = vmatpush.bf16.msrb.mxu3 %v9721_v21  ;;  %v9680_v21 = vld [vmem:[%s14519_s12 + $0x7a0] sm:$0xf]  ;;  %v9553_v28 = vor.u32 %v13015_v18, %v9552_v17  ;;  %v13103_v17 = vld [vmem:[%s14519_s12 + $0x964] sm:$0xf0] }
  0xd2   : > { %5274 = vmatpush.bf16.msrb.mxu0 %v9521_v26  ;;  %v9480_v26 = vld [vmem:[%s14519_s12 + $0x610] sm:$0xf]  ;;  %v9681_v31 = vor.u32 %v13047_v23, %v9680_v21  ;;  %v9840_v21 = vld [vmem:[%s14519_s12 + $0x8e0] sm:$0xf]  ;;  %v13087_v23 = vld [vmem:[%s14519_s12 + $0x8e4] sm:$0xf0] }
  0xd3   : > { %5300 = vmatpush.bf16.msrb.mxu2 %v9649_v29  ;;  %v9608_v29 = vld [vmem:[%s14519_s12 + $0x710] sm:$0xf]  ;;  %v9481_v35 = vor.u32 %v12997_v27, %v9480_v26  ;;  %v9968_v27 = vld [vmem:[%s14519_s12 + $0x9e0] sm:$0xf] }
  0xd4   : > { %5287 = vmatpush.bf16.msrb.mxu1 %v9585_v32  ;;  %v9544_v32 = vld [vmem:[%s14519_s12 + $0x690] sm:$0xf]  ;;  %v9952_v55 = vld [vmem:[%s14519_s12 + $0x9c0] sm:$0xf] }
  0xd5   : > { %5313 = vmatpush.bf16.msrb.mxu3 %v9713_v36  ;;  %v9672_v36 = vld [vmem:[%s14519_s12 + $0x790] sm:$0xf]  ;;  %v9545_v45 = vor.u32 %v13013_v34, %v9544_v32  ;;  %v9841_v32 = vor.u32 %v13087_v23, %v9840_v21  ;;  %v9808_v21 = vld [vmem:[%s14519_s12 + $0x8a0] sm:$0xf]  ;;  %v13079_v23 = vld [vmem:[%s14519_s12 + $0x8a4] sm:$0xf0] }
  0xd6   : > { %5275 = vmatpush.bf16.msrb.mxu0 %v9513_v40  ;;  %v9609_v40 = vor.u32 %v13029_v30, %v9608_v29  ;;  %v9673_v50 = vor.u32 %v13045_v37, %v9672_v36  ;;  %v526_v3 = vld [vmem:[#allocation3 + $0x68] sm:$0xff] }
  0xd7   : > { %5301 = vmatpush.bf16.msrb.mxu2 %v9641_v44  ;;  %v13027_v44 = vld [vmem:[%s14519_s12 + $0x704] sm:$0xf0]  ;;  %v9768_v30 = vld [vmem:[%s14519_s12 + $0x850] sm:$0xf] }
  0xd8   : > { %5288 = vmatpush.bf16.msrb.mxu1 %v9577_v48  ;;  %v13073_v48 = vld [vmem:[%s14519_s12 + $0x874] sm:$0xf0]  ;;  %v9601_v58 = vor.u32 %v13027_v44, %v9600_v43  ;;  %v9896_v34 = vld [vmem:[%s14519_s12 + $0x950] sm:$0xf] }
  0xd9   : > { %5314 = vmatpush.bf16.msrb.mxu3 %v9705_v51  ;;  %v13105_v51 = vld [vmem:[%s14519_s12 + $0x974] sm:$0xf0]  ;;  %v9785_v59 = vor.u32 %v13073_v48, %v9784_v47  ;;  %v9832_v37 = vld [vmem:[%s14519_s12 + $0x8d0] sm:$0xf]  ;;  %v13067_v47 = vld [vmem:[%s14519_s12 + $0x844] sm:$0xf0] }
  0xda   : > { %5276 = vmatpush.bf16.msrb.mxu0 %v9505_v54  ;;  %v9473_v54 = vor.u32 %v12995_v41, %v9472_v39  ;;  %v13085_v39 = vld [vmem:[%s14519_s12 + $0x8d4] sm:$0xf0]  ;;  %v9960_v41 = vld [vmem:[%s14519_s12 + $0x9d0] sm:$0xf] }
  0xdb   : > { %5302 = vmatpush.bf16.msrb.mxu2 %v9633_v57  ;;  %v525_v57 = vld [vmem:[#allocation3 + $0x60] sm:$0xff]  ;;  %v9833_v48 = vor.u32 %v13085_v39, %v9832_v37  ;;  %v9800_v37 = vld [vmem:[%s14519_s12 + $0x890] sm:$0xf] }
  0xdc   : > { %5289 = vmatpush.bf16.msrb.mxu1 %v9569_v60  ;;  %v527_v60 = vld [vmem:[#allocation3 + $0x70] sm:$0xff] }
  0xdd   : > { %5315 = vmatpush.bf16.msrb.mxu3 %v9697_v63  ;;  %v9913_v63 = vor.u32 %v13105_v51, %v9912_v49  ;;  %v14848_v12 = vpack.c.bf16 %v527_v60, %v527_v60  ;;  %v13117_v43 = vld [vmem:[%s14519_s12 + $0x9d4] sm:$0xf0]  ;;  %v9888_v49 = vld [vmem:[%s14519_s12 + $0x940] sm:$0xf]  ;;  %v9825_v60 = vor.u32 %v13083_v53, %v9824_v52  ;;  %v10168_v53 = vld [vmem:[%s14519_s12 + $0xb70] sm:$0xf] }
  0xde   : > { %5277 = vmatpush.bf16.msrb.mxu0 %v9497_v2  ;;  %v13121_v2 = vld [vmem:[%s14519_s12 + $0x9f4] sm:$0xf0]  ;;  %v9961_v51 = vor.u32 %v13117_v43, %v9960_v41  ;;  %v9928_v41 = vld [vmem:[%s14519_s12 + $0x990] sm:$0xf] }
  0xdf   : > { %5303 = vmatpush.bf16.msrb.mxu2 %v9625_v6  ;;  %v14844_v6 = vpack.c.bf16 %v525_v57, %v525_v57  ;;  %v9977_v18 = vor.u32 %v13121_v2, %v9976_v1  ;;  %v13081_v1 = vld [vmem:[%s14519_s12 + $0x8b4] sm:$0xf0] }
  0xe0   : > { %5290 = vmatpush.bf16.msrb.mxu1 %v9561_v9  ;;  %v13071_v9 = vld [vmem:[%s14519_s12 + $0x864] sm:$0xf0]  ;;  %v13077_v39 = vld [vmem:[%s14519_s12 + $0x894] sm:$0xf0] }
  0xe1   : > { %5316 = vmatpush.bf16.msrb.mxu3 %v9689_v14  ;;  %v9904_v14 = vld [vmem:[%s14519_s12 + $0x960] sm:$0xf]  ;;  %v9777_v26 = vor.u32 %v13071_v9, %v9776_v8  ;;  %v13063_v9 = vld [vmem:[%s14519_s12 + $0x824] sm:$0xf0]  ;;  %v13109_v43 = vld [vmem:[%s14519_s12 + $0x994] sm:$0xf0] }
  0xe2   : > { %5278 = vmatpush.bf16.msrb.mxu0 %v9489_v19  ;;  %v14852_v19 = vpack.c.bf16 %v526_v3, %v526_v3  ;;  %v9905_v29 = vor.u32 %v13103_v17, %v9904_v14  ;;  %v9944_v3 = vld [vmem:[%s14519_s12 + $0x9b0] sm:$0xf]  ;;  %v9744_v8 = vld [vmem:[%s14519_s12 + $0x820] sm:$0xf]  ;;  %v13095_v17 = vld [vmem:[%s14519_s12 + $0x924] sm:$0xf0] }
  0xe3   : > { %5304 = vmatpush.bf16.msrb.mxu2 %v9617_v24  ;;  %v14856_v24 = vpack.c.bf16 %v528_v7, %v528_v7  ;;  %v9881_v7 = vor.u32 %v13097_v62, %v9880_v61  ;;  %v9872_v14 = vld [vmem:[%s14519_s12 + $0x920] sm:$0xf]  ;;  %v13137_v52 = vld [vmem:[%s14519_s12 + $0xa74] sm:$0xf0] }
  0xe4   : > { %5291 = vmatpush.bf16.msrb.mxu1 %v9553_v28  ;;  %v13119_v28 = vld [vmem:[%s14519_s12 + $0x9e4] sm:$0xf0] }
  0xe5   : > { %5317 = vmatpush.bf16.msrb.mxu3 %v9681_v31  ;;  %v13069_v31 = vld [vmem:[%s14519_s12 + $0x854] sm:$0xf0]  ;;  %v9969_v36 = vor.u32 %v13119_v28, %v9968_v27  ;;  %v9936_v27 = vld [vmem:[%s14519_s12 + $0x9a0] sm:$0xf]  ;;  %v13111_v28 = vld [vmem:[%s14519_s12 + $0x9a4] sm:$0xf0] }
  0xe6   : > { %5279 = vmatpush.bf16.msrb.mxu0 %v9481_v35  ;;  %v13101_v35 = vld [vmem:[%s14519_s12 + $0x954] sm:$0xf0] }
  0xe7   : > { %5305 = vmatpush.bf16.msrb.mxu2 %v9609_v40  ;;  %v9769_v40 = vor.u32 %v13069_v31, %v9768_v30  ;;  %v9897_v44 = vor.u32 %v13101_v35, %v9896_v34  ;;  %v9736_v30 = vld [vmem:[%s14519_s12 + $0x810] sm:$0xf]  ;;  %v13061_v31 = vld [vmem:[%s14519_s12 + $0x814] sm:$0xf0] }
  0xe8   : > { %5292 = vmatpush.bf16.msrb.mxu1 %v9545_v45  ;;  %v9760_v45 = vld [vmem:[%s14519_s12 + $0x840] sm:$0xf]  ;;  %v9864_v34 = vld [vmem:[%s14519_s12 + $0x910] sm:$0xf]  ;;  %v13093_v35 = vld [vmem:[%s14519_s12 + $0x914] sm:$0xf0] }
  0xe9   : > { %5318 = vmatpush.bf16.msrb.mxu3 %v9673_v50  ;;  %v13099_v50 = vld [vmem:[%s14519_s12 + $0x944] sm:$0xf0] }
  0xea   : > { %5280 = vmatpush.bf16.msrb.mxu0 %v9473_v54  ;;  %v9761_v54 = vor.u32 %v13067_v47, %v9760_v45  ;;  %v9889_v57 = vor.u32 %v13099_v50, %v9888_v49  ;;  %v9865_v45 = vor.u32 %v13093_v35, %v9864_v34  ;;  %v13059_v47 = vld [vmem:[%s14519_s12 + $0x804] sm:$0xf0]  ;;  %v9801_v50 = vor.u32 %v13077_v39, %v9800_v37 }
  0xeb   : > { %5306 = vmatpush.bf16.msrb.mxu2 %v9601_v58  ;;  %v9752_v58 = vld [vmem:[%s14519_s12 + $0x830] sm:$0xf]  ;;  %v13091_v49 = vld [vmem:[%s14519_s12 + $0x904] sm:$0xf0] }
  0xec   : > { %5293 = vmatpush.bf16.msrb.mxu1 %v9537_v0  ;;  %v9816_v0 = vld [vmem:[%s14519_s12 + $0x8b0] sm:$0xf]  ;;  %v529_v61 = vld [vmem:[#allocation3 + $0x80] sm:$0xff] }
  0xed   : > { %5319 = vmatpush.bf16.msrb.mxu3 %v9665_v4  ;;  %5281 = vmatmul.bf16.vlgmr.msrb.gmra.mxu0 %v14844_v6  ;;  %v13113_v4 = vld [vmem:[%s14519_s12 + $0x9b4] sm:$0xf0]  ;;  %v13183_v37 = vld [vmem:[%s14519_s12 + $0xbe4] sm:$0xf0] }
  0xee   : > { %5325 = vmatpush.bf16.msra.mxu0 %v9785_v59  ;;  %5307 = vmatmul.bf16.vlgmr.msrb.gmra.mxu2 %v14848_v12  ;;  %v13065_v59 = vld [vmem:[%s14519_s12 + $0x834] sm:$0xf0] }
  0xef   : > { %5351 = vmatpush.bf16.msra.mxu2 %v9913_v63  ;;  %5294 = vmatmul.bf16.vlgmr.msrb.gmra.mxu1 %v14852_v19  ;;  %v9953_v63 = vor.u32 %v13115_v56, %v9952_v55  ;;  %v9753_v2 = vor.u32 %v13065_v59, %v9752_v58  ;;  %v13169_v55 = vld [vmem:[%s14519_s12 + $0xb74] sm:$0xf0]  ;;  %v9792_v56 = vld [vmem:[%s14519_s12 + $0x880] sm:$0xf] }
  0xf0   : > { %5338 = vmatpush.bf16.msra.mxu1 %v9849_v13  ;;  %5320 = vmatmul.bf16.vlgmr.msrb.gmra.mxu3 %v14856_v24  ;;  %v9817_v13 = vor.u32 %v13081_v1, %v9816_v0  ;;  %v9920_v59 = vld [vmem:[%s14519_s12 + $0x980] sm:$0xf]  ;;  %v531_v0 = vld [vmem:[#allocation3 + $0x90] sm:$0xff]  ;;  %v10104_v1 = vld [vmem:[%s14519_s12 + $0xaf0] sm:$0xf] }
  0xf1   : > { %5364 = vmatpush.bf16.msra.mxu3 %v9977_v18  ;;  %v9945_v18 = vor.u32 %v13113_v4, %v9944_v3  ;;  %v10169_v3 = vor.u32 %v13169_v55, %v10168_v53  ;;  %v13131_v55 = vld [vmem:[%s14519_s12 + $0xa44] sm:$0xf0] }
  0xf2   : > { %5326 = vmatpush.bf16.msra.mxu0 %v9777_v26  ;;  %v9745_v26 = vor.u32 %v13063_v9, %v9744_v8  ;;  %v13185_v8 = vld [vmem:[%s14519_s12 + $0xbf4] sm:$0xf0]  ;;  %v530_v9 = vld [vmem:[#allocation3 + $0x88] sm:$0xff] }
  0xf3   : > { %5352 = vmatpush.bf16.msra.mxu2 %v9905_v29  ;;  %v9873_v29 = vor.u32 %v13095_v17, %v9872_v14  ;;  %v14920_v14 = vpack.c.bf16 %v529_v61, %v529_v61  ;;  %v532_v17 = vld [vmem:[#allocation3 + $0x98] sm:$0xff]  ;;  %v13147_v61 = vld [vmem:[%s14519_s12 + $0xac4] sm:$0xf0] }
  0xf4   : > { %5339 = vmatpush.bf16.msra.mxu1 %v9841_v32  ;;  %v9809_v32 = vor.u32 %v13079_v23, %v9808_v21  ;;  %v13135_v21 = vld [vmem:[%s14519_s12 + $0xa64] sm:$0xf0]  ;;  %v14924_v23 = vpack.c.bf16 %v531_v0, %v531_v0  ;;  %v14932_v34 = vpack.c.bf16 %v532_v17, %v532_v17  ;;  %v10072_v17 = vld [vmem:[%s14519_s12 + $0xab0] sm:$0xf] }
  0xf5   : > { %5365 = vmatpush.bf16.msra.mxu3 %v9969_v36  ;;  %v9937_v36 = vor.u32 %v13111_v28, %v9936_v27  ;;  %v10160_v27 = vld [vmem:[%s14519_s12 + $0xb60] sm:$0xf]  ;;  %v13167_v28 = vld [vmem:[%s14519_s12 + $0xb64] sm:$0xf0] }
  0xf6   : > { %5327 = vmatpush.bf16.msra.mxu0 %v9769_v40  ;;  %v9737_v40 = vor.u32 %v13061_v31, %v9736_v30  ;;  %v14928_v30 = vpack.c.bf16 %v530_v9, %v530_v9  ;;  %v10096_v31 = vld [vmem:[%s14519_s12 + $0xae0] sm:$0xf]  ;;  %v10161_v39 = vor.u32 %v13167_v28, %v10160_v27  ;;  %v13179_v0 = vld [vmem:[%s14519_s12 + $0xbc4] sm:$0xf0]  ;;  %v13161_v9 = vld [vmem:[%s14519_s12 + $0xb34] sm:$0xf0] }
  0xf7   : > { %5353 = vmatpush.bf16.msra.mxu2 %v9897_v44  ;;  %v9728_v44 = vld [vmem:[%s14519_s12 + $0x800] sm:$0xf]  ;;  %v13177_v27 = vld [vmem:[%s14519_s12 + $0xbb4] sm:$0xf0] }
  0xf8   : > { %5340 = vmatpush.bf16.msra.mxu1 %v9833_v48  ;;  %v9856_v48 = vld [vmem:[%s14519_s12 + $0x900] sm:$0xf]  ;;  %v9729_v58 = vor.u32 %v13059_v47, %v9728_v44  ;;  %v10152_v44 = vld [vmem:[%s14519_s12 + $0xb50] sm:$0xf] }
  0xf9   : > { %5366 = vmatpush.bf16.msra.mxu3 %v9961_v51  ;;  %v10040_v51 = vld [vmem:[%s14519_s12 + $0xa70] sm:$0xf]  ;;  %v9857_v62 = vor.u32 %v13091_v49, %v9856_v48  ;;  %v13149_v49 = vld [vmem:[%s14519_s12 + $0xad4] sm:$0xf0] }
  0xfa   : > { %5328 = vmatpush.bf16.msra.mxu0 %v9761_v54  ;;  %v9929_v54 = vor.u32 %v13109_v43, %v9928_v41  ;;  %v13133_v41 = vld [vmem:[%s14519_s12 + $0xa54] sm:$0xf0]  ;;  %v10088_v48 = vld [vmem:[%s14519_s12 + $0xad0] sm:$0xf] }
  0xfb   : > { %5354 = vmatpush.bf16.msra.mxu2 %v9889_v57  ;;  %v13075_v57 = vld [vmem:[%s14519_s12 + $0x884] sm:$0xf0] }
  0xfc   : > { %5341 = vmatpush.bf16.msra.mxu1 %v9825_v60  ;;  %v13107_v60 = vld [vmem:[%s14519_s12 + $0x984] sm:$0xf0]  ;;  %v9793_v4 = vor.u32 %v13075_v57, %v9792_v56  ;;  %v10089_v56 = vor.u32 %v13149_v49, %v10088_v48  ;;  %v10144_v57 = vld [vmem:[%s14519_s12 + $0xb40] sm:$0xf] }
  0xfd   : > { %5367 = vmatpush.bf16.msra.mxu3 %v9953_v63  ;;  %v10041_v63 = vor.u32 %v13137_v52, %v10040_v51  ;;  %v10216_v51 = vld [vmem:[%s14519_s12 + $0xbd0] sm:$0xf]  ;;  %v13181_v52 = vld [vmem:[%s14519_s12 + $0xbd4] sm:$0xf0] }
  0xfe   : > { %5329 = vmatpush.bf16.msra.mxu0 %v9753_v2  ;;  %v13153_v2 = vld [vmem:[%s14519_s12 + $0xaf4] sm:$0xf0] }
  0xff   : > { %5355 = vmatpush.bf16.msra.mxu2 %v9881_v7  ;;  %v10232_v7 = vld [vmem:[%s14519_s12 + $0xbf0] sm:$0xf] }
 0x100   : > { %5342 = vmatpush.bf16.msra.mxu1 %v9817_v13  ;;  %v9921_v13 = vor.u32 %v13107_v60, %v9920_v59  ;;  %v10217_v59 = vor.u32 %v13181_v52, %v10216_v51  ;;  %v10080_v60 = vld [vmem:[%s14519_s12 + $0xac0] sm:$0xf]  ;;  %v13125_v51 = vld [vmem:[%s14519_s12 + $0xa14] sm:$0xf0] }
 0x101   : > { %5368 = vmatpush.bf16.msra.mxu3 %v9945_v18  ;;  %v10032_v18 = vld [vmem:[%s14519_s12 + $0xa60] sm:$0xf] }
 0x102   : > { %5330 = vmatpush.bf16.msra.mxu0 %v9745_v26  ;;  %v10105_v26 = vor.u32 %v13153_v2, %v10104_v1  ;;  %v10033_v35 = vor.u32 %v13135_v21, %v10032_v18  ;;  %v10008_v2 = vld [vmem:[%s14519_s12 + $0xa30] sm:$0xf]  ;;  %v13145_v18 = vld [vmem:[%s14519_s12 + $0xab4] sm:$0xf0] }
 0x103   : > { %5356 = vmatpush.bf16.msra.mxu2 %v9873_v29  ;;  %v10233_v29 = vor.u32 %v13185_v8, %v10232_v7  ;;  %v10081_v7 = vor.u32 %v13147_v61, %v10080_v60  ;;  %v10136_v8 = vld [vmem:[%s14519_s12 + $0xb30] sm:$0xf] }
 0x104   : > { %5343 = vmatpush.bf16.msra.mxu1 %v9809_v32  ;;  %v13151_v32 = vld [vmem:[%s14519_s12 + $0xae4] sm:$0xf0] }
 0x105   : > { %5369 = vmatpush.bf16.msra.mxu3 %v9937_v36  ;;  %v10224_v36 = vld [vmem:[%s14519_s12 + $0xbe0] sm:$0xf]  ;;  %v10097_v43 = vor.u32 %v13151_v32, %v10096_v31  ;;  %v13127_v32 = vld [vmem:[%s14519_s12 + $0xa24] sm:$0xf0] }
 0x106   : > { %5331 = vmatpush.bf16.msra.mxu0 %v9737_v40  ;;  %v10024_v40 = vld [vmem:[%s14519_s12 + $0xa50] sm:$0xf]  ;;  %v10225_v47 = vor.u32 %v13183_v37, %v10224_v36  ;;  %v10000_v31 = vld [vmem:[%s14519_s12 + $0xa20] sm:$0xf]  ;;  %v13159_v37 = vld [vmem:[%s14519_s12 + $0xb24] sm:$0xf0] }
 0x107   : > { %5357 = vmatpush.bf16.msra.mxu2 %v9865_v45  ;;  %v13165_v45 = vld [vmem:[%s14519_s12 + $0xb54] sm:$0xf0]  ;;  %v10128_v36 = vld [vmem:[%s14519_s12 + $0xb20] sm:$0xf] }
 0x108   : > { %5344 = vmatpush.bf16.msra.mxu1 %v9801_v50  ;;  %v10025_v50 = vor.u32 %v13133_v41, %v10024_v40  ;;  %v10153_v53 = vor.u32 %v13165_v45, %v10152_v44  ;;  %v10064_v40 = vld [vmem:[%s14519_s12 + $0xaa0] sm:$0xf]  ;;  %v13143_v41 = vld [vmem:[%s14519_s12 + $0xaa4] sm:$0xf0]  ;;  %v10001_v44 = vor.u32 %v13127_v32, %v10000_v31  ;;  %v10129_v49 = vor.u32 %v13159_v37, %v10128_v36 }
 0x109   : > { %5370 = vmatpush.bf16.msra.mxu3 %v9929_v54  ;;  %v10016_v54 = vld [vmem:[%s14519_s12 + $0xa40] sm:$0xf]  ;;  %v13171_v36 = vld [vmem:[%s14519_s12 + $0xb84] sm:$0xf0] }
 0x10a   : > { %5332 = vmatpush.bf16.msra.mxu0 %v9729_v58  ;;  %v13163_v58 = vld [vmem:[%s14519_s12 + $0xb44] sm:$0xf0]  ;;  %v10192_v45 = vld [vmem:[%s14519_s12 + $0xba0] sm:$0xf] }
 0x10b   : > { %5358 = vmatpush.bf16.msra.mxu2 %v9857_v62  ;;  %v10017_v62 = vor.u32 %v13131_v55, %v10016_v54  ;;  %v10145_v1 = vor.u32 %v13163_v58, %v10144_v57  ;;  %v10120_v54 = vld [vmem:[%s14519_s12 + $0xb10] sm:$0xf]  ;;  %v13157_v55 = vld [vmem:[%s14519_s12 + $0xb14] sm:$0xf0] }
 0x10c   : > { %5345 = vmatpush.bf16.msra.mxu1 %v9793_v4  ;;  %v1357_v4 = vld [vmem:[%s441_s21] sm:$0x3]  ;;  %v5139_v52 = vpop.f32.mrf.mxu1  ;;  %v533_v37 = vld [vmem:[#allocation3 + $0xa0] sm:$0xff] }
 0x10d   : > { %5371 = vmatpush.bf16.msra.mxu3 %v9921_v13  ;;  %5333 = vmatmul.bf16.vlgmr.msra.gmra.mxu0 %v14920_v14  ;;  %v1359_v28 = vperm.slane %v1357_v4, 0  ;;  %v10056_v58 = vld [vmem:[%s14519_s12 + $0xa90] sm:$0xf]  ;;  %v10112_v4 = vld [vmem:[%s14519_s12 + $0xb00] sm:$0xf] }
 0x10e   : > { %5377 = vmatpush.bf16.msrb.mxu0 %v10041_v63  ;;  %5359 = vmatmul.bf16.vlgmr.msra.gmra.mxu2 %v14924_v23  ;;  %v10208_v63 = vld [vmem:[%s14519_s12 + $0xbc0] sm:$0xf] }
 0x10f   : > { %5403 = vmatpush.bf16.msrb.mxu2 %v10169_v3  ;;  %5346 = vmatmul.bf16.vlgmr.msra.gmra.mxu1 %v14928_v30  ;;  %v13129_v3 = vld [vmem:[%s14519_s12 + $0xa34] sm:$0xf0]  ;;  %v10209_v13 = vor.u32 %v13179_v0, %v10208_v63  ;;  %v9984_v0 = vld [vmem:[%s14519_s12 + $0xa00] sm:$0xf] }
 0x110   : > { %5390 = vmatpush.bf16.msrb.mxu1 %v10105_v26  ;;  %5372 = vmatmul.bf16.vlgmr.msra.gmra.mxu3 %v14932_v34  ;;  %v10009_v21 = vor.u32 %v13129_v3, %v10008_v2  ;;  %v10200_v26 = vld [vmem:[%s14519_s12 + $0xbb0] sm:$0xf]  ;;  %v13173_v63 = vld [vmem:[%s14519_s12 + $0xb94] sm:$0xf0]  ;;  %v10121_v2 = vor.u32 %v13157_v55, %v10120_v54  ;;  %v13123_v3 = vld [vmem:[%s14519_s12 + $0xa04] sm:$0xf0] }
 0x111   : > { %5416 = vmatpush.bf16.msrb.mxu3 %v10233_v29  ;;  %v10137_v29 = vor.u32 %v13161_v9, %v10136_v8  ;;  %v5152_v60 = vpop.f32.mrf.mxu2  ;;  %v10296_v9 = vld [vmem:[%s14519_s12 + $0xc70] sm:$0xf]  ;;  %v9985_v32 = vor.u32 %v13123_v3, %v9984_v0  ;;  %v10288_v55 = vld [vmem:[%s14519_s12 + $0xc60] sm:$0xf] }
 0x112   : > { %5378 = vmatpush.bf16.msrb.mxu0 %v10033_v35  ;;  %v10073_v35 = vor.u32 %v13145_v18, %v10072_v17  ;;  %v10424_v17 = vld [vmem:[%s14519_s12 + $0xd70] sm:$0xf]  ;;  %v10352_v0 = vld [vmem:[%s14519_s12 + $0xce0] sm:$0xf] }
 0x113   : > { %5404 = vmatpush.bf16.msrb.mxu2 %v10161_v39  ;;  %v10201_v39 = vor.u32 %v13177_v27, %v10200_v26  ;;  %v5165_v18 = vpop.f32.mrf.mxu3  ;;  %v13233_v26 = vld [vmem:[%s14519_s12 + $0xd74] sm:$0xf0]  ;;  %v10048_v27 = vld [vmem:[%s14519_s12 + $0xa80] sm:$0xf] }
 0x114   : > { %5391 = vmatpush.bf16.msrb.mxu1 %v10097_v43  ;;  %v5126_v43 = vpop.f32.mrf.mxu0  ;;  %v536_v54 = vld [vmem:[#allocation3 + $0xb8] sm:$0xff] }
 0x115   : > { %5417 = vmatpush.bf16.msrb.mxu3 %v10225_v47  ;;  %v13175_v47 = vld [vmem:[%s14519_s12 + $0xba4] sm:$0xf0]  ;;  %v5127_v48 = vadd.f32 %v5126_v43, %v1359_v28  ;;  %v10360_v43 = vld [vmem:[%s14519_s12 + $0xcf0] sm:$0xf] }
 0x116   : > { %5379 = vmatpush.bf16.msrb.mxu0 %v10025_v50  ;;  %v9992_v50 = vld [vmem:[%s14519_s12 + $0xa10] sm:$0xf]  ;;  %v10193_v57 = vor.u32 %v13175_v47, %v10192_v45  ;;  %v13139_v28 = vld [vmem:[%s14519_s12 + $0xa84] sm:$0xf0]  ;;  %v5141_v45 = vpop.f32.mrf.mxu1  ;;  %v10425_v47 = vor.u32 %v13233_v26, %v10424_v17  ;;  %v13197_v17 = vld [vmem:[%s14519_s12 + $0xc54] sm:$0xf0] }
 0x117   : > { %5405 = vmatpush.bf16.msrb.mxu2 %v10153_v53  ;;  %v10065_v53 = vor.u32 %v13143_v41, %v10064_v40  ;;  %v9993_v61 = vor.u32 %v13125_v51, %v9992_v50  ;;  %v535_v41 = vld [vmem:[#allocation3 + $0xb0] sm:$0xff]  ;;  %v534_v51 = vld [vmem:[#allocation3 + $0xa8] sm:$0xff] }
 0x118   : > { %5392 = vmatpush.bf16.msrb.mxu1 %v10089_v56  ;;  %v5140_v56 = vadd.f32 %v5139_v52, %v5127_v48  ;;  %v10049_v48 = vor.u32 %v13139_v28, %v10048_v27  ;;  %v13249_v50 = vld [vmem:[%s14519_s12 + $0xdf4] sm:$0xf0]  ;;  %v10344_v28 = vld [vmem:[%s14519_s12 + $0xcd0] sm:$0xf] }
 0x119   : > { %5418 = vmatpush.bf16.msrb.mxu3 %v10217_v59  ;;  %v13141_v59 = vld [vmem:[%s14519_s12 + $0xa94] sm:$0xf0] }
 0x11a   : > { %5380 = vmatpush.bf16.msrb.mxu0 %v10017_v62  ;;  %v10184_v62 = vld [vmem:[%s14519_s12 + $0xb90] sm:$0xf]  ;;  %v10057_v8 = vor.u32 %v13141_v59, %v10056_v58  ;;  %v15004_v58 = vpack.c.bf16 %v535_v41, %v535_v41  ;;  %v13229_v26 = vld [vmem:[%s14519_s12 + $0xd54] sm:$0xf0] }
 0x11b   : > { %5406 = vmatpush.bf16.msrb.mxu2 %v10145_v1  ;;  %v5153_v1 = vadd.f32 %v5152_v60, %v5140_v56  ;;  %v13199_v56 = vld [vmem:[%s14519_s12 + $0xc64] sm:$0xf0]  ;;  %v10416_v60 = vld [vmem:[%s14519_s12 + $0xd60] sm:$0xf] }
 0x11c   : > { %5393 = vmatpush.bf16.msrb.mxu1 %v10081_v7  ;;  %v13155_v7 = vld [vmem:[%s14519_s12 + $0xb04] sm:$0xf0]  ;;  %v5128_v31 = vpop.f32.mrf.mxu0  ;;  %v10289_v3 = vor.u32 %v13199_v56, %v10288_v55  ;;  %v13193_v55 = vld [vmem:[%s14519_s12 + $0xc34] sm:$0xf0] }
 0x11d   : > { %5419 = vmatpush.bf16.msrb.mxu3 %v10209_v13  ;;  %v13201_v13 = vld [vmem:[%s14519_s12 + $0xc74] sm:$0xf0] }
 0x11e   : > { %5381 = vmatpush.bf16.msrb.mxu0 %v10009_v21  ;;  %v10185_v21 = vor.u32 %v13173_v63, %v10184_v62  ;;  %v10297_v40 = vor.u32 %v13201_v13, %v10296_v9  ;;  %v15008_v63 = vpack.c.bf16 %v534_v51, %v534_v51  ;;  %v10280_v13 = vld [vmem:[%s14519_s12 + $0xc50] sm:$0xf]  ;;  %v13213_v31 = vld [vmem:[%s14519_s12 + $0xcd4] sm:$0xf0]  ;;  %v13243_v51 = vld [vmem:[%s14519_s12 + $0xdc4] sm:$0xf0] }
 0x11f   : > { %5407 = vmatpush.bf16.msrb.mxu2 %v10137_v29  ;;  %v14992_v29 = vadd.f32 %v5165_v18, %v5153_v1  ;;  %v13215_v1 = vld [vmem:[%s14519_s12 + $0xce4] sm:$0xf0]  ;;  %v10345_v41 = vor.u32 %v13213_v31, %v10344_v28  ;;  %v10320_v31 = vld [vmem:[%s14519_s12 + $0xca0] sm:$0xf] }
 0x120   : > { %5394 = vmatpush.bf16.msrb.mxu1 %v10073_v35  ;;  %v10176_v35 = vld [vmem:[%s14519_s12 + $0xb80] sm:$0xf]  ;;  %v10353_v18 = vor.u32 %v13215_v1, %v10352_v0  ;;  %v10328_v0 = vld [vmem:[%s14519_s12 + $0xcb0] sm:$0xf]  ;;  %v13209_v1 = vld [vmem:[%s14519_s12 + $0xcb4] sm:$0xf0] }
 0x121   : > { %5420 = vmatpush.bf16.msrb.mxu3 %v10201_v39  ;;  %v10113_v39 = vor.u32 %v13155_v7, %v10112_v4  ;;  %v10177_v52 = vor.u32 %v13171_v36, %v10176_v35  ;;  %v10480_v4 = vld [vmem:[%s14519_s12 + $0xde0] sm:$0xf]  ;;  %v13247_v7 = vld [vmem:[%s14519_s12 + $0xde4] sm:$0xf0]  ;;  %v10472_v35 = vld [vmem:[%s14519_s12 + $0xdd0] sm:$0xf] }
 0x122   : > { %5382 = vmatpush.bf16.msrb.mxu0 %v10001_v44  ;;  %v13217_v44 = vld [vmem:[%s14519_s12 + $0xcf4] sm:$0xf0]  ;;  %v10481_v27 = vor.u32 %v13247_v7, %v10480_v4  ;;  %v10456_v7 = vld [vmem:[%s14519_s12 + $0xdb0] sm:$0xf] }
 0x123   : > { %5408 = vmatpush.bf16.msrb.mxu2 %v10129_v49  ;;  %v10488_v49 = vld [vmem:[%s14519_s12 + $0xdf0] sm:$0xf]  ;;  %v10361_v59 = vor.u32 %v13217_v44, %v10360_v43  ;;  %v13245_v36 = vld [vmem:[%s14519_s12 + $0xdd4] sm:$0xf0]  ;;  %v10400_v43 = vld [vmem:[%s14519_s12 + $0xd40] sm:$0xf] }
 0x124   : > { %5395 = vmatpush.bf16.msrb.mxu1 %v10065_v53  ;;  %v15000_v53 = vpack.c.bf16 %v533_v37, %v533_v37  ;;  %v10489_v62 = vor.u32 %v13249_v50, %v10488_v49  ;;  %v13227_v44 = vld [vmem:[%s14519_s12 + $0xd44] sm:$0xf0]  ;;  %v10473_v45 = vor.u32 %v13245_v36, %v10472_v35  ;;  %v10464_v50 = vld [vmem:[%s14519_s12 + $0xdc0] sm:$0xf] }
 0x125   : > { %5421 = vmatpush.bf16.msrb.mxu3 %v10193_v57  ;;  %v5154_v57 = vpop.f32.mrf.mxu2 }
 0x126   : > { %5383 = vmatpush.bf16.msrb.mxu0 %v9993_v61  ;;  %v13231_v61 = vld [vmem:[%s14519_s12 + $0xd64] sm:$0xf0] }
 0x127   : > { %5409 = vmatpush.bf16.msrb.mxu2 %v10121_v2  ;;  %v15012_v2 = vpack.c.bf16 %v536_v54, %v536_v54  ;;  %v10417_v9 = vor.u32 %v13231_v61, %v10416_v60  ;;  %v10264_v54 = vld [vmem:[%s14519_s12 + $0xc30] sm:$0xf]  ;;  %v13225_v60 = vld [vmem:[%s14519_s12 + $0xd34] sm:$0xf0] }
 0x128   : > { %5396 = vmatpush.bf16.msrb.mxu1 %v10057_v8  ;;  %v5167_v8 = vpop.f32.mrf.mxu3  ;;  %v10265_v4 = vor.u32 %v13193_v55, %v10264_v54  ;;  %v10312_v54 = vld [vmem:[%s14519_s12 + $0xc90] sm:$0xf]  ;;  %v13205_v55 = vld [vmem:[%s14519_s12 + $0xc94] sm:$0xf0] }
 0x129   : > { %5422 = vmatpush.bf16.msrb.mxu3 %v10185_v21  ;;  %v10408_v21 = vld [vmem:[%s14519_s12 + $0xd50] sm:$0xf]  ;;  %v13241_v8 = vld [vmem:[%s14519_s12 + $0xdb4] sm:$0xf0] }
 0x12a   : > { %5384 = vmatpush.bf16.msrb.mxu0 %v9985_v32  ;;  %v10281_v32 = vor.u32 %v13197_v17, %v10280_v13  ;;  %v10409_v37 = vor.u32 %v13229_v26, %v10408_v21  ;;  %v5178_v61 = vpop.f32.mrf.mxu0  ;;  %v10256_v13 = vld [vmem:[%s14519_s12 + $0xc20] sm:$0xf]  ;;  %v13191_v17 = vld [vmem:[%s14519_s12 + $0xc24] sm:$0xf0]  ;;  %v10329_v21 = vor.u32 %v13209_v1, %v10328_v0  ;;  %v10457_v28 = vor.u32 %v13241_v8, %v10456_v7  ;;  %v13265_v7 = vld [vmem:[%s14519_s12 + $0xe74] sm:$0xf0] }
 0x12b   : > { %5410 = vmatpush.bf16.msrb.mxu2 %v10113_v39  ;;  %v10272_v39 = vld [vmem:[%s14519_s12 + $0xc40] sm:$0xf]  ;;  %v10257_v36 = vor.u32 %v13191_v17, %v10256_v13  ;;  %v13219_v1 = vld [vmem:[%s14519_s12 + $0xd04] sm:$0xf0]  ;;  %v10680_v8 = vld [vmem:[%s14519_s12 + $0xf70] sm:$0xf] }
 0x12c   : > { %5397 = vmatpush.bf16.msrb.mxu1 %v10049_v48  ;;  %v13211_v48 = vld [vmem:[%s14519_s12 + $0xcc4] sm:$0xf0]  ;;  %v5191_v56 = vpop.f32.mrf.mxu1  ;;  %v10384_v26 = vld [vmem:[%s14519_s12 + $0xd20] sm:$0xf]  ;;  %v13297_v17 = vld [vmem:[%s14519_s12 + $0xf74] sm:$0xf0] }
 0x12d   : > { %5423 = vmatpush.bf16.msrb.mxu3 %v10177_v52  ;;  %5385 = vmatmul.bf16.vlgmr.msrb.gmra.mxu0 %v15000_v53  ;;  %v10401_v52 = vor.u32 %v13227_v44, %v10400_v43  ;;  %v13189_v43 = vld [vmem:[%s14519_s12 + $0xc14] sm:$0xf0]  ;;  %v10368_v0 = vld [vmem:[%s14519_s12 + $0xd00] sm:$0xf] }
 0x12e   : > { %5429 = vmatpush.bf16.msra.mxu0 %v10297_v40  ;;  %5411 = vmatmul.bf16.vlgmr.msrb.gmra.mxu2 %v15004_v58  ;;  %v13195_v40 = vld [vmem:[%s14519_s12 + $0xc44] sm:$0xf0] }
 0x12f   : > { %5455 = vmatpush.bf16.msra.mxu2 %v10425_v47  ;;  %5398 = vmatmul.bf16.vlgmr.msrb.gmra.mxu1 %v15008_v63  ;;  %v10336_v47 = vld [vmem:[%s14519_s12 + $0xcc0] sm:$0xf]  ;;  %v10273_v49 = vor.u32 %v13195_v40, %v10272_v39  ;;  %v13239_v39 = vld [vmem:[%s14519_s12 + $0xda4] sm:$0xf0] }
 0x130   : > { %5442 = vmatpush.bf16.msra.mxu1 %v10361_v59  ;;  %5424 = vmatmul.bf16.vlgmr.msrb.gmra.mxu3 %v15012_v2  ;;  %v10337_v57 = vor.u32 %v13211_v48, %v10336_v47  ;;  %v10392_v59 = vld [vmem:[%s14519_s12 + $0xd30] sm:$0xf] }
 0x131   : > { %5468 = vmatpush.bf16.msra.mxu3 %v10489_v62  ;;  %v10465_v62 = vor.u32 %v13243_v51, %v10464_v50  ;;  %v10376_v48 = vld [vmem:[%s14519_s12 + $0xd10] sm:$0xf] }
 0x132   : > { %5430 = vmatpush.bf16.msra.mxu0 %v10289_v3  ;;  %v5179_v3 = vadd.f32 %v5178_v61, %v14992_v29  ;;  %v5204_v29 = vpop.f32.mrf.mxu2  ;;  %v5180_v51 = vpop.f32.mrf.mxu0 }
 0x133   : > { %5456 = vmatpush.bf16.msra.mxu2 %v10417_v9  ;;  %v10393_v9 = vor.u32 %v13225_v60, %v10392_v59  ;;  %v5217_v44 = vpop.f32.mrf.mxu3  ;;  %v13237_v59 = vld [vmem:[%s14519_s12 + $0xd94] sm:$0xf0]  ;;  %v10240_v60 = vld [vmem:[%s14519_s12 + $0xc00] sm:$0xf] }
 0x134   : > { %5443 = vmatpush.bf16.msra.mxu1 %v10353_v18  ;;  %v5192_v18 = vadd.f32 %v5191_v56, %v5179_v3  ;;  %v10313_v3 = vor.u32 %v13205_v55, %v10312_v54  ;;  %v10544_v51 = vld [vmem:[%s14519_s12 + $0xe60] sm:$0xf] }
 0x135   : > { %5469 = vmatpush.bf16.msra.mxu3 %v10481_v27  ;;  %v13223_v27 = vld [vmem:[%s14519_s12 + $0xd24] sm:$0xf0] }
 0x136   : > { %5431 = vmatpush.bf16.msra.mxu0 %v10281_v32  ;;  %v13207_v32 = vld [vmem:[%s14519_s12 + $0xca4] sm:$0xf0]  ;;  %v5205_v35 = vadd.f32 %v5204_v29, %v5192_v18  ;;  %v10385_v40 = vor.u32 %v13223_v27, %v10384_v26  ;;  %v10304_v18 = vld [vmem:[%s14519_s12 + $0xc80] sm:$0xf] }
 0x137   : > { %5457 = vmatpush.bf16.msra.mxu2 %v10409_v37  ;;  %v10448_v37 = vld [vmem:[%s14519_s12 + $0xda0] sm:$0xf]  ;;  %v10321_v47 = vor.u32 %v13207_v32, %v10320_v31  ;;  %v13235_v29 = vld [vmem:[%s14519_s12 + $0xd84] sm:$0xf0]  ;;  %v10369_v31 = vor.u32 %v13219_v1, %v10368_v0 }
 0x138   : > { %5444 = vmatpush.bf16.msra.mxu1 %v10345_v41  ;;  %v10248_v41 = vld [vmem:[%s14519_s12 + $0xc10] sm:$0xf]  ;;  %v15057_v50 = vadd.f32 %v5217_v44, %v5205_v35  ;;  %v10432_v27 = vld [vmem:[%s14519_s12 + $0xd80] sm:$0xf]  ;;  %v539_v35 = vld [vmem:[#allocation3 + $0xd0] sm:$0xff] }
 0x139   : > { %5470 = vmatpush.bf16.msra.mxu3 %v10473_v45  ;;  %v5193_v45 = vpop.f32.mrf.mxu1  ;;  %v10249_v56 = vor.u32 %v13189_v43, %v10248_v41  ;;  %v10744_v43 = vld [vmem:[%s14519_s12 + $0xff0] sm:$0xf]  ;;  %v13313_v44 = vld [vmem:[%s14519_s12 + $0xff4] sm:$0xf0]  ;;  %v15083_v54 = vpack.c.bf16 %v539_v35, %v539_v35  ;;  %v10528_v35 = vld [vmem:[%s14519_s12 + $0xe40] sm:$0xf] }
 0x13a   : > { %5432 = vmatpush.bf16.msra.mxu0 %v10273_v49  ;;  %v13221_v49 = vld [vmem:[%s14519_s12 + $0xd14] sm:$0xf0]  ;;  %v538_v45 = vld [vmem:[#allocation3 + $0xc8] sm:$0xff] }
 0x13b   : > { %5458 = vmatpush.bf16.msra.mxu2 %v10401_v52  ;;  %v10449_v52 = vor.u32 %v13239_v39, %v10448_v37  ;;  %v10377_v61 = vor.u32 %v13221_v49, %v10376_v48  ;;  %v13281_v37 = vld [vmem:[%s14519_s12 + $0xef4] sm:$0xf0]  ;;  %v5219_v39 = vpop.f32.mrf.mxu3  ;;  %v540_v49 = vld [vmem:[#allocation3 + $0xd8] sm:$0xff] }
 0x13c   : > { %5445 = vmatpush.bf16.msra.mxu1 %v10337_v57  ;;  %v10440_v57 = vld [vmem:[%s14519_s12 + $0xd90] sm:$0xf]  ;;  %v15091_v0 = vpack.c.bf16 %v540_v49, %v540_v49 }
 0x13d   : > { %5471 = vmatpush.bf16.msra.mxu3 %v10465_v62  ;;  %v13187_v62 = vld [vmem:[%s14519_s12 + $0xc04] sm:$0xf0]  ;;  %v10441_v13 = vor.u32 %v13237_v59, %v10440_v57  ;;  %v10745_v59 = vor.u32 %v13313_v44, %v10744_v43 }
 0x13e   : > { %5433 = vmatpush.bf16.msra.mxu0 %v10265_v4  ;;  %v10552_v4 = vld [vmem:[%s14519_s12 + $0xe70] sm:$0xf]  ;;  %v10241_v26 = vor.u32 %v13187_v62, %v10240_v60  ;;  %v13295_v57 = vld [vmem:[%s14519_s12 + $0xf64] sm:$0xf0]  ;;  %v15087_v60 = vpack.c.bf16 %v538_v45, %v538_v45  ;;  %v10592_v45 = vld [vmem:[%s14519_s12 + $0xec0] sm:$0xf] }
 0x13f   : > { %5459 = vmatpush.bf16.msra.mxu2 %v10393_v9  ;;  %v5206_v9 = vpop.f32.mrf.mxu2  ;;  %v10553_v32 = vor.u32 %v13265_v7, %v10552_v4  ;;  %v13279_v62 = vld [vmem:[%s14519_s12 + $0xee4] sm:$0xf0] }
 0x140   : > { %5446 = vmatpush.bf16.msra.mxu1 %v10329_v21  ;;  %v13203_v21 = vld [vmem:[%s14519_s12 + $0xc84] sm:$0xf0]  ;;  %v13261_v9 = vld [vmem:[%s14519_s12 + $0xe54] sm:$0xf0] }
 0x141   : > { %5472 = vmatpush.bf16.msra.mxu3 %v10457_v28  ;;  %v537_v28 = vld [vmem:[#allocation3 + $0xc0] sm:$0xff]  ;;  %v10305_v41 = vor.u32 %v13203_v21, %v10304_v18 }
 0x142   : > { %5434 = vmatpush.bf16.msra.mxu0 %v10257_v36  ;;  %v10616_v36 = vld [vmem:[%s14519_s12 + $0xef0] sm:$0xf]  ;;  %v15079_v48 = vpack.c.bf16 %v537_v28, %v537_v28  ;;  %v13311_v4 = vld [vmem:[%s14519_s12 + $0xfe4] sm:$0xf0]  ;;  %v13293_v18 = vld [vmem:[%s14519_s12 + $0xf54] sm:$0xf0] }
 0x143   : > { %5460 = vmatpush.bf16.msra.mxu2 %v10385_v40  ;;  %v10681_v40 = vor.u32 %v13297_v17, %v10680_v8  ;;  %v10617_v55 = vor.u32 %v13281_v37, %v10616_v36  ;;  %v10536_v8 = vld [vmem:[%s14519_s12 + $0xe50] sm:$0xf]  ;;  %v13259_v36 = vld [vmem:[%s14519_s12 + $0xe44] sm:$0xf0] }
 0x144   : > { %5447 = vmatpush.bf16.msra.mxu1 %v10321_v47  ;;  %v10433_v47 = vor.u32 %v13235_v29, %v10432_v27  ;;  %v10664_v17 = vld [vmem:[%s14519_s12 + $0xf50] sm:$0xf]  ;;  %v13277_v27 = vld [vmem:[%s14519_s12 + $0xed4] sm:$0xf0]  ;;  %v10537_v29 = vor.u32 %v13261_v9, %v10536_v8  ;;  %v10529_v49 = vor.u32 %v13259_v36, %v10528_v35 }
 0x145   : > { %5473 = vmatpush.bf16.msra.mxu3 %v10449_v52  ;;  %v13263_v52 = vld [vmem:[%s14519_s12 + $0xe64] sm:$0xf0]  ;;  %v10728_v28 = vld [vmem:[%s14519_s12 + $0xfd0] sm:$0xf] }
 0x146   : > { %5435 = vmatpush.bf16.msra.mxu0 %v10249_v56  ;;  %v10672_v56 = vld [vmem:[%s14519_s12 + $0xf60] sm:$0xf]  ;;  %v10545_v1 = vor.u32 %v13263_v52, %v10544_v51  ;;  %v10712_v9 = vld [vmem:[%s14519_s12 + $0xfb0] sm:$0xf] }
 0x147   : > { %5461 = vmatpush.bf16.msra.mxu2 %v10377_v61  ;;  %v10608_v61 = vld [vmem:[%s14519_s12 + $0xee0] sm:$0xf]  ;;  %v10673_v7 = vor.u32 %v13295_v57, %v10672_v56 }
 0x148   : > { %5448 = vmatpush.bf16.msra.mxu1 %v10313_v3  ;;  %v10736_v3 = vld [vmem:[%s14519_s12 + $0xfe0] sm:$0xf] }
 0x149   : > { %5474 = vmatpush.bf16.msra.mxu3 %v10441_v13  ;;  %v10609_v13 = vor.u32 %v13279_v62, %v10608_v61  ;;  %v10737_v21 = vor.u32 %v13311_v4, %v10736_v3  ;;  %v10720_v52 = vld [vmem:[%s14519_s12 + $0xfc0] sm:$0xf]  ;;  %v13257_v61 = vld [vmem:[%s14519_s12 + $0xe34] sm:$0xf0]  ;;  %v10648_v62 = vld [vmem:[%s14519_s12 + $0xf30] sm:$0xf] }
 0x14a   : > { %5436 = vmatpush.bf16.msra.mxu0 %v10241_v26  ;;  %v10600_v26 = vld [vmem:[%s14519_s12 + $0xed0] sm:$0xf]  ;;  %v5230_v39 = vpop.f32.mrf.mxu0 }
 0x14b   : > { %5462 = vmatpush.bf16.msra.mxu2 %v10369_v31  ;;  %v13309_v31 = vld [vmem:[%s14519_s12 + $0xfd4] sm:$0xf0]  ;;  %v10601_v37 = vor.u32 %v13277_v27, %v10600_v26  ;;  %v5231_v44 = vadd.f32 %v5230_v39, %v15057_v50  ;;  %v10584_v4 = vld [vmem:[%s14519_s12 + $0xeb0] sm:$0xf]  ;;  %v13255_v26 = vld [vmem:[%s14519_s12 + $0xe24] sm:$0xf0] }
 0x14c   : > { %5449 = vmatpush.bf16.msra.mxu1 %v10305_v41  ;;  %v13291_v41 = vld [vmem:[%s14519_s12 + $0xf44] sm:$0xf0]  ;;  %v10729_v43 = vor.u32 %v13309_v31, %v10728_v28  ;;  %v5243_v51 = vpop.f32.mrf.mxu1  ;;  %v10640_v28 = vld [vmem:[%s14519_s12 + $0xf20] sm:$0xf] }
 0x14d   : > { %5475 = vmatpush.bf16.msra.mxu3 %v10433_v47  ;;  %5437 = vmatmul.bf16.vlgmr.msra.gmra.mxu0 %v15079_v48  ;;  %v13275_v47 = vld [vmem:[%s14519_s12 + $0xec4] sm:$0xf0]  ;;  %v5244_v57 = vadd.f32 %v5243_v51, %v5231_v44  ;;  %v13253_v51 = vld [vmem:[%s14519_s12 + $0xe14] sm:$0xf0] }
 0x14e   : > { %5481 = vmatpush.bf16.msrb.mxu0 %v10553_v32  ;;  %5463 = vmatmul.bf16.vlgmr.msra.gmra.mxu2 %v15083_v54  ;;  %v10665_v32 = vor.u32 %v13293_v18, %v10664_v17  ;;  %v10593_v50 = vor.u32 %v13275_v47, %v10592_v45  ;;  %v13287_v31 = vld [vmem:[%s14519_s12 + $0xf24] sm:$0xf0] }
 0x14f   : > { %5507 = vmatpush.bf16.msrb.mxu2 %v10681_v40  ;;  %5450 = vmatmul.bf16.vlgmr.msra.gmra.mxu1 %v15087_v60  ;;  %v10656_v40 = vld [vmem:[%s14519_s12 + $0xf40] sm:$0xf]  ;;  %v13271_v39 = vld [vmem:[%s14519_s12 + $0xea4] sm:$0xf0]  ;;  %v10641_v47 = vor.u32 %v13287_v31, %v10640_v28 }
 0x150   : > { %5494 = vmatpush.bf16.msrb.mxu1 %v10617_v55  ;;  %5476 = vmatmul.bf16.vlgmr.msra.gmra.mxu3 %v15091_v0  ;;  %v13307_v55 = vld [vmem:[%s14519_s12 + $0xfc4] sm:$0xf0]  ;;  %v10657_v56 = vor.u32 %v13291_v41, %v10656_v40  ;;  %v10560_v28 = vld [vmem:[%s14519_s12 + $0xe80] sm:$0xf] }
 0x151   : > { %5520 = vmatpush.bf16.msrb.mxu3 %v10745_v59  ;;  %v10520_v59 = vld [vmem:[%s14519_s12 + $0xe30] sm:$0xf]  ;;  %v10721_v3 = vor.u32 %v13307_v55, %v10720_v52  ;;  %v5256_v18 = vpop.f32.mrf.mxu2  ;;  %v13303_v44 = vld [vmem:[%s14519_s12 + $0xfa4] sm:$0xf0] }
 0x152   : > { %5482 = vmatpush.bf16.msrb.mxu0 %v10545_v1  ;;  %v13289_v1 = vld [vmem:[%s14519_s12 + $0xf34] sm:$0xf0]  ;;  %v10521_v8 = vor.u32 %v13257_v61, %v10520_v59  ;;  %v5257_v27 = vadd.f32 %v5256_v18, %v5244_v57  ;;  %v10632_v55 = vld [vmem:[%s14519_s12 + $0xf10] sm:$0xf]  ;;  %v13267_v31 = vld [vmem:[%s14519_s12 + $0xe84] sm:$0xf0] }
 0x153   : > { %5508 = vmatpush.bf16.msrb.mxu2 %v10673_v7  ;;  %v13273_v7 = vld [vmem:[%s14519_s12 + $0xeb4] sm:$0xf0]  ;;  %v10649_v17 = vor.u32 %v13289_v1, %v10648_v62  ;;  %v5269_v36 = vpop.f32.mrf.mxu3  ;;  %v10568_v59 = vld [vmem:[%s14519_s12 + $0xe90] sm:$0xf] }
 0x154   : > { %5495 = vmatpush.bf16.msrb.mxu1 %v10609_v13  ;;  %v13305_v13 = vld [vmem:[%s14519_s12 + $0xfb4] sm:$0xf0]  ;;  %v15130_v40 = vadd.f32 %v5269_v36, %v5257_v27  ;;  %v5245_v45 = vpop.f32.mrf.mxu1  ;;  %v10696_v62 = vld [vmem:[%s14519_s12 + $0xf90] sm:$0xf]  ;;  %v10688_v36 = vld [vmem:[%s14519_s12 + $0xf80] sm:$0xf] }
 0x155   : > { %5521 = vmatpush.bf16.msrb.mxu3 %v10737_v21  ;;  %v10512_v21 = vld [vmem:[%s14519_s12 + $0xe20] sm:$0xf]  ;;  %v10713_v35 = vor.u32 %v13305_v13, %v10712_v9  ;;  %v13269_v61 = vld [vmem:[%s14519_s12 + $0xe94] sm:$0xf0]  ;;  %v13283_v9 = vld [vmem:[%s14519_s12 + $0xf04] sm:$0xf0] }
 0x156   : > { %5483 = vmatpush.bf16.msrb.mxu0 %v10537_v29  ;;  %v10585_v29 = vor.u32 %v13273_v7, %v10584_v4  ;;  %v10513_v41 = vor.u32 %v13255_v26, %v10512_v21  ;;  %v13301_v1 = vld [vmem:[%s14519_s12 + $0xf94] sm:$0xf0]  ;;  %v13251_v7 = vld [vmem:[%s14519_s12 + $0xe04] sm:$0xf0]  ;;  %v10808_v18 = vld [vmem:[%s14519_s12 + $0x1070] sm:$0xf] }
 0x157   : > { %5509 = vmatpush.bf16.msrb.mxu2 %v10665_v32  ;;  %v5232_v32 = vpop.f32.mrf.mxu0  ;;  %v13329_v21 = vld [vmem:[%s14519_s12 + $0x1074] sm:$0xf0]  ;;  %v10936_v26 = vld [vmem:[%s14519_s12 + $0x1170] sm:$0xf]  ;;  %v10697_v27 = vor.u32 %v13301_v1, %v10696_v62  ;;  %v13327_v62 = vld [vmem:[%s14519_s12 + $0x1064] sm:$0xf0] }
 0x158   : > { %5496 = vmatpush.bf16.msrb.mxu1 %v10601_v37  ;;  %v10576_v37 = vld [vmem:[%s14519_s12 + $0xea0] sm:$0xf]  ;;  %v10872_v45 = vld [vmem:[%s14519_s12 + $0x10f0] sm:$0xf] }
 0x159   : > { %5522 = vmatpush.bf16.msrb.mxu3 %v10729_v43  ;;  %v10704_v43 = vld [vmem:[%s14519_s12 + $0xfa0] sm:$0xf]  ;;  %v10577_v52 = vor.u32 %v13271_v39, %v10576_v37  ;;  %v5258_v13 = vpop.f32.mrf.mxu2  ;;  %v13299_v37 = vld [vmem:[%s14519_s12 + $0xf84] sm:$0xf0] }
 0x15a   : > { %5484 = vmatpush.bf16.msrb.mxu0 %v10529_v49  ;;  %v10504_v49 = vld [vmem:[%s14519_s12 + $0xe10] sm:$0xf]  ;;  %v10705_v57 = vor.u32 %v13303_v44, %v10704_v43  ;;  %v541_v39 = vld [vmem:[#allocation3 + $0xe0] sm:$0xff]  ;;  %v10809_v43 = vor.u32 %v13329_v21, %v10808_v18  ;;  %v543_v44 = vld [vmem:[#allocation3 + $0xf0] sm:$0xff] }
 0x15b   : > { %5510 = vmatpush.bf16.msrb.mxu2 %v10657_v56  ;;  %v13285_v56 = vld [vmem:[%s14519_s12 + $0xf14] sm:$0xf0]  ;;  %v5271_v32 = vpop.f32.mrf.mxu3  ;;  %v15162_v1 = vpack.c.bf16 %v543_v44, %v543_v44  ;;  %v10864_v13 = vld [vmem:[%s14519_s12 + $0x10e0] sm:$0xf]  ;;  %v10984_v44 = vld [vmem:[%s14519_s12 + $0x11d0] sm:$0xf] }
 0x15c   : > { %5497 = vmatpush.bf16.msrb.mxu1 %v10593_v50  ;;  %v10505_v50 = vor.u32 %v13253_v51, %v10504_v49  ;;  %v10633_v4 = vor.u32 %v13285_v56, %v10632_v55  ;;  %v10561_v51 = vor.u32 %v13267_v31, %v10560_v28  ;;  %v13377_v55 = vld [vmem:[%s14519_s12 + $0x11f4] sm:$0xf0]  ;;  %v542_v56 = vld [vmem:[#allocation3 + $0xe8] sm:$0xff] }
 0x15d   : > { %5523 = vmatpush.bf16.msrb.mxu3 %v10721_v3  ;;  %v10496_v3 = vld [vmem:[%s14519_s12 + $0xe00] sm:$0xf]  ;;  %v10792_v28 = vld [vmem:[%s14519_s12 + $0x1050] sm:$0xf]  ;;  %v13325_v31 = vld [vmem:[%s14519_s12 + $0x1054] sm:$0xf0] }
 0x15e   : > { %5485 = vmatpush.bf16.msrb.mxu0 %v10521_v8  ;;  %v10624_v8 = vld [vmem:[%s14519_s12 + $0xf00] sm:$0xf] }
 0x15f   : > { %5511 = vmatpush.bf16.msrb.mxu2 %v10649_v17  ;;  %v10569_v17 = vor.u32 %v13269_v61, %v10568_v59  ;;  %v15158_v59 = vpack.c.bf16 %v541_v39, %v541_v39  ;;  %v544_v61 = vld [vmem:[#allocation3 + $0xf8] sm:$0xff] }
 0x160   : > { %5498 = vmatpush.bf16.msrb.mxu1 %v10585_v29  ;;  %v13361_v29 = vld [vmem:[%s14519_s12 + $0x1174] sm:$0xf0]  ;;  %v15170_v18 = vpack.c.bf16 %v544_v61, %v544_v61  ;;  %v10856_v39 = vld [vmem:[%s14519_s12 + $0x10d0] sm:$0xf] }
 0x161   : > { %5524 = vmatpush.bf16.msrb.mxu3 %v10713_v35  ;;  %v10497_v35 = vor.u32 %v13251_v7, %v10496_v3  ;;  %v10937_v49 = vor.u32 %v13361_v29, %v10936_v26  ;;  %v13359_v7 = vld [vmem:[%s14519_s12 + $0x1164] sm:$0xf0]  ;;  %v10992_v26 = vld [vmem:[%s14519_s12 + $0x11e0] sm:$0xf] }
 0x162   : > { %5486 = vmatpush.bf16.msrb.mxu0 %v10513_v41  ;;  %v10625_v41 = vor.u32 %v13283_v9, %v10624_v8  ;;  %v15166_v9 = vpack.c.bf16 %v542_v56, %v542_v56  ;;  %v10912_v56 = vld [vmem:[%s14519_s12 + $0x1140] sm:$0xf] }
 0x163   : > { %5512 = vmatpush.bf16.msrb.mxu2 %v10641_v47  ;;  %v13345_v47 = vld [vmem:[%s14519_s12 + $0x10f4] sm:$0xf0] }
 0x164   : > { %5499 = vmatpush.bf16.msrb.mxu1 %v10577_v52  ;;  %v11000_v52 = vld [vmem:[%s14519_s12 + $0x11f0] sm:$0xf]  ;;  %v10873_v3 = vor.u32 %v13345_v47, %v10872_v45  ;;  %v13373_v45 = vld [vmem:[%s14519_s12 + $0x11d4] sm:$0xf0] }
 0x165   : > { %5525 = vmatpush.bf16.msrb.mxu3 %v10705_v57  ;;  %v10689_v57 = vor.u32 %v13299_v37, %v10688_v36  ;;  %v11001_v8 = vor.u32 %v13377_v55, %v11000_v52  ;;  %v13357_v36 = vld [vmem:[%s14519_s12 + $0x1154] sm:$0xf0]  ;;  %v10985_v61 = vor.u32 %v13373_v45, %v10984_v44  ;;  %v10768_v44 = vld [vmem:[%s14519_s12 + $0x1020] sm:$0xf]  ;;  %v13319_v45 = vld [vmem:[%s14519_s12 + $0x1024] sm:$0xf0] }
 0x166   : > { %5487 = vmatpush.bf16.msrb.mxu0 %v10505_v50  ;;  %v10800_v50 = vld [vmem:[%s14519_s12 + $0x1060] sm:$0xf] }
 0x167   : > { %5513 = vmatpush.bf16.msrb.mxu2 %v10633_v4  ;;  %v10928_v4 = vld [vmem:[%s14519_s12 + $0x1160] sm:$0xf]  ;;  %v10801_v21 = vor.u32 %v13327_v62, %v10800_v50 }
 0x168   : > { %5500 = vmatpush.bf16.msrb.mxu1 %v10569_v17  ;;  %v13343_v17 = vld [vmem:[%s14519_s12 + $0x10e4] sm:$0xf0]  ;;  %v10929_v29 = vor.u32 %v13359_v7, %v10928_v4  ;;  %v10848_v62 = vld [vmem:[%s14519_s12 + $0x10c0] sm:$0xf] }
 0x169   : > { %5526 = vmatpush.bf16.msrb.mxu3 %v10697_v27  ;;  %v13375_v27 = vld [vmem:[%s14519_s12 + $0x11e4] sm:$0xf0]  ;;  %v10865_v32 = vor.u32 %v13343_v17, %v10864_v13 }
 0x16a   : > { %5488 = vmatpush.bf16.msrb.mxu0 %v10497_v35  ;;  %v10920_v35 = vld [vmem:[%s14519_s12 + $0x1150] sm:$0xf]  ;;  %v10993_v37 = vor.u32 %v13375_v27, %v10992_v26  ;;  %v5282_v55 = vpop.f32.mrf.mxu0  ;;  %v13371_v13 = vld [vmem:[%s14519_s12 + $0x11c4] sm:$0xf0]  ;;  %v13321_v27 = vld [vmem:[%s14519_s12 + $0x1034] sm:$0xf0] }
 0x16b   : > { %5514 = vmatpush.bf16.msrb.mxu2 %v10625_v41  ;;  %v13341_v41 = vld [vmem:[%s14519_s12 + $0x10d4] sm:$0xf0]  ;;  %v10921_v47 = vor.u32 %v13357_v36, %v10920_v35  ;;  %v5283_v50 = vadd.f32 %v5282_v55, %v15130_v40  ;;  %v10776_v26 = vld [vmem:[%s14519_s12 + $0x1030] sm:$0xf] }
 0x16c   : > { %5501 = vmatpush.bf16.msrb.mxu1 %v10561_v51  ;;  %v13323_v51 = vld [vmem:[%s14519_s12 + $0x1044] sm:$0xf0]  ;;  %v10857_v52 = vor.u32 %v13341_v41, %v10856_v39  ;;  %v5295_v7 = vpop.f32.mrf.mxu1  ;;  %v13337_v35 = vld [vmem:[%s14519_s12 + $0x10b4] sm:$0xf0]  ;;  %v10777_v36 = vor.u32 %v13321_v27, %v10776_v26  ;;  %v10888_v27 = vld [vmem:[%s14519_s12 + $0x1110] sm:$0xf] }
 0x16d   : > { %5527 = vmatpush.bf16.msrb.mxu3 %v10689_v57  ;;  %5489 = vmatmul.bf16.vlgmr.msrb.gmra.mxu0 %v15158_v59  ;;  %v13355_v57 = vld [vmem:[%s14519_s12 + $0x1144] sm:$0xf0]  ;;  %v13369_v39 = vld [vmem:[%s14519_s12 + $0x11b4] sm:$0xf0] }
 0x16e   : > { %5533 = vmatpush.bf16.msra.mxu0 %v10809_v43  ;;  %5515 = vmatmul.bf16.vlgmr.msrb.gmra.mxu2 %v15162_v1  ;;  %v10793_v43 = vor.u32 %v13325_v31, %v10792_v28  ;;  %v10913_v17 = vor.u32 %v13355_v57, %v10912_v56  ;;  %v13353_v28 = vld [vmem:[%s14519_s12 + $0x1134] sm:$0xf0] }
 0x16f   : > { %5559 = vmatpush.bf16.msra.mxu2 %v10937_v49  ;;  %5502 = vmatmul.bf16.vlgmr.msrb.gmra.mxu1 %v15166_v9  ;;  %v10784_v49 = vld [vmem:[%s14519_s12 + $0x1040] sm:$0xf] }
 0x170   : > { %5546 = vmatpush.bf16.msra.mxu1 %v10873_v3  ;;  %5528 = vmatmul.bf16.vlgmr.msrb.gmra.mxu3 %v15170_v18  ;;  %v13339_v3 = vld [vmem:[%s14519_s12 + $0x10c4] sm:$0xf0]  ;;  %v10785_v4 = vor.u32 %v13323_v51, %v10784_v49  ;;  %v10896_v51 = vld [vmem:[%s14519_s12 + $0x1120] sm:$0xf] }
 0x171   : > { %5572 = vmatpush.bf16.msra.mxu3 %v11001_v8  ;;  %v10976_v8 = vld [vmem:[%s14519_s12 + $0x11c0] sm:$0xf]  ;;  %v10849_v40 = vor.u32 %v13339_v3, %v10848_v62  ;;  %v10769_v3 = vor.u32 %v13319_v45, %v10768_v44  ;;  %v13347_v44 = vld [vmem:[%s14519_s12 + $0x1104] sm:$0xf0] }
 0x172   : > { %5534 = vmatpush.bf16.msra.mxu0 %v10801_v21  ;;  %v5296_v21 = vadd.f32 %v5295_v7, %v5283_v50  ;;  %v10977_v31 = vor.u32 %v13371_v13, %v10976_v8  ;;  %v5284_v55 = vpop.f32.mrf.mxu0  ;;  %v13335_v50 = vld [vmem:[%s14519_s12 + $0x10a4] sm:$0xf0] }
 0x173   : > { %5560 = vmatpush.bf16.msra.mxu2 %v10929_v29  ;;  %v10904_v29 = vld [vmem:[%s14519_s12 + $0x1130] sm:$0xf]  ;;  %v5321_v57 = vpop.f32.mrf.mxu3  ;;  %v13367_v7 = vld [vmem:[%s14519_s12 + $0x11a4] sm:$0xf0] }
 0x174   : > { %5547 = vmatpush.bf16.msra.mxu1 %v10865_v32  ;;  %v10840_v32 = vld [vmem:[%s14519_s12 + $0x10b0] sm:$0xf]  ;;  %v10905_v41 = vor.u32 %v13353_v28, %v10904_v29  ;;  %v5297_v8 = vpop.f32.mrf.mxu1 }
 0x175   : > { %5573 = vmatpush.bf16.msra.mxu3 %v10993_v37  ;;  %v10968_v37 = vld [vmem:[%s14519_s12 + $0x11b0] sm:$0xf]  ;;  %v10841_v49 = vor.u32 %v13337_v35, %v10840_v32  ;;  %v545_v8 = vld [vmem:[#allocation3 + $0x100] sm:$0xff] }
 0x176   : > { %5535 = vmatpush.bf16.msra.mxu0 %v10793_v43  ;;  %v5308_v43 = vpop.f32.mrf.mxu2  ;;  %v10969_v56 = vor.u32 %v13369_v39, %v10968_v37  ;;  %v10824_v28 = vld [vmem:[%s14519_s12 + $0x1090] sm:$0xf]  ;;  %v10752_v37 = vld [vmem:[%s14519_s12 + $0x1000] sm:$0xf] }
 0x177   : > { %5561 = vmatpush.bf16.msra.mxu2 %v10921_v47  ;;  %v5309_v47 = vadd.f32 %v5308_v43, %v5296_v21  ;;  %v13317_v21 = vld [vmem:[%s14519_s12 + $0x1014] sm:$0xf0]  ;;  %v10952_v35 = vld [vmem:[%s14519_s12 + $0x1190] sm:$0xf]  ;;  %v10880_v43 = vld [vmem:[%s14519_s12 + $0x1100] sm:$0xf] }
 0x178   : > { %5548 = vmatpush.bf16.msra.mxu1 %v10857_v52  ;;  %v13351_v52 = vld [vmem:[%s14519_s12 + $0x1124] sm:$0xf0] }
 0x179   : > { %5574 = vmatpush.bf16.msra.mxu3 %v10985_v61  ;;  %v10832_v61 = vld [vmem:[%s14519_s12 + $0x10a0] sm:$0xf]  ;;  %v15209_v62 = vadd.f32 %v5321_v57, %v5309_v47  ;;  %v10897_v13 = vor.u32 %v13351_v52, %v10896_v51  ;;  %v13393_v51 = vld [vmem:[%s14519_s12 + $0x1274] sm:$0xf0]  ;;  %v11192_v52 = vld [vmem:[%s14519_s12 + $0x1370] sm:$0xf] }
 0x17a   : > { %5536 = vmatpush.bf16.msra.mxu0 %v10785_v4  ;;  %v10960_v4 = vld [vmem:[%s14519_s12 + $0x11a0] sm:$0xf]  ;;  %v10833_v26 = vor.u32 %v13335_v50, %v10832_v61  ;;  %v13331_v61 = vld [vmem:[%s14519_s12 + $0x1084] sm:$0xf0] }
 0x17b   : > { %5562 = vmatpush.bf16.msra.mxu2 %v10913_v17  ;;  %v10760_v17 = vld [vmem:[%s14519_s12 + $0x1010] sm:$0xf]  ;;  %v10961_v29 = vor.u32 %v13367_v7, %v10960_v4  ;;  %v10816_v57 = vld [vmem:[%s14519_s12 + $0x1080] sm:$0xf]  ;;  %v5323_v50 = vpop.f32.mrf.mxu3  ;;  %v13363_v7 = vld [vmem:[%s14519_s12 + $0x1184] sm:$0xf0] }
 0x17c   : > { %5549 = vmatpush.bf16.msra.mxu1 %v10849_v40  ;;  %v13349_v40 = vld [vmem:[%s14519_s12 + $0x1114] sm:$0xf0]  ;;  %v10761_v32 = vor.u32 %v13317_v21, %v10760_v17  ;;  %v10944_v4 = vld [vmem:[%s14519_s12 + $0x1180] sm:$0xf]  ;;  %v13439_v50 = vld [vmem:[%s14519_s12 + $0x13e4] sm:$0xf0] }
 0x17d   : > { %5575 = vmatpush.bf16.msra.mxu3 %v10977_v31  ;;  %v13333_v31 = vld [vmem:[%s14519_s12 + $0x1094] sm:$0xf0]  ;;  %v10889_v39 = vor.u32 %v13349_v40, %v10888_v27 }
 0x17e   : > { %5537 = vmatpush.bf16.msra.mxu0 %v10777_v36  ;;  %v13365_v36 = vld [vmem:[%s14519_s12 + $0x1194] sm:$0xf0]  ;;  %v5310_v45 = vpop.f32.mrf.mxu2  ;;  %v10825_v47 = vor.u32 %v13333_v31, %v10824_v28  ;;  %v11256_v28 = vld [vmem:[%s14519_s12 + $0x13f0] sm:$0xf] }
 0x17f   : > { %5563 = vmatpush.bf16.msra.mxu2 %v10905_v41  ;;  %v13315_v41 = vld [vmem:[%s14519_s12 + $0x1004] sm:$0xf0]  ;;  %v10953_v55 = vor.u32 %v13365_v36, %v10952_v35  ;;  %v13409_v27 = vld [vmem:[%s14519_s12 + $0x12f4] sm:$0xf0]  ;;  %v10945_v35 = vor.u32 %v13363_v7, %v10944_v4  ;;  %v15237_v36 = vpack.c.bf16 %v545_v8, %v545_v8  ;;  %v11184_v45 = vld [vmem:[%s14519_s12 + $0x1360] sm:$0xf] }
 0x180   : > { %5550 = vmatpush.bf16.msra.mxu1 %v10841_v49  ;;  %v11064_v49 = vld [vmem:[%s14519_s12 + $0x1270] sm:$0xf]  ;;  %v547_v21 = vld [vmem:[#allocation3 + $0x110] sm:$0xff] }
 0x181   : > { %5576 = vmatpush.bf16.msra.mxu3 %v10969_v56  ;;  %v13425_v56 = vld [vmem:[%s14519_s12 + $0x1374] sm:$0xf0]  ;;  %v11065_v17 = vor.u32 %v13393_v51, %v11064_v49  ;;  %v11048_v4 = vld [vmem:[%s14519_s12 + $0x1250] sm:$0xf] }
 0x182   : > { %5538 = vmatpush.bf16.msra.mxu0 %v10769_v3  ;;  %v10753_v3 = vor.u32 %v13315_v41, %v10752_v37  ;;  %v11193_v40 = vor.u32 %v13425_v56, %v11192_v52  ;;  %v13441_v31 = vld [vmem:[%s14519_s12 + $0x13f4] sm:$0xf0]  ;;  %v548_v37 = vld [vmem:[#allocation3 + $0x118] sm:$0xff]  ;;  %v13391_v41 = vld [vmem:[%s14519_s12 + $0x1264] sm:$0xf0] }
 0x183   : > { %5564 = vmatpush.bf16.msra.mxu2 %v10897_v13  ;;  %v10881_v13 = vor.u32 %v13347_v44, %v10880_v43  ;;  %v15241_v43 = vpack.c.bf16 %v547_v21, %v547_v21  ;;  %v11257_v49 = vor.u32 %v13441_v31, %v11256_v28  ;;  %v11120_v52 = vld [vmem:[%s14519_s12 + $0x12e0] sm:$0xf]  ;;  %v15249_v56 = vpack.c.bf16 %v548_v37, %v548_v37  ;;  %v13389_v7 = vld [vmem:[%s14519_s12 + $0x1254] sm:$0xf0] }
 0x184   : > { %5551 = vmatpush.bf16.msra.mxu1 %v10833_v26  ;;  %v11128_v26 = vld [vmem:[%s14519_s12 + $0x12f0] sm:$0xf]  ;;  %v13437_v28 = vld [vmem:[%s14519_s12 + $0x13d4] sm:$0xf0] }
 0x185   : > { %5577 = vmatpush.bf16.msra.mxu3 %v10961_v29  ;;  %v10817_v29 = vor.u32 %v13331_v61, %v10816_v57  ;;  %v11129_v44 = vor.u32 %v13409_v27, %v11128_v26  ;;  %16505 = vst [vmem:[#allocation29_spill] sm:$0xff] %v15249_v56  ;;  %v11248_v61 = vld [vmem:[%s14519_s12 + $0x13e0] sm:$0xf]  ;;  %v11112_v26 = vld [vmem:[%s14519_s12 + $0x12d0] sm:$0xf] }
 0x186   : > { %5539 = vmatpush.bf16.msra.mxu0 %v10761_v32  ;;  %v546_v32 = vld [vmem:[#allocation3 + $0x108] sm:$0xff]  ;;  %v11249_v21 = vor.u32 %v13439_v50, %v11248_v61  ;;  %v13405_v27 = vld [vmem:[%s14519_s12 + $0x12d4] sm:$0xf0]  ;;  %v13435_v50 = vld [vmem:[%s14519_s12 + $0x13c4] sm:$0xf0] }
 0x187   : > { %5565 = vmatpush.bf16.msra.mxu2 %v10889_v39  ;;  %v11056_v39 = vld [vmem:[%s14519_s12 + $0x1260] sm:$0xf]  ;;  %v15245_v51 = vpack.c.bf16 %v546_v32, %v546_v32  ;;  %v11113_v37 = vor.u32 %v13405_v27, %v11112_v26  ;;  %v11096_v26 = vld [vmem:[%s14519_s12 + $0x12b0] sm:$0xf]  ;;  %v13401_v27 = vld [vmem:[%s14519_s12 + $0x12b4] sm:$0xf0] }
 0x188   : > { %5552 = vmatpush.bf16.msra.mxu1 %v10825_v47  ;;  %v13423_v47 = vld [vmem:[%s14519_s12 + $0x1364] sm:$0xf0]  ;;  %v11057_v57 = vor.u32 %v13391_v41, %v11056_v39  ;;  %v11040_v32 = vld [vmem:[%s14519_s12 + $0x1240] sm:$0xf] }
 0x189   : > { %5578 = vmatpush.bf16.msra.mxu3 %v10953_v55  ;;  %v13407_v55 = vld [vmem:[%s14519_s12 + $0x12e4] sm:$0xf0]  ;;  %v11168_v41 = vld [vmem:[%s14519_s12 + $0x1340] sm:$0xf] }
 0x18a   : > { %5540 = vmatpush.bf16.msra.mxu0 %v10753_v3  ;;  %v11185_v3 = vor.u32 %v13423_v47, %v11184_v45  ;;  %v11121_v8 = vor.u32 %v13407_v55, %v11120_v52  ;;  %v5334_v39 = vpop.f32.mrf.mxu0  ;;  %v13403_v52 = vld [vmem:[%s14519_s12 + $0x12c4] sm:$0xf0]  ;;  %v11232_v61 = vld [vmem:[%s14519_s12 + $0x13c0] sm:$0xf] }
 0x18b   : > { %5566 = vmatpush.bf16.msra.mxu2 %v10881_v13  ;;  %v11176_v13 = vld [vmem:[%s14519_s12 + $0x1350] sm:$0xf]  ;;  %v5335_v47 = vadd.f32 %v5334_v39, %v15209_v62 }
 0x18c   : > { %5553 = vmatpush.bf16.msra.mxu1 %v10817_v29  ;;  %v11240_v29 = vld [vmem:[%s14519_s12 + $0x13d0] sm:$0xf] }
 0x18d   : > { %5579 = vmatpush.bf16.msra.mxu3 %v10945_v35  ;;  %5541 = vmatmul.bf16.vlgmr.msra.gmra.mxu0 %v15237_v36  ;;  %v13387_v35 = vld [vmem:[%s14519_s12 + $0x1244] sm:$0xf0]  ;;  %v11241_v45 = vor.u32 %v13437_v28, %v11240_v29  ;;  %v11224_v29 = vld [vmem:[%s14519_s12 + $0x13b0] sm:$0xf]  ;;  %v13433_v28 = vld [vmem:[%s14519_s12 + $0x13b4] sm:$0xf0] }
 0x18e   : > { %5585 = vmatpush.bf16.msrb.mxu0 %v11065_v17  ;;  %5567 = vmatmul.bf16.vlgmr.msra.gmra.mxu2 %v15241_v43  ;;  %v13421_v17 = vld [vmem:[%s14519_s12 + $0x1354] sm:$0xf0]  ;;  %v11041_v55 = vor.u32 %v13387_v35, %v11040_v32  ;;  %v11024_v35 = vld [vmem:[%s14519_s12 + $0x1220] sm:$0xf] }
 0x18f   : > { %5611 = vmatpush.bf16.msrb.mxu2 %v11193_v40  ;;  %5554 = vmatmul.bf16.vlgmr.msra.gmra.mxu1 %v15245_v51  ;;  %v11049_v40 = vor.u32 %v13389_v7, %v11048_v4  ;;  %v11177_v31 = vor.u32 %v13421_v17, %v11176_v13  ;;  %v11032_v7 = vld [vmem:[%s14519_s12 + $0x1230] sm:$0xf]  ;;  %v13417_v17 = vld [vmem:[%s14519_s12 + $0x1334] sm:$0xf0] }
 0x190   : > { %5598 = vmatpush.bf16.msrb.mxu1 %v11129_v44  ;;  %5580 = vmatmul.bf16.vlgmr.msra.gmra.mxu3 %v15249_v56  ;;  %v13419_v44 = vld [vmem:[%s14519_s12 + $0x1344] sm:$0xf0]  ;;  %v11160_v13 = vld [vmem:[%s14519_s12 + $0x1330] sm:$0xf]  ;;  %v8762_v56 = vld [vmem:[%s14519_s12 + $0x78] sm:$0xf0] }
 0x191   : > { %5624 = vmatpush.bf16.msrb.mxu3 %v11257_v49  ;;  %v11104_v49 = vld [vmem:[%s14519_s12 + $0x12c0] sm:$0xf]  ;;  %v5360_v32 = vpop.f32.mrf.mxu2 }
 0x192   : > { %5586 = vmatpush.bf16.msrb.mxu0 %v11057_v57  ;;  %v5347_v57 = vpop.f32.mrf.mxu1  ;;  %v11105_v62 = vor.u32 %v13403_v52, %v11104_v49  ;;  %v11225_v49 = vor.u32 %v13433_v28, %v11224_v29  ;;  %v13397_v29 = vld [vmem:[%s14519_s12 + $0x1294] sm:$0xf0] }
 0x193   : > { %5612 = vmatpush.bf16.msrb.mxu2 %v11185_v3  ;;  %v11169_v3 = vor.u32 %v13419_v44, %v11168_v41  ;;  %v5348_v4 = vadd.f32 %v5347_v57, %v5335_v47  ;;  %v11097_v41 = vor.u32 %v13401_v27, %v11096_v26  ;;  %v11152_v44 = vld [vmem:[%s14519_s12 + $0x1320] sm:$0xf]  ;;  %v5336_v47 = vpop.f32.mrf.mxu0  ;;  %v5373_v52 = vpop.f32.mrf.mxu3  ;;  %v13399_v57 = vld [vmem:[%s14519_s12 + $0x12a4] sm:$0xf0]  ;;  %v13413_v26 = vld [vmem:[%s14519_s12 + $0x1314] sm:$0xf0] }
 0x194   : > { %5599 = vmatpush.bf16.msrb.mxu1 %v11121_v8  ;;  %v13385_v8 = vld [vmem:[%s14519_s12 + $0x1234] sm:$0xf0] }
 0x195   : > { %5625 = vmatpush.bf16.msrb.mxu3 %v11249_v21  ;;  %v11233_v21 = vor.u32 %v13435_v50, %v11232_v61  ;;  %v5361_v39 = vadd.f32 %v5360_v32, %v5348_v4  ;;  %v13431_v4 = vld [vmem:[%s14519_s12 + $0x13a4] sm:$0xf0]  ;;  %v13429_v32 = vld [vmem:[%s14519_s12 + $0x1394] sm:$0xf0] }
 0x196   : > { %5587 = vmatpush.bf16.msrb.mxu0 %v11049_v40  ;;  %v11033_v40 = vor.u32 %v13385_v8, %v11032_v7 }
 0x197   : > { %5613 = vmatpush.bf16.msrb.mxu2 %v11177_v31  ;;  %v11161_v31 = vor.u32 %v13417_v17, %v11160_v13  ;;  %v15288_v61 = vadd.f32 %v5373_v52, %v5361_v39  ;;  %v13381_v13 = vld [vmem:[%s14519_s12 + $0x1214] sm:$0xf0]  ;;  %v13379_v39 = vld [vmem:[%s14519_s12 + $0x1204] sm:$0xf0] }
 0x198   : > { %5600 = vmatpush.bf16.msrb.mxu1 %v11113_v37  ;;  %v13383_v37 = vld [vmem:[%s14519_s12 + $0x1224] sm:$0xf0]  ;;  %v13457_v52 = vld [vmem:[%s14519_s12 + $0x1474] sm:$0xf0] }
 0x199   : > { %5626 = vmatpush.bf16.msrb.mxu3 %v11241_v45  ;;  %v13415_v45 = vld [vmem:[%s14519_s12 + $0x1324] sm:$0xf0]  ;;  %v11025_v50 = vor.u32 %v13383_v37, %v11024_v35  ;;  %v11008_v35 = vld [vmem:[%s14519_s12 + $0x1200] sm:$0xf] }
 0x19a   : > { %5588 = vmatpush.bf16.msrb.mxu0 %v11041_v55  ;;  %v11088_v55 = vld [vmem:[%s14519_s12 + $0x12a0] sm:$0xf]  ;;  %v5349_v7 = vpop.f32.mrf.mxu1  ;;  %v11153_v8 = vor.u32 %v13415_v45, %v11152_v44  ;;  %v13411_v44 = vld [vmem:[%s14519_s12 + $0x1304] sm:$0xf0]  ;;  %v5362_v45 = vpop.f32.mrf.mxu2 }
 0x19b   : > { %5614 = vmatpush.bf16.msrb.mxu2 %v11169_v3  ;;  %v11216_v3 = vld [vmem:[%s14519_s12 + $0x13a0] sm:$0xf]  ;;  %v11089_v17 = vor.u32 %v13399_v57, %v11088_v55  ;;  %v11448_v55 = vld [vmem:[%s14519_s12 + $0x1570] sm:$0xf]  ;;  %v5375_v7 = vpop.f32.mrf.mxu3 }
 0x19c   : > { %5601 = vmatpush.bf16.msrb.mxu1 %v11105_v62  ;;  %v11016_v62 = vld [vmem:[%s14519_s12 + $0x1210] sm:$0xf]  ;;  %v11217_v27 = vor.u32 %v13431_v4, %v11216_v3  ;;  %v11072_v3 = vld [vmem:[%s14519_s12 + $0x1280] sm:$0xf]  ;;  %v13395_v4 = vld [vmem:[%s14519_s12 + $0x1284] sm:$0xf0] }
 0x19d   : > { %5627 = vmatpush.bf16.msrb.mxu3 %v11233_v21  ;;  %v11144_v21 = vld [vmem:[%s14519_s12 + $0x1310] sm:$0xf]  ;;  %v11017_v28 = vor.u32 %v13381_v13, %v11016_v62  ;;  %v11200_v62 = vld [vmem:[%s14519_s12 + $0x1380] sm:$0xf]  ;;  %v13427_v13 = vld [vmem:[%s14519_s12 + $0x1384] sm:$0xf0] }
 0x19e   : > { %5589 = vmatpush.bf16.msrb.mxu0 %v11033_v40  ;;  %v11080_v40 = vld [vmem:[%s14519_s12 + $0x1290] sm:$0xf]  ;;  %v11145_v37 = vor.u32 %v13413_v26, %v11144_v21  ;;  %v549_v21 = vld [vmem:[#allocation3 + $0x120] sm:$0xff] }
 0x19f   : > { %5615 = vmatpush.bf16.msrb.mxu2 %v11161_v31  ;;  %v11208_v31 = vld [vmem:[%s14519_s12 + $0x1390] sm:$0xf]  ;;  %v11081_v47 = vor.u32 %v13397_v29, %v11080_v40  ;;  %v551_v40 = vld [vmem:[#allocation3 + $0x130] sm:$0xff] }
 0x1a0   : > { %5602 = vmatpush.bf16.msrb.mxu1 %v11097_v41  ;;  %v11136_v41 = vld [vmem:[%s14519_s12 + $0x1300] sm:$0xf]  ;;  %v11209_v57 = vor.u32 %v13429_v32, %v11208_v31  ;;  %v13473_v29 = vld [vmem:[%s14519_s12 + $0x14f4] sm:$0xf0]  ;;  %v11073_v32 = vor.u32 %v13395_v4, %v11072_v3  ;;  %v11512_v45 = vld [vmem:[%s14519_s12 + $0x15f0] sm:$0xf] }
 0x1a1   : > { %5628 = vmatpush.bf16.msrb.mxu3 %v11225_v49  ;;  %v11320_v49 = vld [vmem:[%s14519_s12 + $0x1470] sm:$0xf]  ;;  %v13505_v7 = vld [vmem:[%s14519_s12 + $0x15f4] sm:$0xf0]  ;;  %v11376_v3 = vld [vmem:[%s14519_s12 + $0x14e0] sm:$0xf] }
 0x1a2   : > { %5590 = vmatpush.bf16.msrb.mxu0 %v11025_v50  ;;  %v13489_v50 = vld [vmem:[%s14519_s12 + $0x1574] sm:$0xf0]  ;;  %v11321_v26 = vor.u32 %v13457_v52, %v11320_v49  ;;  %v15320_v49 = vpack.c.bf16 %v551_v40, %v551_v40  ;;  %v11440_v52 = vld [vmem:[%s14519_s12 + $0x1560] sm:$0xf]  ;;  %v13471_v4 = vld [vmem:[%s14519_s12 + $0x14e4] sm:$0xf0] }
 0x1a3   : > { %5616 = vmatpush.bf16.msrb.mxu2 %v11153_v8  ;;  %v11009_v8 = vor.u32 %v13379_v39, %v11008_v35  ;;  %v11449_v31 = vor.u32 %v13489_v50, %v11448_v55  ;;  %v11201_v35 = vor.u32 %v13427_v13, %v11200_v62  ;;  %v552_v39 = vld [vmem:[#allocation3 + $0x138] sm:$0xff]  ;;  %v13487_v55 = vld [vmem:[%s14519_s12 + $0x1564] sm:$0xf0]  ;;  %v13453_v40 = vld [vmem:[%s14519_s12 + $0x1454] sm:$0xf0] }
 0x1a4   : > { %5603 = vmatpush.bf16.msrb.mxu1 %v11089_v17  ;;  %v11137_v17 = vor.u32 %v13411_v44, %v11136_v41  ;;  %v11312_v41 = vld [vmem:[%s14519_s12 + $0x1460] sm:$0xf]  ;;  %v13455_v44 = vld [vmem:[%s14519_s12 + $0x1464] sm:$0xf0]  ;;  %16506 = vst [vmem:[#allocation30_spill] sm:$0xff] %v15320_v49 }
 0x1a5   : > { %5629 = vmatpush.bf16.msrb.mxu3 %v11217_v27  ;;  %v11384_v27 = vld [vmem:[%s14519_s12 + $0x14f0] sm:$0xf]  ;;  %v11313_v62 = vor.u32 %v13455_v44, %v11312_v41  ;;  %v11504_v13 = vld [vmem:[%s14519_s12 + $0x15e0] sm:$0xf] }
 0x1a6   : > { %5591 = vmatpush.bf16.msrb.mxu0 %v11017_v28  ;;  %v550_v28 = vld [vmem:[#allocation3 + $0x128] sm:$0xff] }
 0x1a7   : > { %5617 = vmatpush.bf16.msrb.mxu2 %v11145_v37  ;;  %v15316_v37 = vpack.c.bf16 %v549_v21, %v549_v21  ;;  %v15324_v50 = vpack.c.bf16 %v550_v28, %v550_v28  ;;  %v13503_v21 = vld [vmem:[%s14519_s12 + $0x15e4] sm:$0xf0]  ;;  %v11296_v44 = vld [vmem:[%s14519_s12 + $0x1440] sm:$0xf] }
 0x1a8   : > { %5604 = vmatpush.bf16.msrb.mxu1 %v11081_v47  ;;  %v11385_v47 = vor.u32 %v13473_v29, %v11384_v27  ;;  %v11377_v27 = vor.u32 %v13471_v4, %v11376_v3  ;;  %v11432_v29 = vld [vmem:[%s14519_s12 + $0x1550] sm:$0xf]  ;;  %v13483_v3 = vld [vmem:[%s14519_s12 + $0x1544] sm:$0xf0] }
 0x1a9   : > { %5630 = vmatpush.bf16.msrb.mxu3 %v11209_v57  ;;  %v11513_v57 = vor.u32 %v13505_v7, %v11512_v45  ;;  %16507 = vst [vmem:[#allocation31_spill] sm:$0xff] %v15324_v50  ;;  %v11368_v45 = vld [vmem:[%s14519_s12 + $0x14d0] sm:$0xf]  ;;  %v13469_v7 = vld [vmem:[%s14519_s12 + $0x14d4] sm:$0xf0] }
 0x1aa   : > { %5592 = vmatpush.bf16.msrb.mxu0 %v11009_v8  ;;  %v15328_v8 = vpack.c.bf16 %v552_v39, %v552_v39  ;;  %v13501_v39 = vld [vmem:[%s14519_s12 + $0x15d4] sm:$0xf0] }
 0x1ab   : > { %5618 = vmatpush.bf16.msrb.mxu2 %v11137_v17  ;;  %v11441_v17 = vor.u32 %v13487_v55, %v11440_v52  ;;  %v11369_v52 = vor.u32 %v13469_v7, %v11368_v45  ;;  %v5386_v55 = vpop.f32.mrf.mxu0  ;;  %v13449_v45 = vld [vmem:[%s14519_s12 + $0x1434] sm:$0xf0]  ;;  %v11416_v7 = vld [vmem:[%s14519_s12 + $0x1530] sm:$0xf] }
 0x1ac   : > { %5605 = vmatpush.bf16.msrb.mxu1 %v11073_v32  ;;  %16508 = vst [vmem:[#allocation32_spill] sm:$0xff] %v15328_v8  ;;  %v11505_v32 = vor.u32 %v13503_v21, %v11504_v13  ;;  %v11360_v13 = vld [vmem:[%s14519_s12 + $0x14c0] sm:$0xf]  ;;  %v13467_v21 = vld [vmem:[%s14519_s12 + $0x14c4] sm:$0xf0] }
 0x1ad   : > { %5631 = vmatpush.bf16.msrb.mxu3 %v11201_v35  ;;  %5593 = vmatmul.bf16.vlgmr.msrb.gmra.mxu0 %v15316_v37  ;;  %v11496_v35 = vld [vmem:[%s14519_s12 + $0x15d0] sm:$0xf] }
 0x1ae   : > { %5637 = vmatpush.bf16.msra.mxu0 %v11321_v26  ;;  %v11304_v26 = vld [vmem:[%s14519_s12 + $0x1450] sm:$0xf]  ;;  %5619 = vmatmul.bf16.vlgmr.msrb.gmra.mxu2 %v15320_v49  ;;  %v11497_v4 = vor.u32 %v13501_v39, %v11496_v35  ;;  %v13481_v35 = vld [vmem:[%s14519_s12 + $0x1534] sm:$0xf0]  ;;  %v13491_v49 = vld [vmem:[%s14519_s12 + $0x1584] sm:$0xf0] }
 0x1af   : > { %5663 = vmatpush.bf16.msra.mxu2 %v11449_v31  ;;  %v13485_v31 = vld [vmem:[%s14519_s12 + $0x1554] sm:$0xf0]  ;;  %5606 = vmatmul.bf16.vlgmr.msrb.gmra.mxu1 %v15324_v50  ;;  %v11305_v28 = vor.u32 %v13453_v40, %v11304_v26  ;;  %v5399_v26 = vpop.f32.mrf.mxu1  ;;  %v11488_v40 = vld [vmem:[%s14519_s12 + $0x15c0] sm:$0xf]  ;;  %v11352_v39 = vld [vmem:[%s14519_s12 + $0x14b0] sm:$0xf] }
 0x1b0   : > { %5650 = vmatpush.bf16.msra.mxu1 %v11385_v47  ;;  %5632 = vmatmul.bf16.vlgmr.msrb.gmra.mxu3 %v15328_v8  ;;  %v11433_v41 = vor.u32 %v13485_v31, %v11432_v29  ;;  %v13451_v47 = vld [vmem:[%s14519_s12 + $0x1444] sm:$0xf0]  ;;  %v13537_v50 = vld [vmem:[%s14519_s12 + $0x16f4] sm:$0xf0] }
 0x1b1   : > { %5676 = vmatpush.bf16.msra.mxu3 %v11513_v57  ;;  %v11424_v57 = vld [vmem:[%s14519_s12 + $0x1540] sm:$0xf]  ;;  %v13459_v8 = vld [vmem:[%s14519_s12 + $0x1484] sm:$0xf0] }
 0x1b2   : > { %5638 = vmatpush.bf16.msra.mxu0 %v11313_v62  ;;  %v5387_v62 = vadd.f32 %v5386_v55, %v15288_v61  ;;  %v11425_v29 = vor.u32 %v13483_v3, %v11424_v57  ;;  %v11361_v61 = vor.u32 %v13467_v21, %v11360_v13  ;;  %v13497_v55 = vld [vmem:[%s14519_s12 + $0x15b4] sm:$0xf0]  ;;  %v11417_v57 = vor.u32 %v13481_v35, %v11416_v7  ;;  %v5412_v3 = vpop.f32.mrf.mxu2  ;;  %v11408_v21 = vld [vmem:[%s14519_s12 + $0x1520] sm:$0xf]  ;;  %v13495_v7 = vld [vmem:[%s14519_s12 + $0x15a4] sm:$0xf0] }
 0x1b3   : > { %5664 = vmatpush.bf16.msra.mxu2 %v11441_v17  ;;  %v11297_v17 = vor.u32 %v13451_v47, %v11296_v44  ;;  %v13465_v44 = vld [vmem:[%s14519_s12 + $0x14b4] sm:$0xf0] }
 0x1b4   : > { %5651 = vmatpush.bf16.msra.mxu1 %v11377_v27  ;;  %v13499_v27 = vld [vmem:[%s14519_s12 + $0x15c4] sm:$0xf0]  ;;  %v5400_v31 = vadd.f32 %v5399_v26, %v5387_v62  ;;  %v11353_v13 = vor.u32 %v13465_v44, %v11352_v39  ;;  %v11272_v39 = vld [vmem:[%s14519_s12 + $0x1410] sm:$0xf]  ;;  %v13445_v44 = vld [vmem:[%s14519_s12 + $0x1414] sm:$0xf0] }
 0x1b5   : > { %5677 = vmatpush.bf16.msra.mxu3 %v11505_v32  ;;  %v11288_v32 = vld [vmem:[%s14519_s12 + $0x1430] sm:$0xf]  ;;  %v13447_v62 = vld [vmem:[%s14519_s12 + $0x1424] sm:$0xf0] }
 0x1b6   : > { %5639 = vmatpush.bf16.msra.mxu0 %v11305_v28  ;;  %v11489_v28 = vor.u32 %v13499_v27, %v11488_v40  ;;  %v11289_v47 = vor.u32 %v13449_v45, %v11288_v32  ;;  %v13479_v26 = vld [vmem:[%s14519_s12 + $0x1524] sm:$0xf0]  ;;  %v5425_v27 = vpop.f32.mrf.mxu3 }
 0x1b7   : > { %5665 = vmatpush.bf16.msra.mxu2 %v11433_v41  ;;  %v11480_v41 = vld [vmem:[%s14519_s12 + $0x15b0] sm:$0xf]  ;;  %v13463_v32 = vld [vmem:[%s14519_s12 + $0x14a4] sm:$0xf0]  ;;  %v5401_v35 = vpop.f32.mrf.mxu1 }
 0x1b8   : > { %5652 = vmatpush.bf16.msra.mxu1 %v11369_v52  ;;  %v11280_v52 = vld [vmem:[%s14519_s12 + $0x1420] sm:$0xf]  ;;  %v11481_v40 = vor.u32 %v13497_v55, %v11480_v41  ;;  %v13477_v55 = vld [vmem:[%s14519_s12 + $0x1514] sm:$0xf0] }
 0x1b9   : > { %5678 = vmatpush.bf16.msra.mxu3 %v11497_v4  ;;  %v5413_v4 = vadd.f32 %v5412_v3, %v5400_v31  ;;  %v11472_v31 = vld [vmem:[%s14519_s12 + $0x15a0] sm:$0xf] }
 0x1ba   : > { %5640 = vmatpush.bf16.msra.mxu0 %v11297_v17  ;;  %v5388_v17 = vpop.f32.mrf.mxu0  ;;  %v11473_v3 = vor.u32 %v13495_v7, %v11472_v31  ;;  %v11576_v31 = vld [vmem:[%s14519_s12 + $0x1670] sm:$0xf]  ;;  %v13521_v7 = vld [vmem:[%s14519_s12 + $0x1674] sm:$0xf0] }
 0x1bb   : > { %5666 = vmatpush.bf16.msra.mxu2 %v11425_v29  ;;  %v11344_v29 = vld [vmem:[%s14519_s12 + $0x14a0] sm:$0xf]  ;;  %v15367_v45 = vadd.f32 %v5425_v27, %v5413_v4  ;;  %v11464_v4 = vld [vmem:[%s14519_s12 + $0x1590] sm:$0xf]  ;;  %v13443_v17 = vld [vmem:[%s14519_s12 + $0x1404] sm:$0xf0] }
 0x1bc   : > { %5653 = vmatpush.bf16.msra.mxu1 %v11361_v61  ;;  %v11281_v61 = vor.u32 %v13447_v62, %v11280_v52  ;;  %v11345_v41 = vor.u32 %v13463_v32, %v11344_v29  ;;  %v11336_v52 = vld [vmem:[%s14519_s12 + $0x1490] sm:$0xf]  ;;  %v13461_v62 = vld [vmem:[%s14519_s12 + $0x1494] sm:$0xf0]  ;;  %v11392_v27 = vld [vmem:[%s14519_s12 + $0x1500] sm:$0xf]  ;;  %v5414_v29 = vpop.f32.mrf.mxu2 }
 0x1bd   : > { %5679 = vmatpush.bf16.msra.mxu3 %v11489_v28  ;;  %v11409_v28 = vor.u32 %v13479_v26, %v11408_v21  ;;  %v13493_v21 = vld [vmem:[%s14519_s12 + $0x1594] sm:$0xf0]  ;;  %v11264_v26 = vld [vmem:[%s14519_s12 + $0x1400] sm:$0xf]  ;;  %v11337_v32 = vor.u32 %v13461_v62, %v11336_v52  ;;  %v11577_v52 = vor.u32 %v13521_v7, %v11576_v31  ;;  %v11688_v7 = vld [vmem:[%s14519_s12 + $0x1750] sm:$0xf] }
 0x1be   : > { %5641 = vmatpush.bf16.msra.mxu0 %v11289_v47  ;;  %v11400_v47 = vld [vmem:[%s14519_s12 + $0x1510] sm:$0xf]  ;;  %v11465_v35 = vor.u32 %v13493_v21, %v11464_v4  ;;  %v553_v29 = vld [vmem:[#allocation3 + $0x140] sm:$0xff]  ;;  %v555_v62 = vld [vmem:[#allocation3 + $0x150] sm:$0xff] }
 0x1bf   : > { %5667 = vmatpush.bf16.msra.mxu2 %v11417_v57  ;;  %v11273_v57 = vor.u32 %v13445_v44, %v11272_v39  ;;  %v13551_v39 = vld [vmem:[%s14519_s12 + $0x1764] sm:$0xf0]  ;;  %v11328_v44 = vld [vmem:[%s14519_s12 + $0x1480] sm:$0xf]  ;;  %v15399_v31 = vpack.c.bf16 %v555_v62, %v555_v62 }
 0x1c0   : > { %5654 = vmatpush.bf16.msra.mxu1 %v11353_v13  ;;  %v11401_v13 = vor.u32 %v13477_v55, %v11400_v47  ;;  %v11265_v47 = vor.u32 %v13443_v17, %v11264_v26  ;;  %v11456_v55 = vld [vmem:[%s14519_s12 + $0x1580] sm:$0xf]  ;;  %v11329_v21 = vor.u32 %v13459_v8, %v11328_v44  ;;  %v13549_v8 = vld [vmem:[%s14519_s12 + $0x1754] sm:$0xf0] }
 0x1c1   : > { %5680 = vmatpush.bf16.msra.mxu3 %v11481_v40  ;;  %v13475_v40 = vld [vmem:[%s14519_s12 + $0x1504] sm:$0xf0]  ;;  %v11457_v26 = vor.u32 %v13491_v49, %v11456_v55  ;;  %v556_v17 = vld [vmem:[#allocation3 + $0x158] sm:$0xff]  ;;  %16510 = vst [vmem:[#allocation34_spill] sm:$0xff] %v15399_v31  ;;  %v8754_v55 = vld [vmem:[%s14519_s12 + $0x68] sm:$0xf0] }
 0x1c2   : > { %5642 = vmatpush.bf16.msra.mxu0 %v11281_v61  ;;  %v11696_v61 = vld [vmem:[%s14519_s12 + $0x1760] sm:$0xf]  ;;  %v15407_v44 = vpack.c.bf16 %v556_v17, %v556_v17  ;;  %v8746_v17 = vld [vmem:[%s14519_s12 + $0x58] sm:$0xf0] }
 0x1c3   : > { %5668 = vmatpush.bf16.msra.mxu2 %v11409_v28  ;;  %v5427_v28 = vpop.f32.mrf.mxu3  ;;  %v11697_v4 = vor.u32 %v13551_v39, %v11696_v61  ;;  %v11632_v49 = vld [vmem:[%s14519_s12 + $0x16e0] sm:$0xf]  ;;  %v13535_v39 = vld [vmem:[%s14519_s12 + $0x16e4] sm:$0xf0] }
 0x1c4   : > { %5655 = vmatpush.bf16.msra.mxu1 %v11345_v41  ;;  %v11393_v41 = vor.u32 %v13475_v40, %v11392_v27  ;;  %v12816_v28 = vld [vmem:[%s14519_s12 + $0x74] sm:$0xf]  ;;  %v11568_v27 = vld [vmem:[%s14519_s12 + $0x1660] sm:$0xf]  ;;  %v13519_v40 = vld [vmem:[%s14519_s12 + $0x1664] sm:$0xf0] }
 0x1c5   : > { %5681 = vmatpush.bf16.msra.mxu3 %v11473_v3  ;;  %v11640_v3 = vld [vmem:[%s14519_s12 + $0x16f0] sm:$0xf]  ;;  %v8765_v61 = vor.u32 %v12816_v28, %v8762_v56  ;;  %16512 = vst [vmem:[#allocation36_spill] sm:$0xff] %v15407_v44  ;;  %v11680_v62 = vld [vmem:[%s14519_s12 + $0x1740] sm:$0xf] }
 0x1c6   : > { %5643 = vmatpush.bf16.msra.mxu0 %v11273_v57  ;;  %v554_v57 = vld [vmem:[#allocation3 + $0x148] sm:$0xff]  ;;  %v13533_v28 = vld [vmem:[%s14519_s12 + $0x16d4] sm:$0xf0] }
 0x1c7   : > { %5669 = vmatpush.bf16.msra.mxu2 %v11401_v13  ;;  %v15395_v13 = vpack.c.bf16 %v553_v29, %v553_v29  ;;  %v11689_v29 = vor.u32 %v13549_v8, %v11688_v7  ;;  %v11560_v56 = vld [vmem:[%s14519_s12 + $0x1650] sm:$0xf] }
 0x1c8   : > { %5656 = vmatpush.bf16.msra.mxu1 %v11337_v32  ;;  %v11641_v32 = vor.u32 %v13537_v50, %v11640_v3  ;;  %v12814_v50 = vld [vmem:[%s14519_s12 + $0x64] sm:$0xf]  ;;  %v13547_v3 = vld [vmem:[%s14519_s12 + $0x1744] sm:$0xf0] }
 0x1c9   : > { %5682 = vmatpush.bf16.msra.mxu3 %v11465_v35  ;;  %16509 = vst [vmem:[#allocation33_spill] sm:$0xff] %v15395_v13  ;;  %v15403_v35 = vpack.c.bf16 %v554_v57, %v554_v57 }
 0x1ca   : > { %5644 = vmatpush.bf16.msra.mxu0 %v11265_v47  ;;  %v11569_v47 = vor.u32 %v13519_v40, %v11568_v27  ;;  %v11681_v27 = vor.u32 %v13547_v3, %v11680_v62  ;;  %v11552_v40 = vld [vmem:[%s14519_s12 + $0x1640] sm:$0xf]  ;;  %v5438_v8 = vpop.f32.mrf.mxu0 }
 0x1cb   : > { %5670 = vmatpush.bf16.msra.mxu2 %v11393_v41  ;;  %16511 = vst [vmem:[#allocation35_spill] sm:$0xff] %v15403_v35  ;;  %v13517_v41 = vld [vmem:[%s14519_s12 + $0x1654] sm:$0xf0] }
 0x1cc   : > { %5657 = vmatpush.bf16.msra.mxu1 %v11329_v21  ;;  %v11624_v21 = vld [vmem:[%s14519_s12 + $0x16d0] sm:$0xf]  ;;  %v11561_v57 = vor.u32 %v13517_v41, %v11560_v56  ;;  %v5451_v56 = vpop.f32.mrf.mxu1  ;;  %v12810_v41 = vld [vmem:[%s14519_s12 + $0x44] sm:$0xf] }
 0x1cd   : > { %5683 = vmatpush.bf16.msra.mxu3 %v11457_v26  ;;  %5645 = vmatmul.bf16.vlgmr.msra.gmra.mxu0 %v15395_v13  ;;  %v12812_v26 = vld [vmem:[%s14519_s12 + $0x54] sm:$0xf]  ;;  %v11625_v7 = vor.u32 %v13533_v28, %v11624_v21  ;;  %v13513_v21 = vld [vmem:[%s14519_s12 + $0x1634] sm:$0xf0]  ;;  %v11664_v28 = vld [vmem:[%s14519_s12 + $0x1720] sm:$0xf] }
 0x1ce   : > { %5689 = vmatpush.bf16.msrb.mxu0 %v11577_v52  ;;  %5671 = vmatmul.bf16.vlgmr.msra.gmra.mxu2 %v15399_v31  ;;  %v11633_v52 = vor.u32 %v13535_v39, %v11632_v49  ;;  %v13545_v49 = vld [vmem:[%s14519_s12 + $0x1734] sm:$0xf0]  ;;  %v8749_v39 = vor.u32 %v12812_v26, %v8746_v17  ;;  %v13543_v26 = vld [vmem:[%s14519_s12 + $0x1724] sm:$0xf0]  ;;  %v11608_v17 = vld [vmem:[%s14519_s12 + $0x16b0] sm:$0xf] }
 0x1cf   : > { %5716 = vmatpush.bf16.msrb.mxu2 %v11697_v4  ;;  %5658 = vmatmul.bf16.vlgmr.msra.gmra.mxu1 %v15403_v35  ;;  %v8757_v4 = vor.u32 %v12814_v50, %v8754_v55  ;;  %v11616_v50 = vld [vmem:[%s14519_s12 + $0x16c0] sm:$0xf]  ;;  %v13531_v55 = vld [vmem:[%s14519_s12 + $0x16c4] sm:$0xf0] }
 0x1d0   : > { %5702 = vmatpush.bf16.msrb.mxu1 %v11641_v32  ;;  %5684 = vmatmul.bf16.vlgmr.msra.gmra.mxu3 %v15407_v44  ;;  %v13515_v32 = vld [vmem:[%s14519_s12 + $0x1644] sm:$0xf0]  ;;  %v12848_v44 = vld [vmem:[%s14519_s12 + $0x174] sm:$0xf] }
 0x1d1   : > { %5728 = vmatpush.bf16.msrb.mxu3 %v8765_v61  ;;  %v11672_v61 = vld [vmem:[%s14519_s12 + $0x1730] sm:$0xf]  ;;  %v13523_v31 = vld [vmem:[%s14519_s12 + $0x1684] sm:$0xf0] }
 0x1d2   : > { %5690 = vmatpush.bf16.msrb.mxu0 %v11569_v47  ;;  %v5439_v47 = vadd.f32 %v5438_v8, %v15367_v45  ;;  %v11673_v62 = vor.u32 %v13545_v49, %v11672_v61  ;;  %v11617_v45 = vor.u32 %v13531_v55, %v11616_v50  ;;  %v8730_v8 = vld [vmem:[%s14519_s12 + $0x38] sm:$0xf0]  ;;  %v11665_v61 = vor.u32 %v13543_v26, %v11664_v28  ;;  %v5464_v49 = vpop.f32.mrf.mxu2  ;;  %v11656_v55 = vld [vmem:[%s14519_s12 + $0x1710] sm:$0xf]  ;;  %v8722_v28 = vld [vmem:[%s14519_s12 + $0x28] sm:$0xf0] }
 0x1d3   : > { %5717 = vmatpush.bf16.msrb.mxu2 %v11689_v29  ;;  %v11553_v29 = vor.u32 %v13515_v32, %v11552_v40  ;;  %v13529_v40 = vld [vmem:[%s14519_s12 + $0x16b4] sm:$0xf0] }
 0x1d4   : > { %5703 = vmatpush.bf16.msrb.mxu1 %v11633_v52  ;;  %v8738_v52 = vld [vmem:[%s14519_s12 + $0x48] sm:$0xf0]  ;;  %v5452_v3 = vadd.f32 %v5451_v56, %v5439_v47  ;;  %v13511_v47 = vld [vmem:[%s14519_s12 + $0x1624] sm:$0xf0]  ;;  %v11609_v50 = vor.u32 %v13529_v40, %v11608_v17  ;;  %v13541_v56 = vld [vmem:[%s14519_s12 + $0x1714] sm:$0xf0]  ;;  %v5453_v26 = vpop.f32.mrf.mxu1 }
 0x1d5   : > { %5729 = vmatpush.bf16.msrb.mxu3 %v8757_v4  ;;  %v11544_v4 = vld [vmem:[%s14519_s12 + $0x1630] sm:$0xf]  ;;  %v13509_v40 = vld [vmem:[%s14519_s12 + $0x1614] sm:$0xf0] }
 0x1d6   : > { %5691 = vmatpush.bf16.msrb.mxu0 %v11561_v57  ;;  %v8741_v57 = vor.u32 %v12810_v41, %v8738_v52  ;;  %v11545_v32 = vor.u32 %v13513_v21, %v11544_v4  ;;  %v5477_v52 = vpop.f32.mrf.mxu3  ;;  %v13527_v4 = vld [vmem:[%s14519_s12 + $0x16a4] sm:$0xf0]  ;;  %v11528_v17 = vld [vmem:[%s14519_s12 + $0x1610] sm:$0xf] }
 0x1d7   : > { %5718 = vmatpush.bf16.msrb.mxu2 %v11681_v27  ;;  %v12808_v27 = vld [vmem:[%s14519_s12 + $0x34] sm:$0xf] }
 0x1d8   : > { %5704 = vmatpush.bf16.msrb.mxu1 %v11625_v7  ;;  %v11536_v7 = vld [vmem:[%s14519_s12 + $0x1620] sm:$0xf]  ;;  %v8733_v41 = vor.u32 %v12808_v27, %v8730_v8  ;;  %v13539_v8 = vld [vmem:[%s14519_s12 + $0x1704] sm:$0xf0] }
 0x1d9   : > { %5730 = vmatpush.bf16.msrb.mxu3 %v8749_v39  ;;  %v5465_v39 = vadd.f32 %v5464_v49, %v5452_v3  ;;  %v12806_v3 = vld [vmem:[%s14519_s12 + $0x24] sm:$0xf]  ;;  %v12832_v49 = vld [vmem:[%s14519_s12 + $0xf4] sm:$0xf] }
 0x1da   : > { %5692 = vmatpush.bf16.msrb.mxu0 %v11553_v29  ;;  %v5440_v29 = vpop.f32.mrf.mxu0 }
 0x1db   : > { %5719 = vmatpush.bf16.msrb.mxu2 %v11673_v62  ;;  %v11600_v62 = vld [vmem:[%s14519_s12 + $0x16a0] sm:$0xf]  ;;  %v15446_v21 = vadd.f32 %v5477_v52, %v5465_v39  ;;  %v11592_v39 = vld [vmem:[%s14519_s12 + $0x1690] sm:$0xf]  ;;  %v13525_v29 = vld [vmem:[%s14519_s12 + $0x1694] sm:$0xf0] }
 0x1dc   : > { %5705 = vmatpush.bf16.msrb.mxu1 %v11617_v45  ;;  %v11537_v45 = vor.u32 %v13511_v47, %v11536_v7  ;;  %v11601_v27 = vor.u32 %v13527_v4, %v11600_v62  ;;  %v8725_v7 = vor.u32 %v12806_v3, %v8722_v28  ;;  %v8826_v47 = vld [vmem:[%s14519_s12 + $0xf8] sm:$0xf0]  ;;  %v13507_v62 = vld [vmem:[%s14519_s12 + $0x1604] sm:$0xf0]  ;;  %v5466_v3 = vpop.f32.mrf.mxu2  ;;  %v11593_v26 = vor.u32 %v13525_v29, %v11592_v39  ;;  %v12880_v39 = vld [vmem:[%s14519_s12 + $0x274] sm:$0xf] }
 0x1dd   : > { %5731 = vmatpush.bf16.msrb.mxu3 %v8741_v57  ;;  %v11657_v57 = vor.u32 %v13541_v56, %v11656_v55  ;;  %v12804_v55 = vld [vmem:[%s14519_s12 + $0x14] sm:$0xf]  ;;  %v8714_v56 = vld [vmem:[%s14519_s12 + $0x18] sm:$0xf0]  ;;  %v8829_v28 = vor.u32 %v12832_v49, %v8826_v47  ;;  %v8706_v49 = vld [vmem:[%s14519_s12 + $0x8] sm:$0xf0] }
 0x1de   : > { %5693 = vmatpush.bf16.msrb.mxu0 %v11545_v32  ;;  %v11648_v32 = vld [vmem:[%s14519_s12 + $0x1700] sm:$0xf]  ;;  %v559_v4 = vld [vmem:[#allocation3 + $0x170] sm:$0xff]  ;;  %v557_v47 = vld [vmem:[#allocation3 + $0x160] sm:$0xff] }
 0x1df   : > { %5720 = vmatpush.bf16.msrb.mxu2 %v11665_v61  ;;  %v11529_v61 = vor.u32 %v13509_v40, %v11528_v17  ;;  %v11649_v52 = vor.u32 %v13539_v8, %v11648_v32  ;;  %v8890_v17 = vld [vmem:[%s14519_s12 + $0x178] sm:$0xf0]  ;;  %v8717_v40 = vor.u32 %v12804_v55, %v8714_v56  ;;  %v12802_v32 = vld [vmem:[%s14519_s12 + $0x4] sm:$0xf]  ;;  %v5479_v8 = vpop.f32.mrf.mxu3  ;;  %v12864_v55 = vld [vmem:[%s14519_s12 + $0x1f4] sm:$0xf]  ;;  %v15478_v13 = vpack.c.bf16 %v557_v47, %v557_v47 }
 0x1e0   : > { %5706 = vmatpush.bf16.msrb.mxu1 %v11609_v50  ;;  %v11520_v50 = vld [vmem:[%s14519_s12 + $0x1600] sm:$0xf]  ;;  %v9018_v29 = vld [vmem:[%s14519_s12 + $0x278] sm:$0xf0]  ;;  %v8882_v3 = vld [vmem:[%s14519_s12 + $0x168] sm:$0xf0]  ;;  %v8709_v8 = vor.u32 %v12802_v32, %v8706_v49 }
 0x1e1   : > { %5732 = vmatpush.bf16.msrb.mxu3 %v8733_v41  ;;  %v12830_v41 = vld [vmem:[%s14519_s12 + $0xe4] sm:$0xf]  ;;  %v11521_v35 = vor.u32 %v13507_v62, %v11520_v50  ;;  %v8954_v56 = vld [vmem:[%s14519_s12 + $0x1f8] sm:$0xf0]  ;;  %v12844_v32 = vld [vmem:[%s14519_s12 + $0x154] sm:$0xf] }
 0x1e2   : > { %5694 = vmatpush.bf16.msrb.mxu0 %v11537_v45  ;;  %v8818_v45 = vld [vmem:[%s14519_s12 + $0xe8] sm:$0xf0]  ;;  %v558_v62 = vld [vmem:[#allocation3 + $0x168] sm:$0xff]  ;;  %v8874_v49 = vld [vmem:[%s14519_s12 + $0x158] sm:$0xf0] }
 0x1e3   : > { %5721 = vmatpush.bf16.msrb.mxu2 %v11657_v57  ;;  %v11584_v57 = vld [vmem:[%s14519_s12 + $0x1680] sm:$0xf]  ;;  %v12826_v47 = vld [vmem:[%s14519_s12 + $0xc4] sm:$0xf] }
 0x1e4   : > { %5707 = vmatpush.bf16.msrb.mxu1 %v11601_v27  ;;  %v15469_v27 = vpack.c.bf16 %v559_v4, %v559_v4  ;;  %v11585_v50 = vor.u32 %v13523_v31, %v11584_v57  ;;  %v12846_v4 = vld [vmem:[%s14519_s12 + $0x164] sm:$0xf]  ;;  %v8957_v31 = vor.u32 %v12864_v55, %v8954_v56  ;;  %v8946_v57 = vld [vmem:[%s14519_s12 + $0x1e8] sm:$0xf0]  ;;  %v12876_v55 = vld [vmem:[%s14519_s12 + $0x254] sm:$0xf]  ;;  %v8877_v56 = vor.u32 %v12844_v32, %v8874_v49 }
 0x1e5   : > { %5733 = vmatpush.bf16.msrb.mxu3 %v8725_v7  ;;  %v8893_v7 = vor.u32 %v12848_v44, %v8890_v17  ;;  %v8810_v44 = vld [vmem:[%s14519_s12 + $0xd8] sm:$0xf0]  ;;  %v9010_v17 = vld [vmem:[%s14519_s12 + $0x268] sm:$0xf0] }
 0x1e6   : > { %5695 = vmatpush.bf16.msrb.mxu0 %v11529_v61  ;;  %v8821_v61 = vor.u32 %v12830_v41, %v8818_v45  ;;  %v9021_v41 = vor.u32 %v12880_v39, %v9018_v29  ;;  %v8885_v45 = vor.u32 %v12846_v4, %v8882_v3  ;;  %v8802_v39 = vld [vmem:[%s14519_s12 + $0xc8] sm:$0xf0]  ;;  %v12842_v3 = vld [vmem:[%s14519_s12 + $0x144] sm:$0xf] }
 0x1e7   : > { %5722 = vmatpush.bf16.msrb.mxu2 %v11649_v52  ;;  %v12828_v52 = vld [vmem:[%s14519_s12 + $0xd4] sm:$0xf]  ;;  %v8805_v4 = vor.u32 %v12826_v47, %v8802_v39  ;;  %v8858_v39 = vld [vmem:[%s14519_s12 + $0x138] sm:$0xf0] }
 0x1e8   : > { %5708 = vmatpush.bf16.msrb.mxu1 %v11593_v26  ;;  %v15485_v26 = vpack.c.bf16 %v558_v62, %v558_v62  ;;  %v8938_v62 = vld [vmem:[%s14519_s12 + $0x1d8] sm:$0xf0]  ;;  %v12840_v47 = vld [vmem:[%s14519_s12 + $0x134] sm:$0xf] }
 0x1e9   : > { %5734 = vmatpush.bf16.msrb.mxu3 %v8717_v40  ;;  %v12862_v40 = vld [vmem:[%s14519_s12 + $0x1e4] sm:$0xf] }
 0x1ea   : > { %5696 = vmatpush.bf16.msrb.mxu0 %v11521_v35  ;;  %11702 = vmatmul.msk.bf16.vlgmr.msrb.gmra.mxu2 %vm5113_vm0, %v15469_v27  ;;  %v8813_v35 = vor.u32 %v12828_v52, %v8810_v44  ;;  %v8949_v29 = vor.u32 %v12862_v40, %v8946_v57  ;;  %v12824_v52 = vld [vmem:[%s14519_s12 + $0xb4] sm:$0xf]  ;;  %v8794_v44 = vld [vmem:[%s14519_s12 + $0xb8] sm:$0xf0]  ;;  %v8994_v57 = vld [vmem:[%s14519_s12 + $0x248] sm:$0xf0] }
 0x1eb   : > { %5741 = vmatpush.bf16.msra.mxu2 %v8829_v28  ;;  %v12878_v28 = vld [vmem:[%s14519_s12 + $0x264] sm:$0xf]  ;;  %v8797_v32 = vor.u32 %v12824_v52, %v8794_v44  ;;  %v8850_v44 = vld [vmem:[%s14519_s12 + $0x128] sm:$0xf0] }
 0x1ec   : > { %5709 = vmatpush.bf16.msrb.mxu1 %v11585_v50  ;;  %v12860_v50 = vld [vmem:[%s14519_s12 + $0x1d4] sm:$0xf]  ;;  %v5503_v49 = vpop.f32.mrf.mxu1  ;;  %v12838_v52 = vld [vmem:[%s14519_s12 + $0x124] sm:$0xf] }
 0x1ed   : > { %5735 = vmatpush.bf16.msrb.mxu3 %v8709_v8  ;;  %5697 = vmatmul.bf16.vlgmr.msrb.gmra.mxu0 %v15478_v13  ;;  %v8866_v8 = vld [vmem:[%s14519_s12 + $0x148] sm:$0xf0] }
 0x1ee   : > { %5754 = vmatpush.bf16.msra.mxu0 %v8893_v7  ;;  %v9013_v7 = vor.u32 %v12878_v28, %v9010_v17  ;;  %v8941_v28 = vor.u32 %v12860_v50, %v8938_v62  ;;  %v8869_v40 = vor.u32 %v12842_v3, %v8866_v8  ;;  %v8861_v50 = vor.u32 %v12840_v47, %v8858_v39  ;;  %v8986_v62 = vld [vmem:[%s14519_s12 + $0x238] sm:$0xf0]  ;;  %v12854_v47 = vld [vmem:[%s14519_s12 + $0x1a4] sm:$0xf]  ;;  %v8914_v39 = vld [vmem:[%s14519_s12 + $0x1a8] sm:$0xf0] }
 0x1ef   : > { %5742 = vmatpush.bf16.msra.mxu2 %v8821_v61  ;;  %5710 = vmatmul.bf16.vlgmr.msrb.gmra.mxu1 %v15485_v26  ;;  %v9002_v61 = vld [vmem:[%s14519_s12 + $0x258] sm:$0xf0] }
 0x1f0   : > { %5767 = vmatpush.bf16.msra.mxu1 %v8957_v31  ;;  %5736 = vmatmul.bf16.vlgmr.msrb.gmra.mxu3 %v14638_v10  ;;  %v5490_v31 = vpop.f32.mrf.mxu0  ;;  %v8930_v10 = vld [vmem:[%s14519_s12 + $0x1c8] sm:$0xf0]  ;;  %v8922_v3 = vld [vmem:[%s14519_s12 + $0x1b8] sm:$0xf0] }
 0x1f1   : > { %5780 = vmatpush.bf16.msra.mxu3 %v9021_v41  ;;  %v9005_v41 = vor.u32 %v12876_v55, %v9002_v61  ;;  %v5491_v17 = vadd.f32 %v5490_v31, %v15446_v21  ;;  %v8786_v55 = vld [vmem:[%s14519_s12 + $0xa8] sm:$0xf0]  ;;  %v12872_v61 = vld [vmem:[%s14519_s12 + $0x234] sm:$0xf]  ;;  %v5516_v31 = vpop.f32.mrf.mxu2 }
 0x1f2   : > { %5755 = vmatpush.bf16.msra.mxu0 %v8885_v45  ;;  %v12874_v45 = vld [vmem:[%s14519_s12 + $0x244] sm:$0xf] }
 0x1f3   : > { %5743 = vmatpush.bf16.msra.mxu2 %v8813_v35  ;;  %v12858_v35 = vld [vmem:[%s14519_s12 + $0x1c4] sm:$0xf]  ;;  %v8997_v21 = vor.u32 %v12874_v45, %v8994_v57  ;;  %v8989_v45 = vor.u32 %v12872_v61, %v8986_v62 }
 0x1f4   : > { %5768 = vmatpush.bf16.msra.mxu1 %v8949_v29  ;;  %v12822_v29 = vld [vmem:[%s14519_s12 + $0xa4] sm:$0xf] }
 0x1f5   : > { %5781 = vmatpush.bf16.msra.mxu3 %v9013_v7  ;;  %v5504_v7 = vadd.f32 %v5503_v49, %v5491_v17  ;;  %v8789_v8 = vor.u32 %v12822_v29, %v8786_v55  ;;  %v8778_v17 = vld [vmem:[%s14519_s12 + $0x98] sm:$0xf0]  ;;  %v12870_v57 = vld [vmem:[%s14519_s12 + $0x224] sm:$0xf]  ;;  %v8978_v49 = vld [vmem:[%s14519_s12 + $0x228] sm:$0xf0] }
 0x1f6   : > { %5756 = vmatpush.bf16.msra.mxu0 %v8877_v56  ;;  %v8933_v56 = vor.u32 %v12858_v35, %v8930_v10  ;;  %v5529_v10 = vpop.f32.mrf.mxu3  ;;  %v12836_v55 = vld [vmem:[%s14519_s12 + $0x114] sm:$0xf]  ;;  %v12818_v61 = vld [vmem:[%s14519_s12 + $0x84] sm:$0xf]  ;;  %v8981_v62 = vor.u32 %v12870_v57, %v8978_v49  ;;  %v9146_v49 = vld [vmem:[%s14519_s12 + $0x378] sm:$0xf0] }
 0x1f7   : > { %5744 = vmatpush.bf16.msra.mxu2 %v8805_v4  ;;  %v12856_v4 = vld [vmem:[%s14519_s12 + $0x1b4] sm:$0xf] }
 0x1f8   : > { %5769 = vmatpush.bf16.msra.mxu1 %v8941_v28  ;;  %v5517_v28 = vadd.f32 %v5516_v31, %v5504_v7  ;;  %v5492_v35 = vpop.f32.mrf.mxu0  ;;  %v8970_v31 = vld [vmem:[%s14519_s12 + $0x218] sm:$0xf0] }
 0x1f9   : > { %5782 = vmatpush.bf16.msra.mxu3 %v9005_v41  ;;  %v12820_v41 = vld [vmem:[%s14519_s12 + $0x94] sm:$0xf]  ;;  %v12894_v35 = vld [vmem:[%s14519_s12 + $0x2e4] sm:$0xf] }
 0x1fa   : > { %5757 = vmatpush.bf16.msra.mxu0 %v8869_v40  ;;  %v8925_v40 = vor.u32 %v12856_v4, %v8922_v3  ;;  %v15526_v29 = vadd.f32 %v5529_v10, %v5517_v28  ;;  %v8781_v7 = vor.u32 %v12820_v41, %v8778_v17  ;;  %v12896_v4 = vld [vmem:[%s14519_s12 + $0x2f4] sm:$0xf]  ;;  %v9082_v3 = vld [vmem:[%s14519_s12 + $0x2f8] sm:$0xf0] }
 0x1fb   : > { %5745 = vmatpush.bf16.msra.mxu2 %v8797_v32  ;;  %v8853_v32 = vor.u32 %v12838_v52, %v8850_v44  ;;  %v12868_v52 = vld [vmem:[%s14519_s12 + $0x214] sm:$0xf]  ;;  %v8906_v17 = vld [vmem:[%s14519_s12 + $0x198] sm:$0xf0]  ;;  %v9085_v57 = vor.u32 %v12896_v4, %v9082_v3  ;;  %v8898_v4 = vld [vmem:[%s14519_s12 + $0x188] sm:$0xf0] }
 0x1fc   : > { %5770 = vmatpush.bf16.msra.mxu1 %v8933_v56  ;;  %v5505_v56 = vpop.f32.mrf.mxu1  ;;  %v12852_v41 = vld [vmem:[%s14519_s12 + $0x194] sm:$0xf] }
 0x1fd   : > { %5783 = vmatpush.bf16.msra.mxu3 %v8997_v21  ;;  %v8842_v21 = vld [vmem:[%s14519_s12 + $0x118] sm:$0xf0]  ;;  %v12912_v10 = vld [vmem:[%s14519_s12 + $0x374] sm:$0xf] }
 0x1fe   : > { %5758 = vmatpush.bf16.msra.mxu0 %v8861_v50  ;;  %v8770_v50 = vld [vmem:[%s14519_s12 + $0x88] sm:$0xf0]  ;;  %v8845_v44 = vor.u32 %v12836_v55, %v8842_v21  ;;  %v8909_v55 = vor.u32 %v12852_v41, %v8906_v17  ;;  %v5531_v3 = vpop.f32.mrf.mxu3  ;;  %v12910_v41 = vld [vmem:[%s14519_s12 + $0x364] sm:$0xf] }
 0x1ff   : > { %5746 = vmatpush.bf16.msra.mxu2 %v8789_v8  ;;  %v8917_v8 = vor.u32 %v12854_v47, %v8914_v39  ;;  %v8773_v28 = vor.u32 %v12818_v61, %v8770_v50  ;;  %v5518_v47 = vpop.f32.mrf.mxu2  ;;  %v9074_v39 = vld [vmem:[%s14519_s12 + $0x2e8] sm:$0xf0]  ;;  %v12944_v61 = vld [vmem:[%s14519_s12 + $0x474] sm:$0xf]  ;;  %v12850_v50 = vld [vmem:[%s14519_s12 + $0x184] sm:$0xf] }
 0x200   : > { %5771 = vmatpush.bf16.msra.mxu1 %v8925_v40  ;;  %v8834_v40 = vld [vmem:[%s14519_s12 + $0x108] sm:$0xf0]  ;;  %v9274_v47 = vld [vmem:[%s14519_s12 + $0x478] sm:$0xf0]  ;;  %v12940_v3 = vld [vmem:[%s14519_s12 + $0x454] sm:$0xf] }
 0x201   : > { %5784 = vmatpush.bf16.msra.mxu3 %v8989_v45  ;;  %v12834_v45 = vld [vmem:[%s14519_s12 + $0x104] sm:$0xf]  ;;  %v8962_v21 = vld [vmem:[%s14519_s12 + $0x208] sm:$0xf0] }
 0x202   : > { %5759 = vmatpush.bf16.msra.mxu0 %v8853_v32  ;;  %v8973_v32 = vor.u32 %v12868_v52, %v8970_v31  ;;  %v8837_v56 = vor.u32 %v12834_v45, %v8834_v40  ;;  %v9210_v52 = vld [vmem:[%s14519_s12 + $0x3f8] sm:$0xf0]  ;;  %v9077_v31 = vor.u32 %v12894_v35, %v9074_v39  ;;  %v9138_v17 = vld [vmem:[%s14519_s12 + $0x368] sm:$0xf0]  ;;  %v12892_v45 = vld [vmem:[%s14519_s12 + $0x2d4] sm:$0xf] }
 0x203   : > { %5747 = vmatpush.bf16.msra.mxu2 %v8781_v7  ;;  %v12866_v7 = vld [vmem:[%s14519_s12 + $0x204] sm:$0xf]  ;;  %v9066_v40 = vld [vmem:[%s14519_s12 + $0x2d8] sm:$0xf0]  ;;  %v9141_v35 = vor.u32 %v12910_v41, %v9138_v17  ;;  %v9266_v39 = vld [vmem:[%s14519_s12 + $0x468] sm:$0xf0] }
 0x204   : > { %5772 = vmatpush.bf16.msra.mxu1 %v8917_v8  ;;  %v12928_v8 = vld [vmem:[%s14519_s12 + $0x3f4] sm:$0xf]  ;;  %v12906_v41 = vld [vmem:[%s14519_s12 + $0x344] sm:$0xf]  ;;  %v9122_v17 = vld [vmem:[%s14519_s12 + $0x348] sm:$0xf0] }
 0x205   : > { %5785 = vmatpush.bf16.msra.mxu3 %v8981_v62  ;;  %v9149_v62 = vor.u32 %v12912_v10, %v9146_v49  ;;  %v9277_v10 = vor.u32 %v12944_v61, %v9274_v47  ;;  %v9213_v49 = vor.u32 %v12928_v8, %v9210_v52  ;;  %v12890_v61 = vld [vmem:[%s14519_s12 + $0x2c4] sm:$0xf]  ;;  %v9258_v47 = vld [vmem:[%s14519_s12 + $0x458] sm:$0xf0]  ;;  %v12924_v8 = vld [vmem:[%s14519_s12 + $0x3d4] sm:$0xf] }
 0x206   : > { %5760 = vmatpush.bf16.msra.mxu0 %v8845_v44  ;;  %v8965_v44 = vor.u32 %v12866_v7, %v8962_v21  ;;  %v9069_v7 = vor.u32 %v12892_v45, %v9066_v40  ;;  %v12908_v21 = vld [vmem:[%s14519_s12 + $0x354] sm:$0xf]  ;;  %v9194_v52 = vld [vmem:[%s14519_s12 + $0x3d8] sm:$0xf0]  ;;  %v9261_v40 = vor.u32 %v12940_v3, %v9258_v47 }
 0x207   : > { %5748 = vmatpush.bf16.msra.mxu2 %v8773_v28  ;;  %v8901_v28 = vor.u32 %v12850_v50, %v8898_v4  ;;  %v9058_v50 = vld [vmem:[%s14519_s12 + $0x2c8] sm:$0xf0]  ;;  %v9050_v45 = vld [vmem:[%s14519_s12 + $0x2b8] sm:$0xf0] }
 0x208   : > { %5773 = vmatpush.bf16.msra.mxu1 %v8909_v55  ;;  %v9202_v55 = vld [vmem:[%s14519_s12 + $0x3e8] sm:$0xf0]  ;;  %v9242_v3 = vld [vmem:[%s14519_s12 + $0x438] sm:$0xf0] }
 0x209   : > { %5786 = vmatpush.bf16.msra.mxu3 %v8973_v32  ;;  %v12926_v32 = vld [vmem:[%s14519_s12 + $0x3e4] sm:$0xf]  ;;  %v9178_v47 = vld [vmem:[%s14519_s12 + $0x3b8] sm:$0xf0] }
 0x20a   : > { %5761 = vmatpush.bf16.msra.mxu0 %v8837_v56  ;;  %5749 = vmatmul.bf16.vlgmr.msra.gmra.mxu2 %v14647_v20  ;;  %v9130_v56 = vld [vmem:[%s14519_s12 + $0x358] sm:$0xf0]  ;;  %v9205_v4 = vor.u32 %v12926_v32, %v9202_v55  ;;  %v12904_v32 = vld [vmem:[%s14519_s12 + $0x334] sm:$0xf] }
 0x20b   : > { %5793 = vmatpush.bf16.msrb.mxu2 %v9085_v57  ;;  %v12942_v57 = vld [vmem:[%s14519_s12 + $0x464] sm:$0xf]  ;;  %v9114_v55 = vld [vmem:[%s14519_s12 + $0x338] sm:$0xf0] }
 0x20c   : > { %5774 = vmatpush.bf16.msra.mxu1 %v8901_v28  ;;  %v9269_v20 = vor.u32 %v12942_v57, %v9266_v39  ;;  %v9197_v28 = vor.u32 %v12924_v8, %v9194_v52  ;;  %v9125_v57 = vor.u32 %v12906_v41, %v9122_v17  ;;  %v9186_v39 = vld [vmem:[%s14519_s12 + $0x3c8] sm:$0xf0]  ;;  %v12902_v52 = vld [vmem:[%s14519_s12 + $0x324] sm:$0xf]  ;;  %v12884_v41 = vld [vmem:[%s14519_s12 + $0x294] sm:$0xf] }
 0x20d   : > { %5787 = vmatpush.bf16.msra.mxu3 %v8965_v44  ;;  %v12888_v44 = vld [vmem:[%s14519_s12 + $0x2b4] sm:$0xf]  ;;  %5762 = vmatmul.bf16.vlgmr.msra.gmra.mxu0 %v14634_v5  ;;  %v9034_v17 = vld [vmem:[%s14519_s12 + $0x298] sm:$0xf0] }
 0x20e   : > { %5806 = vmatpush.bf16.msrb.mxu0 %v9149_v62  ;;  %v9133_v62 = vor.u32 %v12908_v21, %v9130_v56  ;;  %v12886_v21 = vld [vmem:[%s14519_s12 + $0x2a4] sm:$0xf]  ;;  %v9042_v56 = vld [vmem:[%s14519_s12 + $0x2a8] sm:$0xf0] }
 0x20f   : > { %5794 = vmatpush.bf16.msrb.mxu2 %v9077_v31  ;;  %v9061_v31 = vor.u32 %v12890_v61, %v9058_v50  ;;  %5775 = vmatmul.bf16.vlgmr.msra.gmra.mxu1 %v14643_v15  ;;  %v9053_v15 = vor.u32 %v12888_v44, %v9050_v45  ;;  %v9045_v8 = vor.u32 %v12886_v21, %v9042_v56 }
 0x210   : > { %5819 = vmatpush.bf16.msrb.mxu1 %v9213_v49  ;;  %5788 = vmatmul.bf16.vlgmr.msra.gmra.mxu3 %v14706_v42  ;;  %v5542_v49 = vpop.f32.mrf.mxu0  ;;  %v12922_v42 = vld [vmem:[%s14519_s12 + $0x3c4] sm:$0xf] }
 0x211   : > { %5832 = vmatpush.bf16.msrb.mxu3 %v9277_v10  ;;  %v12938_v10 = vld [vmem:[%s14519_s12 + $0x444] sm:$0xf]  ;;  %v5543_v5 = vadd.f32 %v5542_v49, %v15526_v29  ;;  %v9117_v29 = vor.u32 %v12904_v32, %v9114_v55  ;;  %v15595_v44 = vpop.f32.mrf.mxu2  ;;  %v9234_v49 = vld [vmem:[%s14519_s12 + $0x428] sm:$0xf0]  ;;  %v9098_v32 = vld [vmem:[%s14519_s12 + $0x318] sm:$0xf0] }
 0x212   : > { %5807 = vmatpush.bf16.msrb.mxu0 %v9141_v35  ;;  %v9250_v35 = vld [vmem:[%s14519_s12 + $0x448] sm:$0xf0]  ;;  %v12882_v55 = vld [vmem:[%s14519_s12 + $0x284] sm:$0xf] }
 0x213   : > { %5795 = vmatpush.bf16.msrb.mxu2 %v9069_v7  ;;  %v5555_v7 = vpop.f32.mrf.mxu1  ;;  %v9253_v50 = vor.u32 %v12938_v10, %v9250_v35  ;;  %v9170_v35 = vld [vmem:[%s14519_s12 + $0x3a8] sm:$0xf0] }
 0x214   : > { %5820 = vmatpush.bf16.msrb.mxu1 %v9205_v4  ;;  %v15585_v61 = vadd.f32 %v5555_v7, %v5543_v5  ;;  %v12936_v4 = vld [vmem:[%s14519_s12 + $0x434] sm:$0xf]  ;;  %v9037_v5 = vor.u32 %v12884_v41, %v9034_v17  ;;  %v9026_v7 = vld [vmem:[%s14519_s12 + $0x288] sm:$0xf0] }
 0x215   : > { %5833 = vmatpush.bf16.msrb.mxu3 %v9269_v20  ;;  %v9189_v20 = vor.u32 %v12922_v42, %v9186_v39  ;;  %v9245_v45 = vor.u32 %v12936_v4, %v9242_v3  ;;  %v15601_v39 = vpop.f32.mrf.mxu3  ;;  %v9090_v41 = vld [vmem:[%s14519_s12 + $0x308] sm:$0xf0] }
 0x216   : > { %5808 = vmatpush.bf16.msrb.mxu0 %v9133_v62  ;;  %v12920_v62 = vld [vmem:[%s14519_s12 + $0x3b4] sm:$0xf] }
 0x217   : > { %5796 = vmatpush.bf16.msrb.mxu2 %v9061_v31  ;;  %v9106_v31 = vld [vmem:[%s14519_s12 + $0x328] sm:$0xf0] }
 0x218   : > { %5821 = vmatpush.bf16.msrb.mxu1 %v9197_v28  ;;  %v12934_v28 = vld [vmem:[%s14519_s12 + $0x424] sm:$0xf]  ;;  %v9109_v10 = vor.u32 %v12902_v52, %v9106_v31  ;;  %v5544_v42 = vpop.f32.mrf.mxu0  ;;  %v9029_v52 = vor.u32 %v12882_v55, %v9026_v7  ;;  %v9154_v7 = vld [vmem:[%s14519_s12 + $0x388] sm:$0xf0] }
 0x219   : > { %5834 = vmatpush.bf16.msrb.mxu3 %v9261_v40  ;;  %v9181_v40 = vor.u32 %v12920_v62, %v9178_v47  ;;  %v9237_v56 = vor.u32 %v12934_v28, %v9234_v49  ;;  %v9226_v62 = vld [vmem:[%s14519_s12 + $0x418] sm:$0xf0]  ;;  %v12916_v47 = vld [vmem:[%s14519_s12 + $0x394] sm:$0xf]  ;;  %v12898_v31 = vld [vmem:[%s14519_s12 + $0x304] sm:$0xf] }
 0x21a   : > { %5809 = vmatpush.bf16.msrb.mxu0 %v9125_v57  ;;  %v12918_v57 = vld [vmem:[%s14519_s12 + $0x3a4] sm:$0xf]  ;;  %v9402_v28 = vld [vmem:[%s14519_s12 + $0x578] sm:$0xf0]  ;;  %v9330_v49 = vld [vmem:[%s14519_s12 + $0x4e8] sm:$0xf0] }
 0x21b   : > { %5797 = vmatpush.bf16.msrb.mxu2 %v9053_v15  ;;  %v12900_v15 = vld [vmem:[%s14519_s12 + $0x314] sm:$0xf]  ;;  %v5557_v21 = vpop.f32.mrf.mxu1  ;;  %v9173_v4 = vor.u32 %v12918_v57, %v9170_v35  ;;  %v12930_v35 = vld [vmem:[%s14519_s12 + $0x404] sm:$0xf]  ;;  %v9218_v42 = vld [vmem:[%s14519_s12 + $0x408] sm:$0xf0] }
 0x21c   : > { %5822 = vmatpush.bf16.msrb.mxu1 %v9189_v20  ;;  %v9338_v20 = vld [vmem:[%s14519_s12 + $0x4f8] sm:$0xf0]  ;;  %v9101_v3 = vor.u32 %v12900_v15, %v9098_v32  ;;  %v9093_v15 = vor.u32 %v12898_v31, %v9090_v41  ;;  %v13008_v32 = vld [vmem:[%s14519_s12 + $0x674] sm:$0xf]  ;;  %v12914_v55 = vld [vmem:[%s14519_s12 + $0x384] sm:$0xf] }
 0x21d   : > { %5835 = vmatpush.bf16.msrb.mxu3 %v9253_v50  ;;  %v12960_v50 = vld [vmem:[%s14519_s12 + $0x4f4] sm:$0xf]  ;;  %v9157_v31 = vor.u32 %v12914_v55, %v9154_v7 }
 0x21e   : > { %5810 = vmatpush.bf16.msrb.mxu0 %v9117_v29  ;;  %v12932_v29 = vld [vmem:[%s14519_s12 + $0x414] sm:$0xf]  ;;  %v9341_v17 = vor.u32 %v12960_v50, %v9338_v20  ;;  %v9466_v20 = vld [vmem:[%s14519_s12 + $0x5f8] sm:$0xf0] }
 0x21f   : > { %5798 = vmatpush.bf16.msrb.mxu2 %v9045_v8  ;;  %v9162_v8 = vld [vmem:[%s14519_s12 + $0x398] sm:$0xf0]  ;;  %v12992_v50 = vld [vmem:[%s14519_s12 + $0x5f4] sm:$0xf] }
 0x220   : > { %5823 = vmatpush.bf16.msrb.mxu1 %v9181_v40  ;;  %v12976_v40 = vld [vmem:[%s14519_s12 + $0x574] sm:$0xf]  ;;  %v9165_v57 = vor.u32 %v12916_v47, %v9162_v8  ;;  %v9394_v47 = vld [vmem:[%s14519_s12 + $0x568] sm:$0xf0] }
 0x221   : > { %5836 = vmatpush.bf16.msrb.mxu3 %v9245_v45  ;;  %v12958_v45 = vld [vmem:[%s14519_s12 + $0x4e4] sm:$0xf]  ;;  %v9405_v21 = vor.u32 %v12976_v40, %v9402_v28  ;;  %v12956_v8 = vld [vmem:[%s14519_s12 + $0x4d4] sm:$0xf]  ;;  %v9522_v28 = vld [vmem:[%s14519_s12 + $0x668] sm:$0xf0] }
 0x222   : > { %5811 = vmatpush.bf16.msrb.mxu0 %v9109_v10  ;;  %v9229_v10 = vor.u32 %v12932_v29, %v9226_v62  ;;  %v9333_v29 = vor.u32 %v12958_v45, %v9330_v49  ;;  %v12974_v62 = vld [vmem:[%s14519_s12 + $0x564] sm:$0xf]  ;;  %v9458_v49 = vld [vmem:[%s14519_s12 + $0x5e8] sm:$0xf0]  ;;  %v13004_v55 = vld [vmem:[%s14519_s12 + $0x654] sm:$0xf] }
 0x223   : > { %5799 = vmatpush.bf16.msrb.mxu2 %v9037_v5  ;;  %v5570_v5 = vpop.f32.mrf.mxu2  ;;  %v13006_v45 = vld [vmem:[%s14519_s12 + $0x664] sm:$0xf]  ;;  %v9397_v40 = vor.u32 %v12974_v62, %v9394_v47  ;;  %v12952_v62 = vld [vmem:[%s14519_s12 + $0x4b4] sm:$0xf]  ;;  %v9306_v47 = vld [vmem:[%s14519_s12 + $0x4b8] sm:$0xf0] }
 0x224   : > { %5824 = vmatpush.bf16.msrb.mxu1 %v9173_v4  ;;  %v5583_v4 = vpop.f32.mrf.mxu3  ;;  %v12954_v5 = vld [vmem:[%s14519_s12 + $0x4c4] sm:$0xf] }
 0x225   : > { %5837 = vmatpush.bf16.msrb.mxu3 %v9237_v56  ;;  %v9530_v56 = vld [vmem:[%s14519_s12 + $0x678] sm:$0xf0]  ;;  %v12970_v4 = vld [vmem:[%s14519_s12 + $0x544] sm:$0xf] }
 0x226   : > { %5812 = vmatpush.bf16.msrb.mxu0 %v9101_v3  ;;  %v9221_v3 = vor.u32 %v12930_v35, %v9218_v42  ;;  %v9533_v41 = vor.u32 %v13008_v32, %v9530_v56  ;;  %v12972_v35 = vld [vmem:[%s14519_s12 + $0x554] sm:$0xf]  ;;  %v9386_v42 = vld [vmem:[%s14519_s12 + $0x558] sm:$0xf0] }
 0x227   : > { %5800 = vmatpush.bf16.msrb.mxu2 %v9029_v52  ;;  %v9322_v52 = vld [vmem:[%s14519_s12 + $0x4d8] sm:$0xf0]  ;;  %v9389_v7 = vor.u32 %v12972_v35, %v9386_v42  ;;  %v12988_v56 = vld [vmem:[%s14519_s12 + $0x5d4] sm:$0xf] }
 0x228   : > { %5825 = vmatpush.bf16.msrb.mxu1 %v9165_v57  ;;  %v9325_v57 = vor.u32 %v12956_v8, %v9322_v52  ;;  %v13002_v52 = vld [vmem:[%s14519_s12 + $0x644] sm:$0xf]  ;;  %v13000_v42 = vld [vmem:[%s14519_s12 + $0x634] sm:$0xf] }
 0x229   : > { %5838 = vmatpush.bf16.msrb.mxu3 %v9229_v10  ;;  %v12990_v10 = vld [vmem:[%s14519_s12 + $0x5e4] sm:$0xf] }
 0x22a   : > { %5813 = vmatpush.bf16.msrb.mxu0 %v9093_v15  ;;  %5801 = vmatmul.bf16.vlgmr.msrb.gmra.mxu2 %v14702_v38  ;;  %v9314_v38 = vld [vmem:[%s14519_s12 + $0x4c8] sm:$0xf0]  ;;  %v9525_v15 = vor.u32 %v13006_v45, %v9522_v28  ;;  %v9461_v32 = vor.u32 %v12990_v10, %v9458_v49  ;;  %v12968_v45 = vld [vmem:[%s14519_s12 + $0x534] sm:$0xf]  ;;  %v12950_v28 = vld [vmem:[%s14519_s12 + $0x4a4] sm:$0xf] }
 0x22b   : > { %5845 = vmatpush.bf16.msra.mxu2 %v9341_v17  ;;  %v9469_v17 = vor.u32 %v12992_v50, %v9466_v20  ;;  %v9450_v50 = vld [vmem:[%s14519_s12 + $0x5d8] sm:$0xf0]  ;;  %v9317_v20 = vor.u32 %v12954_v5, %v9314_v38  ;;  %v9298_v10 = vld [vmem:[%s14519_s12 + $0x4a8] sm:$0xf0] }
 0x22c   : > { %5826 = vmatpush.bf16.msrb.mxu1 %v9157_v31  ;;  %v9453_v8 = vor.u32 %v12988_v56, %v9450_v50  ;;  %v9506_v31 = vld [vmem:[%s14519_s12 + $0x648] sm:$0xf0]  ;;  %v15661_v49 = vpop.f32.mrf.mxu1  ;;  %v9498_v38 = vld [vmem:[%s14519_s12 + $0x638] sm:$0xf0]  ;;  %v12948_v56 = vld [vmem:[%s14519_s12 + $0x494] sm:$0xf] }
 0x22d   : > { %5839 = vmatpush.bf16.msrb.mxu3 %v9221_v3  ;;  %5814 = vmatmul.bf16.vlgmr.msrb.gmra.mxu0 %v14698_v33  ;;  %v15655_v33 = vpop.f32.mrf.mxu0  ;;  %v9290_v50 = vld [vmem:[%s14519_s12 + $0x498] sm:$0xf0] }
 0x22e   : > { %5858 = vmatpush.bf16.msra.mxu0 %v9405_v21  ;;  %v9514_v21 = vld [vmem:[%s14519_s12 + $0x658] sm:$0xf0] }
 0x22f   : > { %5846 = vmatpush.bf16.msra.mxu2 %v9333_v29  ;;  %v9378_v29 = vld [vmem:[%s14519_s12 + $0x548] sm:$0xf0]  ;;  %5827 = vmatmul.bf16.vlgmr.msrb.gmra.mxu1 %v14710_v46  ;;  %v9517_v3 = vor.u32 %v13004_v55, %v9514_v21  ;;  %v9309_v46 = vor.u32 %v12952_v62, %v9306_v47  ;;  %v9301_v55 = vor.u32 %v12950_v28, %v9298_v10  ;;  %v13024_v10 = vld [vmem:[%s14519_s12 + $0x6f4] sm:$0xf] }
 0x230   : > { %5871 = vmatpush.bf16.msra.mxu1 %v9469_v17  ;;  %5840 = vmatmul.bf16.vlgmr.msrb.gmra.mxu3 %v14768_v11  ;;  %v9381_v11 = vor.u32 %v12970_v4, %v9378_v29  ;;  %v9442_v17 = vld [vmem:[%s14519_s12 + $0x5c8] sm:$0xf0]  ;;  %v12998_v29 = vld [vmem:[%s14519_s12 + $0x624] sm:$0xf] }
 0x231   : > { %5884 = vmatpush.bf16.msra.mxu3 %v9533_v41  ;;  %v12986_v41 = vld [vmem:[%s14519_s12 + $0x5c4] sm:$0xf]  ;;  %v9362_v21 = vld [vmem:[%s14519_s12 + $0x528] sm:$0xf0]  ;;  %v15672_v62 = vpop.f32.mrf.mxu2 }
 0x232   : > { %5859 = vmatpush.bf16.msra.mxu0 %v9397_v40  ;;  %v9370_v40 = vld [vmem:[%s14519_s12 + $0x538] sm:$0xf0]  ;;  %v9445_v35 = vor.u32 %v12986_v41, %v9442_v17 }
 0x233   : > { %5847 = vmatpush.bf16.msra.mxu2 %v9325_v57  ;;  %v9509_v57 = vor.u32 %v13002_v52, %v9506_v31  ;;  %v9373_v5 = vor.u32 %v12968_v45, %v9370_v40  ;;  %v9426_v52 = vld [vmem:[%s14519_s12 + $0x5a8] sm:$0xf0]  ;;  %v12964_v31 = vld [vmem:[%s14519_s12 + $0x514] sm:$0xf]  ;;  %v9354_v41 = vld [vmem:[%s14519_s12 + $0x518] sm:$0xf0] }
 0x234   : > { %5872 = vmatpush.bf16.msra.mxu1 %v9461_v32  ;;  %v9434_v32 = vld [vmem:[%s14519_s12 + $0x5b8] sm:$0xf0]  ;;  %v12946_v45 = vld [vmem:[%s14519_s12 + $0x484] sm:$0xf]  ;;  %v9282_v40 = vld [vmem:[%s14519_s12 + $0x488] sm:$0xf0] }
 0x235   : > { %5885 = vmatpush.bf16.msra.mxu3 %v9525_v15  ;;  %v12984_v15 = vld [vmem:[%s14519_s12 + $0x5b4] sm:$0xf]  ;;  %v5596_v17 = vpop.f32.mrf.mxu0 }
 0x236   : > { %5860 = vmatpush.bf16.msra.mxu0 %v9389_v7  ;;  %v12966_v7 = vld [vmem:[%s14519_s12 + $0x524] sm:$0xf]  ;;  %v9437_v4 = vor.u32 %v12984_v15, %v9434_v32  ;;  %v9482_v15 = vld [vmem:[%s14519_s12 + $0x618] sm:$0xf0]  ;;  %v12980_v32 = vld [vmem:[%s14519_s12 + $0x594] sm:$0xf] }
 0x237   : > { %5848 = vmatpush.bf16.msra.mxu2 %v9317_v20  ;;  %v9501_v20 = vor.u32 %v13000_v42, %v9498_v38  ;;  %v9365_v47 = vor.u32 %v12966_v7, %v9362_v21  ;;  %v12996_v42 = vld [vmem:[%s14519_s12 + $0x614] sm:$0xf]  ;;  %v9357_v38 = vor.u32 %v12964_v31, %v9354_v41  ;;  %v9285_v7 = vor.u32 %v12946_v45, %v9282_v40  ;;  %v12962_v21 = vld [vmem:[%s14519_s12 + $0x504] sm:$0xf]  ;;  %v9474_v31 = vld [vmem:[%s14519_s12 + $0x608] sm:$0xf0] }
 0x238   : > { %5873 = vmatpush.bf16.msra.mxu1 %v9453_v8  ;;  %v12982_v8 = vld [vmem:[%s14519_s12 + $0x5a4] sm:$0xf]  ;;  %v9410_v17 = vld [vmem:[%s14519_s12 + $0x588] sm:$0xf0] }
 0x239   : > { %5886 = vmatpush.bf16.msra.mxu3 %v9517_v3  ;;  %v9490_v3 = vld [vmem:[%s14519_s12 + $0x628] sm:$0xf0]  ;;  %v12978_v41 = vld [vmem:[%s14519_s12 + $0x584] sm:$0xf]  ;;  %v5622_v45 = vpop.f32.mrf.mxu2 }
 0x23a   : > { %5861 = vmatpush.bf16.msra.mxu0 %v9381_v11  ;;  %v9293_v11 = vor.u32 %v12948_v56, %v9290_v50  ;;  %v9493_v28 = vor.u32 %v12998_v29, %v9490_v3  ;;  %v9346_v56 = vld [vmem:[%s14519_s12 + $0x508] sm:$0xf0]  ;;  %v9485_v29 = vor.u32 %v12996_v42, %v9482_v15  ;;  %v9722_v15 = vld [vmem:[%s14519_s12 + $0x7f8] sm:$0xf0] }
 0x23b   : > { %5849 = vmatpush.bf16.msra.mxu2 %v9309_v46  ;;  %v15679_v46 = vpop.f32.mrf.mxu3  ;;  %v9586_v3 = vld [vmem:[%s14519_s12 + $0x6e8] sm:$0xf0] }
 0x23c   : > { %5874 = vmatpush.bf16.msra.mxu1 %v9445_v35  ;;  %v9429_v35 = vor.u32 %v12982_v8, %v9426_v52  ;;  %v12994_v52 = vld [vmem:[%s14519_s12 + $0x604] sm:$0xf]  ;;  %v9650_v42 = vld [vmem:[%s14519_s12 + $0x768] sm:$0xf0] }
 0x23d   : > { %5887 = vmatpush.bf16.msra.mxu3 %v9509_v57  ;;  %v9594_v57 = vld [vmem:[%s14519_s12 + $0x6f8] sm:$0xf0] }
 0x23e   : > { %5862 = vmatpush.bf16.msra.mxu0 %v9373_v5  ;;  %v5609_v5 = vpop.f32.mrf.mxu1  ;;  %v9597_v50 = vor.u32 %v13024_v10, %v9594_v57  ;;  %v9786_v10 = vld [vmem:[%s14519_s12 + $0x878] sm:$0xf0]  ;;  %v13038_v57 = vld [vmem:[%s14519_s12 + $0x764] sm:$0xf] }
 0x23f   : > { %5850 = vmatpush.bf16.msra.mxu2 %v9301_v55  ;;  %v9418_v55 = vld [vmem:[%s14519_s12 + $0x598] sm:$0xf0]  ;;  %v13056_v5 = vld [vmem:[%s14519_s12 + $0x7f4] sm:$0xf] }
 0x240   : > { %5875 = vmatpush.bf16.msra.mxu1 %v9437_v4  ;;  %v9658_v4 = vld [vmem:[%s14519_s12 + $0x778] sm:$0xf0]  ;;  %v9421_v8 = vor.u32 %v12980_v32, %v9418_v55  ;;  %v9477_v32 = vor.u32 %v12994_v52, %v9474_v31  ;;  %v13020_v55 = vld [vmem:[%s14519_s12 + $0x6d4] sm:$0xf]  ;;  %v13054_v52 = vld [vmem:[%s14519_s12 + $0x7e4] sm:$0xf] }
 0x241   : > { %5888 = vmatpush.bf16.msra.mxu3 %v9501_v20  ;;  %v13040_v20 = vld [vmem:[%s14519_s12 + $0x774] sm:$0xf]  ;;  %v9714_v31 = vld [vmem:[%s14519_s12 + $0x7e8] sm:$0xf0] }
 0x242   : > { %5863 = vmatpush.bf16.msra.mxu0 %v9365_v47  ;;  %v13022_v47 = vld [vmem:[%s14519_s12 + $0x6e4] sm:$0xf]  ;;  %v9661_v40 = vor.u32 %v13040_v20, %v9658_v4  ;;  %v9725_v20 = vor.u32 %v13056_v5, %v9722_v15  ;;  %v9717_v45 = vor.u32 %v13054_v52, %v9714_v31  ;;  %v13016_v5 = vld [vmem:[%s14519_s12 + $0x6b4] sm:$0xf]  ;;  %v9562_v15 = vld [vmem:[%s14519_s12 + $0x6b8] sm:$0xf0] }
 0x243   : > { %5851 = vmatpush.bf16.msra.mxu2 %v9293_v11  ;;  %v9349_v11 = vor.u32 %v12962_v21, %v9346_v56  ;;  %v9413_v21 = vor.u32 %v12978_v41, %v9410_v17  ;;  %v13070_v4 = vld [vmem:[%s14519_s12 + $0x864] sm:$0xf] }
 0x244   : > { %5876 = vmatpush.bf16.msra.mxu1 %v9429_v35  ;;  %v9589_v35 = vor.u32 %v13022_v47, %v9586_v3  ;;  %v9778_v47 = vld [vmem:[%s14519_s12 + $0x868] sm:$0xf0] }
 0x245   : > { %5889 = vmatpush.bf16.msra.mxu3 %v9493_v28  ;;  %v13072_v28 = vld [vmem:[%s14519_s12 + $0x874] sm:$0xf]  ;;  %v9781_v41 = vor.u32 %v13070_v4, %v9778_v47  ;;  %v13014_v47 = vld [vmem:[%s14519_s12 + $0x6a4] sm:$0xf] }
 0x246   : > { %5864 = vmatpush.bf16.msra.mxu0 %v9357_v38  ;;  %v5635_v38 = vpop.f32.mrf.mxu3  ;;  %v9789_v56 = vor.u32 %v13072_v28, %v9786_v10  ;;  %v9770_v28 = vld [vmem:[%s14519_s12 + $0x858] sm:$0xf0]  ;;  %v13034_v10 = vld [vmem:[%s14519_s12 + $0x744] sm:$0xf] }
 0x247   : > { %5852 = vmatpush.bf16.msra.mxu2 %v9285_v7  ;;  %v9578_v7 = vld [vmem:[%s14519_s12 + $0x6d8] sm:$0xf0] }
 0x248   : > { %5877 = vmatpush.bf16.msra.mxu1 %v9421_v8  ;;  %v9581_v3 = vor.u32 %v13020_v55, %v9578_v7  ;;  %v9642_v8 = vld [vmem:[%s14519_s12 + $0x758] sm:$0xf0]  ;;  %v13066_v55 = vld [vmem:[%s14519_s12 + $0x844] sm:$0xf]  ;;  %v9762_v7 = vld [vmem:[%s14519_s12 + $0x848] sm:$0xf0] }
 0x249   : > { %5890 = vmatpush.bf16.msra.mxu3 %v9485_v29  ;;  %v13036_v29 = vld [vmem:[%s14519_s12 + $0x754] sm:$0xf] }
 0x24a   : > { %5853 = vmatmul.bf16.vlgmr.msra.gmra.mxu2 %v14776_v22  ;;  %5865 = vmatpush.bf16.msra.mxu0 %v9349_v11  ;;  %v13018_v22 = vld [vmem:[%s14519_s12 + $0x6c4] sm:$0xf]  ;;  %v9570_v11 = vld [vmem:[%s14519_s12 + $0x6c8] sm:$0xf0]  ;;  %v9645_v17 = vor.u32 %v13036_v29, %v9642_v8  ;;  %v15733_v4 = vpop.f32.mrf.mxu0  ;;  %v9765_v8 = vor.u32 %v13066_v55, %v9762_v7  ;;  %v9610_v55 = vld [vmem:[%s14519_s12 + $0x718] sm:$0xf0] }
 0x24b   : > { %5897 = vmatpush.bf16.msrb.mxu2 %v9597_v50  ;;  %v9653_v50 = vor.u32 %v13038_v57, %v9650_v42  ;;  %v9573_v57 = vor.u32 %v13018_v22, %v9570_v11  ;;  %v13052_v42 = vld [vmem:[%s14519_s12 + $0x7d4] sm:$0xf]  ;;  %v9554_v29 = vld [vmem:[%s14519_s12 + $0x6a8] sm:$0xf0]  ;;  %v13046_v7 = vld [vmem:[%s14519_s12 + $0x7a4] sm:$0xf] }
 0x24c   : > { %5878 = vmatpush.bf16.msra.mxu1 %v9413_v21  ;;  %v13032_v21 = vld [vmem:[%s14519_s12 + $0x734] sm:$0xf]  ;;  %v15739_v52 = vpop.f32.mrf.mxu1 }
 0x24d   : > { %5891 = vmatpush.bf16.msra.mxu3 %v9477_v32  ;;  %5866 = vmatmul.bf16.vlgmr.msra.gmra.mxu0 %v14772_v16  ;;  %v9706_v16 = vld [vmem:[%s14519_s12 + $0x7d8] sm:$0xf0]  ;;  %v13064_v11 = vld [vmem:[%s14519_s12 + $0x834] sm:$0xf] }
 0x24e   : > { %5910 = vmatpush.bf16.msrb.mxu0 %v9661_v40  ;;  %v13068_v40 = vld [vmem:[%s14519_s12 + $0x854] sm:$0xf]  ;;  %v9709_v32 = vor.u32 %v13052_v42, %v9706_v16 }
 0x24f   : > { %5898 = vmatpush.bf16.msrb.mxu2 %v9589_v35  ;;  %v9634_v35 = vld [vmem:[%s14519_s12 + $0x748] sm:$0xf0]  ;;  %5879 = vmatmul.bf16.vlgmr.msra.gmra.mxu1 %v14780_v25  ;;  %v9773_v38 = vor.u32 %v13068_v40, %v9770_v28  ;;  %v13050_v25 = vld [vmem:[%s14519_s12 + $0x7c4] sm:$0xf]  ;;  %v13012_v28 = vld [vmem:[%s14519_s12 + $0x694] sm:$0xf] }
 0x250   : > { %5923 = vmatpush.bf16.msrb.mxu1 %v9725_v20  ;;  %5892 = vmatmul.bf16.vlgmr.msra.gmra.mxu3 %v14844_v6  ;;  %v9637_v6 = vor.u32 %v13034_v10, %v9634_v35  ;;  %v9698_v20 = vld [vmem:[%s14519_s12 + $0x7c8] sm:$0xf0]  ;;  %v9546_v10 = vld [vmem:[%s14519_s12 + $0x698] sm:$0xf0] }
 0x251   : > { %5936 = vmatpush.bf16.msrb.mxu3 %v9789_v56  ;;  %v9565_v56 = vor.u32 %v13016_v5, %v9562_v15  ;;  %v9701_v22 = vor.u32 %v13050_v25, %v9698_v20  ;;  %v9618_v40 = vld [vmem:[%s14519_s12 + $0x728] sm:$0xf0]  ;;  %v13062_v5 = vld [vmem:[%s14519_s12 + $0x824] sm:$0xf] }
 0x252   : > { %5911 = vmatpush.bf16.msrb.mxu0 %v9653_v50  ;;  %v9626_v50 = vld [vmem:[%s14519_s12 + $0x738] sm:$0xf0]  ;;  %v9746_v15 = vld [vmem:[%s14519_s12 + $0x828] sm:$0xf0]  ;;  %v5648_v25 = vpop.f32.mrf.mxu0 }
 0x253   : > { %5899 = vmatpush.bf16.msrb.mxu2 %v9581_v3  ;;  %v5569_v3 = vadd.f32 %v15595_v44, %v15585_v61  ;;  %v9629_v31 = vor.u32 %v13032_v21, %v9626_v50  ;;  %v13048_v61 = vld [vmem:[%s14519_s12 + $0x7b4] sm:$0xf]  ;;  %v9690_v44 = vld [vmem:[%s14519_s12 + $0x7b8] sm:$0xf0]  ;;  %v9682_v21 = vld [vmem:[%s14519_s12 + $0x7a8] sm:$0xf0]  ;;  %v15761_v20 = vpop.f32.mrf.mxu3 }
 0x254   : > { %5924 = vmatpush.bf16.msrb.mxu1 %v9717_v45  ;;  %v9557_v45 = vor.u32 %v13014_v47, %v9554_v29  ;;  %v9693_v16 = vor.u32 %v13048_v61, %v9690_v44  ;;  %v9538_v50 = vld [vmem:[%s14519_s12 + $0x688] sm:$0xf0]  ;;  %v9749_v47 = vor.u32 %v13062_v5, %v9746_v15  ;;  %v9850_v29 = vld [vmem:[%s14519_s12 + $0x8f8] sm:$0xf0]  ;;  %v13104_v61 = vld [vmem:[%s14519_s12 + $0x974] sm:$0xf] }
 0x255   : > { %5937 = vmatpush.bf16.msrb.mxu3 %v9781_v41  ;;  %v9754_v41 = vld [vmem:[%s14519_s12 + $0x838] sm:$0xf0]  ;;  %v13058_v15 = vld [vmem:[%s14519_s12 + $0x804] sm:$0xf] }
 0x256   : > { %5912 = vmatpush.bf16.msrb.mxu0 %v9645_v17  ;;  %v13030_v17 = vld [vmem:[%s14519_s12 + $0x724] sm:$0xf]  ;;  %v9757_v35 = vor.u32 %v13064_v11, %v9754_v41  ;;  %v5661_v11 = vpop.f32.mrf.mxu1 }
 0x257   : > { %5900 = vmatpush.bf16.msrb.mxu2 %v9573_v57  ;;  %v5582_v57 = vadd.f32 %v15601_v39, %v5569_v3  ;;  %v9621_v42 = vor.u32 %v13030_v17, %v9618_v40  ;;  %v9549_v39 = vor.u32 %v13012_v28, %v9546_v10  ;;  %v9602_v40 = vld [vmem:[%s14519_s12 + $0x708] sm:$0xf0]  ;;  %v9914_v28 = vld [vmem:[%s14519_s12 + $0x978] sm:$0xf0]  ;;  %v13044_v10 = vld [vmem:[%s14519_s12 + $0x794] sm:$0xf] }
 0x258   : > { %5925 = vmatpush.bf16.msrb.mxu1 %v9709_v32  ;;  %v15754_v32 = vpop.f32.mrf.mxu2  ;;  %v13042_v25 = vld [vmem:[%s14519_s12 + $0x784] sm:$0xf]  ;;  %v13120_v11 = vld [vmem:[%s14519_s12 + $0x9f4] sm:$0xf] }
 0x259   : > { %5938 = vmatpush.bf16.msrb.mxu3 %v9773_v38  ;;  %v13028_v38 = vld [vmem:[%s14519_s12 + $0x714] sm:$0xf] }
 0x25a   : > { %5913 = vmatpush.bf16.msrb.mxu0 %v9637_v6  ;;  %v5595_v6 = vadd.f32 %v15655_v33, %v5582_v57  ;;  %v13088_v33 = vld [vmem:[%s14519_s12 + $0x8f4] sm:$0xf]  ;;  %v9613_v3 = vor.u32 %v13028_v38, %v9610_v55  ;;  %v9674_v57 = vld [vmem:[%s14519_s12 + $0x798] sm:$0xf0]  ;;  %v9730_v38 = vld [vmem:[%s14519_s12 + $0x808] sm:$0xf0] }
 0x25b   : > { %5901 = vmatpush.bf16.msrb.mxu2 %v9565_v56  ;;  %v13010_v56 = vld [vmem:[%s14519_s12 + $0x684] sm:$0xf]  ;;  %v9853_v44 = vor.u32 %v13088_v33, %v9850_v29  ;;  %v13136_v55 = vld [vmem:[%s14519_s12 + $0xa74] sm:$0xf]  ;;  %v9733_v29 = vor.u32 %v13058_v15, %v9730_v38 }
 0x25c   : > { %5926 = vmatpush.bf16.msrb.mxu1 %v9701_v22  ;;  %v9738_v22 = vld [vmem:[%s14519_s12 + $0x818] sm:$0xf0]  ;;  %v5608_v41 = vadd.f32 %v15661_v49, %v5595_v6  ;;  %v9541_v17 = vor.u32 %v13010_v56, %v9538_v50  ;;  %v9842_v49 = vld [vmem:[%s14519_s12 + $0x8e8] sm:$0xf0]  ;;  %v9917_v6 = vor.u32 %v13104_v61, %v9914_v28  ;;  %v13132_v15 = vld [vmem:[%s14519_s12 + $0xa54] sm:$0xf] }
 0x25d   : > { %5939 = vmatpush.bf16.msrb.mxu3 %v9765_v8  ;;  %v9685_v8 = vor.u32 %v13046_v7, %v9682_v21  ;;  %v10042_v7 = vld [vmem:[%s14519_s12 + $0xa78] sm:$0xf0]  ;;  %v9906_v50 = vld [vmem:[%s14519_s12 + $0x968] sm:$0xf0] }
 0x25e   : > { %5914 = vmatpush.bf16.msrb.mxu0 %v9629_v31  ;;  %v13060_v31 = vld [vmem:[%s14519_s12 + $0x814] sm:$0xf]  ;;  %v10034_v61 = vld [vmem:[%s14519_s12 + $0xa68] sm:$0xf0]  ;;  %v9898_v28 = vld [vmem:[%s14519_s12 + $0x958] sm:$0xf0] }
 0x25f   : > { %5902 = vmatpush.bf16.msrb.mxu2 %v9557_v45  ;;  %v13026_v45 = vld [vmem:[%s14519_s12 + $0x704] sm:$0xf] }
 0x260   : > { %5927 = vmatpush.bf16.msrb.mxu1 %v9693_v16  ;;  %v13086_v16 = vld [vmem:[%s14519_s12 + $0x8e4] sm:$0xf]  ;;  %v9605_v5 = vor.u32 %v13026_v45, %v9602_v40  ;;  %v5674_v21 = vpop.f32.mrf.mxu2 }
 0x261   : > { %5940 = vmatpush.bf16.msrb.mxu3 %v9757_v35  ;;  %v5621_v35 = vadd.f32 %v15672_v62, %v5608_v41  ;;  %v13102_v62 = vld [vmem:[%s14519_s12 + $0x964] sm:$0xf]  ;;  %v9845_v56 = vor.u32 %v13086_v16, %v9842_v49  ;;  %v9978_v41 = vld [vmem:[%s14519_s12 + $0x9f8] sm:$0xf0]  ;;  %v9970_v16 = vld [vmem:[%s14519_s12 + $0x9e8] sm:$0xf0] }
 0x262   : > { %5915 = vmatpush.bf16.msrb.mxu0 %v9621_v42  ;;  %v9741_v42 = vor.u32 %v13060_v31, %v9738_v22  ;;  %v5687_v31 = vpop.f32.mrf.mxu3  ;;  %v10045_v22 = vor.u32 %v13136_v55, %v10042_v7  ;;  %v13134_v40 = vld [vmem:[%s14519_s12 + $0xa64] sm:$0xf]  ;;  %v13080_v7 = vld [vmem:[%s14519_s12 + $0x8b4] sm:$0xf] }
 0x263   : > { %5903 = vmatpush.bf16.msrb.mxu2 %v9549_v39  ;;  %v9677_v39 = vor.u32 %v13044_v10, %v9674_v57  ;;  %v5634_v33 = vadd.f32 %v15679_v46, %v5621_v35  ;;  %v9909_v46 = vor.u32 %v13102_v62, %v9906_v50  ;;  %v9981_v10 = vor.u32 %v13120_v11, %v9978_v41  ;;  %v9826_v57 = vld [vmem:[%s14519_s12 + $0x8c8] sm:$0xf0]  ;;  %v9818_v62 = vld [vmem:[%s14519_s12 + $0x8b8] sm:$0xf0]  ;;  %v13114_v41 = vld [vmem:[%s14519_s12 + $0x9c4] sm:$0xf] }
 0x264   : > { %5928 = vmatpush.bf16.msrb.mxu1 %v9685_v8  ;;  %v9834_v8 = vld [vmem:[%s14519_s12 + $0x8d8] sm:$0xf0]  ;;  %v10037_v35 = vor.u32 %v13134_v40, %v10034_v61  ;;  %v9810_v31 = vld [vmem:[%s14519_s12 + $0x8a8] sm:$0xf0] }
 0x265   : > { %5941 = vmatpush.bf16.msrb.mxu3 %v9749_v47  ;;  %v9666_v47 = vld [vmem:[%s14519_s12 + $0x788] sm:$0xf0]  ;;  %v10010_v40 = vld [vmem:[%s14519_s12 + $0xa38] sm:$0xf0] }
 0x266   : > { %5916 = vmatpush.bf16.msrb.mxu0 %v9613_v3  ;;  %v13084_v3 = vld [vmem:[%s14519_s12 + $0x8d4] sm:$0xf]  ;;  %v9669_v45 = vor.u32 %v13042_v25, %v9666_v47  ;;  %v10018_v25 = vld [vmem:[%s14519_s12 + $0xa48] sm:$0xf0]  ;;  %v9821_v47 = vor.u32 %v13080_v7, %v9818_v62  ;;  %v9866_v62 = vld [vmem:[%s14519_s12 + $0x918] sm:$0xf0] }
 0x267   : > { %5904 = vmatpush.bf16.msrb.mxu2 %v9541_v17  ;;  %v5647_v17 = vadd.f32 %v15733_v4, %v5634_v33  ;;  %v13082_v4 = vld [vmem:[%s14519_s12 + $0x8c4] sm:$0xf]  ;;  %v13096_v33 = vld [vmem:[%s14519_s12 + $0x934] sm:$0xf] }
 0x268   : > { %5929 = vmatpush.bf16.msrb.mxu1 %v9677_v39  ;;  %v9829_v38 = vor.u32 %v13082_v4, %v9826_v57  ;;  %v9890_v39 = vld [vmem:[%s14519_s12 + $0x948] sm:$0xf0]  ;;  %v13092_v7 = vld [vmem:[%s14519_s12 + $0x914] sm:$0xf] }
 0x269   : > { %5942 = vmatpush.bf16.msrb.mxu3 %v9741_v42  ;;  %v13118_v42 = vld [vmem:[%s14519_s12 + $0x9e4] sm:$0xf]  ;;  %v5660_v49 = vadd.f32 %v15739_v52, %v5647_v17  ;;  %v9954_v17 = vld [vmem:[%s14519_s12 + $0x9c8] sm:$0xf0] }
 0x26a   : > { %5905 = vmatmul.bf16.vlgmr.msrb.gmra.mxu2 %v14852_v19  ;;  %5917 = vmatpush.bf16.msrb.mxu0 %v9605_v5  ;;  %v13100_v19 = vld [vmem:[%s14519_s12 + $0x954] sm:$0xf]  ;;  %v9973_v52 = vor.u32 %v13118_v42, %v9970_v16  ;;  %v9957_v57 = vor.u32 %v13114_v41, %v9954_v17  ;;  %v9802_v42 = vld [vmem:[%s14519_s12 + $0x898] sm:$0xf0]  ;;  %v6342_v16 = vstv %s15813_s23  ;;  %v13090_v41 = vld [vmem:[%s14519_s12 + $0x904] sm:$0xf] }
 0x26b   : > { %5949 = vmatpush.bf16.msra.mxu2 %v9853_v44  ;;  %v9837_v44 = vor.u32 %v13084_v3, %v9834_v8  ;;  %v9901_v5 = vor.u32 %v13100_v19, %v9898_v28  ;;  %v5673_v55 = vadd.f32 %v15754_v32, %v5660_v49  ;;  %v13130_v32 = vld [vmem:[%s14519_s12 + $0xa44] sm:$0xf]  ;;  %v9874_v28 = vld [vmem:[%s14519_s12 + $0x928] sm:$0xf0] }
 0x26c   : > { %5930 = vmatpush.bf16.msrb.mxu1 %v9669_v45  ;;  %v13078_v8 = vld [vmem:[%s14519_s12 + $0x8a4] sm:$0xf]  ;;  %v10021_v11 = vor.u32 %v13130_v32, %v10018_v25  ;;  %v5711_v61 = vpop.f32.mrf.mxu1  ;;  %v10106_v25 = vld [vmem:[%s14519_s12 + $0xaf8] sm:$0xf0]  ;;  %v9858_v17 = vld [vmem:[%s14519_s12 + $0x908] sm:$0xf0] }
 0x26d   : > { %5943 = vmatpush.bf16.msrb.mxu3 %v9733_v29  ;;  %5918 = vmatmul.bf16.vlgmr.msrb.gmra.mxu0 %v14848_v12  ;;  %v10026_v12 = vld [vmem:[%s14519_s12 + $0xa58] sm:$0xf0]  ;;  %v13094_v19 = vld [vmem:[%s14519_s12 + $0x924] sm:$0xf]  ;;  %v5724_v4 = vpop.f32.mrf.mxu2 }
 0x26e   : > { %5962 = vmatpush.bf16.msra.mxu0 %v9917_v6  ;;  %v13098_v6 = vld [vmem:[%s14519_s12 + $0x944] sm:$0xf]  ;;  %v10029_v21 = vor.u32 %v13132_v15, %v10026_v12  ;;  %v9882_v29 = vld [vmem:[%s14519_s12 + $0x938] sm:$0xf0] }
 0x26f   : > { %5950 = vmatpush.bf16.msra.mxu2 %v9845_v56  ;;  %5931 = vmatmul.bf16.vlgmr.msrb.gmra.mxu1 %v14856_v24  ;;  %v9962_v56 = vld [vmem:[%s14519_s12 + $0x9d8] sm:$0xf0]  ;;  %v9893_v50 = vor.u32 %v13098_v6, %v9890_v39  ;;  %v5686_v24 = vadd.f32 %v15761_v20, %v5673_v55  ;;  %v9885_v45 = vor.u32 %v13096_v33, %v9882_v29  ;;  %v13128_v20 = vld [vmem:[%s14519_s12 + $0xa34] sm:$0xf]  ;;  %v13126_v6 = vld [vmem:[%s14519_s12 + $0xa24] sm:$0xf] }
 0x270   : > { %5944 = vmatmul.bf16.vlgmr.msrb.gmra.mxu3 %v14920_v14  ;;  %5975 = vmatpush.bf16.msra.mxu1 %v9981_v10  ;;  %v13116_v14 = vld [vmem:[%s14519_s12 + $0x9d4] sm:$0xf]  ;;  %v10013_v49 = vor.u32 %v13128_v20, %v10010_v40  ;;  %v9946_v15 = vld [vmem:[%s14519_s12 + $0x9b8] sm:$0xf0]  ;;  %v10002_v39 = vld [vmem:[%s14519_s12 + $0xa28] sm:$0xf0] }
 0x271   : > { %5988 = vmatpush.bf16.msra.mxu3 %v10045_v22  ;;  %v9965_v3 = vor.u32 %v13116_v14, %v9962_v56  ;;  %v5698_v22 = vpop.f32.mrf.mxu0  ;;  %v9794_v56 = vld [vmem:[%s14519_s12 + $0x888] sm:$0xf0]  ;;  %v10005_v32 = vor.u32 %v13126_v6, %v10002_v39  ;;  %v13150_v40 = vld [vmem:[%s14519_s12 + $0xae4] sm:$0xf] }
 0x272   : > { %5963 = vmatpush.bf16.msra.mxu0 %v9909_v46  ;;  %v5699_v46 = vadd.f32 %v5698_v22, %v5686_v24  ;;  %v9938_v33 = vld [vmem:[%s14519_s12 + $0x9a8] sm:$0xf0]  ;;  %v13166_v39 = vld [vmem:[%s14519_s12 + $0xb64] sm:$0xf] }
 0x273   : > { %5951 = vmatpush.bf16.msra.mxu2 %v9837_v44  ;;  %v9813_v44 = vor.u32 %v13078_v8, %v9810_v31  ;;  %v13124_v8 = vld [vmem:[%s14519_s12 + $0xa14] sm:$0xf]  ;;  %v9994_v31 = vld [vmem:[%s14519_s12 + $0xa18] sm:$0xf0]  ;;  %v15851_v22 = vpop.f32.mrf.mxu3 }
 0x274   : > { %5976 = vmatpush.bf16.msra.mxu1 %v9973_v52  ;;  %v5712_v10 = vadd.f32 %v5711_v61, %v5699_v46  ;;  %v13074_v52 = vld [vmem:[%s14519_s12 + $0x884] sm:$0xf]  ;;  %v5713_v46 = vpop.f32.mrf.mxu1  ;;  %v13168_v61 = vld [vmem:[%s14519_s12 + $0xb74] sm:$0xf] }
 0x275   : > { %5989 = vmatpush.bf16.msra.mxu3 %v10037_v35  ;;  %v13076_v35 = vld [vmem:[%s14519_s12 + $0x894] sm:$0xf]  ;;  %v13182_v46 = vld [vmem:[%s14519_s12 + $0xbe4] sm:$0xf] }
 0x276   : > { %5964 = vmatpush.bf16.msra.mxu0 %v9901_v5  ;;  %v13112_v5 = vld [vmem:[%s14519_s12 + $0x9b4] sm:$0xf]  ;;  %v5725_v12 = vadd.f32 %v5724_v4, %v5712_v10  ;;  %v9805_v55 = vor.u32 %v13076_v35, %v9802_v42  ;;  %v10098_v10 = vld [vmem:[%s14519_s12 + $0xae8] sm:$0xf0]  ;;  %v9861_v35 = vor.u32 %v13090_v41, %v9858_v17  ;;  %v13122_v42 = vld [vmem:[%s14519_s12 + $0xa04] sm:$0xf] }
 0x277   : > { %5952 = vmatpush.bf16.msra.mxu2 %v9829_v38  ;;  %v9877_v38 = vor.u32 %v13094_v19, %v9874_v28  ;;  %v9949_v14 = vor.u32 %v13112_v5, %v9946_v15  ;;  %v5726_v19 = vpop.f32.mrf.mxu2  ;;  %v9997_v28 = vor.u32 %v13124_v8, %v9994_v31  ;;  %v13108_v4 = vld [vmem:[%s14519_s12 + $0x994] sm:$0xf]  ;;  %v13146_v31 = vld [vmem:[%s14519_s12 + $0xac4] sm:$0xf] }
 0x278   : > { %5977 = vmatpush.bf16.msra.mxu1 %v9965_v3  ;;  %vm6340_vm1 = vcmp.ge.f32.partialorder %v5725_v12, 0.0  ;;  %v9869_v3 = vor.u32 %v13092_v7, %v9866_v62  ;;  %v13200_v15 = vld [vmem:[%s14519_s12 + $0xc74] sm:$0xf]  ;;  %v10090_v62 = vld [vmem:[%s14519_s12 + $0xad8] sm:$0xf0] }
 0x279   : > { %5990 = vmatpush.bf16.msra.mxu3 %v10029_v21  ;;  %v6343_v21 = vmul.f32 %v6342_v16, %v5725_v12  ;;  %v5700_v29 = vpop.f32.mrf.mxu0  ;;  %v13148_v7 = vld [vmem:[%s14519_s12 + $0xad4] sm:$0xf]  ;;  %v10146_v19 = vld [vmem:[%s14519_s12 + $0xb48] sm:$0xf0] }
 0x27a   : > { %5965 = vmatpush.bf16.msra.mxu0 %v9893_v50  ;;  %v13152_v50 = vld [vmem:[%s14519_s12 + $0xaf4] sm:$0xf]  ;;  %v10290_v29 = vld [vmem:[%s14519_s12 + $0xc68] sm:$0xf0] }
 0x27b   : > { %5953 = vmatpush.bf16.msra.mxu2 %v9821_v47  ;;  %v13110_v47 = vld [vmem:[%s14519_s12 + $0x9a4] sm:$0xf]  ;;  %v6345_v24 = vsel %vm6340_vm1, %v5725_v12, %v6343_v21  ;;  %v10298_v12 = vld [vmem:[%s14519_s12 + $0xc78] sm:$0xf0] }
 0x27c   : > { %5978 = vmatpush.bf16.msra.mxu1 %v9957_v57  ;;  %6352 = vst [vmem:[%s15855_s18] sm:$0xff] %v6345_v24  ;;  %v9941_v20 = vor.u32 %v13110_v47, %v9938_v33  ;;  %v9930_v57 = vld [vmem:[%s14519_s12 + $0x998] sm:$0xf0]  ;;  %v10301_v21 = vor.u32 %v13200_v15, %v10298_v12  ;;  %v13198_v33 = vld [vmem:[%s14519_s12 + $0xc64] sm:$0xf]  ;;  %v13164_v24 = vld [vmem:[%s14519_s12 + $0xb54] sm:$0xf] }
 0x27d   : > { %5991 = vmatpush.bf16.msra.mxu3 %v10021_v11  ;;  %v9797_v11 = vor.u32 %v13074_v52, %v9794_v56  ;;  %v9933_v6 = vor.u32 %v13108_v4, %v9930_v57  ;;  %v9922_v56 = vld [vmem:[%s14519_s12 + $0x988] sm:$0xf0]  ;;  %v10234_v47 = vld [vmem:[%s14519_s12 + $0xbf8] sm:$0xf0]  ;;  %v10293_v17 = vor.u32 %v13198_v33, %v10290_v29  ;;  %v13194_v15 = vld [vmem:[%s14519_s12 + $0xc44] sm:$0xf] }
 0x27e   : > { %5966 = vmatpush.bf16.msra.mxu0 %v9885_v45  ;;  %v10109_v45 = vor.u32 %v13152_v50, %v10106_v25  ;;  %v13184_v50 = vld [vmem:[%s14519_s12 + $0xbf4] sm:$0xf]  ;;  %v10274_v12 = vld [vmem:[%s14519_s12 + $0xc48] sm:$0xf0] }
 0x27f   : > { %5954 = vmatpush.bf16.msra.mxu2 %v9813_v44  ;;  %v10170_v44 = vld [vmem:[%s14519_s12 + $0xb78] sm:$0xf0]  ;;  %v10237_v41 = vor.u32 %v13184_v50, %v10234_v47  ;;  %v13192_v50 = vld [vmem:[%s14519_s12 + $0xc34] sm:$0xf]  ;;  %v13158_v47 = vld [vmem:[%s14519_s12 + $0xb24] sm:$0xf] }
 0x280   : > { %5979 = vmatpush.bf16.msra.mxu1 %v9949_v14  ;;  %v10173_v5 = vor.u32 %v13168_v61, %v10170_v44  ;;  %v13106_v14 = vld [vmem:[%s14519_s12 + $0x984] sm:$0xf]  ;;  %v10282_v61 = vld [vmem:[%s14519_s12 + $0xc58] sm:$0xf0]  ;;  %v10130_v33 = vld [vmem:[%s14519_s12 + $0xb28] sm:$0xf0] }
 0x281   : > { %5992 = vmatpush.bf16.msra.mxu3 %v10013_v49  ;;  %v9986_v49 = vld [vmem:[%s14519_s12 + $0xa08] sm:$0xf0]  ;;  %v9925_v8 = vor.u32 %v13106_v14, %v9922_v56  ;;  %v13162_v44 = vld [vmem:[%s14519_s12 + $0xb44] sm:$0xf]  ;;  %v13140_v29 = vld [vmem:[%s14519_s12 + $0xa94] sm:$0xf] }
 0x282   : > { %5967 = vmatpush.bf16.msra.mxu0 %v9877_v38  ;;  %v10101_v38 = vor.u32 %v13150_v40, %v10098_v10  ;;  %v9989_v52 = vor.u32 %v13122_v42, %v9986_v49  ;;  %v13196_v40 = vld [vmem:[%s14519_s12 + $0xc54] sm:$0xf]  ;;  %v10074_v10 = vld [vmem:[%s14519_s12 + $0xab8] sm:$0xf0]  ;;  %v10149_v49 = vor.u32 %v13162_v44, %v10146_v19  ;;  %v10210_v56 = vld [vmem:[%s14519_s12 + $0xbc8] sm:$0xf0] }
 0x283   : > { %5955 = vmatpush.bf16.msra.mxu2 %v9805_v55  ;;  %v10162_v55 = vld [vmem:[%s14519_s12 + $0xb68] sm:$0xf0]  ;;  %v10285_v57 = vor.u32 %v13196_v40, %v10282_v61  ;;  %v13156_v61 = vld [vmem:[%s14519_s12 + $0xb14] sm:$0xf]  ;;  %v13138_v19 = vld [vmem:[%s14519_s12 + $0xa84] sm:$0xf] }
 0x284   : > { %5980 = vmatpush.bf16.msra.mxu1 %v9941_v20  ;;  %v10165_v25 = vor.u32 %v13166_v39, %v10162_v55  ;;  %v10226_v20 = vld [vmem:[%s14519_s12 + $0xbe8] sm:$0xf0]  ;;  %v10138_v39 = vld [vmem:[%s14519_s12 + $0xb38] sm:$0xf0]  ;;  %v13142_v55 = vld [vmem:[%s14519_s12 + $0xaa4] sm:$0xf] }
 0x285   : > { %5993 = vmatpush.bf16.msra.mxu3 %v10005_v32  ;;  %v5739_v32 = vpop.f32.mrf.mxu3  ;;  %v10229_v4 = vor.u32 %v13182_v46, %v10226_v20  ;;  %v10202_v46 = vld [vmem:[%s14519_s12 + $0xbb8] sm:$0xf0]  ;;  %v10258_v20 = vld [vmem:[%s14519_s12 + $0xc28] sm:$0xf0] }
 0x286   : > { %5968 = vmatpush.bf16.msra.mxu0 %v9869_v3  ;;  %v10154_v3 = vld [vmem:[%s14519_s12 + $0xb58] sm:$0xf0] }
 0x287   : > { %5956 = vmatpush.bf16.msra.mxu2 %v9797_v11  ;;  %v10082_v11 = vld [vmem:[%s14519_s12 + $0xac8] sm:$0xf0]  ;;  %v10266_v32 = vld [vmem:[%s14519_s12 + $0xc38] sm:$0xf0] }
 0x288   : > { %5981 = vmatpush.bf16.msra.mxu1 %v9933_v6  ;;  %v13160_v6 = vld [vmem:[%s14519_s12 + $0xb34] sm:$0xf] }
 0x289   : > { %5994 = vmatpush.bf16.msra.mxu3 %v9997_v28  ;;  %v13144_v28 = vld [vmem:[%s14519_s12 + $0xab4] sm:$0xf] }
 0x28a   : > { %5957 = vmatmul.bf16.vlgmr.msra.gmra.mxu2 %v14928_v30  ;;  %5969 = vmatpush.bf16.msra.mxu0 %v9861_v35  ;;  %v10093_v30 = vor.u32 %v13148_v7, %v10090_v62  ;;  %v13180_v35 = vld [vmem:[%s14519_s12 + $0xbd4] sm:$0xf]  ;;  %v10277_v62 = vor.u32 %v13194_v15, %v10274_v12  ;;  %v10250_v12 = vld [vmem:[%s14519_s12 + $0xc18] sm:$0xf0] }
 0x28b   : > { %6001 = vmatpush.bf16.msrb.mxu2 %v10109_v45  ;;  %v10157_v45 = vor.u32 %v13164_v24, %v10154_v3  ;;  %v10269_v3 = vor.u32 %v13192_v50, %v10266_v32  ;;  %v13188_v15 = vld [vmem:[%s14519_s12 + $0xc14] sm:$0xf]  ;;  %v13214_v50 = vld [vmem:[%s14519_s12 + $0xce4] sm:$0xf]  ;;  %v10354_v32 = vld [vmem:[%s14519_s12 + $0xce8] sm:$0xf0] }
 0x28c   : > { %5982 = vmatpush.bf16.msra.mxu1 %v9925_v8  ;;  %v13176_v8 = vld [vmem:[%s14519_s12 + $0xbb4] sm:$0xf] }
 0x28d   : > { %5995 = vmatpush.bf16.msra.mxu3 %v9989_v52  ;;  %5970 = vmatmul.bf16.vlgmr.msra.gmra.mxu0 %v14924_v23  ;;  %v10085_v23 = vor.u32 %v13146_v31, %v10082_v11  ;;  %v10066_v52 = vld [vmem:[%s14519_s12 + $0xaa8] sm:$0xf0]  ;;  %v5750_v24 = vpop.f32.mrf.mxu2  ;;  %v5763_v11 = vpop.f32.mrf.mxu0 }
 0x28e   : > { %6014 = vmatpush.bf16.msrb.mxu0 %v10173_v5  ;;  %v10218_v5 = vld [vmem:[%s14519_s12 + $0xbd8] sm:$0xf0] }
 0x28f   : > { %6002 = vmatpush.bf16.msrb.mxu2 %v10101_v38  ;;  %5983 = vmatmul.bf16.vlgmr.msra.gmra.mxu1 %v14932_v34  ;;  %v10077_v38 = vor.u32 %v13144_v28, %v10074_v10  ;;  %v10221_v7 = vor.u32 %v13180_v35, %v10218_v5  ;;  %v10141_v34 = vor.u32 %v13160_v6, %v10138_v39  ;;  %v10050_v28 = vld [vmem:[%s14519_s12 + $0xa88] sm:$0xf0]  ;;  %v10362_v35 = vld [vmem:[%s14519_s12 + $0xcf8] sm:$0xf0]  ;;  %v13154_v39 = vld [vmem:[%s14519_s12 + $0xb04] sm:$0xf] }
 0x290   : > { %5996 = vmatmul.bf16.vlgmr.msra.gmra.mxu3 %v15000_v53  ;;  %6027 = vmatpush.bf16.msrb.mxu1 %v10237_v41  ;;  %v13953_v53 = vld [vmem:[%s441_s21] sm:$0x3]  ;;  %v5776_v41 = vpop.f32.mrf.mxu1  ;;  %v10205_v10 = vor.u32 %v13176_v8, %v10202_v46  ;;  %v10194_v5 = vld [vmem:[%s14519_s12 + $0xba8] sm:$0xf0]  ;;  %v10053_v6 = vor.u32 %v13138_v19, %v10050_v28  ;;  %v13264_v8 = vld [vmem:[%s14519_s12 + $0xe74] sm:$0xf] }
 0x291   : > { %6040 = vmatpush.bf16.msrb.mxu3 %v10301_v21  ;;  %v1360_v42 = vperm.slane %v13953_v53, 1  ;;  %v13178_v21 = vld [vmem:[%s14519_s12 + $0xbc4] sm:$0xf]  ;;  %v13248_v19 = vld [vmem:[%s14519_s12 + $0xdf4] sm:$0xf] }
 0x292   : > { %6015 = vmatpush.bf16.msrb.mxu0 %v10165_v25  ;;  %v10069_v25 = vor.u32 %v13142_v55, %v10066_v52  ;;  %v13174_v53 = vld [vmem:[%s14519_s12 + $0xba4] sm:$0xf]  ;;  %v10114_v55 = vld [vmem:[%s14519_s12 + $0xb08] sm:$0xf0] }
 0x293   : > { %6003 = vmatpush.bf16.msrb.mxu2 %v10093_v30  ;;  %v5738_v14 = vadd.f32 %v15851_v22, %v1360_v42  ;;  %v10058_v30 = vld [vmem:[%s14519_s12 + $0xa98] sm:$0xf0]  ;;  %v10213_v22 = vor.u32 %v13178_v21, %v10210_v56  ;;  %v10253_v56 = vor.u32 %v13188_v15, %v10250_v12  ;;  %v10338_v15 = vld [vmem:[%s14519_s12 + $0xcc8] sm:$0xf0] }
 0x294   : > { %6028 = vmatpush.bf16.msrb.mxu1 %v10229_v4  ;;  %v10061_v40 = vor.u32 %v13140_v29, %v10058_v30  ;;  %v10426_v21 = vld [vmem:[%s14519_s12 + $0xd78] sm:$0xf0]  ;;  %v10117_v29 = vor.u32 %v13154_v39, %v10114_v55  ;;  %v10482_v55 = vld [vmem:[%s14519_s12 + $0xde8] sm:$0xf0] }
 0x295   : > { %6041 = vmatpush.bf16.msrb.mxu3 %v10293_v17  ;;  %v5751_v31 = vadd.f32 %v5750_v24, %v5738_v14  ;;  %v10133_v17 = vor.u32 %v13158_v47, %v10130_v33  ;;  %v5752_v14 = vpop.f32.mrf.mxu2  ;;  %v5765_v47 = vpop.f32.mrf.mxu0  ;;  %v10186_v30 = vld [vmem:[%s14519_s12 + $0xb98] sm:$0xf0]  ;;  %v13186_v24 = vld [vmem:[%s14519_s12 + $0xc04] sm:$0xf] }
 0x296   : > { %6016 = vmatpush.bf16.msrb.mxu0 %v10157_v45  ;;  %v13190_v45 = vld [vmem:[%s14519_s12 + $0xc24] sm:$0xf]  ;;  %v10474_v47 = vld [vmem:[%s14519_s12 + $0xdd8] sm:$0xf0] }
 0x297   : > { %6004 = vmatpush.bf16.msrb.mxu2 %v10085_v23  ;;  %v10122_v23 = vld [vmem:[%s14519_s12 + $0xb18] sm:$0xf0]  ;;  %v5764_v44 = vadd.f32 %v5763_v11, %v5751_v31  ;;  %v10261_v4 = vor.u32 %v13190_v45, %v10258_v20  ;;  %v10357_v11 = vor.u32 %v13214_v50, %v10354_v32  ;;  %v13212_v20 = vld [vmem:[%s14519_s12 + $0xcd4] sm:$0xf]  ;;  %v13226_v14 = vld [vmem:[%s14519_s12 + $0xd44] sm:$0xf] }
 0x298   : > { %6029 = vmatpush.bf16.msrb.mxu1 %v10221_v7  ;;  %v5778_v33 = vpop.f32.mrf.mxu1  ;;  %v10554_v31 = vld [vmem:[%s14519_s12 + $0xe78] sm:$0xf0] }
 0x299   : > { %6042 = vmatpush.bf16.msrb.mxu3 %v10285_v57  ;;  %v13216_v57 = vld [vmem:[%s14519_s12 + $0xcf4] sm:$0xf]  ;;  %v5777_v42 = vadd.f32 %v5776_v41, %v5764_v44  ;;  %v13230_v41 = vld [vmem:[%s14519_s12 + $0xd64] sm:$0xf]  ;;  %v10178_v44 = vld [vmem:[%s14519_s12 + $0xb88] sm:$0xf0] }
 0x29a   : > { %6017 = vmatpush.bf16.msrb.mxu0 %v10149_v49  ;;  %v10125_v49 = vor.u32 %v13156_v61, %v10122_v23  ;;  %v10365_v7 = vor.u32 %v13216_v57, %v10362_v35  ;;  %v10557_v61 = vor.u32 %v13264_v8, %v10554_v31  ;;  %v13170_v23 = vld [vmem:[%s14519_s12 + $0xb84] sm:$0xf]  ;;  %v10546_v35 = vld [vmem:[%s14519_s12 + $0xe68] sm:$0xf0] }
 0x29b   : > { %6005 = vmatpush.bf16.msrb.mxu2 %v10077_v38  ;;  %v5789_v38 = vpop.f32.mrf.mxu3  ;;  %v13262_v57 = vld [vmem:[%s14519_s12 + $0xe64] sm:$0xf]  ;;  %v10322_v8 = vld [vmem:[%s14519_s12 + $0xca8] sm:$0xf0] }
 0x29c   : > { %6030 = vmatpush.bf16.msrb.mxu1 %v10213_v22  ;;  %v15931_v52 = vadd.f32 %v5789_v38, %v5777_v42  ;;  %v10242_v22 = vld [vmem:[%s14519_s12 + $0xc08] sm:$0xf0]  ;;  %v13228_v42 = vld [vmem:[%s14519_s12 + $0xd54] sm:$0xf]  ;;  %v10549_v38 = vor.u32 %v13262_v57, %v10546_v35  ;;  %v13258_v33 = vld [vmem:[%s14519_s12 + $0xe44] sm:$0xf] }
 0x29d   : > { %6043 = vmatpush.bf16.msrb.mxu3 %v10277_v62  ;;  %v13232_v62 = vld [vmem:[%s14519_s12 + $0xd74] sm:$0xf]  ;;  %v10245_v45 = vor.u32 %v13186_v24, %v10242_v22  ;;  %v10394_v22 = vld [vmem:[%s14519_s12 + $0xd38] sm:$0xf0] }
 0x29e   : > { %6018 = vmatpush.bf16.msrb.mxu0 %v10141_v34  ;;  %v10197_v34 = vor.u32 %v13174_v53, %v10194_v5  ;;  %v13210_v5 = vld [vmem:[%s14519_s12 + $0xcc4] sm:$0xf]  ;;  %v13224_v24 = vld [vmem:[%s14519_s12 + $0xd34] sm:$0xf] }
 0x29f   : > { %6006 = vmatpush.bf16.msrb.mxu2 %v10069_v25  ;;  %v13172_v25 = vld [vmem:[%s14519_s12 + $0xb94] sm:$0xf] }
 0x2a0   : > { %6031 = vmatpush.bf16.msrb.mxu1 %v10205_v10  ;;  %v10189_v46 = vor.u32 %v13172_v25, %v10186_v30  ;;  %v13244_v25 = vld [vmem:[%s14519_s12 + $0xdd4] sm:$0xf] }
 0x2a1   : > { %6044 = vmatpush.bf16.msrb.mxu3 %v10269_v3  ;;  %v10429_v3 = vor.u32 %v13232_v62, %v10426_v21  ;;  %v10538_v62 = vld [vmem:[%s14519_s12 + $0xe58] sm:$0xf0]  ;;  %v10341_v21 = vor.u32 %v13210_v5, %v10338_v15  ;;  %v10477_v31 = vor.u32 %v13244_v25, %v10474_v47  ;;  %v13240_v35 = vld [vmem:[%s14519_s12 + $0xdb4] sm:$0xf]  ;;  %v10514_v5 = vld [vmem:[%s14519_s12 + $0xe28] sm:$0xf0] }
 0x2a2   : > { %6019 = vmatpush.bf16.msrb.mxu0 %v10133_v17  ;;  %v10418_v17 = vld [vmem:[%s14519_s12 + $0xd68] sm:$0xf0]  ;;  %v10506_v25 = vld [vmem:[%s14519_s12 + $0xe18] sm:$0xf0] }
 0x2a3   : > { %6007 = vmatpush.bf16.msrb.mxu2 %v10061_v40  ;;  %v10346_v40 = vld [vmem:[%s14519_s12 + $0xcd8] sm:$0xf0]  ;;  %v5791_v28 = vpop.f32.mrf.mxu3  ;;  %v10421_v10 = vor.u32 %v13230_v41, %v10418_v17  ;;  %v13242_v41 = vld [vmem:[%s14519_s12 + $0xdc4] sm:$0xf]  ;;  %v10397_v17 = vor.u32 %v13224_v24, %v10394_v22  ;;  %v13296_v24 = vld [vmem:[%s14519_s12 + $0xf74] sm:$0xf] }
 0x2a4   : > { %6032 = vmatpush.bf16.msrb.mxu1 %v10197_v34  ;;  %v10349_v53 = vor.u32 %v13212_v20, %v10346_v40  ;;  %v10402_v34 = vld [vmem:[%s14519_s12 + $0xd48] sm:$0xf0]  ;;  %v13222_v40 = vld [vmem:[%s14519_s12 + $0xd24] sm:$0xf]  ;;  %v10682_v22 = vld [vmem:[%s14519_s12 + $0xf78] sm:$0xf0] }
 0x2a5   : > { %6045 = vmatpush.bf16.msrb.mxu3 %v10261_v4  ;;  %v10490_v4 = vld [vmem:[%s14519_s12 + $0xdf8] sm:$0xf0] }
 0x2a6   : > { %6020 = vmatpush.bf16.msrb.mxu0 %v10125_v49  ;;  %v10181_v49 = vor.u32 %v13170_v23, %v10178_v44  ;;  %v10493_v12 = vor.u32 %v13248_v19, %v10490_v4  ;;  %v13204_v44 = vld [vmem:[%s14519_s12 + $0xc94] sm:$0xf]  ;;  %v10314_v19 = vld [vmem:[%s14519_s12 + $0xc98] sm:$0xf0] }
 0x2a7   : > { %6008 = vmatpush.bf16.msrb.mxu2 %v10053_v6  ;;  %v13246_v6 = vld [vmem:[%s14519_s12 + $0xde4] sm:$0xf]  ;;  %v10317_v15 = vor.u32 %v13204_v44, %v10314_v19  ;;  %v13328_v44 = vld [vmem:[%s14519_s12 + $0x1074] sm:$0xf]  ;;  %v10810_v19 = vld [vmem:[%s14519_s12 + $0x1078] sm:$0xf0] }
 0x2a8   : > { %6033 = vmatpush.bf16.msrb.mxu1 %v10189_v46  ;;  %v10485_v50 = vor.u32 %v13246_v6, %v10482_v55  ;;  %v10466_v46 = vld [vmem:[%s14519_s12 + $0xdc8] sm:$0xf0]  ;;  %v10378_v6 = vld [vmem:[%s14519_s12 + $0xd18] sm:$0xf0] }
 0x2a9   : > { %6046 = vmatpush.bf16.msrb.mxu3 %v10253_v56  ;;  %v10330_v56 = vld [vmem:[%s14519_s12 + $0xcb8] sm:$0xf0]  ;;  %v10469_v28 = vor.u32 %v13242_v41, %v10466_v46  ;;  %v10610_v41 = vld [vmem:[%s14519_s12 + $0xee8] sm:$0xf0] }
 0x2aa   : > { %6009 = vmatmul.bf16.vlgmr.msrb.gmra.mxu2 %v15008_v63  ;;  %6021 = vmatpush.bf16.msrb.mxu0 %v10117_v29  ;;  %v10410_v63 = vld [vmem:[%s14519_s12 + $0xd58] sm:$0xf0]  ;;  %v10530_v29 = vld [vmem:[%s14519_s12 + $0xe48] sm:$0xf0]  ;;  %v5815_v57 = vpop.f32.mrf.mxu0 }
 0x2ab   : > { %6053 = vmatpush.bf16.msra.mxu2 %v10365_v7  ;;  %v10413_v39 = vor.u32 %v13228_v42, %v10410_v63  ;;  %v13260_v7 = vld [vmem:[%s14519_s12 + $0xe54] sm:$0xf]  ;;  %v10458_v63 = vld [vmem:[%s14519_s12 + $0xdb8] sm:$0xf0] }
 0x2ac   : > { %6034 = vmatpush.bf16.msrb.mxu1 %v10181_v49  ;;  %v10541_v32 = vor.u32 %v13260_v7, %v10538_v62  ;;  %v13254_v49 = vld [vmem:[%s14519_s12 + $0xe24] sm:$0xf]  ;;  %v10461_v55 = vor.u32 %v13240_v35, %v10458_v63  ;;  %v10813_v63 = vor.u32 %v13328_v44, %v10810_v19  ;;  %v10722_v19 = vld [vmem:[%s14519_s12 + $0xfc8] sm:$0xf0] }
 0x2ad   : > { %6047 = vmatpush.bf16.msrb.mxu3 %v10245_v45  ;;  %6022 = vmatmul.bf16.vlgmr.msrb.gmra.mxu0 %v15004_v58  ;;  %v13208_v58 = vld [vmem:[%s14519_s12 + $0xcb4] sm:$0xf]  ;;  %v10522_v45 = vld [vmem:[%s14519_s12 + $0xe38] sm:$0xf0]  ;;  %v5802_v23 = vpop.f32.mrf.mxu2  ;;  %v10517_v7 = vor.u32 %v13254_v49, %v10514_v5  ;;  %v13234_v49 = vld [vmem:[%s14519_s12 + $0xd84] sm:$0xf] }
 0x2ae   : > { %6066 = vmatpush.bf16.msra.mxu0 %v10429_v3  ;;  %v10333_v30 = vor.u32 %v13208_v58, %v10330_v56  ;;  %v13206_v3 = vld [vmem:[%s14519_s12 + $0xca4] sm:$0xf]  ;;  %v5803_v4 = vadd.f32 %v5802_v23, %v15931_v52  ;;  %v10685_v23 = vor.u32 %v13296_v24, %v10682_v22  ;;  %v10434_v5 = vld [vmem:[%s14519_s12 + $0xd88] sm:$0xf0]  ;;  %v10586_v24 = vld [vmem:[%s14519_s12 + $0xeb8] sm:$0xf0] }
 0x2af   : > { %6054 = vmatpush.bf16.msra.mxu2 %v10357_v11  ;;  %6035 = vmatmul.bf16.vlgmr.msrb.gmra.mxu1 %v15012_v2  ;;  %v10533_v11 = vor.u32 %v13258_v33, %v10530_v29  ;;  %v13256_v2 = vld [vmem:[%s14519_s12 + $0xe34] sm:$0xf]  ;;  %v10325_v20 = vor.u32 %v13206_v3, %v10322_v8  ;;  %v13202_v52 = vld [vmem:[%s14519_s12 + $0xc84] sm:$0xf]  ;;  %v10370_v29 = vld [vmem:[%s14519_s12 + $0xd08] sm:$0xf0] }
 0x2b0   : > { %6048 = vmatmul.bf16.vlgmr.msrb.gmra.mxu3 %v15079_v48  ;;  %6079 = vmatpush.bf16.msra.mxu1 %v10493_v12  ;;  %v10405_v48 = vor.u32 %v13226_v14, %v10402_v34  ;;  %v5816_v12 = vadd.f32 %v5815_v57, %v5803_v4  ;;  %v10618_v14 = vld [vmem:[%s14519_s12 + $0xef8] sm:$0xf0]  ;;  %v13238_v34 = vld [vmem:[%s14519_s12 + $0xda4] sm:$0xf]  ;;  %v10674_v4 = vld [vmem:[%s14519_s12 + $0xf68] sm:$0xf0] }
 0x2b1   : > { %6092 = vmatpush.bf16.msra.mxu3 %v10557_v61  ;;  %v10386_v61 = vld [vmem:[%s14519_s12 + $0xd28] sm:$0xf0]  ;;  %v13218_v33 = vld [vmem:[%s14519_s12 + $0xd04] sm:$0xf] }
 0x2b2   : > { %6067 = vmatpush.bf16.msra.mxu0 %v10421_v10  ;;  %v10525_v10 = vor.u32 %v13256_v2, %v10522_v45  ;;  %v10389_v42 = vor.u32 %v13222_v40, %v10386_v61  ;;  %v5817_v46 = vpop.f32.mrf.mxu0  ;;  %v10373_v45 = vor.u32 %v13218_v33, %v10370_v29  ;;  %v13250_v40 = vld [vmem:[%s14519_s12 + $0xe04] sm:$0xf]  ;;  %v10498_v61 = vld [vmem:[%s14519_s12 + $0xe08] sm:$0xf0] }
 0x2b3   : > { %6055 = vmatpush.bf16.msra.mxu2 %v10349_v53  ;;  %v5828_v53 = vpop.f32.mrf.mxu1  ;;  %v5841_v56 = vpop.f32.mrf.mxu3  ;;  %v10501_v35 = vor.u32 %v13250_v40, %v10498_v61  ;;  %v13290_v29 = vld [vmem:[%s14519_s12 + $0xf44] sm:$0xf]  ;;  %v13288_v46 = vld [vmem:[%s14519_s12 + $0xf34] sm:$0xf] }
 0x2b4   : > { %6080 = vmatpush.bf16.msra.mxu1 %v10485_v50  ;;  %v5829_v62 = vadd.f32 %v5828_v53, %v5816_v12  ;;  %v10450_v50 = vld [vmem:[%s14519_s12 + $0xda8] sm:$0xf0]  ;;  %v13276_v53 = vld [vmem:[%s14519_s12 + $0xed4] sm:$0xf] }
 0x2b5   : > { %6093 = vmatpush.bf16.msra.mxu3 %v10549_v38  ;;  %v13220_v38 = vld [vmem:[%s14519_s12 + $0xd14] sm:$0xf]  ;;  %v5804_v3 = vpop.f32.mrf.mxu2  ;;  %v10453_v8 = vor.u32 %v13238_v34, %v10450_v50 }
 0x2b6   : > { %6068 = vmatpush.bf16.msra.mxu0 %v10413_v39  ;;  %v10306_v39 = vld [vmem:[%s14519_s12 + $0xc88] sm:$0xf0]  ;;  %v10381_v58 = vor.u32 %v13220_v38, %v10378_v6  ;;  %v16000_v47 = vadd.f32 %v5841_v56, %v5829_v62  ;;  %v10746_v6 = vld [vmem:[%s14519_s12 + $0xff8] sm:$0xf0]  ;;  %v10437_v62 = vor.u32 %v13234_v49, %v10434_v5  ;;  %v13310_v56 = vld [vmem:[%s14519_s12 + $0xfe4] sm:$0xf] }
 0x2b7   : > { %6056 = vmatpush.bf16.msra.mxu2 %v10341_v21  ;;  %v13280_v21 = vld [vmem:[%s14519_s12 + $0xef4] sm:$0xf] }
 0x2b8   : > { %6081 = vmatpush.bf16.msra.mxu1 %v10477_v31 }
 0x2b9   : > { %6094 = vmatpush.bf16.msra.mxu3 %v10541_v32  ;;  %v13252_v32 = vld [vmem:[%s14519_s12 + $0xe14] sm:$0xf] }
 0x2ba   : > { %6069 = vmatpush.bf16.msra.mxu0 %v10405_v48  ;;  %v10309_v48 = vor.u32 %v13202_v52, %v10306_v39  ;;  %v10509_v31 = vor.u32 %v13252_v32, %v10506_v25  ;;  %v13326_v52 = vld [vmem:[%s14519_s12 + $0x1064] sm:$0xf]  ;;  %v10802_v39 = vld [vmem:[%s14519_s12 + $0x1068] sm:$0xf0]  ;;  %v13324_v25 = vld [vmem:[%s14519_s12 + $0x1054] sm:$0xf] }
 0x2bb   : > { %6057 = vmatpush.bf16.msra.mxu2 %v10333_v30  ;;  %v10621_v30 = vor.u32 %v13280_v21, %v10618_v14  ;;  %v5830_v2 = vpop.f32.mrf.mxu1  ;;  %v5843_v12 = vpop.f32.mrf.mxu3  ;;  %v13274_v21 = vld [vmem:[%s14519_s12 + $0xec4] sm:$0xf]  ;;  %v10594_v14 = vld [vmem:[%s14519_s12 + $0xec8] sm:$0xf0] }
 0x2bc   : > { %6082 = vmatpush.bf16.msra.mxu1 %v10469_v28  ;;  %v10738_v32 = vld [vmem:[%s14519_s12 + $0xfe8] sm:$0xf0]  ;;  %v10597_v33 = vor.u32 %v13274_v21, %v10594_v14  ;;  %v10650_v2 = vld [vmem:[%s14519_s12 + $0xf38] sm:$0xf0]  ;;  %v13266_v21 = vld [vmem:[%s14519_s12 + $0xe84] sm:$0xf] }
 0x2bd   : > { %6095 = vmatpush.bf16.msra.mxu3 %v10533_v11  ;;  %v13278_v11 = vld [vmem:[%s14519_s12 + $0xee4] sm:$0xf]  ;;  %v10741_v22 = vor.u32 %v13310_v56, %v10738_v32  ;;  %v10562_v14 = vld [vmem:[%s14519_s12 + $0xe88] sm:$0xf0]  ;;  %v10874_v32 = vld [vmem:[%s14519_s12 + $0x10f8] sm:$0xf0] }
 0x2be   : > { %6070 = vmatpush.bf16.msra.mxu0 %v10397_v17  ;;  %v13236_v17 = vld [vmem:[%s14519_s12 + $0xd94] sm:$0xf]  ;;  %v10613_v28 = vor.u32 %v13278_v11, %v10610_v41  ;;  %v13322_v11 = vld [vmem:[%s14519_s12 + $0x1044] sm:$0xf]  ;;  %v10786_v41 = vld [vmem:[%s14519_s12 + $0x1048] sm:$0xf0] }
 0x2bf   : > { %6058 = vmatpush.bf16.msra.mxu2 %v10325_v20  ;;  %v10442_v20 = vld [vmem:[%s14519_s12 + $0xd98] sm:$0xf0]  ;;  %v10789_v61 = vor.u32 %v13322_v11, %v10786_v41  ;;  %v13360_v11 = vld [vmem:[%s14519_s12 + $0x1174] sm:$0xf] }
 0x2c0   : > { %6083 = vmatpush.bf16.msra.mxu1 %v10461_v55  ;;  %v10445_v57 = vor.u32 %v13236_v17, %v10442_v20  ;;  %v10578_v20 = vld [vmem:[%s14519_s12 + $0xea8] sm:$0xf0]  ;;  %v10938_v41 = vld [vmem:[%s14519_s12 + $0x1178] sm:$0xf0] }
 0x2c1   : > { %6096 = vmatpush.bf16.msra.mxu3 %v10525_v10  ;;  %v13294_v10 = vld [vmem:[%s14519_s12 + $0xf64] sm:$0xf] }
 0x2c2   : > { %6071 = vmatpush.bf16.msra.mxu0 %v10389_v42  ;;  %v10602_v42 = vld [vmem:[%s14519_s12 + $0xed8] sm:$0xf0]  ;;  %v10677_v38 = vor.u32 %v13294_v10, %v10674_v4 }
 0x2c3   : > { %6059 = vmatpush.bf16.msra.mxu2 %v10317_v15  ;;  %v13312_v15 = vld [vmem:[%s14519_s12 + $0xff4] sm:$0xf]  ;;  %v10605_v55 = vor.u32 %v13276_v53, %v10602_v42  ;;  %v10778_v10 = vld [vmem:[%s14519_s12 + $0x1038] sm:$0xf0] }
 0x2c4   : > { %6084 = vmatpush.bf16.msra.mxu1 %v10453_v8  ;;  %v10749_v34 = vor.u32 %v13312_v15, %v10746_v6  ;;  %v13308_v8 = vld [vmem:[%s14519_s12 + $0xfd4] sm:$0xf] }
 0x2c5   : > { %6097 = vmatpush.bf16.msra.mxu3 %v10517_v7  ;;  %v13292_v7 = vld [vmem:[%s14519_s12 + $0xf54] sm:$0xf] }
 0x2c6   : > { %6072 = vmatpush.bf16.msra.mxu0 %v10381_v58  ;;  %v10805_v58 = vor.u32 %v13326_v52, %v10802_v39  ;;  %v13268_v42 = vld [vmem:[%s14519_s12 + $0xe94] sm:$0xf]  ;;  %v10714_v52 = vld [vmem:[%s14519_s12 + $0xfb8] sm:$0xf0]  ;;  %v13318_v39 = vld [vmem:[%s14519_s12 + $0x1024] sm:$0xf] }
 0x2c7   : > { %6060 = vmatpush.bf16.msra.mxu2 %v10309_v48  ;;  %v10794_v48 = vld [vmem:[%s14519_s12 + $0x1058] sm:$0xf0] }
 0x2c8   : > { %6085 = vmatpush.bf16.msra.mxu1 %v10445_v57  ;;  %v10797_v3 = vor.u32 %v13324_v25, %v10794_v48  ;;  %v13286_v57 = vld [vmem:[%s14519_s12 + $0xf24] sm:$0xf] }
 0x2c9   : > { %6098 = vmatpush.bf16.msra.mxu3 %v10509_v31  ;;  %v10730_v31 = vld [vmem:[%s14519_s12 + $0xfd8] sm:$0xf0]  ;;  %v13302_v25 = vld [vmem:[%s14519_s12 + $0xfa4] sm:$0xf] }
 0x2ca   : > { %6061 = vmatmul.bf16.vlgmr.msra.gmra.mxu2 %v15087_v60  ;;  %6073 = vmatpush.bf16.msra.mxu0 %v10373_v45  ;;  %v10666_v60 = vld [vmem:[%s14519_s12 + $0xf58] sm:$0xf0]  ;;  %v13270_v45 = vld [vmem:[%s14519_s12 + $0xea4] sm:$0xf]  ;;  %v10733_v40 = vor.u32 %v13308_v8, %v10730_v31  ;;  %v5867_v44 = vpop.f32.mrf.mxu0 }
 0x2cb   : > { %6105 = vmatpush.bf16.msrb.mxu2 %v10621_v30  ;;  %v10669_v50 = vor.u32 %v13292_v7, %v10666_v60  ;;  %v10658_v30 = vld [vmem:[%s14519_s12 + $0xf48] sm:$0xf0]  ;;  %v10581_v4 = vor.u32 %v13270_v45, %v10578_v20  ;;  %v13284_v60 = vld [vmem:[%s14519_s12 + $0xf14] sm:$0xf]  ;;  %v13282_v8 = vld [vmem:[%s14519_s12 + $0xf04] sm:$0xf] }
 0x2cc   : > { %6086 = vmatpush.bf16.msra.mxu1 %v10437_v62  ;;  %v5880_v5 = vpop.f32.mrf.mxu1  ;;  %v10634_v62 = vld [vmem:[%s14519_s12 + $0xf18] sm:$0xf0]  ;;  %v13342_v45 = vld [vmem:[%s14519_s12 + $0x10e4] sm:$0xf]  ;;  %v10866_v20 = vld [vmem:[%s14519_s12 + $0x10e8] sm:$0xf0] }
 0x2cd   : > { %6099 = vmatpush.bf16.msra.mxu3 %v10501_v35  ;;  %6074 = vmatmul.bf16.vlgmr.msra.gmra.mxu0 %v15083_v54  ;;  %v13272_v54 = vld [vmem:[%s14519_s12 + $0xeb4] sm:$0xf]  ;;  %v10642_v35 = vld [vmem:[%s14519_s12 + $0xf28] sm:$0xf0]  ;;  %v5854_v53 = vpop.f32.mrf.mxu2 }
 0x2ce   : > { %6118 = vmatpush.bf16.msrb.mxu0 %v10685_v23  ;;  %v10589_v17 = vor.u32 %v13272_v54, %v10586_v24  ;;  %v13306_v23 = vld [vmem:[%s14519_s12 + $0xfc4] sm:$0xf]  ;;  %v5855_v49 = vadd.f32 %v5854_v53, %v16000_v47  ;;  %v10645_v6 = vor.u32 %v13286_v57, %v10642_v35  ;;  %v10762_v54 = vld [vmem:[%s14519_s12 + $0x1018] sm:$0xf0]  ;;  %v10869_v57 = vor.u32 %v13342_v45, %v10866_v20  ;;  %v10930_v53 = vld [vmem:[%s14519_s12 + $0x1168] sm:$0xf0] }
 0x2cf   : > { %6106 = vmatpush.bf16.msrb.mxu2 %v10613_v28  ;;  %6087 = vmatmul.bf16.vlgmr.msra.gmra.mxu1 %v15091_v0  ;;  %v10653_v0 = vor.u32 %v13288_v46, %v10650_v2  ;;  %v13320_v28 = vld [vmem:[%s14519_s12 + $0x1034] sm:$0xf]  ;;  %v10725_v15 = vor.u32 %v13306_v23, %v10722_v19  ;;  %v10754_v19 = vld [vmem:[%s14519_s12 + $0x1008] sm:$0xf0]  ;;  %v13358_v35 = vld [vmem:[%s14519_s12 + $0x1164] sm:$0xf] }
 0x2d0   : > { %6100 = vmatmul.bf16.vlgmr.msra.gmra.mxu3 %v15158_v59  ;;  %6131 = vmatpush.bf16.msrb.mxu1 %v10749_v34  ;;  %v10661_v59 = vor.u32 %v13290_v29, %v10658_v30  ;;  %v10781_v12 = vor.u32 %v13320_v28, %v10778_v10  ;;  %v5868_v7 = vadd.f32 %v5867_v44, %v5855_v49  ;;  %v10706_v29 = vld [vmem:[%s14519_s12 + $0xfa8] sm:$0xf0]  ;;  %v13316_v30 = vld [vmem:[%s14519_s12 + $0x1014] sm:$0xf]  ;;  %v10698_v44 = vld [vmem:[%s14519_s12 + $0xf98] sm:$0xf0] }
 0x2d1   : > { %6144 = vmatpush.bf16.msrb.mxu3 %v10813_v63  ;;  %v10570_v63 = vld [vmem:[%s14519_s12 + $0xe98] sm:$0xf0]  ;;  %v10709_v46 = vor.u32 %v13302_v25, %v10706_v29  ;;  %v10765_v2 = vor.u32 %v13316_v30, %v10762_v54  ;;  %v10941_v28 = vor.u32 %v13360_v11, %v10938_v41  ;;  %v13392_v10 = vld [vmem:[%s14519_s12 + $0x1274] sm:$0xf]  ;;  %v10994_v25 = vld [vmem:[%s14519_s12 + $0x11e8] sm:$0xf0] }
 0x2d2   : > { %6119 = vmatpush.bf16.msrb.mxu0 %v10677_v38  ;;  %v13304_v38 = vld [vmem:[%s14519_s12 + $0xfb4] sm:$0xf]  ;;  %v10573_v47 = vor.u32 %v13268_v42, %v10570_v63  ;;  %v5881_v34 = vadd.f32 %v5880_v5, %v5868_v7  ;;  %v5869_v24 = vpop.f32.mrf.mxu0  ;;  %v10858_v5 = vld [vmem:[%s14519_s12 + $0x10d8] sm:$0xf0]  ;;  %v13390_v7 = vld [vmem:[%s14519_s12 + $0x1264] sm:$0xf] }
 0x2d3   : > { %6107 = vmatpush.bf16.msrb.mxu2 %v10605_v55  ;;  %v10770_v55 = vld [vmem:[%s14519_s12 + $0x1028] sm:$0xf0]  ;;  %v5893_v48 = vpop.f32.mrf.mxu3  ;;  %v13340_v49 = vld [vmem:[%s14519_s12 + $0x10d4] sm:$0xf]  ;;  %v13354_v30 = vld [vmem:[%s14519_s12 + $0x1144] sm:$0xf] }
 0x2d4   : > { %6132 = vmatpush.bf16.msrb.mxu1 %v10741_v22  ;;  %v10773_v56 = vor.u32 %v13318_v39, %v10770_v55  ;;  %v16071_v22 = vadd.f32 %v5893_v48, %v5881_v34  ;;  %v10933_v39 = vor.u32 %v13358_v35, %v10930_v53  ;;  %v11002_v55 = vld [vmem:[%s14519_s12 + $0x11f8] sm:$0xf0]  ;;  %v10850_v34 = vld [vmem:[%s14519_s12 + $0x10c8] sm:$0xf0]  ;;  %v13388_v48 = vld [vmem:[%s14519_s12 + $0x1254] sm:$0xf] }
 0x2d5   : > { %6145 = vmatpush.bf16.msrb.mxu3 %v10805_v58  ;;  %v10717_v58 = vor.u32 %v13304_v38, %v10714_v52  ;;  %v10690_v38 = vld [vmem:[%s14519_s12 + $0xf88] sm:$0xf0]  ;;  %v10842_v24 = vld [vmem:[%s14519_s12 + $0x10b8] sm:$0xf0]  ;;  %v13386_v11 = vld [vmem:[%s14519_s12 + $0x1244] sm:$0xf] }
 0x2d6   : > { %6120 = vmatpush.bf16.msrb.mxu0 %v10669_v50  ;;  %v13344_v50 = vld [vmem:[%s14519_s12 + $0x10f4] sm:$0xf]  ;;  %v10914_v54 = vld [vmem:[%s14519_s12 + $0x1148] sm:$0xf0]  ;;  %v13334_v45 = vld [vmem:[%s14519_s12 + $0x10a4] sm:$0xf] }
 0x2d7   : > { %6108 = vmatpush.bf16.msrb.mxu2 %v10597_v33  ;;  %v10637_v33 = vor.u32 %v13284_v60, %v10634_v62  ;;  %v10877_v31 = vor.u32 %v13344_v50, %v10874_v32  ;;  %v10861_v60 = vor.u32 %v13340_v49, %v10858_v5  ;;  %v13356_v62 = vld [vmem:[%s14519_s12 + $0x1154] sm:$0xf]  ;;  %v13374_v50 = vld [vmem:[%s14519_s12 + $0x11e4] sm:$0xf]  ;;  %v11042_v41 = vld [vmem:[%s14519_s12 + $0x1248] sm:$0xf0] }
 0x2d8   : > { %6133 = vmatpush.bf16.msrb.mxu1 %v10733_v40  ;;  %v13300_v40 = vld [vmem:[%s14519_s12 + $0xf94] sm:$0xf]  ;;  %v10834_v20 = vld [vmem:[%s14519_s12 + $0x10a8] sm:$0xf0] }
 0x2d9   : > { %6146 = vmatpush.bf16.msrb.mxu3 %v10797_v3  ;;  %v10565_v3 = vor.u32 %v13266_v21, %v10562_v14  ;;  %v10701_v42 = vor.u32 %v13300_v40, %v10698_v44  ;;  %v13338_v14 = vld [vmem:[%s14519_s12 + $0x10c4] sm:$0xf]  ;;  %v13332_v53 = vld [vmem:[%s14519_s12 + $0x1094] sm:$0xf] }
 0x2da   : > { %6121 = vmatpush.bf16.msrb.mxu0 %v10661_v59  ;;  %v10626_v59 = vld [vmem:[%s14519_s12 + $0xf08] sm:$0xf0]  ;;  %v10853_v29 = vor.u32 %v13338_v14, %v10850_v34  ;;  %v13370_v44 = vld [vmem:[%s14519_s12 + $0x11c4] sm:$0xf]  ;;  %v13408_v34 = vld [vmem:[%s14519_s12 + $0x12f4] sm:$0xf] }
 0x2db   : > { %6109 = vmatpush.bf16.msrb.mxu2 %v10589_v17  ;;  %v5856_v17 = vpop.f32.mrf.mxu2  ;;  %v10629_v23 = vor.u32 %v13282_v8, %v10626_v59  ;;  %v5895_v52 = vpop.f32.mrf.mxu3  ;;  %v13372_v59 = vld [vmem:[%s14519_s12 + $0x11d4] sm:$0xf] }
 0x2dc   : > { %6134 = vmatpush.bf16.msrb.mxu1 %v10725_v15  ;;  %v13382_v52 = vld [vmem:[%s14519_s12 + $0x1224] sm:$0xf] }
 0x2dd   : > { %6147 = vmatpush.bf16.msrb.mxu3 %v10789_v61  ;;  %v5882_v61 = vpop.f32.mrf.mxu1 }
 0x2de   : > { %6122 = vmatpush.bf16.msrb.mxu0 %v10653_v0  ;;  %v13314_v0 = vld [vmem:[%s14519_s12 + $0x1004] sm:$0xf]  ;;  %v11045_v61 = vor.u32 %v13386_v11, %v11042_v41 }
 0x2df   : > { %6110 = vmatpush.bf16.msrb.mxu2 %v10581_v4  ;;  %v11066_v4 = vld [vmem:[%s14519_s12 + $0x1278] sm:$0xf0]  ;;  %v10757_v63 = vor.u32 %v13314_v0, %v10754_v19  ;;  %v10978_v0 = vld [vmem:[%s14519_s12 + $0x11c8] sm:$0xf0]  ;;  %v13384_v19 = vld [vmem:[%s14519_s12 + $0x1234] sm:$0xf] }
 0x2e0   : > { %6135 = vmatpush.bf16.msrb.mxu1 %v10717_v58  ;;  %v11069_v15 = vor.u32 %v13392_v10, %v11066_v4  ;;  %v10837_v10 = vor.u32 %v13334_v45, %v10834_v20  ;;  %v13350_v4 = vld [vmem:[%s14519_s12 + $0x1124] sm:$0xf]  ;;  %v10981_v49 = vor.u32 %v13370_v44, %v10978_v0  ;;  %v10954_v45 = vld [vmem:[%s14519_s12 + $0x1198] sm:$0xf0]  ;;  %v13456_v44 = vld [vmem:[%s14519_s12 + $0x1474] sm:$0xf] }
 0x2e1   : > { %6148 = vmatpush.bf16.msrb.mxu3 %v10781_v12  ;;  %v13298_v12 = vld [vmem:[%s14519_s12 + $0xf84] sm:$0xf] }
 0x2e2   : > { %6123 = vmatpush.bf16.msrb.mxu0 %v10645_v6  ;;  %v13376_v6 = vld [vmem:[%s14519_s12 + $0x11f4] sm:$0xf]  ;;  %v10693_v21 = vor.u32 %v13298_v12, %v10690_v38  ;;  %v13406_v41 = vld [vmem:[%s14519_s12 + $0x12e4] sm:$0xf] }
 0x2e3   : > { %6111 = vmatpush.bf16.msrb.mxu2 %v10573_v47  ;;  %v11058_v47 = vld [vmem:[%s14519_s12 + $0x1268] sm:$0xf0]  ;;  %v11005_v58 = vor.u32 %v13376_v6, %v11002_v55  ;;  %v10970_v6 = vld [vmem:[%s14519_s12 + $0x11b8] sm:$0xf0]  ;;  %v13378_v20 = vld [vmem:[%s14519_s12 + $0x1204] sm:$0xf] }
 0x2e4   : > { %6136 = vmatpush.bf16.msrb.mxu1 %v10709_v46  ;;  %v13352_v46 = vld [vmem:[%s14519_s12 + $0x1134] sm:$0xf] }
 0x2e5   : > { %6149 = vmatpush.bf16.msrb.mxu3 %v10773_v56  ;;  %v11061_v56 = vor.u32 %v13390_v7, %v11058_v47  ;;  %v13348_v7 = vld [vmem:[%s14519_s12 + $0x1114] sm:$0xf]  ;;  %v10890_v47 = vld [vmem:[%s14519_s12 + $0x1118] sm:$0xf0] }
 0x2e6   : > { %6124 = vmatpush.bf16.msrb.mxu0 %v10637_v33  ;;  %v11050_v33 = vld [vmem:[%s14519_s12 + $0x1258] sm:$0xf0] }
 0x2e7   : > { %6112 = vmatpush.bf16.msrb.mxu2 %v10565_v3  ;;  %v10997_v3 = vor.u32 %v13374_v50, %v10994_v25  ;;  %v11053_v8 = vor.u32 %v13388_v48, %v11050_v33  ;;  %v10893_v25 = vor.u32 %v13348_v7, %v10890_v47  ;;  %v10962_v48 = vld [vmem:[%s14519_s12 + $0x11a8] sm:$0xf0]  ;;  %v13380_v33 = vld [vmem:[%s14519_s12 + $0x1214] sm:$0xf] }
 0x2e8   : > { %6137 = vmatpush.bf16.msrb.mxu1 %v10701_v42  ;;  %v10826_v42 = vld [vmem:[%s14519_s12 + $0x1098] sm:$0xf0]  ;;  %v11106_v7 = vld [vmem:[%s14519_s12 + $0x12c8] sm:$0xf0] }
 0x2e9   : > { %6150 = vmatpush.bf16.msrb.mxu3 %v10765_v2  ;;  %v10906_v2 = vld [vmem:[%s14519_s12 + $0x1138] sm:$0xf0] }
 0x2ea   : > { %6113 = vmatmul.bf16.vlgmr.msrb.gmra.mxu2 %v15166_v9  ;;  %6125 = vmatpush.bf16.msrb.mxu0 %v10629_v23  ;;  %v10922_v9 = vld [vmem:[%s14519_s12 + $0x1158] sm:$0xf0]  ;;  %v5919_v23 = vpop.f32.mrf.mxu0 }
 0x2eb   : > { %6157 = vmatpush.bf16.msra.mxu2 %v10877_v31  ;;  %v10925_v32 = vor.u32 %v13356_v62, %v10922_v9  ;;  %v10986_v31 = vld [vmem:[%s14519_s12 + $0x11d8] sm:$0xf0]  ;;  %v10818_v62 = vld [vmem:[%s14519_s12 + $0x1088] sm:$0xf0] }
 0x2ec   : > { %6138 = vmatpush.bf16.msrb.mxu1 %v10693_v21  ;;  %v10989_v40 = vor.u32 %v13372_v59, %v10986_v31  ;;  %v5932_v12 = vpop.f32.mrf.mxu1  ;;  %v11194_v59 = vld [vmem:[%s14519_s12 + $0x1378] sm:$0xf0] }
 0x2ed   : > { %6151 = vmatpush.bf16.msrb.mxu3 %v10757_v63  ;;  %6126 = vmatmul.bf16.vlgmr.msrb.gmra.mxu0 %v15162_v1  ;;  %v13336_v1 = vld [vmem:[%s14519_s12 + $0x10b4] sm:$0xf]  ;;  %v5906_v35 = vpop.f32.mrf.mxu2 }
 0x2ee   : > { %6170 = vmatpush.bf16.msra.mxu0 %v10941_v28  ;;  %v10845_v17 = vor.u32 %v13336_v1, %v10842_v24  ;;  %v11034_v28 = vld [vmem:[%s14519_s12 + $0x1238] sm:$0xf0]  ;;  %v5907_v63 = vadd.f32 %v5906_v35, %v16071_v22  ;;  %v10829_v22 = vor.u32 %v13332_v53, %v10826_v42  ;;  %v13346_v1 = vld [vmem:[%s14519_s12 + $0x1104] sm:$0xf]  ;;  %v10882_v24 = vld [vmem:[%s14519_s12 + $0x1108] sm:$0xf0] }
 0x2ef   : > { %6158 = vmatpush.bf16.msra.mxu2 %v10869_v57  ;;  %6139 = vmatmul.bf16.vlgmr.msrb.gmra.mxu1 %v15170_v18  ;;  %v10909_v18 = vor.u32 %v13352_v46, %v10906_v2  ;;  %v10898_v57 = vld [vmem:[%s14519_s12 + $0x1128] sm:$0xf0]  ;;  %v11037_v5 = vor.u32 %v13384_v19, %v11034_v28  ;;  %v13364_v46 = vld [vmem:[%s14519_s12 + $0x1194] sm:$0xf]  ;;  %v10885_v2 = vor.u32 %v13346_v1, %v10882_v24  ;;  %v13422_v19 = vld [vmem:[%s14519_s12 + $0x1364] sm:$0xf] }
 0x2f0   : > { %6152 = vmatmul.bf16.vlgmr.msrb.gmra.mxu3 %v15237_v36  ;;  %6183 = vmatpush.bf16.msra.mxu1 %v11005_v58  ;;  %v10917_v36 = vor.u32 %v13354_v30, %v10914_v54  ;;  %v10901_v38 = vor.u32 %v13350_v4, %v10898_v57  ;;  %v5920_v55 = vadd.f32 %v5919_v23, %v5907_v63  ;;  %v11130_v58 = vld [vmem:[%s14519_s12 + $0x12f8] sm:$0xf0]  ;;  %v11186_v28 = vld [vmem:[%s14519_s12 + $0x1368] sm:$0xf0]  ;;  %v13404_v57 = vld [vmem:[%s14519_s12 + $0x12d4] sm:$0xf] }
 0x2f1   : > { %6196 = vmatpush.bf16.msra.mxu3 %v11069_v15  ;;  %v13368_v15 = vld [vmem:[%s14519_s12 + $0x11b4] sm:$0xf]  ;;  %v11114_v35 = vld [vmem:[%s14519_s12 + $0x12d8] sm:$0xf0]  ;;  %v13362_v42 = vld [vmem:[%s14519_s12 + $0x1184] sm:$0xf] }
 0x2f2   : > { %6171 = vmatpush.bf16.msra.mxu0 %v10933_v39  ;;  %v11026_v39 = vld [vmem:[%s14519_s12 + $0x1228] sm:$0xf0]  ;;  %v5933_v9 = vadd.f32 %v5932_v12, %v5920_v55  ;;  %v10973_v21 = vor.u32 %v13368_v15, %v10970_v6  ;;  %v5921_v50 = vpop.f32.mrf.mxu0  ;;  %v11189_v15 = vor.u32 %v13422_v19, %v11186_v28  ;;  %v11258_v12 = vld [vmem:[%s14519_s12 + $0x13f8] sm:$0xf0]  ;;  %v16513_v24 = vld [vmem:[#allocation29_spill] sm:$0xff] }
 0x2f3   : > { %6159 = vmatpush.bf16.msra.mxu2 %v10861_v60  ;;  %v13330_v60 = vld [vmem:[%s14519_s12 + $0x1084] sm:$0xf]  ;;  %v11029_v14 = vor.u32 %v13382_v52, %v11026_v39  ;;  %v10946_v63 = vld [vmem:[%s14519_s12 + $0x1188] sm:$0xf0]  ;;  %v11117_v52 = vor.u32 %v13404_v57, %v11114_v35  ;;  %v13420_v39 = vld [vmem:[%s14519_s12 + $0x1354] sm:$0xf] }
 0x2f4   : > { %6184 = vmatpush.bf16.msra.mxu1 %v10997_v3  ;;  %v10821_v54 = vor.u32 %v13330_v60, %v10818_v62  ;;  %v11133_v3 = vor.u32 %v13408_v34, %v11130_v58  ;;  %v11314_v6 = vld [vmem:[%s14519_s12 + $0x1468] sm:$0xf0]  ;;  %v10949_v55 = vor.u32 %v13362_v42, %v10946_v63  ;;  %v13438_v62 = vld [vmem:[%s14519_s12 + $0x13e4] sm:$0xf]  ;;  %v11306_v34 = vld [vmem:[%s14519_s12 + $0x1458] sm:$0xf0] }
 0x2f5   : > { %6197 = vmatpush.bf16.msra.mxu3 %v11061_v56  ;;  %v13366_v56 = vld [vmem:[%s14519_s12 + $0x11a4] sm:$0xf]  ;;  %v11170_v50 = vld [vmem:[%s14519_s12 + $0x1348] sm:$0xf0]  ;;  %v11082_v19 = vld [vmem:[%s14519_s12 + $0x1298] sm:$0xf0] }
 0x2f6   : > { %6172 = vmatpush.bf16.msra.mxu0 %v10925_v32  ;;  %v5945_v32 = vpop.f32.mrf.mxu3  ;;  %v10965_v31 = vor.u32 %v13366_v56, %v10962_v48  ;;  %v13418_v56 = vld [vmem:[%s14519_s12 + $0x1344] sm:$0xf]  ;;  %v11298_v1 = vld [vmem:[%s14519_s12 + $0x1448] sm:$0xf0]  ;;  %v13432_v57 = vld [vmem:[%s14519_s12 + $0x13b4] sm:$0xf] }
 0x2f7   : > { %6160 = vmatpush.bf16.msra.mxu2 %v10853_v29  ;;  %v11018_v29 = vld [vmem:[%s14519_s12 + $0x1218] sm:$0xf0]  ;;  %v16142_v30 = vadd.f32 %v5945_v32, %v5933_v9  ;;  %v13446_v42 = vld [vmem:[%s14519_s12 + $0x1424] sm:$0xf]  ;;  %v11282_v63 = vld [vmem:[%s14519_s12 + $0x1428] sm:$0xf0] }
 0x2f8   : > { %6185 = vmatpush.bf16.msra.mxu1 %v10989_v40  ;;  %v11021_v11 = vor.u32 %v13380_v33, %v11018_v29  ;;  %v11010_v40 = vld [vmem:[%s14519_s12 + $0x1208] sm:$0xf0]  ;;  %v11098_v32 = vld [vmem:[%s14519_s12 + $0x12b8] sm:$0xf0]  ;;  %v13436_v33 = vld [vmem:[%s14519_s12 + $0x13d4] sm:$0xf] }
 0x2f9   : > { %6198 = vmatpush.bf16.msra.mxu3 %v11053_v8  ;;  %v13424_v8 = vld [vmem:[%s14519_s12 + $0x1374] sm:$0xf]  ;;  %v11013_v4 = vor.u32 %v13378_v20, %v11010_v40  ;;  %v11242_v29 = vld [vmem:[%s14519_s12 + $0x13d8] sm:$0xf0] }
 0x2fa   : > { %6173 = vmatpush.bf16.msra.mxu0 %v10917_v36  ;;  %v5908_v36 = vpop.f32.mrf.mxu2  ;;  %v11197_v23 = vor.u32 %v13424_v8, %v11194_v59  ;;  %v13416_v8 = vld [vmem:[%s14519_s12 + $0x1334] sm:$0xf]  ;;  %v11162_v59 = vld [vmem:[%s14519_s12 + $0x1338] sm:$0xf0] }
 0x2fb   : > { %6161 = vmatpush.bf16.msra.mxu2 %v10845_v17  ;;  %v11122_v17 = vld [vmem:[%s14519_s12 + $0x12e8] sm:$0xf0]  ;;  %v13398_v36 = vld [vmem:[%s14519_s12 + $0x12a4] sm:$0xf]  ;;  %v13448_v20 = vld [vmem:[%s14519_s12 + $0x1434] sm:$0xf] }
 0x2fc   : > { %6186 = vmatpush.bf16.msra.mxu1 %v10981_v49  ;;  %v11125_v0 = vor.u32 %v13406_v41, %v11122_v17  ;;  %v13440_v49 = vld [vmem:[%s14519_s12 + $0x13f4] sm:$0xf]  ;;  %v11290_v40 = vld [vmem:[%s14519_s12 + $0x1438] sm:$0xf0] }
 0x2fd   : > { %6199 = vmatpush.bf16.msra.mxu3 %v11045_v61  ;;  %v5934_v61 = vpop.f32.mrf.mxu1  ;;  %v11261_v47 = vor.u32 %v13440_v49, %v11258_v12 }
 0x2fe   : > { %6174 = vmatpush.bf16.msra.mxu0 %v10909_v18  ;;  %v11322_v18 = vld [vmem:[%s14519_s12 + $0x1478] sm:$0xf0] }
 0x2ff   : > { %6162 = vmatpush.bf16.msra.mxu2 %v10837_v10  ;;  %v10957_v10 = vor.u32 %v13364_v46, %v10954_v45  ;;  %v11325_v53 = vor.u32 %v13456_v44, %v11322_v18  ;;  %v13434_v46 = vld [vmem:[%s14519_s12 + $0x13c4] sm:$0xf]  ;;  %v11234_v45 = vld [vmem:[%s14519_s12 + $0x13c8] sm:$0xf0] }
 0x300   : > { %6187 = vmatpush.bf16.msra.mxu1 %v10973_v21  ;;  %v11250_v21 = vld [vmem:[%s14519_s12 + $0x13e8] sm:$0xf0] }
 0x301   : > { %6200 = vmatpush.bf16.msra.mxu3 %v11037_v5  ;;  %v5947_v5 = vpop.f32.mrf.mxu3  ;;  %v11154_v44 = vld [vmem:[%s14519_s12 + $0x1328] sm:$0xf0] }
 0x302   : > { %6175 = vmatpush.bf16.msra.mxu0 %v10901_v38  ;;  %v13454_v38 = vld [vmem:[%s14519_s12 + $0x1464] sm:$0xf] }
 0x303   : > { %6163 = vmatpush.bf16.msra.mxu2 %v10829_v22  ;;  %v13402_v22 = vld [vmem:[%s14519_s12 + $0x12c4] sm:$0xf]  ;;  %v11317_v60 = vor.u32 %v13454_v38, %v11314_v6  ;;  %v11074_v6 = vld [vmem:[%s14519_s12 + $0x1288] sm:$0xf0] }
 0x304   : > { %6188 = vmatpush.bf16.msra.mxu1 %v10965_v31  ;;  %v11109_v58 = vor.u32 %v13402_v22, %v11106_v7  ;;  %v11090_v31 = vld [vmem:[%s14519_s12 + $0x12a8] sm:$0xf0]  ;;  %v13394_v38 = vld [vmem:[%s14519_s12 + $0x1284] sm:$0xf]  ;;  %v11386_v22 = vld [vmem:[%s14519_s12 + $0x14f8] sm:$0xf0] }
 0x305   : > { %6201 = vmatpush.bf16.msra.mxu3 %v11029_v14  ;;  %v13452_v14 = vld [vmem:[%s14519_s12 + $0x1454] sm:$0xf]  ;;  %v11093_v61 = vor.u32 %v13398_v36, %v11090_v31  ;;  %v13430_v7 = vld [vmem:[%s14519_s12 + $0x13a4] sm:$0xf] }
 0x306   : > { %6176 = vmatpush.bf16.msra.mxu0 %v10893_v25  ;;  %v11253_v25 = vor.u32 %v13438_v62, %v11250_v21  ;;  %v11309_v48 = vor.u32 %v13452_v14, %v11306_v34  ;;  %v13444_v21 = vld [vmem:[%s14519_s12 + $0x1414] sm:$0xf]  ;;  %v11274_v14 = vld [vmem:[%s14519_s12 + $0x1418] sm:$0xf0] }
 0x307   : > { %6164 = vmatpush.bf16.msra.mxu2 %v10821_v54  ;;  %v13450_v54 = vld [vmem:[%s14519_s12 + $0x1444] sm:$0xf]  ;;  %v13520_v31 = vld [vmem:[%s14519_s12 + $0x1674] sm:$0xf] }
 0x308   : > { %6189 = vmatpush.bf16.msra.mxu1 %v10957_v10  ;;  %v11301_v41 = vor.u32 %v13450_v54, %v11298_v1  ;;  %v11237_v10 = vor.u32 %v13434_v46, %v11234_v45  ;;  %v11378_v54 = vld [vmem:[%s14519_s12 + $0x14e8] sm:$0xf0]  ;;  %v13428_v1 = vld [vmem:[%s14519_s12 + $0x1394] sm:$0xf] }
 0x309   : > { %6202 = vmatpush.bf16.msra.mxu3 %v11021_v11  ;;  %v11245_v11 = vor.u32 %v13436_v33, %v11242_v29  ;;  %v13470_v29 = vld [vmem:[%s14519_s12 + $0x14e4] sm:$0xf]  ;;  %v11442_v46 = vld [vmem:[%s14519_s12 + $0x1568] sm:$0xf0] }
 0x30a   : > { %6165 = vmatmul.bf16.vlgmr.msra.gmra.mxu2 %v15245_v51  ;;  %6177 = vmatpush.bf16.msra.mxu0 %v10885_v2  ;;  %v11178_v51 = vld [vmem:[%s14519_s12 + $0x1358] sm:$0xf0]  ;;  %v5971_v17 = vpop.f32.mrf.mxu0  ;;  %v11165_v2 = vor.u32 %v13416_v8, %v11162_v59  ;;  %v13442_v8 = vld [vmem:[%s14519_s12 + $0x1404] sm:$0xf]  ;;  %v11266_v59 = vld [vmem:[%s14519_s12 + $0x1408] sm:$0xf0] }
 0x30b   : > { %6209 = vmatpush.bf16.msrb.mxu2 %v11133_v3  ;;  %v11181_v9 = vor.u32 %v13420_v39, %v11178_v51  ;;  %v11285_v51 = vor.u32 %v13446_v42, %v11282_v63  ;;  %v13484_v42 = vld [vmem:[%s14519_s12 + $0x1554] sm:$0xf]  ;;  %v11434_v63 = vld [vmem:[%s14519_s12 + $0x1558] sm:$0xf0] }
 0x30c   : > { %6190 = vmatpush.bf16.msra.mxu1 %v10949_v55  ;;  %v5984_v12 = vpop.f32.mrf.mxu1  ;;  %v13472_v55 = vld [vmem:[%s14519_s12 + $0x14f4] sm:$0xf] }
 0x30d   : > { %6203 = vmatpush.bf16.msra.mxu3 %v11013_v4  ;;  %6178 = vmatmul.bf16.vlgmr.msra.gmra.mxu0 %v15241_v43  ;;  %v13400_v43 = vld [vmem:[%s14519_s12 + $0x12b4] sm:$0xf]  ;;  %v5958_v18 = vpop.f32.mrf.mxu2  ;;  %v11293_v4 = vor.u32 %v13448_v20, %v11290_v40  ;;  %v11269_v20 = vor.u32 %v13442_v8, %v11266_v59 }
 0x30e   : > { %6222 = vmatpush.bf16.msrb.mxu0 %v11197_v23  ;;  %v11101_v3 = vor.u32 %v13400_v43, %v11098_v32  ;;  %v13414_v23 = vld [vmem:[%s14519_s12 + $0x1324] sm:$0xf]  ;;  %v5959_v28 = vadd.f32 %v5958_v18, %v16142_v30  ;;  %v11146_v30 = vld [vmem:[%s14519_s12 + $0x1318] sm:$0xf0]  ;;  %v11389_v43 = vor.u32 %v13472_v55, %v11386_v22  ;;  %v13488_v32 = vld [vmem:[%s14519_s12 + $0x1574] sm:$0xf] }
 0x30f   : > { %6210 = vmatpush.bf16.msrb.mxu2 %v11125_v0  ;;  %6191 = vmatmul.bf16.vlgmr.msra.gmra.mxu1 %v16513_v24  ;;  %v13396_v0 = vld [vmem:[%s14519_s12 + $0x1294] sm:$0xf]  ;;  %v11157_v35 = vor.u32 %v13414_v23, %v11154_v44  ;;  %v13426_v18 = vld [vmem:[%s14519_s12 + $0x1384] sm:$0xf]  ;;  %v11562_v55 = vld [vmem:[%s14519_s12 + $0x1658] sm:$0xf0] }
 0x310   : > { %6204 = vmatmul.bf16.vlgmr.msra.gmra.mxu3 %v15316_v37  ;;  %6235 = vmatpush.bf16.msrb.mxu1 %v11261_v47  ;;  %v11173_v37 = vor.u32 %v13418_v56, %v11170_v50  ;;  %v5972_v49 = vadd.f32 %v5971_v17, %v5959_v28  ;;  %v11085_v5 = vor.u32 %v13396_v0, %v11082_v19  ;;  %v13410_v56 = vld [vmem:[%s14519_s12 + $0x1304] sm:$0xf]  ;;  %v11138_v50 = vld [vmem:[%s14519_s12 + $0x1308] sm:$0xf0]  ;;  %v13468_v40 = vld [vmem:[%s14519_s12 + $0x14d4] sm:$0xf] }
 0x311   : > { %6248 = vmatpush.bf16.msrb.mxu3 %v11325_v53  ;;  %v11226_v53 = vld [vmem:[%s14519_s12 + $0x13b8] sm:$0xf0]  ;;  %v11141_v24 = vor.u32 %v13410_v56, %v11138_v50  ;;  %v13486_v17 = vld [vmem:[%s14519_s12 + $0x1564] sm:$0xf]  ;;  %v11202_v0 = vld [vmem:[%s14519_s12 + $0x1388] sm:$0xf0] }
 0x312   : > { %6223 = vmatpush.bf16.msrb.mxu0 %v11189_v15  ;;  %v13412_v15 = vld [vmem:[%s14519_s12 + $0x1314] sm:$0xf]  ;;  %v11229_v39 = vor.u32 %v13432_v57, %v11226_v53  ;;  %v5973_v47 = vpop.f32.mrf.mxu0  ;;  %v13518_v57 = vld [vmem:[%s14519_s12 + $0x1664] sm:$0xf]  ;;  %v11498_v50 = vld [vmem:[%s14519_s12 + $0x15d8] sm:$0xf0] }
 0x313   : > { %6211 = vmatpush.bf16.msrb.mxu2 %v11117_v52  ;;  %v5985_v52 = vadd.f32 %v5984_v12, %v5972_v49  ;;  %v11149_v62 = vor.u32 %v13412_v15, %v11146_v30  ;;  %v16514_v23 = vld [vmem:[#allocation31_spill] sm:$0xff]  ;;  %v11205_v49 = vor.u32 %v13426_v18, %v11202_v0  ;;  %v11362_v15 = vld [vmem:[%s14519_s12 + $0x14c8] sm:$0xf0]  ;;  %v16516_v22 = vld [vmem:[#allocation33_spill] sm:$0xff] }
 0x314   : > { %6236 = vmatpush.bf16.msrb.mxu1 %v11253_v25  ;;  %v11450_v25 = vld [vmem:[%s14519_s12 + $0x1578] sm:$0xf0]  ;;  %v13504_v19 = vld [vmem:[%s14519_s12 + $0x15f4] sm:$0xf]  ;;  %v13482_v47 = vld [vmem:[%s14519_s12 + $0x1544] sm:$0xf] }
 0x315   : > { %6249 = vmatpush.bf16.msrb.mxu3 %v11317_v60  ;;  %v5997_v60 = vpop.f32.mrf.mxu3  ;;  %v11453_v36 = vor.u32 %v13488_v32, %v11450_v25  ;;  %v16515_v30 = vld [vmem:[#allocation30_spill] sm:$0xff]  ;;  %v16517_v25 = vld [vmem:[#allocation32_spill] sm:$0xff] }
 0x316   : > { %6224 = vmatpush.bf16.msrb.mxu0 %v11181_v9  ;;  %v11218_v9 = vld [vmem:[%s14519_s12 + $0x13a8] sm:$0xf0]  ;;  %v16213_v34 = vadd.f32 %v5997_v60, %v5985_v52  ;;  %v11437_v52 = vor.u32 %v13484_v42, %v11434_v63  ;;  %v11482_v0 = vld [vmem:[%s14519_s12 + $0x15b8] sm:$0xf0] }
 0x317   : > { %6212 = vmatpush.bf16.msrb.mxu2 %v11109_v58  ;;  %v11077_v58 = vor.u32 %v13394_v38, %v11074_v6  ;;  %v11221_v33 = vor.u32 %v13430_v7, %v11218_v9  ;;  %v13502_v6 = vld [vmem:[%s14519_s12 + $0x15e4] sm:$0xf]  ;;  %v11426_v60 = vld [vmem:[%s14519_s12 + $0x1548] sm:$0xf0]  ;;  %v11354_v9 = vld [vmem:[%s14519_s12 + $0x14b8] sm:$0xf0] }
 0x318   : > { %6237 = vmatpush.bf16.msrb.mxu1 %v11245_v11  ;;  %v11578_v11 = vld [vmem:[%s14519_s12 + $0x1678] sm:$0xf0]  ;;  %v11429_v56 = vor.u32 %v13482_v47, %v11426_v60  ;;  %v11554_v32 = vld [vmem:[%s14519_s12 + $0x1648] sm:$0xf0]  ;;  %v13474_v47 = vld [vmem:[%s14519_s12 + $0x1504] sm:$0xf] }
 0x319   : > { %6250 = vmatpush.bf16.msrb.mxu3 %v11309_v48  ;;  %v5960_v48 = vpop.f32.mrf.mxu2  ;;  %v11581_v44 = vor.u32 %v13520_v31, %v11578_v11  ;;  %v13512_v31 = vld [vmem:[%s14519_s12 + $0x1634] sm:$0xf]  ;;  %v11546_v11 = vld [vmem:[%s14519_s12 + $0x1638] sm:$0xf0]  ;;  %v11330_v42 = vld [vmem:[%s14519_s12 + $0x1488] sm:$0xf0] }
 0x31a   : > { %6225 = vmatpush.bf16.msrb.mxu0 %v11173_v37  ;;  %v11277_v37 = vor.u32 %v13444_v21, %v11274_v14  ;;  %v11394_v60 = vld [vmem:[%s14519_s12 + $0x1508] sm:$0xf0] }
 0x31b   : > { %6213 = vmatpush.bf16.msrb.mxu2 %v11101_v3  ;;  %v11210_v3 = vld [vmem:[%s14519_s12 + $0x1398] sm:$0xf0] }
 0x31c   : > { %6238 = vmatpush.bf16.msrb.mxu1 %v11237_v10  ;;  %v11213_v45 = vor.u32 %v13428_v1, %v11210_v3  ;;  %v11445_v10 = vor.u32 %v13486_v17, %v11442_v46  ;;  %v13498_v3 = vld [vmem:[%s14519_s12 + $0x15c4] sm:$0xf]  ;;  %v11410_v46 = vld [vmem:[%s14519_s12 + $0x1528] sm:$0xf0] }
 0x31d   : > { %6251 = vmatpush.bf16.msrb.mxu3 %v11301_v41  ;;  %v11381_v41 = vor.u32 %v13470_v29, %v11378_v54  ;;  %v5999_v28 = vpop.f32.mrf.mxu3  ;;  %v13462_v29 = vld [vmem:[%s14519_s12 + $0x14a4] sm:$0xf]  ;;  %v11346_v54 = vld [vmem:[%s14519_s12 + $0x14a8] sm:$0xf0] }
 0x31e   : > { %6226 = vmatpush.bf16.msrb.mxu0 %v11165_v2  ;;  %v5986_v2 = vpop.f32.mrf.mxu1  ;;  %v13478_v17 = vld [vmem:[%s14519_s12 + $0x1524] sm:$0xf]  ;;  %v11538_v28 = vld [vmem:[%s14519_s12 + $0x1628] sm:$0xf0] }
 0x31f   : > { %6214 = vmatpush.bf16.msrb.mxu2 %v11093_v61  ;;  %v11370_v61 = vld [vmem:[%s14519_s12 + $0x14d8] sm:$0xf0]  ;;  %v11413_v18 = vor.u32 %v13478_v17, %v11410_v46  ;;  %v11458_v17 = vld [vmem:[%s14519_s12 + $0x1588] sm:$0xf0] }
 0x320   : > { %6239 = vmatpush.bf16.msrb.mxu1 %v11229_v39  ;;  %v11373_v53 = vor.u32 %v13468_v40, %v11370_v61  ;;  %v11506_v39 = vld [vmem:[%s14519_s12 + $0x15e8] sm:$0xf0] }
 0x321   : > { %6252 = vmatpush.bf16.msrb.mxu3 %v11293_v4  ;;  %v11514_v4 = vld [vmem:[%s14519_s12 + $0x15f8] sm:$0xf0]  ;;  %v11509_v21 = vor.u32 %v13502_v6, %v11506_v39  ;;  %v13508_v39 = vld [vmem:[%s14519_s12 + $0x1614] sm:$0xf] }
 0x322   : > { %6227 = vmatpush.bf16.msrb.mxu0 %v11157_v35  ;;  %v11570_v35 = vld [vmem:[%s14519_s12 + $0x1668] sm:$0xf0]  ;;  %v11517_v12 = vor.u32 %v13504_v19, %v11514_v4  ;;  %v13510_v19 = vld [vmem:[%s14519_s12 + $0x1624] sm:$0xf] }
 0x323   : > { %6215 = vmatpush.bf16.msrb.mxu2 %v11085_v5  ;;  %v13466_v5 = vld [vmem:[%s14519_s12 + $0x14c4] sm:$0xf]  ;;  %v11573_v38 = vor.u32 %v13518_v57, %v11570_v35  ;;  %v13476_v57 = vld [vmem:[%s14519_s12 + $0x1514] sm:$0xf] }
 0x324   : > { %6240 = vmatpush.bf16.msrb.mxu1 %v11221_v33  ;;  %v11365_v7 = vor.u32 %v13466_v5, %v11362_v15  ;;  %v13480_v33 = vld [vmem:[%s14519_s12 + $0x1534] sm:$0xf]  ;;  %v11541_v5 = vor.u32 %v13510_v19, %v11538_v28 }
 0x325   : > { %6253 = vmatpush.bf16.msrb.mxu3 %v11285_v51  ;;  %v13516_v51 = vld [vmem:[%s14519_s12 + $0x1654] sm:$0xf] }
 0x326   : > { %6228 = vmatpush.bf16.msrb.mxu0 %v11149_v62  ;;  %v13464_v62 = vld [vmem:[%s14519_s12 + $0x14b4] sm:$0xf]  ;;  %v11565_v14 = vor.u32 %v13516_v51, %v11562_v55  ;;  %v11530_v51 = vld [vmem:[%s14519_s12 + $0x1618] sm:$0xf0] }
 0x327   : > { %6216 = vmatpush.bf16.msrb.mxu2 %v11077_v58  ;;  %v13500_v58 = vld [vmem:[%s14519_s12 + $0x15d4] sm:$0xf]  ;;  %v11357_v48 = vor.u32 %v13464_v62, %v11354_v9  ;;  %v13550_v9 = vld [vmem:[%s14519_s12 + $0x1764] sm:$0xf] }
 0x328   : > { %6241 = vmatpush.bf16.msrb.mxu1 %v11213_v45  ;;  %v11501_v1 = vor.u32 %v13500_v58, %v11498_v50  ;;  %v13460_v45 = vld [vmem:[%s14519_s12 + $0x1494] sm:$0xf]  ;;  %v13534_v50 = vld [vmem:[%s14519_s12 + $0x16e4] sm:$0xf] }
 0x329   : > { %6254 = vmatpush.bf16.msrb.mxu3 %v11277_v37  ;;  %v11418_v37 = vld [vmem:[%s14519_s12 + $0x1538] sm:$0xf0]  ;;  %v13536_v15 = vld [vmem:[%s14519_s12 + $0x16f4] sm:$0xf] }
 0x32a   : > { %6217 = vmatmul.bf16.vlgmr.msrb.gmra.mxu2 %v16514_v23  ;;  %6229 = vmatpush.bf16.msrb.mxu0 %v11141_v24  ;;  %v6023_v8 = vpop.f32.mrf.mxu0  ;;  %v11421_v59 = vor.u32 %v13480_v33, %v11418_v37  ;;  %v11549_v23 = vor.u32 %v13512_v31, %v11546_v11  ;;  %v13506_v33 = vld [vmem:[%s14519_s12 + $0x1604] sm:$0xf]  ;;  %v11522_v37 = vld [vmem:[%s14519_s12 + $0x1608] sm:$0xf0]  ;;  %v11626_v31 = vld [vmem:[%s14519_s12 + $0x16d8] sm:$0xf0] }
 0x32b   : > { %6261 = vmatpush.bf16.msra.mxu2 %v11389_v43  ;;  %v13514_v43 = vld [vmem:[%s14519_s12 + $0x1644] sm:$0xf]  ;;  %v13544_v28 = vld [vmem:[%s14519_s12 + $0x1734] sm:$0xf] }
 0x32c   : > { %6242 = vmatpush.bf16.msrb.mxu1 %v11205_v49  ;;  %v11557_v24 = vor.u32 %v13514_v43, %v11554_v32  ;;  %v6036_v35 = vpop.f32.mrf.mxu1  ;;  %v11634_v43 = vld [vmem:[%s14519_s12 + $0x16e8] sm:$0xf0]  ;;  %v13492_v32 = vld [vmem:[%s14519_s12 + $0x1594] sm:$0xf] }
 0x32d   : > { %6255 = vmatpush.bf16.msrb.mxu3 %v11269_v20  ;;  %6230 = vmatmul.bf16.vlgmr.msrb.gmra.mxu0 %v16515_v30  ;;  %v6010_v2 = vpop.f32.mrf.mxu2  ;;  %v11338_v20 = vld [vmem:[%s14519_s12 + $0x1498] sm:$0xf0]  ;;  %v16518_v11 = vld [vmem:[#allocation35_spill] sm:$0xff] }
 0x32e   : > { %6274 = vmatpush.bf16.msra.mxu0 %v11453_v36  ;;  %v11490_v36 = vld [vmem:[%s14519_s12 + $0x15c8] sm:$0xf0]  ;;  %v6011_v40 = vadd.f32 %v6010_v2, %v16213_v34  ;;  %v11341_v4 = vor.u32 %v13460_v45, %v11338_v20  ;;  %v11402_v34 = vld [vmem:[%s14519_s12 + $0x1518] sm:$0xf0]  ;;  %v13546_v20 = vld [vmem:[%s14519_s12 + $0x1744] sm:$0xf] }
 0x32f   : > { %6262 = vmatpush.bf16.msra.mxu2 %v11381_v41  ;;  %6243 = vmatmul.bf16.vlgmr.msrb.gmra.mxu1 %v16517_v25  ;;  %v11349_v41 = vor.u32 %v13462_v29, %v11346_v54  ;;  %v11493_v61 = vor.u32 %v13498_v3, %v11490_v36  ;;  %v11642_v30 = vld [vmem:[%s14519_s12 + $0x16f8] sm:$0xf0]  ;;  %v11405_v6 = vor.u32 %v13476_v57, %v11402_v34  ;;  %v13532_v36 = vld [vmem:[%s14519_s12 + $0x16d4] sm:$0xf] }
 0x330   : > { %6256 = vmatmul.bf16.vlgmr.msrb.gmra.mxu3 %v16516_v22  ;;  %6287 = vmatpush.bf16.msra.mxu1 %v11517_v12  ;;  %v13494_v12 = vld [vmem:[%s14519_s12 + $0x15a4] sm:$0xf]  ;;  %v11645_v62 = vor.u32 %v13536_v15, %v11642_v30  ;;  %v11397_v25 = vor.u32 %v13474_v47, %v11394_v60  ;;  %v11637_v54 = vor.u32 %v13534_v50, %v11634_v43  ;;  %v11610_v57 = vld [vmem:[%s14519_s12 + $0x16b8] sm:$0xf0] }
 0x331   : > { %6300 = vmatpush.bf16.msra.mxu3 %v11581_v44  ;;  %v13496_v44 = vld [vmem:[%s14519_s12 + $0x15b4] sm:$0xf]  ;;  %v11629_v45 = vor.u32 %v13532_v36, %v11626_v31  ;;  %v13538_v60 = vld [vmem:[%s14519_s12 + $0x1704] sm:$0xf] }
 0x332   : > { %6275 = vmatpush.bf16.msra.mxu0 %v11445_v10  ;;  %v6024_v10 = vadd.f32 %v6023_v8, %v6011_v40  ;;  %v11485_v49 = vor.u32 %v13496_v44, %v11482_v0  ;;  %v6025_v55 = vpop.f32.mrf.mxu0  ;;  %v11682_v40 = vld [vmem:[%s14519_s12 + $0x1748] sm:$0xf0] }
 0x333   : > { %6263 = vmatpush.bf16.msra.mxu2 %v11373_v53  ;;  %v13458_v53 = vld [vmem:[%s14519_s12 + $0x1484] sm:$0xf]  ;;  %v11618_v44 = vld [vmem:[%s14519_s12 + $0x16c8] sm:$0xf0]  ;;  %v11685_v0 = vor.u32 %v13546_v20, %v11682_v40 }
 0x334   : > { %6288 = vmatpush.bf16.msra.mxu1 %v11509_v21  ;;  %v6037_v63 = vadd.f32 %v6036_v35, %v6024_v10  ;;  %v11698_v21 = vld [vmem:[%s14519_s12 + $0x1768] sm:$0xf0]  ;;  %v6038_v3 = vpop.f32.mrf.mxu1  ;;  %v11674_v10 = vld [vmem:[%s14519_s12 + $0x1738] sm:$0xf0] }
 0x335   : > { %6301 = vmatpush.bf16.msra.mxu3 %v11573_v38  ;;  %v6049_v38 = vpop.f32.mrf.mxu3  ;;  %v11701_v29 = vor.u32 %v13550_v9, %v11698_v21  ;;  %v11677_v34 = vor.u32 %v13544_v28, %v11674_v10  ;;  %v16520_v35 = vld [vmem:[#allocation36_spill] sm:$0xff]  ;;  %v13522_v21 = vld [vmem:[%s14519_s12 + $0x1684] sm:$0xf] }
 0x336   : > { %6276 = vmatpush.bf16.msra.mxu0 %v11437_v52  ;;  %v11474_v52 = vld [vmem:[%s14519_s12 + $0x15a8] sm:$0xf0]  ;;  %v16284_v22 = vadd.f32 %v6049_v38, %v6037_v63  ;;  %v13526_v63 = vld [vmem:[%s14519_s12 + $0x16a4] sm:$0xf]  ;;  %v11658_v38 = vld [vmem:[%s14519_s12 + $0x1718] sm:$0xf0] }
 0x337   : > { %6264 = vmatpush.bf16.msra.mxu2 %v11365_v7  ;;  %v11333_v7 = vor.u32 %v13458_v53, %v11330_v42  ;;  %v11477_v58 = vor.u32 %v13494_v12, %v11474_v52  ;;  %v13542_v42 = vld [vmem:[%s14519_s12 + $0x1724] sm:$0xf]  ;;  %v13540_v12 = vld [vmem:[%s14519_s12 + $0x1714] sm:$0xf] }
 0x338   : > { %6289 = vmatpush.bf16.msra.mxu1 %v11501_v1  ;;  %v13548_v1 = vld [vmem:[%s14519_s12 + $0x1754] sm:$0xf]  ;;  %v11661_v55 = vor.u32 %v13540_v12, %v11658_v38 }
 0x339   : > { %6302 = vmatpush.bf16.msra.mxu3 %v11565_v14  ;;  %v6012_v14 = vpop.f32.mrf.mxu2  ;;  %v13524_v52 = vld [vmem:[%s14519_s12 + $0x1694] sm:$0xf] }
 0x33a   : > { %6277 = vmatpush.bf16.msra.mxu0 %v11429_v56  ;;  %v11533_v56 = vor.u32 %v13508_v39, %v11530_v51  ;;  %v11594_v39 = vld [vmem:[%s14519_s12 + $0x1698] sm:$0xf0]  ;;  %v11586_v14 = vld [vmem:[%s14519_s12 + $0x1688] sm:$0xf0] }
 0x33b   : > { %6265 = vmatpush.bf16.msra.mxu2 %v11357_v48  ;;  %v11466_v48 = vld [vmem:[%s14519_s12 + $0x1598] sm:$0xf0]  ;;  %v11597_v47 = vor.u32 %v13524_v52, %v11594_v39 }
 0x33c   : > { %6290 = vmatpush.bf16.msra.mxu1 %v11493_v61  ;;  %v11469_v8 = vor.u32 %v13492_v32, %v11466_v48 }
 0x33d   : > { %6303 = vmatpush.bf16.msra.mxu3 %v11557_v24  ;;  %v11690_v24 = vld [vmem:[%s14519_s12 + $0x1758] sm:$0xf0]  ;;  %v6051_v46 = vpop.f32.mrf.mxu3 }
 0x33e   : > { %6278 = vmatpush.bf16.msra.mxu0 %v11421_v59  ;;  %v11525_v59 = vor.u32 %v13506_v33, %v11522_v37  ;;  %v11693_v2 = vor.u32 %v13548_v1, %v11690_v24 }
 0x33f   : > { %6266 = vmatpush.bf16.msra.mxu2 %v11349_v41  ;;  %v13490_v41 = vld [vmem:[%s14519_s12 + $0x1584] sm:$0xf] }
 0x340   : > { %6291 = vmatpush.bf16.msra.mxu1 %v11485_v49  ;;  %v11461_v61 = vor.u32 %v13490_v41, %v11458_v17  ;;  %v11602_v49 = vld [vmem:[%s14519_s12 + $0x16a8] sm:$0xf0] }
 0x341   : > { %6304 = vmatpush.bf16.msra.mxu3 %v11549_v23  ;;  %v13530_v23 = vld [vmem:[%s14519_s12 + $0x16c4] sm:$0xf]  ;;  %v11605_v30 = vor.u32 %v13526_v63, %v11602_v49 }
 0x342   : > { %6279 = vmatpush.bf16.msra.mxu0 %v11413_v18  ;;  %v16519_v18 = vld [vmem:[#allocation34_spill] sm:$0xff]  ;;  %v11621_v19 = vor.u32 %v13530_v23, %v11618_v44 }
 0x343   : > { %6267 = vmatpush.bf16.msra.mxu2 %v11341_v4  ;;  %v13528_v4 = vld [vmem:[%s14519_s12 + $0x16b4] sm:$0xf] }
 0x344   : > { %6292 = vmatpush.bf16.msra.mxu1 %v11477_v58  ;;  %v11613_v53 = vor.u32 %v13528_v4, %v11610_v57 }
 0x345   : > { %6305 = vmatpush.bf16.msra.mxu3 %v11541_v5 }
 0x346   : > { %6280 = vmatpush.bf16.msra.mxu0 %v11405_v6 }
 0x347   : > { %6268 = vmatpush.bf16.msra.mxu2 %v11333_v7 }
 0x348   : > { %6293 = vmatpush.bf16.msra.mxu1 %v11469_v8 }
 0x349   : > { %6306 = vmatpush.bf16.msra.mxu3 %v11533_v56 }
 0x34a   : > { %6269 = vmatmul.bf16.vlgmr.msra.gmra.mxu2 %v16518_v11  ;;  %6281 = vmatpush.bf16.msra.mxu0 %v11397_v25  ;;  %v6075_v5 = vpop.f32.mrf.mxu0  ;;  %v11589_v25 = vor.u32 %v13522_v21, %v11586_v14 }
 0x34b   : > { %6313 = vmatpush.bf16.msrb.mxu2 %v11645_v62  ;;  %v11650_v62 = vld [vmem:[%s14519_s12 + $0x1708] sm:$0xf0] }
 0x34c   : > { %6294 = vmatpush.bf16.msra.mxu1 %v11461_v61  ;;  %v6088_v9 = vpop.f32.mrf.mxu1  ;;  %v11653_v50 = vor.u32 %v13538_v60, %v11650_v62 }
 0x34d   : > { %6307 = vmatpush.bf16.msra.mxu3 %v11525_v59  ;;  %6282 = vmatmul.bf16.vlgmr.msra.gmra.mxu0 %v16519_v18  ;;  %v6062_v6 = vpop.f32.mrf.mxu2 }
 0x34e   : > { %6327 = vmatpush.bf16.msrb.mxu0 %v11701_v29  ;;  %v6063_v51 = vadd.f32 %v6062_v6, %v16284_v22 }
 0x34f   : > { %6314 = vmatpush.bf16.msrb.mxu2 %v11637_v54  ;;  %6295 = vmatmul.bf16.vlgmr.msra.gmra.mxu1 %v16520_v35 }
 0x350   : > { %6308 = vmatmul.bf16.vlgmr.msra.gmra.mxu3 %v15478_v13  ;;  %v11666_v13 = vld [vmem:[%s14519_s12 + $0x1728] sm:$0xf0]  ;;  %v6076_v7 = vadd.f32 %v6075_v5, %v6063_v51 }
 0x351   : > { %v11669_v15 = vor.u32 %v13542_v42, %v11666_v13 }
 0x352   : > { %6328 = vmatpush.bf16.msrb.mxu0 %v11693_v2  ;;  %v6089_v58 = vadd.f32 %v6088_v9, %v6076_v7  ;;  %v6077_v43 = vpop.f32.mrf.mxu0 }
 0x353   : > { %6315 = vmatpush.bf16.msrb.mxu2 %v11629_v45  ;;  %v6101_v56 = vpop.f32.mrf.mxu3 }
 0x354   : > { %v6102_v32 = vadd.f32 %v6101_v56, %v6089_v58  ;;  %v6090_v22 = vpop.f32.mrf.mxu1 }
 0x355   : > { %v6064_v48 = vpop.f32.mrf.mxu2 }
 0x356   : > { %6329 = vmatpush.bf16.msrb.mxu0 %v11685_v0 }
 0x357   : > { %6316 = vmatpush.bf16.msrb.mxu2 %v11621_v19 }
 0x35a   : > { %6330 = vmatpush.bf16.msrb.mxu0 %v11677_v34 }
 0x35b   : > { %6317 = vmatpush.bf16.msrb.mxu2 %v11613_v53  ;;  %v6103_v33 = vpop.f32.mrf.mxu3 }
 0x35e   : > { %6331 = vmatpush.bf16.msrb.mxu0 %v11669_v15 }
 0x35f   : > { %6318 = vmatpush.bf16.msrb.mxu2 %v11605_v30 }
 0x362   : > { %6332 = vmatpush.bf16.msrb.mxu0 %v11661_v55 }
 0x363   : > { %6319 = vmatpush.bf16.msrb.mxu2 %v11597_v47 }
 0x366   : > { %6333 = vmatpush.bf16.msrb.mxu0 %v11653_v50 }
 0x367   : > { %6320 = vmatpush.bf16.msrb.mxu2 %v11589_v25 }
 0x369   : > { %11703 = vmatmul.msk.bf16.vlgmr.msrb.gmra.mxu0 %vm5113_vm0, %v15469_v27 }
 0x36a   : > { %6321 = vmatmul.bf16.vlgmr.msrb.gmra.mxu2 %v15485_v26  ;;  %v6127_v37 = vpop.f32.mrf.mxu0 }
 0x36c   : > { %v6140_v24 = vpop.f32.mrf.mxu1 }
 0x36d   : > { %v6114_v29 = vpop.f32.mrf.mxu2 }
 0x36e   : > { %v6115_v54 = vadd.f32 %v6114_v29, %v6102_v32 }
 0x370   : > { %v6128_v1 = vadd.f32 %v6127_v37, %v6115_v54 }
 0x372   : > { %v6141_v3 = vadd.f32 %v6140_v24, %v6128_v1  ;;  %v6129_v59 = vpop.f32.mrf.mxu0 }
 0x373   : > { %v6153_v8 = vpop.f32.mrf.mxu3 }
 0x374   : > { %v6154_v36 = vadd.f32 %v6153_v8, %v6141_v3  ;;  %v6142_v11 = vpop.f32.mrf.mxu1 }
 0x375   : > { %v6116_v31 = vpop.f32.mrf.mxu2 }
 0x37b   : > { %v6155_v41 = vpop.f32.mrf.mxu3 }
 0x38a   : > { %v6179_v17 = vpop.f32.mrf.mxu0 }
 0x38c   : > { %v6192_v27 = vpop.f32.mrf.mxu1 }
 0x38d   : > { %v6166_v46 = vpop.f32.mrf.mxu2 }
 0x38e   : > { %v6167_v2 = vadd.f32 %v6166_v46, %v6154_v36 }
 0x390   : > { %v6180_v45 = vadd.f32 %v6179_v17, %v6167_v2 }
 0x392   : > { %v6181_v26 = vpop.f32.mrf.mxu0  ;;  %v6193_v34 = vadd.f32 %v6192_v27, %v6180_v45 }
 0x393   : > { %v6205_v20 = vpop.f32.mrf.mxu3 }
 0x394   : > { %v6194_v61 = vpop.f32.mrf.mxu1  ;;  %v6206_v53 = vadd.f32 %v6205_v20, %v6193_v34 }
 0x395   : > { %v6168_v40 = vpop.f32.mrf.mxu2 }
 0x39b   : > { %v6207_v23 = vpop.f32.mrf.mxu3 }
 0x3aa   : > { %v6231_v44 = vpop.f32.mrf.mxu0 }
 0x3ac   : > { %v6244_v0 = vpop.f32.mrf.mxu1 }
 0x3ad   : > { %v6218_v18 = vpop.f32.mrf.mxu2 }
 0x3ae   : > { %v6219_v13 = vadd.f32 %v6218_v18, %v6206_v53 }
 0x3b0   : > { %v6232_v49 = vadd.f32 %v6231_v44, %v6219_v13 }
 0x3b2   : > { %v6233_v28 = vpop.f32.mrf.mxu0  ;;  %v6245_v12 = vadd.f32 %v6244_v0, %v6232_v49 }
 0x3b3   : > { %v6257_v19 = vpop.f32.mrf.mxu3 }
 0x3b4   : > { %v6246_v4 = vpop.f32.mrf.mxu1  ;;  %v6258_v6 = vadd.f32 %v6257_v19, %v6245_v12 }
 0x3b5   : > { %v6220_v10 = vpop.f32.mrf.mxu2 }
 0x3bb   : > { %v6259_v57 = vpop.f32.mrf.mxu3 }
 0x3ca   : > { %v6283_v35 = vpop.f32.mrf.mxu0 }
 0x3cc   : > { %v6296_v63 = vpop.f32.mrf.mxu1 }
 0x3cd   : > { %v6270_v42 = vpop.f32.mrf.mxu2 }
 0x3ce   : > { %v6271_v39 = vadd.f32 %v6270_v42, %v6258_v6 }
 0x3d0   : > { %v6284_v51 = vadd.f32 %v6283_v35, %v6271_v39 }
 0x3d2   : > { %v6285_v15 = vpop.f32.mrf.mxu0  ;;  %v6297_v7 = vadd.f32 %v6296_v63, %v6284_v51 }
 0x3d3   : > { %v6309_v5 = vpop.f32.mrf.mxu3 }
 0x3d4   : > { %v6298_v38 = vpop.f32.mrf.mxu1  ;;  %v6310_v47 = vadd.f32 %v6309_v5, %v6297_v7 }
 0x3d5   : > { %v6272_v30 = vpop.f32.mrf.mxu2 }
 0x3db   : > { %v6311_v52 = vpop.f32.mrf.mxu3 }
 0x3e6   : > { %v6335_v55 = vpop.f32.mrf.mxu0 }
 0x3ed   : > { %v6322_v60 = vpop.f32.mrf.mxu2 }
 0x3ee   : > { %v6323_v62 = vadd.f32 %v6322_v60, %v6310_v47  ;;  %v6337_v9 = vpop.f32.mrf.mxu0 }
 0x3f0   : > { %v6336_v21 = vadd.f32 %v6335_v55, %v6323_v62 }
 0x3f1   : > { %6357 = sbr.rel (%p11706_p1) target bundleno = 1640 (0x668), region = 100 }
 0x3f2   : > { %vm6341_vm2 = vcmp.ge.f32.partialorder %v6336_v21, 0.0  ;;  %v6344_v14 = vmul.f32 %v6342_v16, %v6336_v21 }
 0x3f4   : > { %v6346_v58 = vsel %vm6341_vm2, %v6336_v21, %v6344_v14 }
 0x3f5   : > { %6353 = vst [vmem:[%s15855_s18 + $0x8] sm:$0xff] %v6346_v58  ;;  %v6324_v56 = vpop.f32.mrf.mxu2 }
 0x3f6   : > { %v11821_v50 = vld [vmem:[#allocation10 + $0xe0] sm:$0xf]  ;;  %v13582_v43 = vld [vmem:[#allocation10 + $0xec] sm:$0xf0]  ;;  %vm8524_vm9 = vcmask 490496  }
 0x3f7   : > { %v11949_v32 = vld [vmem:[#allocation10 + $0x1e0] sm:$0xf]  ;;  %v11822_v25 = vor.u32 %v13582_v43, %v11821_v50  ;;  %v13614_v48 = vld [vmem:[#allocation10 + $0x1ec] sm:$0xf0] }
 0x3f8   : > { %v12077_v22 = vld [vmem:[#allocation10 + $0x2e0] sm:$0xf]  ;;  %v13646_v33 = vld [vmem:[#allocation10 + $0x2ec] sm:$0xf0]  ;;  %v11950_v37 = vor.u32 %v13614_v48, %v11949_v32 }
 0x3f9   : > { %v12078_v29 = vor.u32 %v13646_v33, %v12077_v22  ;;  %v12205_v54 = vld [vmem:[#allocation10 + $0x3e0] sm:$0xf]  ;;  %v13678_v1 = vld [vmem:[#allocation10 + $0x3ec] sm:$0xf0]  ;;  %7532 = vmatpush.bf16.msra.mxu0 %v11822_v25 }
 0x3fa   : > { %v11805_v24 = vld [vmem:[#allocation10 + $0xc0] sm:$0xf]  ;;  %v12206_v16 = vor.u32 %v13678_v1, %v12205_v54  ;;  %v13578_v3 = vld [vmem:[#allocation10 + $0xcc] sm:$0xf0]  ;;  %7545 = vmatpush.bf16.msra.mxu1 %v11950_v37 }
 0x3fb   : > { %v11933_v8 = vld [vmem:[#allocation10 + $0x1c0] sm:$0xf]  ;;  %v13610_v59 = vld [vmem:[#allocation10 + $0x1cc] sm:$0xf0]  ;;  %7558 = vmatpush.bf16.msra.mxu2 %v12078_v29  ;;  %v11806_v36 = vor.u32 %v13578_v3, %v11805_v24 }
 0x3fc   : > { %v11934_v31 = vor.u32 %v13610_v59, %v11933_v8  ;;  %v12061_v11 = vld [vmem:[#allocation10 + $0x2c0] sm:$0xf]  ;;  %v13642_v41 = vld [vmem:[#allocation10 + $0x2cc] sm:$0xf0]  ;;  %7571 = vmatpush.bf16.msra.mxu3 %v12206_v16 }
 0x3fd   : > { %v12189_v17 = vld [vmem:[#allocation10 + $0x3c0] sm:$0xf]  ;;  %v12062_v46 = vor.u32 %v13642_v41, %v12061_v11  ;;  %v13674_v2 = vld [vmem:[#allocation10 + $0x3cc] sm:$0xf0]  ;;  %7533 = vmatpush.bf16.msra.mxu0 %v11806_v36 }
 0x3fe   : > { %v11789_v45 = vld [vmem:[#allocation10 + $0xa0] sm:$0xf]  ;;  %v13574_v27 = vld [vmem:[#allocation10 + $0xac] sm:$0xf0]  ;;  %v12190_v20 = vor.u32 %v13674_v2, %v12189_v17  ;;  %7546 = vmatpush.bf16.msra.mxu1 %v11934_v31 }
 0x3ff   : > { %v11917_v26 = vld [vmem:[#allocation10 + $0x1a0] sm:$0xf]  ;;  %v13606_v40 = vld [vmem:[#allocation10 + $0x1ac] sm:$0xf0]  ;;  %v11790_v23 = vor.u32 %v13574_v27, %v11789_v45  ;;  %7559 = vmatpush.bf16.msra.mxu2 %v12062_v46 }
 0x400   : > { %v12045_v61 = vld [vmem:[#allocation10 + $0x2a0] sm:$0xf]  ;;  %v13638_v44 = vld [vmem:[#allocation10 + $0x2ac] sm:$0xf0]  ;;  %v11918_v19 = vor.u32 %v13606_v40, %v11917_v26  ;;  %7572 = vmatpush.bf16.msra.mxu3 %v12190_v20 }
 0x401   : > { %v12173_v18 = vld [vmem:[#allocation10 + $0x3a0] sm:$0xf]  ;;  %v13670_v0 = vld [vmem:[#allocation10 + $0x3ac] sm:$0xf0]  ;;  %v12046_v28 = vor.u32 %v13638_v44, %v12045_v61  ;;  %7534 = vmatpush.bf16.msra.mxu0 %v11790_v23 }
 0x402   : > { %v11773_v10 = vld [vmem:[#allocation10 + $0x80] sm:$0xf]  ;;  %v13570_v4 = vld [vmem:[#allocation10 + $0x8c] sm:$0xf0]  ;;  %v12174_v34 = vor.u32 %v13670_v0, %v12173_v18  ;;  %7547 = vmatpush.bf16.msra.mxu1 %v11918_v19  ;;  %v13580_v19 = vld [vmem:[#allocation10 + $0xe4] sm:$0xf] }
 0x403   : > { %v11901_v57 = vld [vmem:[#allocation10 + $0x180] sm:$0xf]  ;;  %v13602_v35 = vld [vmem:[#allocation10 + $0x18c] sm:$0xf0]  ;;  %v11774_v49 = vor.u32 %v13570_v4, %v11773_v10  ;;  %7560 = vmatpush.bf16.msra.mxu2 %v12046_v28  ;;  %v11823_v28 = vld [vmem:[#allocation10 + $0xf0] sm:$0xf0] }
 0x404   : > { %v12029_v53 = vld [vmem:[#allocation10 + $0x280] sm:$0xf]  ;;  %v13634_v42 = vld [vmem:[#allocation10 + $0x28c] sm:$0xf0]  ;;  %v11902_v5 = vor.u32 %v13602_v35, %v11901_v57  ;;  %7573 = vmatpush.bf16.msra.mxu3 %v12174_v34  ;;  %v13612_v57 = vld [vmem:[#allocation10 + $0x1e4] sm:$0xf] }
 0x405   : > { %v12157_v13 = vld [vmem:[#allocation10 + $0x380] sm:$0xf]  ;;  %v13666_v63 = vld [vmem:[#allocation10 + $0x38c] sm:$0xf0]  ;;  %v12030_v15 = vor.u32 %v13634_v42, %v12029_v53  ;;  %7535 = vmatpush.bf16.msra.mxu0 %v11774_v49  ;;  %v11951_v34 = vld [vmem:[#allocation10 + $0x1f0] sm:$0xf0] }
 0x406   : > { %v11757_v30 = vld [vmem:[#allocation10 + $0x60] sm:$0xf]  ;;  %v13566_v12 = vld [vmem:[#allocation10 + $0x6c] sm:$0xf0]  ;;  %v12158_v6 = vor.u32 %v13666_v63, %v12157_v13  ;;  %7548 = vmatpush.bf16.msra.mxu1 %v11902_v5  ;;  %v11826_v13 = vor.u32 %v13580_v19, %v11823_v28 }
 0x407   : > { %v11885_v38 = vld [vmem:[#allocation10 + $0x160] sm:$0xf]  ;;  %v13598_v52 = vld [vmem:[#allocation10 + $0x16c] sm:$0xf0]  ;;  %v11758_v47 = vor.u32 %v13566_v12, %v11757_v30  ;;  %7561 = vmatpush.bf16.msra.mxu2 %v12030_v15  ;;  %v11954_v15 = vor.u32 %v13612_v57, %v11951_v34  ;;  %v13576_v12 = vld [vmem:[#allocation10 + $0xc4] sm:$0xf] }
 0x408   : > { %v12013_v39 = vld [vmem:[#allocation10 + $0x260] sm:$0xf]  ;;  %v13630_v51 = vld [vmem:[#allocation10 + $0x26c] sm:$0xf0]  ;;  %v11886_v60 = vor.u32 %v13598_v52, %v11885_v38  ;;  %7574 = vmatpush.bf16.msra.mxu3 %v12158_v6  ;;  %v11807_v38 = vld [vmem:[#allocation10 + $0xd0] sm:$0xf0] }
 0x409   : > { %v12141_v55 = vld [vmem:[#allocation10 + $0x360] sm:$0xf]  ;;  %v13662_v7 = vld [vmem:[#allocation10 + $0x36c] sm:$0xf0]  ;;  %v12014_v62 = vor.u32 %v13630_v51, %v12013_v39  ;;  %7536 = vmatpush.bf16.msra.mxu0 %v11758_v47  ;;  %v13608_v6 = vld [vmem:[#allocation10 + $0x1c4] sm:$0xf] }
 0x40a   : > { %v11741_v9 = vld [vmem:[#allocation10 + $0x40] sm:$0xf]  ;;  %v13562_v21 = vld [vmem:[#allocation10 + $0x4c] sm:$0xf0]  ;;  %v12142_v58 = vor.u32 %v13662_v7, %v12141_v55  ;;  %7549 = vmatpush.bf16.msra.mxu1 %v11886_v60  ;;  %v11935_v52 = vld [vmem:[#allocation10 + $0x1d0] sm:$0xf0]  ;;  %v11810_v7 = vor.u32 %v13576_v12, %v11807_v38 }
 0x40b   : > { %v11869_v14 = vld [vmem:[#allocation10 + $0x140] sm:$0xf]  ;;  %v13594_v56 = vld [vmem:[#allocation10 + $0x14c] sm:$0xf0]  ;;  %v11742_v48 = vor.u32 %v13562_v21, %v11741_v9  ;;  %7562 = vmatpush.bf16.msra.mxu2 %v12014_v62  ;;  %v11938_v9 = vor.u32 %v13608_v6, %v11935_v52  ;;  %v13572_v21 = vld [vmem:[#allocation10 + $0xa4] sm:$0xf] }
 0x40c   : > { %v11997_v50 = vld [vmem:[#allocation10 + $0x240] sm:$0xf]  ;;  %v13626_v43 = vld [vmem:[#allocation10 + $0x24c] sm:$0xf0]  ;;  %v11870_v22 = vor.u32 %v13594_v56, %v11869_v14  ;;  %7575 = vmatpush.bf16.msra.mxu3 %v12142_v58  ;;  %v11791_v14 = vld [vmem:[#allocation10 + $0xb0] sm:$0xf0] }
 0x40d   : > { %v12125_v32 = vld [vmem:[#allocation10 + $0x340] sm:$0xf]  ;;  %v13658_v25 = vld [vmem:[#allocation10 + $0x34c] sm:$0xf0]  ;;  %v11998_v33 = vor.u32 %v13626_v43, %v11997_v50  ;;  %7537 = vmatpush.bf16.msra.mxu0 %v11742_v48  ;;  %v13604_v58 = vld [vmem:[#allocation10 + $0x1a4] sm:$0xf] }
 0x40e   : > { %v11725_v37 = vld [vmem:[#allocation10 + $0x20] sm:$0xf]  ;;  %v13558_v29 = vld [vmem:[#allocation10 + $0x2c] sm:$0xf0]  ;;  %v12126_v1 = vor.u32 %v13658_v25, %v12125_v32  ;;  %7550 = vmatpush.bf16.msra.mxu1 %v11870_v22  ;;  %v11919_v56 = vld [vmem:[#allocation10 + $0x1b0] sm:$0xf0] }
 0x40f   : > { %v11853_v54 = vld [vmem:[#allocation10 + $0x120] sm:$0xf]  ;;  %v13590_v24 = vld [vmem:[#allocation10 + $0x12c] sm:$0xf0]  ;;  %v11726_v36 = vor.u32 %v13558_v29, %v11725_v37  ;;  %7563 = vmatpush.bf16.msra.mxu2 %v11998_v33  ;;  %v6358_v48 = vld [vmem:[#allocation2] sm:$0xff]  ;;  %v11794_v33 = vor.u32 %v13572_v21, %v11791_v14 }
 0x410   : > { %v11981_v16 = vld [vmem:[#allocation10 + $0x220] sm:$0xf]  ;;  %v13622_v3 = vld [vmem:[#allocation10 + $0x22c] sm:$0xf0]  ;;  %v11854_v41 = vor.u32 %v13590_v24, %v11853_v54  ;;  %7576 = vmatpush.bf16.msra.mxu3 %v12126_v1  ;;  %v6360_v22 = vld [vmem:[#allocation2 + $0x10] sm:$0xff]  ;;  %v16334_v29 = vpack.c.bf16 %v6358_v48, %v6358_v48 }
 0x411   : > { %v12109_v8 = vld [vmem:[#allocation10 + $0x320] sm:$0xf]  ;;  %v13654_v59 = vld [vmem:[#allocation10 + $0x32c] sm:$0xf0]  ;;  %v11982_v17 = vor.u32 %v13622_v3, %v11981_v16  ;;  %7538 = vmatpush.bf16.msra.mxu0 %v11726_v36  ;;  %v16336_v54 = vpack.c.bf16 %v6360_v22, %v6360_v22  ;;  %v11922_v16 = vor.u32 %v13604_v58, %v11919_v56  ;;  %v13552_v56 = vld [vmem:[#allocation10 + $0x4] sm:$0xf] }
 0x412   : > { %v11709_v31 = vld [vmem:[#allocation10] sm:$0xf]  ;;  %v13554_v11 = vld [vmem:[#allocation10 + $0xc] sm:$0xf0]  ;;  %v12110_v27 = vor.u32 %v13654_v59, %v12109_v8  ;;  %7551 = vmatpush.bf16.msra.mxu1 %v11854_v41  ;;  %v13568_v8 = vld [vmem:[#allocation10 + $0x84] sm:$0xf] }
 0x413   : > { %v11837_v46 = vld [vmem:[#allocation10 + $0x100] sm:$0xf]  ;;  %v13586_v2 = vld [vmem:[#allocation10 + $0x10c] sm:$0xf0]  ;;  %v11710_v18 = vor.u32 %v13554_v11, %v11709_v31  ;;  %7564 = vmatpush.bf16.msra.mxu2 %v11982_v17  ;;  %v11775_v59 = vld [vmem:[#allocation10 + $0x90] sm:$0xf0] }
 0x414   : > { %v11965_v45 = vld [vmem:[#allocation10 + $0x200] sm:$0xf]  ;;  %v13618_v20 = vld [vmem:[#allocation10 + $0x20c] sm:$0xf0]  ;;  %v11838_v10 = vor.u32 %v13586_v2, %v11837_v46  ;;  %7577 = vmatpush.bf16.msra.mxu3 %v12110_v27  ;;  %v13600_v31 = vld [vmem:[#allocation10 + $0x184] sm:$0xf]  ;;  %v11778_v2 = vor.u32 %v13568_v8, %v11775_v59 }
 0x415   : > { %v12093_v26 = vld [vmem:[#allocation10 + $0x300] sm:$0xf]  ;;  %v13650_v40 = vld [vmem:[#allocation10 + $0x30c] sm:$0xf0]  ;;  %v11966_v4 = vor.u32 %v13618_v20, %v11965_v45  ;;  %7539 = vmatpush.bf16.msra.mxu0 %v11710_v18  ;;  %v11903_v11 = vld [vmem:[#allocation10 + $0x190] sm:$0xf0] }
 0x416   : > { %v12333_v61 = vld [vmem:[#allocation10 + $0x4e0] sm:$0xf]  ;;  %v13710_v23 = vld [vmem:[#allocation10 + $0x4ec] sm:$0xf0]  ;;  %v12094_v35 = vor.u32 %v13650_v40, %v12093_v26  ;;  %7552 = vmatpush.bf16.msra.mxu1 %v11838_v10  ;;  %v11906_v26 = vor.u32 %v13600_v31, %v11903_v11  ;;  %v11887_v18 = vld [vmem:[#allocation10 + $0x170] sm:$0xf0] }
 0x417   : > { %v12461_v44 = vld [vmem:[#allocation10 + $0x5e0] sm:$0xf]  ;;  %v13742_v0 = vld [vmem:[#allocation10 + $0x5ec] sm:$0xf0]  ;;  %v12334_v53 = vor.u32 %v13710_v23, %v12333_v61  ;;  %7565 = vmatpush.bf16.msra.mxu2 %v11966_v4  ;;  %v13564_v61 = vld [vmem:[#allocation10 + $0x64] sm:$0xf] }
 0x418   : > { %v12462_v42 = vor.u32 %v13742_v0, %v12461_v44  ;;  %v12317_v63 = vld [vmem:[#allocation10 + $0x4c0] sm:$0xf]  ;;  %v13706_v49 = vld [vmem:[#allocation10 + $0x4cc] sm:$0xf0]  ;;  %7578 = vmatpush.bf16.msra.mxu3 %v12094_v35  ;;  %7540 = vmatmul.bf16.vlgmr.msra.gmra.mxu0 %v16334_v29  ;;  %v11759_v23 = vld [vmem:[#allocation10 + $0x70] sm:$0xf0] }
 0x419   : > { %v12445_v5 = vld [vmem:[#allocation10 + $0x5c0] sm:$0xf]  ;;  %v13738_v30 = vld [vmem:[#allocation10 + $0x5cc] sm:$0xf0]  ;;  %7584 = vmatpush.bf16.msrb.mxu0 %v12334_v53  ;;  %v12318_v39 = vor.u32 %v13706_v49, %v12317_v63  ;;  %v13596_v44 = vld [vmem:[#allocation10 + $0x164] sm:$0xf]  ;;  %v11762_v28 = vor.u32 %v13564_v61, %v11759_v23 }
 0x41a   : > { %v12301_v51 = vld [vmem:[#allocation10 + $0x4a0] sm:$0xf]  ;;  %7597 = vmatpush.bf16.msrb.mxu1 %v12462_v42  ;;  %v12446_v55 = vor.u32 %v13738_v30, %v12445_v5  ;;  %v13702_v47 = vld [vmem:[#allocation10 + $0x4ac] sm:$0xf0]  ;;  %7566 = vmatmul.bf16.vlgmr.msra.gmra.mxu2 %v16336_v54  ;;  %v11890_v34 = vor.u32 %v13596_v44, %v11887_v18  ;;  %v13560_v53 = vld [vmem:[#allocation10 + $0x44] sm:$0xf] }
 0x41b   : > { %7610 = vmatpush.bf16.msrb.mxu2 %v11826_v13  ;;  %v12429_v60 = vld [vmem:[#allocation10 + $0x5a0] sm:$0xf]  ;;  %v13734_v62 = vld [vmem:[#allocation10 + $0x5ac] sm:$0xf0]  ;;  %v12302_v43 = vor.u32 %v13702_v47, %v12301_v51  ;;  %v11743_v42 = vld [vmem:[#allocation10 + $0x50] sm:$0xf0] }
 0x41c   : > { %7623 = vmatpush.bf16.msrb.mxu3 %v11954_v15  ;;  %v12285_v50 = vld [vmem:[#allocation10 + $0x480] sm:$0xf]  ;;  %v12430_v32 = vor.u32 %v13734_v62, %v12429_v60  ;;  %v13698_v25 = vld [vmem:[#allocation10 + $0x48c] sm:$0xf0]  ;;  %v13592_v13 = vld [vmem:[#allocation10 + $0x144] sm:$0xf]  ;;  %v11746_v15 = vor.u32 %v13560_v53, %v11743_v42 }
 0x41d   : > { %7585 = vmatpush.bf16.msrb.mxu0 %v12318_v39  ;;  %v12413_v37 = vld [vmem:[#allocation10 + $0x580] sm:$0xf]  ;;  %v6361_v24 = vld [vmem:[#allocation2 + $0x18] sm:$0xff]  ;;  %v12286_v17 = vor.u32 %v13698_v25, %v12285_v50  ;;  %v11871_v63 = vld [vmem:[#allocation10 + $0x150] sm:$0xf0] }
 0x41e   : > { %7598 = vmatpush.bf16.msrb.mxu1 %v12446_v55  ;;  %v6359_v1 = vld [vmem:[#allocation2 + $0x8] sm:$0xff]  ;;  %v13730_v3 = vld [vmem:[#allocation10 + $0x58c] sm:$0xf0]  ;;  %v16342_v41 = vpack.c.bf16 %v6361_v24, %v6361_v24  ;;  %v11874_v6 = vor.u32 %v13592_v13, %v11871_v63  ;;  %v13556_v39 = vld [vmem:[#allocation10 + $0x24] sm:$0xf] }
 0x41f   : > { %7611 = vmatpush.bf16.msrb.mxu2 %v11810_v7  ;;  %v16338_v36 = vpack.c.bf16 %v6359_v1, %v6359_v1  ;;  %v12414_v46 = vor.u32 %v13730_v3, %v12413_v37  ;;  %v12269_v45 = vld [vmem:[#allocation10 + $0x460] sm:$0xf]  ;;  %v13694_v27 = vld [vmem:[#allocation10 + $0x46c] sm:$0xf0]  ;;  %v11727_v51 = vld [vmem:[#allocation10 + $0x30] sm:$0xf0] }
 0x420   : > { %7624 = vmatpush.bf16.msrb.mxu3 %v11938_v9  ;;  %v12397_v20 = vld [vmem:[#allocation10 + $0x560] sm:$0xf]  ;;  %v13726_v40 = vld [vmem:[#allocation10 + $0x56c] sm:$0xf0]  ;;  %v12270_v0 = vor.u32 %v13694_v27, %v12269_v45  ;;  %v13588_v55 = vld [vmem:[#allocation10 + $0x124] sm:$0xf]  ;;  %v11730_v21 = vor.u32 %v13556_v39, %v11727_v51 }
 0x421   : > { %7586 = vmatpush.bf16.msrb.mxu0 %v12302_v43  ;;  %7553 = vmatmul.bf16.vlgmr.msra.gmra.mxu1 %v16338_v36  ;;  %v12398_v19 = vor.u32 %v13726_v40, %v12397_v20  ;;  %v12253_v10 = vld [vmem:[#allocation10 + $0x440] sm:$0xf]  ;;  %v13690_v4 = vld [vmem:[#allocation10 + $0x44c] sm:$0xf0]  ;;  %v11855_v7 = vld [vmem:[#allocation10 + $0x130] sm:$0xf0] }
 0x422   : > { %7599 = vmatpush.bf16.msrb.mxu1 %v12430_v32  ;;  %7579 = vmatmul.bf16.vlgmr.msra.gmra.mxu3 %v16342_v41  ;;  %v12381_v57 = vld [vmem:[#allocation10 + $0x540] sm:$0xf]  ;;  %v13722_v35 = vld [vmem:[#allocation10 + $0x54c] sm:$0xf0]  ;;  %v12254_v49 = vor.u32 %v13690_v4, %v12253_v10  ;;  %v11858_v50 = vor.u32 %v13588_v55, %v11855_v7  ;;  %v11711_v43 = vld [vmem:[#allocation10 + $0x10] sm:$0xf0] }
 0x423   : > { %7612 = vmatpush.bf16.msrb.mxu2 %v11794_v33  ;;  %v12382_v5 = vor.u32 %v13722_v35, %v12381_v57  ;;  %v12237_v30 = vld [vmem:[#allocation10 + $0x420] sm:$0xf]  ;;  %v13686_v12 = vld [vmem:[#allocation10 + $0x42c] sm:$0xf0]  ;;  %v13584_v32 = vld [vmem:[#allocation10 + $0x104] sm:$0xf]  ;;  %v11714_v8 = vor.u32 %v13552_v56, %v11711_v43 }
 0x424   : > { %7625 = vmatpush.bf16.msrb.mxu3 %v11922_v16  ;;  %v12365_v38 = vld [vmem:[#allocation10 + $0x520] sm:$0xf]  ;;  %v13718_v52 = vld [vmem:[#allocation10 + $0x52c] sm:$0xf0]  ;;  %v12238_v47 = vor.u32 %v13686_v12, %v12237_v30  ;;  %v11839_v25 = vld [vmem:[#allocation10 + $0x110] sm:$0xf0] }
 0x425   : > { %7587 = vmatpush.bf16.msrb.mxu0 %v12286_v17  ;;  %v12221_v60 = vld [vmem:[#allocation10 + $0x400] sm:$0xf]  ;;  %v13682_v62 = vld [vmem:[#allocation10 + $0x40c] sm:$0xf0]  ;;  %v12366_v9 = vor.u32 %v13718_v52, %v12365_v38  ;;  %v13644_v48 = vld [vmem:[#allocation10 + $0x2e4] sm:$0xf]  ;;  %v11842_v17 = vor.u32 %v13584_v32, %v11839_v25 }
 0x426   : > { %7600 = vmatpush.bf16.msrb.mxu1 %v12414_v46  ;;  %v12349_v14 = vld [vmem:[#allocation10 + $0x500] sm:$0xf]  ;;  %v13714_v58 = vld [vmem:[#allocation10 + $0x50c] sm:$0xf0]  ;;  %v12079_v22 = vld [vmem:[#allocation10 + $0x2f0] sm:$0xf0]  ;;  %v12222_v37 = vor.u32 %v13682_v62, %v12221_v60 }
 0x427   : > { %7613 = vmatpush.bf16.msrb.mxu2 %v11778_v2  ;;  %v13676_v33 = vld [vmem:[#allocation10 + $0x3e4] sm:$0xf]  ;;  %v12207_v1 = vld [vmem:[#allocation10 + $0x3f0] sm:$0xf0]  ;;  %v12350_v3 = vor.u32 %v13714_v58, %v12349_v14  ;;  %v12082_v46 = vor.u32 %v13644_v48, %v12079_v22  ;;  %v6363_v2 = vld [vmem:[#allocation2 + $0x28] sm:$0xff] }
 0x428   : > { %7626 = vmatpush.bf16.msrb.mxu3 %v11906_v26  ;;  %v13708_v24 = vld [vmem:[#allocation10 + $0x4e4] sm:$0xf]  ;;  %v12335_v16 = vld [vmem:[#allocation10 + $0x4f0] sm:$0xf0]  ;;  %v12210_v45 = vor.u32 %v13676_v33, %v12207_v1  ;;  %v16348_v10 = vpack.c.bf16 %v6363_v2, %v6363_v2 }
 0x429   : > { %7588 = vmatpush.bf16.msrb.mxu0 %v12270_v0  ;;  %v13740_v59 = vld [vmem:[#allocation10 + $0x5e4] sm:$0xf]  ;;  %v12463_v31 = vld [vmem:[#allocation10 + $0x5f0] sm:$0xf0]  ;;  %v12338_v27 = vor.u32 %v13708_v24, %v12335_v16 }
 0x42a   : > { %7601 = vmatpush.bf16.msrb.mxu1 %v12398_v19  ;;  %v6362_v11 = vld [vmem:[#allocation2 + $0x20] sm:$0xff]  ;;  %v13640_v20 = vld [vmem:[#allocation10 + $0x2c4] sm:$0xf]  ;;  %v12466_v61 = vor.u32 %v13740_v59, %v12463_v31 }
 0x42b   : > { %7614 = vmatpush.bf16.msrb.mxu2 %v11762_v28  ;;  %v12063_v26 = vld [vmem:[#allocation10 + $0x2d0] sm:$0xf0]  ;;  %v13672_v40 = vld [vmem:[#allocation10 + $0x3c4] sm:$0xf]  ;;  %v16346_v0 = vpack.c.bf16 %v6362_v11, %v6362_v11 }
 0x42c   : > { %7627 = vmatpush.bf16.msrb.mxu3 %v11890_v34  ;;  %v12191_v23 = vld [vmem:[#allocation10 + $0x3d0] sm:$0xf0]  ;;  %v13704_v44 = vld [vmem:[#allocation10 + $0x4c4] sm:$0xf]  ;;  %v12066_v4 = vor.u32 %v13640_v20, %v12063_v26 }
 0x42d   : > { %7589 = vmatpush.bf16.msrb.mxu0 %v12254_v49  ;;  %v12319_v18 = vld [vmem:[#allocation10 + $0x4d0] sm:$0xf0]  ;;  %v13736_v19 = vld [vmem:[#allocation10 + $0x5c4] sm:$0xf]  ;;  %v12194_v57 = vor.u32 %v13672_v40, %v12191_v23 }
 0x42e   : > { %7602 = vmatpush.bf16.msrb.mxu1 %v12382_v5  ;;  %v12447_v28 = vld [vmem:[#allocation10 + $0x5d0] sm:$0xf0]  ;;  %v12322_v34 = vor.u32 %v13704_v44, %v12319_v18  ;;  %v13636_v35 = vld [vmem:[#allocation10 + $0x2a4] sm:$0xf] }
 0x42f   : > { %7615 = vmatpush.bf16.msrb.mxu2 %v11746_v15  ;;  %v12047_v53 = vld [vmem:[#allocation10 + $0x2b0] sm:$0xf0]  ;;  %v13668_v42 = vld [vmem:[#allocation10 + $0x3a4] sm:$0xf]  ;;  %v12450_v13 = vor.u32 %v13736_v19, %v12447_v28 }
 0x430   : > { %7628 = vmatpush.bf16.msrb.mxu3 %v11874_v6  ;;  %v12175_v63 = vld [vmem:[#allocation10 + $0x3b0] sm:$0xf0]  ;;  %v13700_v49 = vld [vmem:[#allocation10 + $0x4a4] sm:$0xf]  ;;  %v12050_v12 = vor.u32 %v13636_v35, %v12047_v53 }
 0x431   : > { %7590 = vmatpush.bf16.msrb.mxu0 %v12238_v47  ;;  %v12303_v5 = vld [vmem:[#allocation10 + $0x4b0] sm:$0xf0]  ;;  %v13732_v15 = vld [vmem:[#allocation10 + $0x5a4] sm:$0xf]  ;;  %v12178_v38 = vor.u32 %v13668_v42, %v12175_v63 }
 0x432   : > { %7603 = vmatpush.bf16.msrb.mxu1 %v12366_v9  ;;  %v12431_v30 = vld [vmem:[#allocation10 + $0x5b0] sm:$0xf0]  ;;  %v12306_v6 = vor.u32 %v13700_v49, %v12303_v5  ;;  %v13632_v52 = vld [vmem:[#allocation10 + $0x284] sm:$0xf] }
 0x433   : > { %7616 = vmatpush.bf16.msrb.mxu2 %v11730_v21  ;;  %v12031_v39 = vld [vmem:[#allocation10 + $0x290] sm:$0xf0]  ;;  %v13664_v51 = vld [vmem:[#allocation10 + $0x384] sm:$0xf]  ;;  %v12434_v55 = vor.u32 %v13732_v15, %v12431_v30 }
 0x434   : > { %7629 = vmatpush.bf16.msrb.mxu3 %v11858_v50  ;;  %v12159_v7 = vld [vmem:[#allocation10 + $0x390] sm:$0xf0]  ;;  %v13696_v47 = vld [vmem:[#allocation10 + $0x484] sm:$0xf]  ;;  %v12034_v21 = vor.u32 %v13632_v52, %v12031_v39  ;;  %v13583_v52 = vld [vmem:[#allocation10 + $0xf4] sm:$0xf0] }
 0x435   : > { %7591 = vmatpush.bf16.msrb.mxu0 %v12222_v37  ;;  %v12287_v60 = vld [vmem:[#allocation10 + $0x490] sm:$0xf0]  ;;  %v13728_v62 = vld [vmem:[#allocation10 + $0x584] sm:$0xf]  ;;  %v12162_v14 = vor.u32 %v13664_v51, %v12159_v7  ;;  %v11957_v39 = vld [vmem:[#allocation10 + $0x1e8] sm:$0xf] }
 0x436   : > { %7604 = vmatpush.bf16.msrb.mxu1 %v12350_v3  ;;  %v12415_v9 = vld [vmem:[#allocation10 + $0x590] sm:$0xf0]  ;;  %v12290_v58 = vor.u32 %v13696_v47, %v12287_v60  ;;  %v13628_v56 = vld [vmem:[#allocation10 + $0x264] sm:$0xf]  ;;  %v12085_v7 = vld [vmem:[#allocation10 + $0x2e8] sm:$0xf] }
 0x437   : > { %7617 = vmatpush.bf16.msrb.mxu2 %v11714_v8  ;;  %v12015_v50 = vld [vmem:[#allocation10 + $0x270] sm:$0xf0]  ;;  %v13660_v43 = vld [vmem:[#allocation10 + $0x364] sm:$0xf]  ;;  %v12418_v32 = vor.u32 %v13728_v62, %v12415_v9  ;;  %v13647_v47 = vld [vmem:[#allocation10 + $0x2f4] sm:$0xf0] }
 0x438   : > { %7630 = vmatpush.bf16.msrb.mxu3 %v11842_v17  ;;  %7592 = vmatmul.bf16.vlgmr.msrb.gmra.mxu0 %v16346_v0  ;;  %v12143_v25 = vld [vmem:[#allocation10 + $0x370] sm:$0xf0]  ;;  %v13692_v48 = vld [vmem:[#allocation10 + $0x464] sm:$0xf]  ;;  %v12018_v1 = vor.u32 %v13628_v56, %v12015_v50  ;;  %v12213_v9 = vld [vmem:[#allocation10 + $0x3e8] sm:$0xf]  ;;  %v12086_v50 = vor.u32 %v13647_v47, %v12085_v7 }
 0x439   : > { %7636 = vmatpush.bf16.msra.mxu0 %v12082_v46  ;;  %7605 = vmatmul.bf16.vlgmr.msrb.gmra.mxu1 %v16348_v10  ;;  %v12271_v22 = vld [vmem:[#allocation10 + $0x470] sm:$0xf0]  ;;  %v13724_v33 = vld [vmem:[#allocation10 + $0x564] sm:$0xf]  ;;  %v12146_v24 = vor.u32 %v13660_v43, %v12143_v25  ;;  %v11813_v43 = vld [vmem:[#allocation10 + $0xc8] sm:$0xf] }
 0x43a   : > { %7649 = vmatpush.bf16.msra.mxu1 %v12210_v45  ;;  %7618 = vmatmul.bf16.vlgmr.msrb.gmra.mxu2 %v16334_v29  ;;  %v12399_v37 = vld [vmem:[#allocation10 + $0x570] sm:$0xf0]  ;;  %v12274_v16 = vor.u32 %v13692_v48, %v12271_v22  ;;  %v13624_v3 = vld [vmem:[#allocation10 + $0x244] sm:$0xf]  ;;  %v11941_v25 = vld [vmem:[#allocation10 + $0x1c8] sm:$0xf] }
 0x43b   : > { %7662 = vmatpush.bf16.msra.mxu2 %v12338_v27  ;;  %7631 = vmatmul.bf16.vlgmr.msrb.gmra.mxu3 %v16338_v36  ;;  %v11999_v8 = vld [vmem:[#allocation10 + $0x250] sm:$0xf0]  ;;  %v13656_v59 = vld [vmem:[#allocation10 + $0x344] sm:$0xf]  ;;  %v12402_v31 = vor.u32 %v13724_v33, %v12399_v37  ;;  %v13611_v22 = vld [vmem:[#allocation10 + $0x1d4] sm:$0xf0] }
 0x43c   : > { %7675 = vmatpush.bf16.msra.mxu3 %v12466_v61  ;;  %v12127_v11 = vld [vmem:[#allocation10 + $0x350] sm:$0xf0]  ;;  %v13688_v17 = vld [vmem:[#allocation10 + $0x444] sm:$0xf]  ;;  %v12002_v27 = vor.u32 %v13624_v3, %v11999_v8  ;;  %v12069_v33 = vld [vmem:[#allocation10 + $0x2c8] sm:$0xf]  ;;  %v11942_v3 = vor.u32 %v13611_v22, %v11941_v25 }
 0x43d   : > { %7637 = vmatpush.bf16.msra.mxu0 %v12066_v4  ;;  %v12255_v46 = vld [vmem:[#allocation10 + $0x450] sm:$0xf0]  ;;  %v13720_v2 = vld [vmem:[#allocation10 + $0x544] sm:$0xf]  ;;  %v12130_v20 = vor.u32 %v13656_v59, %v12127_v11  ;;  %v13643_v37 = vld [vmem:[#allocation10 + $0x2d4] sm:$0xf0] }
 0x43e   : > { %7650 = vmatpush.bf16.msra.mxu1 %v12194_v57  ;;  %v12383_v45 = vld [vmem:[#allocation10 + $0x550] sm:$0xf0]  ;;  %v12258_v26 = vor.u32 %v13688_v17, %v12255_v46  ;;  %v13620_v40 = vld [vmem:[#allocation10 + $0x224] sm:$0xf]  ;;  %v12070_v8 = vor.u32 %v13643_v37, %v12069_v33  ;;  %v11797_v59 = vld [vmem:[#allocation10 + $0xa8] sm:$0xf] }
 0x43f   : > { %7663 = vmatpush.bf16.msra.mxu2 %v12322_v34  ;;  %v11983_v61 = vld [vmem:[#allocation10 + $0x230] sm:$0xf0]  ;;  %v13652_v23 = vld [vmem:[#allocation10 + $0x324] sm:$0xf]  ;;  %v12386_v44 = vor.u32 %v13720_v2, %v12383_v45  ;;  %v11925_v11 = vld [vmem:[#allocation10 + $0x1a8] sm:$0xf] }
 0x440   : > { %7676 = vmatpush.bf16.msra.mxu3 %v12450_v13  ;;  %v12111_v18 = vld [vmem:[#allocation10 + $0x330] sm:$0xf0]  ;;  %v13684_v19 = vld [vmem:[#allocation10 + $0x424] sm:$0xf]  ;;  %v11986_v34 = vor.u32 %v13620_v40, %v11983_v61  ;;  %v13607_v46 = vld [vmem:[#allocation10 + $0x1b4] sm:$0xf0] }
 0x441   : > { %7638 = vmatpush.bf16.msra.mxu0 %v12050_v12  ;;  %v12239_v28 = vld [vmem:[#allocation10 + $0x430] sm:$0xf0]  ;;  %v13716_v4 = vld [vmem:[#allocation10 + $0x524] sm:$0xf]  ;;  %v12114_v42 = vor.u32 %v13652_v23, %v12111_v18  ;;  %v12053_v2 = vld [vmem:[#allocation10 + $0x2a8] sm:$0xf]  ;;  %v11926_v40 = vor.u32 %v13607_v46, %v11925_v11 }
 0x442   : > { %7651 = vmatpush.bf16.msra.mxu1 %v12178_v38  ;;  %v12367_v57 = vld [vmem:[#allocation10 + $0x530] sm:$0xf0]  ;;  %v13616_v35 = vld [vmem:[#allocation10 + $0x204] sm:$0xf]  ;;  %v12242_v13 = vor.u32 %v13684_v19, %v12239_v28  ;;  %v13639_v45 = vld [vmem:[#allocation10 + $0x2b4] sm:$0xf0] }
 0x443   : > { %7664 = vmatpush.bf16.msra.mxu2 %v12306_v6  ;;  %v11967_v53 = vld [vmem:[#allocation10 + $0x210] sm:$0xf0]  ;;  %v13648_v63 = vld [vmem:[#allocation10 + $0x304] sm:$0xf]  ;;  %v12370_v15 = vor.u32 %v13716_v4, %v12367_v57  ;;  %v11829_v6 = vld [vmem:[#allocation10 + $0xe8] sm:$0xf]  ;;  %v12054_v61 = vor.u32 %v13639_v45, %v12053_v2 }
 0x444   : > { %7677 = vmatpush.bf16.msra.mxu3 %v12434_v55  ;;  %v12095_v49 = vld [vmem:[#allocation10 + $0x310] sm:$0xf0]  ;;  %v13680_v5 = vld [vmem:[#allocation10 + $0x404] sm:$0xf]  ;;  %v11970_v51 = vor.u32 %v13616_v35, %v11967_v53  ;;  %v13615_v55 = vld [vmem:[#allocation10 + $0x1f4] sm:$0xf0] }
 0x445   : > { %7639 = vmatpush.bf16.msra.mxu0 %v12034_v21  ;;  %v12223_v30 = vld [vmem:[#allocation10 + $0x410] sm:$0xf0]  ;;  %v13712_v12 = vld [vmem:[#allocation10 + $0x504] sm:$0xf]  ;;  %v12098_v60 = vor.u32 %v13648_v63, %v12095_v49  ;;  %v13679_v21 = vld [vmem:[#allocation10 + $0x3f4] sm:$0xf0]  ;;  %v11958_v56 = vor.u32 %v13615_v55, %v11957_v39 }
 0x446   : > { %7652 = vmatpush.bf16.msra.mxu1 %v12162_v14  ;;  %v12351_v38 = vld [vmem:[#allocation10 + $0x510] sm:$0xf0]  ;;  %v12226_v62 = vor.u32 %v13680_v5, %v12223_v30  ;;  %v12214_v48 = vor.u32 %v13679_v21, %v12213_v9  ;;  %v11781_v23 = vld [vmem:[#allocation10 + $0x88] sm:$0xf]  ;;  %v13603_v28 = vld [vmem:[#allocation10 + $0x194] sm:$0xf0] }
 0x447   : > { %7665 = vmatpush.bf16.msra.mxu2 %v12290_v58  ;;  %v12354_v14 = vor.u32 %v13712_v12, %v12351_v38  ;;  %v11830_v58 = vor.u32 %v13583_v52, %v11829_v6  ;;  %v11909_v18 = vld [vmem:[#allocation10 + $0x188] sm:$0xf]  ;;  %v13635_v57 = vld [vmem:[#allocation10 + $0x294] sm:$0xf0] }
 0x448   : > { %7678 = vmatpush.bf16.msra.mxu3 %v12418_v32  ;;  %v13579_v32 = vld [vmem:[#allocation10 + $0xd4] sm:$0xf0]  ;;  %v12037_v4 = vld [vmem:[#allocation10 + $0x288] sm:$0xf] }
 0x449   : > { %7640 = vmatpush.bf16.msra.mxu0 %v12018_v1  ;;  %v12197_v1 = vld [vmem:[#allocation10 + $0x3c8] sm:$0xf]  ;;  %v13667_v35 = vld [vmem:[#allocation10 + $0x394] sm:$0xf0] }
 0x44a   : > { %7653 = vmatpush.bf16.msra.mxu1 %v12146_v24  ;;  %v13675_v24 = vld [vmem:[#allocation10 + $0x3d4] sm:$0xf0]  ;;  %v11765_v63 = vld [vmem:[#allocation10 + $0x68] sm:$0xf] }
 0x44b   : > { %7666 = vmatpush.bf16.msra.mxu2 %v12274_v16  ;;  %v11814_v16 = vor.u32 %v13579_v32, %v11813_v43  ;;  %v12198_v17 = vor.u32 %v13675_v24, %v12197_v1  ;;  %v13567_v49 = vld [vmem:[#allocation10 + $0x74] sm:$0xf0]  ;;  %v11893_v5 = vld [vmem:[#allocation10 + $0x168] sm:$0xf] }
 0x44c   : > { %7679 = vmatpush.bf16.msra.mxu3 %v12402_v31  ;;  %v13575_v31 = vld [vmem:[#allocation10 + $0xb4] sm:$0xf0]  ;;  %v12021_v12 = vld [vmem:[#allocation10 + $0x268] sm:$0xf]  ;;  %v11766_v39 = vor.u32 %v13567_v49, %v11765_v63 }
 0x44d   : > { %7641 = vmatpush.bf16.msra.mxu0 %v12002_v27  ;;  %v12181_v27 = vld [vmem:[#allocation10 + $0x3a8] sm:$0xf]  ;;  %v13599_v30 = vld [vmem:[#allocation10 + $0x174] sm:$0xf0] }
 0x44e   : > { %7654 = vmatpush.bf16.msra.mxu1 %v12130_v20  ;;  %v13671_v20 = vld [vmem:[#allocation10 + $0x3b4] sm:$0xf0]  ;;  %v12149_v6 = vld [vmem:[#allocation10 + $0x368] sm:$0xf] }
 0x44f   : > { %7667 = vmatpush.bf16.msra.mxu2 %v12258_v26  ;;  %v11798_v26 = vor.u32 %v13575_v31, %v11797_v59  ;;  %v12182_v19 = vor.u32 %v13671_v20, %v12181_v27  ;;  %v13631_v38 = vld [vmem:[#allocation10 + $0x274] sm:$0xf0]  ;;  %v11749_v7 = vld [vmem:[#allocation10 + $0x48] sm:$0xf] }
 0x450   : > { %7680 = vmatpush.bf16.msra.mxu3 %v12386_v44  ;;  %v13571_v44 = vld [vmem:[#allocation10 + $0x94] sm:$0xf0]  ;;  %v12022_v55 = vor.u32 %v13631_v38, %v12021_v12  ;;  %v12005_v21 = vld [vmem:[#allocation10 + $0x248] sm:$0xf] }
 0x451   : > { %7642 = vmatpush.bf16.msra.mxu0 %v11986_v34  ;;  %v12165_v34 = vld [vmem:[#allocation10 + $0x388] sm:$0xf]  ;;  %v11782_v53 = vor.u32 %v13571_v44, %v11781_v23  ;;  %v13663_v52 = vld [vmem:[#allocation10 + $0x374] sm:$0xf0] }
 0x452   : > { %7655 = vmatpush.bf16.msra.mxu1 %v12114_v42  ;;  %v11910_v42 = vor.u32 %v13603_v28, %v11909_v18  ;;  %v13563_v47 = vld [vmem:[#allocation10 + $0x54] sm:$0xf0]  ;;  %v11733_v25 = vld [vmem:[#allocation10 + $0x28] sm:$0xf]  ;;  %v13581_v28 = vld [vmem:[#allocation10 + $0xec] sm:$0xf] }
 0x453   : > { %7668 = vmatpush.bf16.msra.mxu2 %v12242_v13  ;;  %v12038_v13 = vor.u32 %v13635_v57, %v12037_v4  ;;  %v13595_v9 = vld [vmem:[#allocation10 + $0x154] sm:$0xf0]  ;;  %v11861_v22 = vld [vmem:[#allocation10 + $0x128] sm:$0xf]  ;;  %v11831_v4 = vld [vmem:[#allocation10 + $0xf8] sm:$0xf0] }
 0x454   : > { %7681 = vmatpush.bf16.msra.mxu3 %v12370_v15  ;;  %v12166_v15 = vor.u32 %v13667_v35, %v12165_v34  ;;  %v13591_v37 = vld [vmem:[#allocation10 + $0x134] sm:$0xf0]  ;;  %v11989_v1 = vld [vmem:[#allocation10 + $0x228] sm:$0xf]  ;;  %v13613_v35 = vld [vmem:[#allocation10 + $0x1ec] sm:$0xf]  ;;  %v11834_v49 = vor.u32 %v13581_v28, %v11831_v4 }
 0x455   : > { %7643 = vmatpush.bf16.msra.mxu0 %v11970_v51  ;;  %v11894_v51 = vor.u32 %v13599_v30, %v11893_v5  ;;  %v13623_v24 = vld [vmem:[#allocation10 + $0x234] sm:$0xf0]  ;;  %v11717_v59 = vld [vmem:[#allocation10 + $0x8] sm:$0xf]  ;;  %v11862_v11 = vor.u32 %v13591_v37, %v11861_v22 }
 0x456   : > { %7656 = vmatpush.bf16.msra.mxu1 %v12098_v60  ;;  %v11877_v60 = vld [vmem:[#allocation10 + $0x148] sm:$0xf]  ;;  %v13555_v31 = vld [vmem:[#allocation10 + $0x14] sm:$0xf0] }
 0x457   : > { %7669 = vmatpush.bf16.msra.mxu2 %v12226_v62  ;;  %v12150_v62 = vor.u32 %v13663_v52, %v12149_v6  ;;  %v11878_v43 = vor.u32 %v13595_v9, %v11877_v60  ;;  %v11845_v46 = vld [vmem:[#allocation10 + $0x108] sm:$0xf]  ;;  %v13587_v2 = vld [vmem:[#allocation10 + $0x114] sm:$0xf0]  ;;  %v11718_v18 = vor.u32 %v13555_v31, %v11717_v59  ;;  %v13577_v6 = vld [vmem:[#allocation10 + $0xcc] sm:$0xf] }
 0x458   : > { %7682 = vmatpush.bf16.msra.mxu3 %v12354_v14  ;;  %7644 = vmatmul.bf16.vlgmr.msra.gmra.mxu0 %v16336_v54  ;;  %v13627_v14 = vld [vmem:[#allocation10 + $0x254] sm:$0xf0]  ;;  %v11973_v45 = vld [vmem:[#allocation10 + $0x208] sm:$0xf]  ;;  %v11846_v57 = vor.u32 %v13587_v2, %v11845_v46  ;;  %v11815_v52 = vld [vmem:[#allocation10 + $0xd8] sm:$0xf0] }
 0x459   : > { %7688 = vmatpush.bf16.msrb.mxu0 %v11830_v58  ;;  %7657 = vmatmul.bf16.vlgmr.msra.gmra.mxu1 %v16342_v41  ;;  %v12133_v58 = vld [vmem:[#allocation10 + $0x348] sm:$0xf]  ;;  %v12006_v32 = vor.u32 %v13627_v14, %v12005_v21  ;;  %v13619_v20 = vld [vmem:[#allocation10 + $0x214] sm:$0xf0]  ;;  %v11911_v59 = vld [vmem:[#allocation10 + $0x198] sm:$0xf0] }
 0x45a   : > { %7701 = vmatpush.bf16.msrb.mxu1 %v11958_v56  ;;  %7670 = vmatmul.bf16.vlgmr.msra.gmra.mxu2 %v16346_v0  ;;  %v13659_v56 = vld [vmem:[#allocation10 + $0x354] sm:$0xf0]  ;;  %v12469_v44 = vld [vmem:[#allocation10 + $0x5e8] sm:$0xf]  ;;  %v11974_v34 = vor.u32 %v13619_v20, %v11973_v45 }
 0x45b   : > { %7714 = vmatpush.bf16.msrb.mxu2 %v12086_v50  ;;  %7683 = vmatmul.bf16.vlgmr.msra.gmra.mxu3 %v16348_v10  ;;  %v11750_v50 = vor.u32 %v13563_v47, %v11749_v7  ;;  %v12134_v33 = vor.u32 %v13659_v56, %v12133_v58  ;;  %v13711_v23 = vld [vmem:[#allocation10 + $0x4f4] sm:$0xf0]  ;;  %v12325_v5 = vld [vmem:[#allocation10 + $0x4c8] sm:$0xf]  ;;  %v11818_v47 = vor.u32 %v13577_v6, %v11815_v52  ;;  %v13573_v58 = vld [vmem:[#allocation10 + $0xac] sm:$0xf] }
 0x45c   : > { %7727 = vmatpush.bf16.msrb.mxu3 %v12214_v48  ;;  %v13559_v48 = vld [vmem:[#allocation10 + $0x34] sm:$0xf0]  ;;  %v12453_v30 = vld [vmem:[#allocation10 + $0x5c8] sm:$0xf]  ;;  %v11799_v56 = vld [vmem:[#allocation10 + $0xb8] sm:$0xf0] }
 0x45d   : > { %7689 = vmatpush.bf16.msrb.mxu0 %v11814_v16  ;;  %v12117_v16 = vld [vmem:[#allocation10 + $0x328] sm:$0xf]  ;;  %v13739_v38 = vld [vmem:[#allocation10 + $0x5d4] sm:$0xf0] }
 0x45e   : > { %7702 = vmatpush.bf16.msrb.mxu1 %v11942_v3  ;;  %v13655_v3 = vld [vmem:[#allocation10 + $0x334] sm:$0xf0]  ;;  %v12454_v7 = vor.u32 %v13739_v38, %v12453_v30  ;;  %v12309_v60 = vld [vmem:[#allocation10 + $0x4a8] sm:$0xf] }
 0x45f   : > { %7715 = vmatpush.bf16.msrb.mxu2 %v12070_v8  ;;  %v11734_v8 = vor.u32 %v13559_v48, %v11733_v25  ;;  %v12118_v27 = vor.u32 %v13655_v3, %v12117_v16  ;;  %v12437_v9 = vld [vmem:[#allocation10 + $0x5a8] sm:$0xf]  ;;  %v13735_v14 = vld [vmem:[#allocation10 + $0x5b4] sm:$0xf0]  ;;  %v11802_v48 = vor.u32 %v13573_v58, %v11799_v56  ;;  %v13569_v16 = vld [vmem:[#allocation10 + $0x8c] sm:$0xf] }
 0x460   : > { %7728 = vmatpush.bf16.msrb.mxu3 %v12198_v17  ;;  %v11990_v17 = vor.u32 %v13623_v24, %v11989_v1  ;;  %v12438_v25 = vor.u32 %v13735_v14, %v12437_v9  ;;  %v12293_v22 = vld [vmem:[#allocation10 + $0x488] sm:$0xf]  ;;  %v13731_v24 = vld [vmem:[#allocation10 + $0x594] sm:$0xf0]  ;;  %v11783_v3 = vld [vmem:[#allocation10 + $0x98] sm:$0xf0] }
 0x461   : > { %7690 = vmatpush.bf16.msrb.mxu0 %v11798_v26  ;;  %v12101_v26 = vld [vmem:[#allocation10 + $0x308] sm:$0xf]  ;;  %v13695_v2 = vld [vmem:[#allocation10 + $0x474] sm:$0xf0]  ;;  %v13553_v56 = vld [vmem:[#allocation10 + $0xc] sm:$0xf] }
 0x462   : > { %7703 = vmatpush.bf16.msrb.mxu1 %v11926_v40  ;;  %v13651_v40 = vld [vmem:[#allocation10 + $0x314] sm:$0xf0]  ;;  %v12421_v37 = vld [vmem:[#allocation10 + $0x588] sm:$0xf] }
 0x463   : > { %7716 = vmatpush.bf16.msrb.mxu2 %v12054_v61  ;;  %v12341_v61 = vld [vmem:[#allocation10 + $0x4e8] sm:$0xf]  ;;  %v13727_v20 = vld [vmem:[#allocation10 + $0x574] sm:$0xf0] }
 0x464   : > { %7729 = vmatpush.bf16.msrb.mxu3 %v12182_v19  ;;  %v13743_v19 = vld [vmem:[#allocation10 + $0x5f4] sm:$0xf0]  ;;  %v12277_v46 = vld [vmem:[#allocation10 + $0x468] sm:$0xf] }
 0x465   : > { %7691 = vmatpush.bf16.msrb.mxu0 %v11782_v53  ;;  %v11959_v53 = vld [vmem:[#allocation10 + $0x1f8] sm:$0xf0]  ;;  %v12470_v63 = vor.u32 %v13743_v19, %v12469_v44  ;;  %v12405_v45 = vld [vmem:[#allocation10 + $0x568] sm:$0xf]  ;;  %v12278_v44 = vor.u32 %v13695_v2, %v12277_v46  ;;  %v13691_v4 = vld [vmem:[#allocation10 + $0x454] sm:$0xf0] }
 0x466   : > { %7704 = vmatpush.bf16.msrb.mxu1 %v11910_v42  ;;  %v12102_v42 = vor.u32 %v13651_v40, %v12101_v26  ;;  %v11962_v12 = vor.u32 %v13613_v35, %v11959_v53  ;;  %v13565_v26 = vld [vmem:[#allocation10 + $0x6c] sm:$0xf]  ;;  %v11767_v40 = vld [vmem:[#allocation10 + $0x78] sm:$0xf0]  ;;  %v12261_v28 = vld [vmem:[#allocation10 + $0x448] sm:$0xf] }
 0x467   : > { %7717 = vmatpush.bf16.msrb.mxu2 %v12038_v13  ;;  %v12342_v13 = vor.u32 %v13711_v23, %v12341_v61  ;;  %v13597_v61 = vld [vmem:[#allocation10 + $0x16c] sm:$0xf]  ;;  %v11895_v23 = vld [vmem:[#allocation10 + $0x178] sm:$0xf0]  ;;  %v11770_v19 = vor.u32 %v13565_v26, %v11767_v40  ;;  %v13723_v35 = vld [vmem:[#allocation10 + $0x554] sm:$0xf0] }
 0x468   : > { %7730 = vmatpush.bf16.msrb.mxu3 %v12166_v15  ;;  %v13707_v15 = vld [vmem:[#allocation10 + $0x4d4] sm:$0xf0]  ;;  %v13561_v53 = vld [vmem:[#allocation10 + $0x4c] sm:$0xf]  ;;  %v12245_v30 = vld [vmem:[#allocation10 + $0x428] sm:$0xf] }
 0x469   : > { %7692 = vmatpush.bf16.msrb.mxu0 %v11766_v39  ;;  %v13609_v39 = vld [vmem:[#allocation10 + $0x1cc] sm:$0xf]  ;;  %v12373_v38 = vld [vmem:[#allocation10 + $0x528] sm:$0xf]  ;;  %v13719_v52 = vld [vmem:[#allocation10 + $0x534] sm:$0xf0] }
 0x46a   : > { %7705 = vmatpush.bf16.msrb.mxu1 %v11894_v51  ;;  %v11943_v51 = vld [vmem:[#allocation10 + $0x1d8] sm:$0xf0]  ;;  %v12374_v9 = vor.u32 %v13719_v52, %v12373_v38  ;;  %v12357_v14 = vld [vmem:[#allocation10 + $0x508] sm:$0xf]  ;;  %v13715_v58 = vld [vmem:[#allocation10 + $0x514] sm:$0xf0] }
 0x46b   : > { %7718 = vmatpush.bf16.msrb.mxu2 %v12022_v55  ;;  %v12326_v55 = vor.u32 %v13707_v15, %v12325_v5  ;;  %v11946_v21 = vor.u32 %v13609_v39, %v11943_v51  ;;  %v13557_v39 = vld [vmem:[#allocation10 + $0x2c] sm:$0xf]  ;;  %v11735_v51 = vld [vmem:[#allocation10 + $0x38] sm:$0xf0] }
 0x46c   : > { %7731 = vmatpush.bf16.msrb.mxu3 %v12150_v62  ;;  %v13703_v62 = vld [vmem:[#allocation10 + $0x4b4] sm:$0xf0]  ;;  %v12199_v40 = vld [vmem:[#allocation10 + $0x3d8] sm:$0xf0]  ;;  %v13633_v38 = vld [vmem:[#allocation10 + $0x28c] sm:$0xf] }
 0x46d   : > { %7693 = vmatpush.bf16.msrb.mxu0 %v11750_v50  ;;  %v13605_v50 = vld [vmem:[#allocation10 + $0x1ac] sm:$0xf] }
 0x46e   : > { %7706 = vmatpush.bf16.msrb.mxu1 %v11878_v43  ;;  %v11927_v43 = vld [vmem:[#allocation10 + $0x1b8] sm:$0xf0]  ;;  %v13665_v52 = vld [vmem:[#allocation10 + $0x38c] sm:$0xf] }
 0x46f   : > { %7719 = vmatpush.bf16.msrb.mxu2 %v12006_v32  ;;  %v12310_v32 = vor.u32 %v13703_v62, %v12309_v60  ;;  %v11930_v1 = vor.u32 %v13605_v50, %v11927_v43  ;;  %v12229_v60 = vld [vmem:[#allocation10 + $0x408] sm:$0xf]  ;;  %v13683_v62 = vld [vmem:[#allocation10 + $0x414] sm:$0xf0]  ;;  %v11719_v43 = vld [vmem:[#allocation10 + $0x18] sm:$0xf0] }
 0x470   : > { %7732 = vmatpush.bf16.msrb.mxu3 %v12134_v33  ;;  %v13699_v33 = vld [vmem:[#allocation10 + $0x494] sm:$0xf0] }
 0x471   : > { %7694 = vmatpush.bf16.msrb.mxu0 %v11734_v8  ;;  %v13601_v8 = vld [vmem:[#allocation10 + $0x18c] sm:$0xf]  ;;  %v12294_v31 = vor.u32 %v13699_v33, %v12293_v22  ;;  %v12087_v22 = vld [vmem:[#allocation10 + $0x2f8] sm:$0xf0] }
 0x472   : > { %7707 = vmatpush.bf16.msrb.mxu1 %v11862_v11  ;;  %v12422_v11 = vor.u32 %v13731_v24, %v12421_v37  ;;  %v13677_v33 = vld [vmem:[#allocation10 + $0x3ec] sm:$0xf]  ;;  %v12230_v37 = vor.u32 %v13683_v62, %v12229_v60 }
 0x473   : > { %7720 = vmatpush.bf16.msrb.mxu2 %v11990_v17  ;;  %v11786_v17 = vor.u32 %v13569_v16, %v11783_v3  ;;  %v13709_v24 = vld [vmem:[#allocation10 + $0x4ec] sm:$0xf]  ;;  %v12343_v16 = vld [vmem:[#allocation10 + $0x4f8] sm:$0xf0]  ;;  %v12358_v3 = vor.u32 %v13715_v58, %v12357_v14 }
 0x474   : > { %7733 = vmatpush.bf16.msrb.mxu3 %v12118_v27  ;;  %v11914_v27 = vor.u32 %v13601_v8, %v11911_v59  ;;  %v11722_v8 = vor.u32 %v13553_v56, %v11719_v43  ;;  %v13741_v59 = vld [vmem:[#allocation10 + $0x5ec] sm:$0xf]  ;;  %v12346_v2 = vor.u32 %v13709_v24, %v12343_v16  ;;  %v12151_v56 = vld [vmem:[#allocation10 + $0x378] sm:$0xf0] }
 0x475   : > { %7695 = vmatpush.bf16.msrb.mxu0 %v11718_v18  ;;  %v12406_v18 = vor.u32 %v13727_v20, %v12405_v45  ;;  %v13641_v45 = vld [vmem:[#allocation10 + $0x2cc] sm:$0xf]  ;;  %v12279_v43 = vld [vmem:[#allocation10 + $0x478] sm:$0xf0] }
 0x476   : > { %7708 = vmatpush.bf16.msrb.mxu1 %v11846_v57  ;;  %v12389_v57 = vld [vmem:[#allocation10 + $0x548] sm:$0xf]  ;;  %v13673_v20 = vld [vmem:[#allocation10 + $0x3cc] sm:$0xf]  ;;  %v12007_v24 = vld [vmem:[#allocation10 + $0x258] sm:$0xf0] }
 0x477   : > { %7721 = vmatpush.bf16.msrb.mxu2 %v11974_v34  ;;  %v11898_v34 = vor.u32 %v13597_v61, %v11895_v23  ;;  %v12390_v5 = vor.u32 %v13723_v35, %v12389_v57  ;;  %v13705_v61 = vld [vmem:[#allocation10 + $0x4cc] sm:$0xf]  ;;  %v12327_v23 = vld [vmem:[#allocation10 + $0x4d8] sm:$0xf0] }
 0x478   : > { %7734 = vmatpush.bf16.msrb.mxu3 %v12102_v42  ;;  %7696 = vmatmul.bf16.vlgmr.msrb.gmra.mxu0 %v16334_v29  ;;  %v11751_v42 = vld [vmem:[#allocation10 + $0x58] sm:$0xf0]  ;;  %v13637_v57 = vld [vmem:[#allocation10 + $0x2ac] sm:$0xf] }
 0x479   : > { %7740 = vmatpush.bf16.msra.mxu0 %v12342_v13  ;;  %7709 = vmatmul.bf16.vlgmr.msrb.gmra.mxu1 %v16338_v36  ;;  %v13593_v13 = vld [vmem:[#allocation10 + $0x14c] sm:$0xf]  ;;  %v11754_v15 = vor.u32 %v13561_v53, %v11751_v42  ;;  %v12183_v42 = vld [vmem:[#allocation10 + $0x3b8] sm:$0xf0] }
 0x47a   : > { %7753 = vmatpush.bf16.msra.mxu1 %v12470_v63  ;;  %7722 = vmatmul.bf16.vlgmr.msrb.gmra.mxu2 %v16336_v54  ;;  %v11879_v63 = vld [vmem:[#allocation10 + $0x158] sm:$0xf0]  ;;  %v13669_v35 = vld [vmem:[#allocation10 + $0x3ac] sm:$0xf] }
 0x47b   : > { %7766 = vmatpush.bf16.msra.mxu2 %v11834_v49  ;;  %7735 = vmatmul.bf16.vlgmr.msrb.gmra.mxu3 %v16342_v41  ;;  %v12262_v49 = vor.u32 %v13691_v4, %v12261_v28  ;;  %v11882_v6 = vor.u32 %v13593_v13, %v11879_v63  ;;  %v12202_v28 = vor.u32 %v13673_v20, %v12199_v40  ;;  %v13701_v13 = vld [vmem:[#allocation10 + $0x4ac] sm:$0xf]  ;;  %v12311_v63 = vld [vmem:[#allocation10 + $0x4b8] sm:$0xf0] }
 0x47c   : > { %7779 = vmatpush.bf16.msra.mxu3 %v11962_v12  ;;  %v13687_v12 = vld [vmem:[#allocation10 + $0x434] sm:$0xf0]  ;;  %v12330_v4 = vor.u32 %v13705_v61, %v12327_v23  ;;  %v13661_v14 = vld [vmem:[#allocation10 + $0x36c] sm:$0xf]  ;;  %v12119_v23 = vld [vmem:[#allocation10 + $0x338] sm:$0xf0] }
 0x47d   : > { %7741 = vmatpush.bf16.msra.mxu0 %v12326_v55  ;;  %v13589_v55 = vld [vmem:[#allocation10 + $0x12c] sm:$0xf] }
 0x47e   : > { %7754 = vmatpush.bf16.msra.mxu1 %v12454_v7  ;;  %v11863_v7 = vld [vmem:[#allocation10 + $0x138] sm:$0xf0]  ;;  %v13657_v16 = vld [vmem:[#allocation10 + $0x34c] sm:$0xf] }
 0x47f   : > { %7767 = vmatpush.bf16.msra.mxu2 %v11818_v47  ;;  %v12246_v47 = vor.u32 %v13687_v12, %v12245_v30  ;;  %v11866_v50 = vor.u32 %v13589_v55, %v11863_v7  ;;  %v12186_v30 = vor.u32 %v13669_v35, %v12183_v42  ;;  %v12314_v12 = vor.u32 %v13701_v13, %v12311_v63  ;;  %v13697_v55 = vld [vmem:[#allocation10 + $0x48c] sm:$0xf]  ;;  %v12295_v7 = vld [vmem:[#allocation10 + $0x498] sm:$0xf0] }
 0x480   : > { %7780 = vmatpush.bf16.msra.mxu3 %v11946_v21  ;;  %v11738_v21 = vor.u32 %v13557_v39, %v11735_v51  ;;  %v12167_v51 = vld [vmem:[#allocation10 + $0x398] sm:$0xf0]  ;;  %v13621_v20 = vld [vmem:[#allocation10 + $0x22c] sm:$0xf] }
 0x481   : > { %7742 = vmatpush.bf16.msra.mxu0 %v12310_v32  ;;  %v13585_v32 = vld [vmem:[#allocation10 + $0x10c] sm:$0xf]  ;;  %v12170_v62 = vor.u32 %v13665_v52, %v12167_v51  ;;  %v11975_v35 = vld [vmem:[#allocation10 + $0x218] sm:$0xf0]  ;;  %v12534_v51 = vld [vmem:[#allocation13 + $0x70] sm:$0xf] }
 0x482   : > { %7755 = vmatpush.bf16.msra.mxu1 %v12438_v25  ;;  %v11847_v25 = vld [vmem:[#allocation10 + $0x118] sm:$0xf0]  ;;  %v13653_v40 = vld [vmem:[#allocation10 + $0x32c] sm:$0xf] }
 0x483   : > { %7768 = vmatpush.bf16.msra.mxu2 %v11802_v48  ;;  %v13645_v48 = vld [vmem:[#allocation10 + $0x2ec] sm:$0xf]  ;;  %v12122_v42 = vor.u32 %v13653_v40, %v12119_v23  ;;  %v13767_v40 = vld [vmem:[#allocation13 + $0xb4] sm:$0xf0]  ;;  %v12494_v23 = vld [vmem:[#allocation13 + $0x20] sm:$0xf] }
 0x484   : > { %7781 = vmatpush.bf16.msra.mxu3 %v11930_v1  ;;  %v12215_v1 = vld [vmem:[#allocation10 + $0x3f8] sm:$0xf0]  ;;  %v13649_v63 = vld [vmem:[#allocation10 + $0x30c] sm:$0xf] }
 0x485   : > { %7743 = vmatpush.bf16.msra.mxu0 %v12294_v31  ;;  %v12471_v31 = vld [vmem:[#allocation10 + $0x5f8] sm:$0xf0]  ;;  %v12218_v46 = vor.u32 %v13677_v33, %v12215_v1  ;;  %v12154_v33 = vor.u32 %v13661_v14, %v12151_v56  ;;  %v13625_v1 = vld [vmem:[#allocation10 + $0x24c] sm:$0xf] }
 0x486   : > { %7756 = vmatpush.bf16.msra.mxu1 %v12422_v11  ;;  %v11850_v11 = vor.u32 %v13585_v32, %v11847_v25  ;;  %v12474_v26 = vor.u32 %v13741_v59, %v12471_v31  ;;  %v13725_v32 = vld [vmem:[#allocation10 + $0x56c] sm:$0xf]  ;;  %v12407_v25 = vld [vmem:[#allocation10 + $0x578] sm:$0xf0] }
 0x487   : > { %7769 = vmatpush.bf16.msra.mxu2 %v11786_v17  ;;  %v12090_v17 = vor.u32 %v13645_v48, %v12087_v22  ;;  %v12135_v59 = vld [vmem:[#allocation10 + $0x358] sm:$0xf0]  ;;  %v13689_v31 = vld [vmem:[#allocation10 + $0x44c] sm:$0xf] }
 0x488   : > { %7782 = vmatpush.bf16.msra.mxu3 %v11914_v27  ;;  %v12071_v27 = vld [vmem:[#allocation10 + $0x2d8] sm:$0xf0]  ;;  %v13757_v56 = vld [vmem:[#allocation13 + $0x64] sm:$0xf0] }
 0x489   : > { %7744 = vmatpush.bf16.msra.mxu0 %v12278_v44  ;;  %v13737_v44 = vld [vmem:[#allocation10 + $0x5cc] sm:$0xf] }
 0x48a   : > { %7757 = vmatpush.bf16.msra.mxu1 %v12406_v18  ;;  %v12455_v18 = vld [vmem:[#allocation10 + $0x5d8] sm:$0xf0] }
 0x48b   : > { %7770 = vmatpush.bf16.msra.mxu2 %v11770_v19  ;;  %v12074_v19 = vor.u32 %v13641_v45, %v12071_v27  ;;  %v12458_v53 = vor.u32 %v13737_v44, %v12455_v18  ;;  %v12138_v45 = vor.u32 %v13657_v16, %v12135_v59  ;;  %v13685_v44 = vld [vmem:[#allocation10 + $0x42c] sm:$0xf]  ;;  %v12247_v18 = vld [vmem:[#allocation10 + $0x438] sm:$0xf0]  ;;  %v12582_v16 = vld [vmem:[#allocation13 + $0xd0] sm:$0xf] }
 0x48c   : > { %7783 = vmatpush.bf16.msra.mxu3 %v11898_v34  ;;  %v12055_v34 = vld [vmem:[#allocation10 + $0x2b8] sm:$0xf0]  ;;  %v12250_v13 = vor.u32 %v13685_v44, %v12247_v18  ;;  %v13749_v44 = vld [vmem:[#allocation13 + $0x24] sm:$0xf0] }
 0x48d   : > { %7745 = vmatpush.bf16.msra.mxu0 %v12262_v49  ;;  %v13733_v49 = vld [vmem:[#allocation10 + $0x5ac] sm:$0xf] }
 0x48e   : > { %7758 = vmatpush.bf16.msra.mxu1 %v12390_v5  ;;  %v12439_v5 = vld [vmem:[#allocation10 + $0x5b8] sm:$0xf0] }
 0x48f   : > { %7771 = vmatpush.bf16.msra.mxu2 %v11754_v15  ;;  %v12058_v15 = vor.u32 %v13637_v57, %v12055_v34  ;;  %v12442_v39 = vor.u32 %v13733_v49, %v12439_v5  ;;  %v13617_v34 = vld [vmem:[#allocation10 + $0x20c] sm:$0xf]  ;;  %v12103_v49 = vld [vmem:[#allocation10 + $0x318] sm:$0xf0]  ;;  %v16372_v5 = vld [vmem:[#allocation12] sm:$0xf] }
 0x490   : > { %7784 = vmatpush.bf16.msra.mxu3 %v11882_v6  ;;  %v12039_v6 = vld [vmem:[#allocation10 + $0x298] sm:$0xf0] }
 0x491   : > { %7746 = vmatpush.bf16.msra.mxu0 %v12246_v47  ;;  %v13729_v47 = vld [vmem:[#allocation10 + $0x58c] sm:$0xf]  ;;  %v12042_v60 = vor.u32 %v13633_v38, %v12039_v6  ;;  %v12231_v38 = vld [vmem:[#allocation10 + $0x418] sm:$0xf0] }
 0x492   : > { %7759 = vmatpush.bf16.msra.mxu1 %v12374_v9  ;;  %v13629_v9 = vld [vmem:[#allocation10 + $0x26c] sm:$0xf] }
 0x493   : > { %7772 = vmatpush.bf16.msra.mxu2 %v11738_v21  ;;  %v12023_v21 = vld [vmem:[#allocation10 + $0x278] sm:$0xf0]  ;;  %v13713_v6 = vld [vmem:[#allocation10 + $0x50c] sm:$0xf] }
 0x494   : > { %7785 = vmatpush.bf16.msra.mxu3 %v11866_v50  ;;  %v13693_v50 = vld [vmem:[#allocation10 + $0x46c] sm:$0xf]  ;;  %v12026_v48 = vor.u32 %v13629_v9, %v12023_v21 }
 0x495   : > { %7747 = vmatpush.bf16.msra.mxu0 %v12230_v37  ;;  %v16366_v22 = vpop.f32.mrf.mxu0  ;;  %v12282_v37 = vor.u32 %v13693_v50, %v12279_v43 }
 0x496   : > { %7760 = vmatpush.bf16.msra.mxu1 %v12358_v3 }
 0x497   : > { %7773 = vmatpush.bf16.msra.mxu2 %v11722_v8  ;;  %v12410_v8 = vor.u32 %v13725_v32, %v12407_v25  ;;  %v12590_v32 = vld [vmem:[#allocation13 + $0xe0] sm:$0xf]  ;;  %v13773_v25 = vld [vmem:[#allocation13 + $0xe4] sm:$0xf0] }
 0x498   : > { %7786 = vmatpush.bf16.msra.mxu3 %v11850_v11  ;;  %7748 = vmatmul.bf16.vlgmr.msra.gmra.mxu0 %v16346_v0  ;;  %v12263_v11 = vld [vmem:[#allocation10 + $0x458] sm:$0xf0] }
 0x499   : > { %7792 = vmatpush.bf16.msrb.mxu0 %v12090_v17  ;;  %7761 = vmatmul.bf16.vlgmr.msra.gmra.mxu1 %v16348_v10  ;;  %v13721_v17 = vld [vmem:[#allocation10 + $0x54c] sm:$0xf]  ;;  %v12266_v27 = vor.u32 %v13689_v31, %v12263_v11  ;;  %v12510_v31 = vld [vmem:[#allocation13 + $0x40] sm:$0xf] }
 0x49a   : > { %7805 = vmatpush.bf16.msrb.mxu1 %v12218_v46  ;;  %7774 = vmatmul.bf16.vlgmr.msra.gmra.mxu2 %v16334_v29  ;;  %v12423_v29 = vld [vmem:[#allocation10 + $0x598] sm:$0xf0]  ;;  %v13753_v11 = vld [vmem:[#allocation13 + $0x44] sm:$0xf0] }
 0x49b   : > { %7818 = vmatpush.bf16.msrb.mxu2 %v12346_v2  ;;  %7787 = vmatmul.bf16.vlgmr.msra.gmra.mxu3 %v16338_v36  ;;  %v12298_v36 = vor.u32 %v13697_v55, %v12295_v7  ;;  %v12426_v58 = vor.u32 %v13729_v47, %v12423_v29  ;;  %v12391_v46 = vld [vmem:[#allocation10 + $0x558] sm:$0xf0]  ;;  %v12010_v2 = vor.u32 %v13625_v1, %v12007_v24  ;;  %v6564_v47 = vperm.slane %v16372_v5, 0  ;;  %v12598_v29 = vld [vmem:[#allocation13 + $0xf0] sm:$0xf] }
 0x49c   : > { %7831 = vmatpush.bf16.msrb.mxu3 %v12474_v26  ;;  %v11991_v26 = vld [vmem:[#allocation10 + $0x238] sm:$0xf0]  ;;  %v12394_v61 = vor.u32 %v13721_v17, %v12391_v46  ;;  %v11978_v7 = vor.u32 %v13617_v34, %v11975_v35  ;;  %v12591_v24 = vor.u32 %v13773_v25, %v12590_v32  ;;  %v12574_v46 = vld [vmem:[#allocation13 + $0xc0] sm:$0xf]  ;;  %v12528_v32 = vld [vmem:[#allocation13 + $0x68] sm:$0xf0] }
 0x49d   : > { %7793 = vmatpush.bf16.msrb.mxu0 %v12074_v19  ;;  %v16370_v19 = vpop.f32.mrf.mxu2  ;;  %v11994_v57 = vor.u32 %v13621_v20, %v11991_v26  ;;  %v13759_v55 = vld [vmem:[#allocation13 + $0x74] sm:$0xf0]  ;;  %v7542_v43 = vadd.f32 %v16366_v22, %v6564_v47  ;;  %v12536_v47 = vld [vmem:[#allocation13 + $0x78] sm:$0xf0] }
 0x49e   : > { %7806 = vmatpush.bf16.msrb.mxu1 %v12202_v28  ;;  %v16368_v3 = vpop.f32.mrf.mxu1  ;;  %v13717_v28 = vld [vmem:[#allocation10 + $0x52c] sm:$0xf]  ;;  %v12535_v21 = vor.u32 %v13759_v55, %v12534_v51  ;;  %v13755_v1 = vld [vmem:[#allocation13 + $0x54] sm:$0xf0]  ;;  %v13758_v51 = vld [vmem:[#allocation13 + $0x74] sm:$0xf] }
 0x49f   : > { %7819 = vmatpush.bf16.msrb.mxu2 %v12330_v4  ;;  %v12375_v4 = vld [vmem:[#allocation10 + $0x538] sm:$0xf0]  ;;  %v7555_v22 = vadd.f32 %v16368_v3, %v7542_v43  ;;  %v13756_v43 = vld [vmem:[#allocation13 + $0x64] sm:$0xf] }
 0x4a0   : > { %7832 = vmatpush.bf16.msrb.mxu3 %v12458_v53  ;;  %v7543_v53 = vpop.f32.mrf.mxu0  ;;  %v13751_v3 = vld [vmem:[#allocation13 + $0x34] sm:$0xf0] }
 0x4a1   : > { %7794 = vmatpush.bf16.msrb.mxu0 %v12058_v15  ;;  %v7568_v17 = vadd.f32 %v16370_v19, %v7555_v22  ;;  %v12495_v53 = vor.u32 %v13749_v44, %v12494_v23  ;;  %v12576_v23 = vld [vmem:[#allocation13 + $0xc8] sm:$0xf0] }
 0x4a2   : > { %7807 = vmatpush.bf16.msrb.mxu1 %v12186_v30  ;;  %v12378_v30 = vor.u32 %v13717_v28, %v12375_v4  ;;  %v12558_v4 = vld [vmem:[#allocation13 + $0xa0] sm:$0xf] }
 0x4a3   : > { %7820 = vmatpush.bf16.msrb.mxu2 %v12314_v12  ;;  %v13681_v12 = vld [vmem:[#allocation10 + $0x40c] sm:$0xf] }
 0x4a4   : > { %7833 = vmatpush.bf16.msrb.mxu3 %v12442_v39  ;;  %v12359_v39 = vld [vmem:[#allocation10 + $0x518] sm:$0xf0] }
 0x4a5   : > { %7795 = vmatpush.bf16.msrb.mxu0 %v12042_v60  ;;  %v7580_v52 = vpop.f32.mrf.mxu3  ;;  %v13775_v60 = vld [vmem:[#allocation13 + $0xf4] sm:$0xf0]  ;;  %v12362_v9 = vor.u32 %v13713_v6, %v12359_v39  ;;  %v7569_v14 = vpop.f32.mrf.mxu2  ;;  %v13745_v39 = vld [vmem:[#allocation13 + $0x4] sm:$0xf0] }
 0x4a6   : > { %7808 = vmatpush.bf16.msrb.mxu1 %v12170_v62  ;;  %v7556_v15 = vpop.f32.mrf.mxu1  ;;  %v12106_v62 = vor.u32 %v13649_v63, %v12103_v49  ;;  %v12599_v50 = vor.u32 %v13775_v60, %v12598_v29  ;;  %v7581_v26 = vadd.f32 %v7580_v52, %v7568_v17  ;;  %v13747_v63 = vld [vmem:[#allocation13 + $0x14] sm:$0xf0]  ;;  %v12478_v52 = vld [vmem:[#allocation13] sm:$0xf] }
 0x4a7   : > { %7821 = vmatpush.bf16.msrb.mxu2 %v12298_v36  ;;  %v12234_v36 = vor.u32 %v13681_v12, %v12231_v38  ;;  %v13763_v12 = vld [vmem:[#allocation13 + $0x94] sm:$0xf0]  ;;  %v16384_v38 = vstv %s12475_s24  ;;  %v12542_v60 = vld [vmem:[#allocation13 + $0x80] sm:$0xf]  ;;  %v12479_v14 = vor.u32 %v13745_v39, %v12478_v52  ;;  %v13748_v52 = vld [vmem:[#allocation13 + $0x24] sm:$0xf] }
 0x4a8   : > { %7834 = vmatpush.bf16.msrb.mxu3 %v12426_v58  ;;  %v12526_v58 = vld [vmem:[#allocation13 + $0x60] sm:$0xf]  ;;  %v12496_v39 = vld [vmem:[#allocation13 + $0x28] sm:$0xf0] }
 0x4a9   : > { %7796 = vmatpush.bf16.msrb.mxu0 %v12026_v48  ;;  %v12527_v48 = vor.u32 %v13757_v56, %v12526_v58  ;;  %v12539_v58 = vor.u32 %v13758_v51, %v12536_v47  ;;  %v12560_v47 = vld [vmem:[#allocation13 + $0xa8] sm:$0xf0] }
 0x4aa   : > { %7809 = vmatpush.bf16.msrb.mxu1 %v12154_v33 }
 0x4ab   : > { %7822 = vmatpush.bf16.msrb.mxu2 %v12282_v37  ;;  %v12518_v37 = vld [vmem:[#allocation13 + $0x50] sm:$0xf] }
 0x4ac   : > { %7835 = vmatpush.bf16.msrb.mxu3 %v12410_v8  ;;  %v13771_v8 = vld [vmem:[#allocation13 + $0xd4] sm:$0xf0]  ;;  %v12519_v59 = vor.u32 %v13755_v1, %v12518_v37  ;;  %v12592_v37 = vld [vmem:[#allocation13 + $0xe8] sm:$0xf0]  ;;  %v12662_v1 = vld [vmem:[#allocation13 + $0x170] sm:$0xf] }
 0x4ad   : > { %7797 = vmatpush.bf16.msrb.mxu0 %v12010_v2  ;;  %v7582_v33 = vpop.f32.mrf.mxu3  ;;  %v13769_v2 = vld [vmem:[#allocation13 + $0xc4] sm:$0xf0] }
 0x4ae   : > { %7810 = vmatpush.bf16.msrb.mxu1 %v12138_v45  ;;  %v12575_v20 = vor.u32 %v13769_v2, %v12574_v46  ;;  %v13772_v33 = vld [vmem:[#allocation13 + $0xe4] sm:$0xf]  ;;  %v13770_v2 = vld [vmem:[#allocation13 + $0xd4] sm:$0xf] }
 0x4af   : > { %7823 = vmatpush.bf16.msrb.mxu2 %v12266_v27  ;;  %v12502_v27 = vld [vmem:[#allocation13 + $0x30] sm:$0xf]  ;;  %v12595_v17 = vor.u32 %v13772_v33, %v12592_v37 }
 0x4b0   : > { %7836 = vmatpush.bf16.msrb.mxu3 %v12394_v61  ;;  %v12503_v61 = vor.u32 %v13751_v3, %v12502_v27  ;;  %v13787_v27 = vld [vmem:[#allocation13 + $0x154] sm:$0xf0] }
 0x4b1   : > { %7798 = vmatpush.bf16.msrb.mxu0 %v11994_v57  ;;  %v13765_v57 = vld [vmem:[#allocation13 + $0xa4] sm:$0xf0] }
 0x4b2   : > { %7811 = vmatpush.bf16.msrb.mxu1 %v12122_v42  ;;  %v12559_v49 = vor.u32 %v13765_v57, %v12558_v4  ;;  %v13750_v57 = vld [vmem:[#allocation13 + $0x34] sm:$0xf] }
 0x4b3   : > { %7824 = vmatpush.bf16.msrb.mxu2 %v12250_v13  ;;  %v12486_v13 = vld [vmem:[#allocation13 + $0x10] sm:$0xf] }
 0x4b4   : > { %7837 = vmatpush.bf16.msrb.mxu3 %v12378_v30  ;;  %v12550_v30 = vld [vmem:[#allocation13 + $0x90] sm:$0xf]  ;;  %v12487_v6 = vor.u32 %v13747_v63, %v12486_v13  ;;  %v13766_v63 = vld [vmem:[#allocation13 + $0xb4] sm:$0xf] }
 0x4b5   : > { %7799 = vmatpush.bf16.msrb.mxu0 %v11978_v7  ;;  %v7593_v45 = vpop.f32.mrf.mxu0  ;;  %v12551_v55 = vor.u32 %v13763_v12, %v12550_v30  ;;  %v13783_v30 = vld [vmem:[#allocation13 + $0x134] sm:$0xf0] }
 0x4b6   : > { %7812 = vmatpush.bf16.msrb.mxu1 %v12106_v62  ;;  %v7594_v19 = vadd.f32 %v7593_v45, %v7581_v26  ;;  %v13761_v62 = vld [vmem:[#allocation13 + $0x84] sm:$0xf0]  ;;  %v12584_v45 = vld [vmem:[#allocation13 + $0xd8] sm:$0xf0]  ;;  %v12512_v26 = vld [vmem:[#allocation13 + $0x48] sm:$0xf0] }
 0x4b7   : > { %7825 = vmatpush.bf16.msrb.mxu2 %v12234_v36  ;;  %v12543_v56 = vor.u32 %v13761_v62, %v12542_v60 }
 0x4b8   : > { %7838 = vmatpush.bf16.msrb.mxu3 %v12362_v9  ;;  %7800 = vmatmul.bf16.vlgmr.msrb.gmra.mxu0 %v16336_v54  ;;  %v12583_v54 = vor.u32 %v13771_v8, %v12582_v16  ;;  %v13774_v9 = vld [vmem:[#allocation13 + $0xf4] sm:$0xf]  ;;  %v12531_v16 = vor.u32 %v13756_v43, %v12528_v32 }
 0x4b9   : > { %8252 = vmatpush.bf16.msra.mxu0 %v12535_v21  ;;  %7813 = vmatmul.bf16.vlgmr.msrb.gmra.mxu1 %v16342_v41  ;;  %v12511_v41 = vor.u32 %v13753_v11, %v12510_v31  ;;  %v12600_v21 = vld [vmem:[#allocation13 + $0xf8] sm:$0xf0]  ;;  %v13789_v31 = vld [vmem:[#allocation13 + $0x164] sm:$0xf0]  ;;  %v13754_v11 = vld [vmem:[#allocation13 + $0x54] sm:$0xf] }
 0x4ba   : > { %8265 = vmatpush.bf16.msra.mxu1 %v12599_v50  ;;  %7826 = vmatmul.bf16.vlgmr.msrb.gmra.mxu2 %v16346_v0  ;;  %v7606_v0 = vpop.f32.mrf.mxu1  ;;  %v12603_v25 = vor.u32 %v13774_v9, %v12600_v21  ;;  %v13781_v9 = vld [vmem:[#allocation13 + $0x124] sm:$0xf0]  ;;  %v12499_v21 = vor.u32 %v13748_v52, %v12496_v39  ;;  %v13762_v32 = vld [vmem:[#allocation13 + $0x94] sm:$0xf] }
 0x4bb   : > { %7839 = vmatmul.bf16.vlgmr.msrb.gmra.mxu3 %v16348_v10  ;;  %v12566_v10 = vld [vmem:[#allocation13 + $0xb0] sm:$0xf]  ;;  %v7607_v15 = vadd.f32 %v7606_v0, %v7594_v19  ;;  %v12638_v19 = vld [vmem:[#allocation13 + $0x140] sm:$0xf] }
 0x4bc   : > { %v12567_v18 = vor.u32 %v13767_v40, %v12566_v10  ;;  %v12646_v0 = vld [vmem:[#allocation13 + $0x150] sm:$0xf]  ;;  %v12587_v10 = vor.u32 %v13770_v2, %v12584_v45 }
 0x4bd   : > { %8253 = vmatpush.bf16.msra.mxu0 %v12527_v48  ;;  %v7619_v28 = vpop.f32.mrf.mxu2  ;;  %v7595_v35 = vpop.f32.mrf.mxu0  ;;  %v7850_v7 = vmul.f32 %v16384_v38, %v7607_v15  ;;  %vm7845_vm3 = vcmp.ge.f32.partialorder %v7607_v15, 0.0  ;;  %v6565_v48 = vperm.slane %v16372_v5, 1  ;;  %v12647_v44 = vor.u32 %v13787_v27, %v12646_v0  ;;  %v12606_v0 = vld [vmem:[#allocation13 + $0x100] sm:$0xf]  ;;  %v13777_v27 = vld [vmem:[#allocation13 + $0x104] sm:$0xf0] }
 0x4be   : > { %8266 = vmatpush.bf16.msra.mxu1 %v12591_v24  ;;  %v16382_v34 = vpop.f32.mrf.mxu3  ;;  %v13791_v24 = vld [vmem:[#allocation13 + $0x174] sm:$0xf0]  ;;  %v12504_v35 = vld [vmem:[#allocation13 + $0x38] sm:$0xf0] }
 0x4bf   : > { %v7854_v50 = vsel %vm7845_vm3, %v7607_v15, %v7850_v7  ;;  %v12663_v8 = vor.u32 %v13791_v24, %v12662_v1  ;;  %v7620_v46 = vadd.f32 %v7619_v28, %v6565_v48  ;;  %v13785_v28 = vld [vmem:[#allocation13 + $0x144] sm:$0xf0]  ;;  %v13764_v7 = vld [vmem:[#allocation13 + $0xa4] sm:$0xf]  ;;  %v12614_v1 = vld [vmem:[#allocation13 + $0x110] sm:$0xf] }
 0x4c0   : > { %v16388_v22 = vpack.c.bf16 %v7854_v50, %v7854_v50  ;;  %v12639_v15 = vor.u32 %v13785_v28, %v12638_v19  ;;  %v12563_v50 = vor.u32 %v13764_v7, %v12560_v47  ;;  %v13779_v24 = vld [vmem:[#allocation13 + $0x114] sm:$0xf0]  ;;  %v12726_v19 = vld [vmem:[#allocation13 + $0x1f0] sm:$0xf]  ;;  %v13782_v7 = vld [vmem:[#allocation13 + $0x134] sm:$0xf] }
 0x4c1   : > { %8254 = vmatpush.bf16.msra.mxu0 %v12519_v59  ;;  %v12654_v59 = vld [vmem:[#allocation13 + $0x160] sm:$0xf]  ;;  %8278 = vmatpush.bf16.msra.mxu2 %v12663_v8  ;;  %v7633_v40 = vadd.f32 %v16382_v34, %v7620_v46  ;;  %v12630_v34 = vld [vmem:[#allocation13 + $0x130] sm:$0xf]  ;;  %v12544_v46 = vld [vmem:[#allocation13 + $0x88] sm:$0xf0]  ;;  %v12615_v45 = vor.u32 %v13779_v24, %v12614_v1 }
 0x4c2   : > { %8267 = vmatpush.bf16.msra.mxu1 %v12583_v54  ;;  %v7608_v42 = vpop.f32.mrf.mxu1  ;;  %v12520_v54 = vld [vmem:[#allocation13 + $0x58] sm:$0xf0]  ;;  %v13807_v28 = vld [vmem:[#allocation13 + $0x1f4] sm:$0xf0] }
 0x4c3   : > { %v12523_v3 = vor.u32 %v13754_v11, %v12520_v54  ;;  %v12632_v47 = vld [vmem:[#allocation13 + $0x138] sm:$0xf0] }
 0x4c5   : > { %8255 = vmatpush.bf16.msra.mxu0 %v12511_v41  ;;  %v7621_v29 = vpop.f32.mrf.mxu2  ;;  %v12655_v41 = vor.u32 %v13789_v31, %v12654_v59  ;;  %v13744_v59 = vld [vmem:[#allocation13 + $0x4] sm:$0xf]  ;;  %v12480_v31 = vld [vmem:[#allocation13 + $0x8] sm:$0xf0] }
 0x4c6   : > { %8268 = vmatpush.bf16.msra.mxu1 %v12575_v20  ;;  %v7634_v36 = vpop.f32.mrf.mxu3  ;;  %v13752_v20 = vld [vmem:[#allocation13 + $0x44] sm:$0xf]  ;;  %v12631_v29 = vor.u32 %v13783_v30, %v12630_v34  ;;  %v12640_v30 = vld [vmem:[#allocation13 + $0x148] sm:$0xf0] }
 0x4c7   : > { %8279 = vmatpush.bf16.msra.mxu2 %v12655_v41  ;;  %v12622_v36 = vld [vmem:[#allocation13 + $0x120] sm:$0xf]  ;;  %v13784_v34 = vld [vmem:[#allocation13 + $0x144] sm:$0xf] }
 0x4c8   : > { %v12623_v33 = vor.u32 %v13781_v9, %v12622_v36  ;;  %v13801_v36 = vld [vmem:[#allocation13 + $0x1c4] sm:$0xf0]  ;;  %v13780_v9 = vld [vmem:[#allocation13 + $0x124] sm:$0xf] }
 0x4c9   : > { %8256 = vmatpush.bf16.msra.mxu0 %v12503_v61  ;;  %v13768_v61 = vld [vmem:[#allocation13 + $0xc4] sm:$0xf] }
 0x4ca   : > { %8269 = vmatpush.bf16.msra.mxu1 %v12567_v18  ;;  %v12515_v18 = vor.u32 %v13752_v20, %v12512_v26  ;;  %v13790_v20 = vld [vmem:[#allocation13 + $0x174] sm:$0xf]  ;;  %v12664_v26 = vld [vmem:[#allocation13 + $0x178] sm:$0xf0] }
 0x4cb   : > { %8280 = vmatpush.bf16.msra.mxu2 %v12647_v44  ;;  %v12656_v44 = vld [vmem:[#allocation13 + $0x168] sm:$0xf0] }
 0x4cd   : > { %8257 = vmatpush.bf16.msra.mxu0 %v12495_v53  ;;  %v12579_v53 = vor.u32 %v13768_v61, %v12576_v23  ;;  %v12667_v61 = vor.u32 %v13790_v20, %v12664_v26  ;;  %v13788_v23 = vld [vmem:[#allocation13 + $0x164] sm:$0xf]  ;;  %v13806_v26 = vld [vmem:[#allocation13 + $0x1f4] sm:$0xf] }
 0x4ce   : > { %8270 = vmatpush.bf16.msra.mxu1 %v12559_v49  ;;  %v12568_v49 = vld [vmem:[#allocation13 + $0xb8] sm:$0xf0] }
 0x4cf   : > { %v12571_v51 = vor.u32 %v13766_v63, %v12568_v49  ;;  %8281 = vmatpush.bf16.msra.mxu2 %v12639_v15  ;;  %v12718_v63 = vld [vmem:[#allocation13 + $0x1e0] sm:$0xf]  ;;  %v13805_v49 = vld [vmem:[#allocation13 + $0x1e4] sm:$0xf0] }
 0x4d0   : > { %v12719_v15 = vor.u32 %v13805_v49, %v12718_v63 }
 0x4d1   : > { %8258 = vmatpush.bf16.msra.mxu0 %v12487_v6  ;;  %v12507_v6 = vor.u32 %v13750_v57, %v12504_v35  ;;  %v13786_v35 = vld [vmem:[#allocation13 + $0x154] sm:$0xf] }
 0x4d2   : > { %8271 = vmatpush.bf16.msra.mxu1 %v12551_v55 }
 0x4d3   : > { %8282 = vmatpush.bf16.msra.mxu2 %v12631_v29 }
 0x4d5   : > { %8259 = vmatpush.bf16.msra.mxu0 %v12479_v14  ;;  %v7645_v4 = vpop.f32.mrf.mxu0 }
 0x4d6   : > { %8272 = vmatpush.bf16.msra.mxu1 %v12543_v56  ;;  %v7646_v42 = vadd.f32 %v7645_v4, %v7633_v40  ;;  %v7658_v13 = vpop.f32.mrf.mxu1  ;;  %v12488_v56 = vld [vmem:[#allocation13 + $0x18] sm:$0xf0]  ;;  %v12607_v40 = vor.u32 %v13777_v27, %v12606_v0  ;;  %v12727_v4 = vor.u32 %v13807_v28, %v12726_v19  ;;  %v12670_v0 = vld [vmem:[#allocation13 + $0x180] sm:$0xf]  ;;  %v13793_v27 = vld [vmem:[#allocation13 + $0x184] sm:$0xf0] }
 0x4d7   : > { %8283 = vmatpush.bf16.msra.mxu2 %v12623_v33  ;;  %v12686_v33 = vld [vmem:[#allocation13 + $0x1a0] sm:$0xf]  ;;  %v12671_v20 = vor.u32 %v13793_v27, %v12670_v0 }
 0x4d8   : > { %8260 = vmatmul.bf16.vlgmr.msra.gmra.mxu0 %v16388_v22  ;;  %v7659_v12 = vadd.f32 %v7658_v13, %v7646_v42  ;;  %8291 = vmatpush.bf16.msra.mxu3 %v12727_v4 }
 0x4d9   : > { %8304 = vmatpush.bf16.msrb.mxu0 %v12539_v58  ;;  %v13746_v58 = vld [vmem:[#allocation13 + $0x14] sm:$0xf] }
 0x4da   : > { %8317 = vmatpush.bf16.msrb.mxu1 %v12603_v25  ;;  %v12552_v25 = vld [vmem:[#allocation13 + $0x98] sm:$0xf0] }
 0x4db   : > { %v12555_v11 = vor.u32 %v13762_v32, %v12552_v25  ;;  %8284 = vmatpush.bf16.msra.mxu2 %v12615_v45  ;;  %v13778_v25 = vld [vmem:[#allocation13 + $0x114] sm:$0xf] }
 0x4dc   : > { %8292 = vmatpush.bf16.msra.mxu3 %v12719_v15 }
 0x4dd   : > { %8305 = vmatpush.bf16.msrb.mxu0 %v12531_v16  ;;  %v7671_v55 = vpop.f32.mrf.mxu2  ;;  %v7647_v43 = vpop.f32.mrf.mxu0  ;;  %v12491_v16 = vor.u32 %v13746_v58, %v12488_v56  ;;  %v12694_v58 = vld [vmem:[#allocation13 + $0x1b0] sm:$0xf]  ;;  %v13799_v56 = vld [vmem:[#allocation13 + $0x1b4] sm:$0xf0] }
 0x4de   : > { %8318 = vmatpush.bf16.msrb.mxu1 %v12595_v17  ;;  %v7672_v60 = vadd.f32 %v7671_v55, %v7659_v12  ;;  %v7684_v62 = vpop.f32.mrf.mxu3  ;;  %v7660_v48 = vpop.f32.mrf.mxu1  ;;  %v13760_v17 = vld [vmem:[#allocation13 + $0x84] sm:$0xf]  ;;  %v12710_v12 = vld [vmem:[#allocation13 + $0x1d0] sm:$0xf]  ;;  %v12695_v32 = vor.u32 %v13799_v56, %v12694_v58  ;;  %v12672_v56 = vld [vmem:[#allocation13 + $0x188] sm:$0xf0] }
 0x4df   : > { %8285 = vmatpush.bf16.msra.mxu2 %v12607_v40  ;;  %v12616_v48 = vld [vmem:[#allocation13 + $0x118] sm:$0xf0]  ;;  %v13792_v58 = vld [vmem:[#allocation13 + $0x184] sm:$0xf] }
 0x4e0   : > { %v7685_v14 = vadd.f32 %v7684_v62, %v7672_v60  ;;  %v12635_v60 = vor.u32 %v13782_v7, %v12632_v47  ;;  %v12702_v62 = vld [vmem:[#allocation13 + $0x1c0] sm:$0xf]  ;;  %v12688_v7 = vld [vmem:[#allocation13 + $0x1a8] sm:$0xf0] }
 0x4e1   : > { %8306 = vmatpush.bf16.msrb.mxu0 %v12523_v3  ;;  %v12483_v3 = vor.u32 %v13744_v59, %v12480_v31  ;;  %v13776_v59 = vld [vmem:[#allocation13 + $0x104] sm:$0xf]  ;;  %v12608_v31 = vld [vmem:[#allocation13 + $0x108] sm:$0xf0] }
 0x4e2   : > { %8319 = vmatpush.bf16.msrb.mxu1 %v12587_v10  ;;  %vm7846_vm4 = vcmp.ge.f32.partialorder %v7685_v14, 0.0  ;;  %v7851_v37 = vmul.f32 %v16384_v38, %v7685_v14  ;;  %v12547_v10 = vor.u32 %v13760_v17, %v12544_v46  ;;  %v13795_v17 = vld [vmem:[#allocation13 + $0x194] sm:$0xf0] }
 0x4e3   : > { %8330 = vmatpush.bf16.msrb.mxu2 %v12667_v61 }
 0x4e4   : > { %v7855_v8 = vsel %vm7846_vm4, %v7685_v14, %v7851_v37  ;;  %v12624_v14 = vld [vmem:[#allocation13 + $0x128] sm:$0xf0]  ;;  %v13797_v37 = vld [vmem:[#allocation13 + $0x1a4] sm:$0xf0] }
 0x4e5   : > { %8307 = vmatpush.bf16.msrb.mxu0 %v12515_v18  ;;  %v7859_v54 = vpack.c.bf16 %v7855_v8, %v7855_v8  ;;  %v7673_v2 = vpop.f32.mrf.mxu2  ;;  %v12659_v18 = vor.u32 %v13788_v23, %v12656_v44  ;;  %v12627_v43 = vor.u32 %v13780_v9, %v12624_v14  ;;  %v13804_v23 = vld [vmem:[#allocation13 + $0x1e4] sm:$0xf]  ;;  %v12720_v44 = vld [vmem:[#allocation13 + $0x1e8] sm:$0xf0] }
 0x4e6   : > { %8320 = vmatpush.bf16.msrb.mxu1 %v12579_v53  ;;  %v7686_v41 = vpop.f32.mrf.mxu3  ;;  %v12648_v53 = vld [vmem:[#allocation13 + $0x158] sm:$0xf0]  ;;  %v12611_v2 = vor.u32 %v13776_v59, %v12608_v31  ;;  %v12723_v28 = vor.u32 %v13804_v23, %v12720_v44 }
 0x4e7   : > { %8273 = vmatmul.bf16.vlgmr.msra.gmra.mxu1 %v7859_v54  ;;  %8331 = vmatpush.bf16.msrb.mxu2 %v12659_v18  ;;  %v12651_v13 = vor.u32 %v13786_v35, %v12648_v53  ;;  %v13802_v35 = vld [vmem:[#allocation13 + $0x1d4] sm:$0xf]  ;;  %v12712_v53 = vld [vmem:[#allocation13 + $0x1d8] sm:$0xf0] }
 0x4e9   : > { %8308 = vmatpush.bf16.msrb.mxu0 %v12507_v6  ;;  %v13803_v6 = vld [vmem:[#allocation13 + $0x1d4] sm:$0xf0] }
 0x4ea   : > { %8321 = vmatpush.bf16.msrb.mxu1 %v12571_v51  ;;  %v12711_v39 = vor.u32 %v13803_v6, %v12710_v12  ;;  %v12704_v12 = vld [vmem:[#allocation13 + $0x1c8] sm:$0xf0] }
 0x4eb   : > { %8332 = vmatpush.bf16.msrb.mxu2 %v12651_v13 }
 0x4ec   : > { %8293 = vmatpush.bf16.msra.mxu3 %v12711_v39  ;;  %v12696_v39 = vld [vmem:[#allocation13 + $0x1b8] sm:$0xf0] }
 0x4ed   : > { %8309 = vmatpush.bf16.msrb.mxu0 %v12499_v21  ;;  %v12703_v21 = vor.u32 %v13801_v36, %v12702_v62  ;;  %v13794_v62 = vld [vmem:[#allocation13 + $0x194] sm:$0xf]  ;;  %v12680_v36 = vld [vmem:[#allocation13 + $0x198] sm:$0xf0] }
 0x4ee   : > { %8322 = vmatpush.bf16.msrb.mxu1 %v12563_v50  ;;  %v6566_v50 = vperm.slane %v16372_v5, 2  ;;  %v12683_v9 = vor.u32 %v13794_v62, %v12680_v36 }
 0x4f0   : > { %8294 = vmatpush.bf16.msra.mxu3 %v12703_v21  ;;  %v6567_v21 = vperm.slane %v16372_v5, 3 }
 0x4f1   : > { %8310 = vmatpush.bf16.msrb.mxu0 %v12491_v16  ;;  %v12619_v16 = vor.u32 %v13778_v25, %v12616_v48 }
 0x4f2   : > { %8323 = vmatpush.bf16.msrb.mxu1 %v12555_v11  ;;  %v12687_v11 = vor.u32 %v13797_v37, %v12686_v33 }
 0x4f4   : > { %8295 = vmatpush.bf16.msra.mxu3 %v12695_v32 }
 0x4f5   : > { %8311 = vmatpush.bf16.msrb.mxu0 %v12483_v3  ;;  %v7697_v57 = vpop.f32.mrf.mxu0 }
 0x4f6   : > { %8324 = vmatpush.bf16.msrb.mxu1 %v12547_v10  ;;  %v7710_v42 = vpop.f32.mrf.mxu1  ;;  %v7698_v1 = vadd.f32 %v7697_v57, %v6566_v50  ;;  %v12728_v10 = vld [vmem:[#allocation13 + $0x1f8] sm:$0xf0]  ;;  %v12675_v50 = vor.u32 %v13792_v58, %v12672_v56 }
 0x4f7   : > { %v12731_v40 = vor.u32 %v13806_v26, %v12728_v10 }
 0x4f8   : > { %8312 = vmatmul.bf16.vlgmr.msrb.gmra.mxu0 %v16388_v22  ;;  %v12643_v22 = vor.u32 %v13784_v34, %v12640_v30  ;;  %v7711_v46 = vadd.f32 %v7710_v42, %v7698_v1  ;;  %8296 = vmatpush.bf16.msra.mxu3 %v12687_v11  ;;  %v12715_v42 = vor.u32 %v13802_v35, %v12712_v53  ;;  %v13811_v35 = vld [vmem:[%s16521_s1 + $0x18] sm:$0xff]  ;;  %v13822_v53 = vld [vmem:[%s16521_s1 + $0x70] sm:$0xff] }
 0x4f9   : > { %8325 = vmatmul.bf16.vlgmr.msrb.gmra.mxu1 %v7859_v54  ;;  %v12678_v54 = vld [vmem:[#allocation13 + $0x190] sm:$0xf] }
 0x4fa   : > { %8333 = vmatpush.bf16.msrb.mxu2 %v12643_v22  ;;  %v12679_v45 = vor.u32 %v13795_v17, %v12678_v54  ;;  %v13800_v22 = vld [vmem:[#allocation13 + $0x1c4] sm:$0xf] }
 0x4fb   : > { %v12707_v6 = vor.u32 %v13800_v22, %v12704_v12  ;;  %v13819_v22 = vld [vmem:[%s16521_s1 + $0x58] sm:$0xff]  ;;  %v13818_v12 = vld [vmem:[%s16521_s1 + $0x50] sm:$0xff] }
 0x4fc   : > { %8297 = vmatpush.bf16.msra.mxu3 %v12679_v45  ;;  %v7926_v45 = vld [vmem:[#allocation15] sm:$0x3] }
 0x4fd   : > { %v7723_v52 = vpop.f32.mrf.mxu2  ;;  %v7699_v51 = vpop.f32.mrf.mxu0  ;;  %v7929_v10 = vperm.slane %v7926_v45, 1 }
 0x4fe   : > { %v7736_v55 = vpop.f32.mrf.mxu3  ;;  %v7712_v29 = vpop.f32.mrf.mxu1  ;;  %8334 = vmatpush.bf16.msrb.mxu2 %v12635_v60  ;;  %v7724_v41 = vadd.f32 %v7723_v52, %v7711_v46  ;;  %v13798_v52 = vld [vmem:[#allocation13 + $0x1b4] sm:$0xf] }
 0x4ff   : > { %v12699_v51 = vor.u32 %v13798_v52, %v12696_v39  ;;  %v13817_v52 = vld [vmem:[%s16521_s1 + $0x48] sm:$0xff] }
 0x500   : > { %v7737_v3 = vadd.f32 %v7736_v55, %v7724_v41  ;;  %8298 = vmatpush.bf16.msra.mxu3 %v12671_v20  ;;  %v13796_v55 = vld [vmem:[#allocation13 + $0x1a4] sm:$0xf]  ;;  %v7928_v41 = vperm.slane %v7926_v45, 0 }
 0x501   : > { %v12691_v60 = vor.u32 %v13796_v55, %v12688_v7 }
 0x502   : > { %8335 = vmatpush.bf16.msrb.mxu2 %v12627_v43 }
 0x504   : > { %8343 = vmatpush.bf16.msrb.mxu3 %v12731_v40 }
 0x505   : > { %v7725_v24 = vpop.f32.mrf.mxu2 }
 0x506   : > { %v7738_v8 = vpop.f32.mrf.mxu3  ;;  %8336 = vmatpush.bf16.msrb.mxu2 %v12619_v16 }
 0x508   : > { %8344 = vmatpush.bf16.msrb.mxu3 %v12723_v28  ;;  %v13813_v28 = vld [vmem:[%s16521_s1 + $0x28] sm:$0xff] }
 0x50a   : > { %8337 = vmatpush.bf16.msrb.mxu2 %v12611_v2 }
 0x50c   : > { %8345 = vmatpush.bf16.msrb.mxu3 %v12715_v42  ;;  %v13810_v42 = vld [vmem:[%s16521_s1 + $0x10] sm:$0xff] }
 0x510   : > { %8346 = vmatpush.bf16.msrb.mxu3 %v12707_v6 }
 0x514   : > { %8347 = vmatpush.bf16.msrb.mxu3 %v12699_v51  ;;  %v13816_v51 = vld [vmem:[%s16521_s1 + $0x40] sm:$0xff] }
 0x515   : > { %v7749_v61 = vpop.f32.mrf.mxu0 }
 0x516   : > { %v7750_v18 = vadd.f32 %v7749_v61, %v7737_v3  ;;  %v7762_v19 = vpop.f32.mrf.mxu1 }
 0x518   : > { %v7763_v4 = vadd.f32 %v7762_v19, %v7750_v18  ;;  %8348 = vmatpush.bf16.msrb.mxu3 %v12691_v60  ;;  %v13815_v18 = vld [vmem:[%s16521_s1 + $0x38] sm:$0xff]  ;;  %v13814_v19 = vld [vmem:[%s16521_s1 + $0x30] sm:$0xff] }
 0x519   : > { %8498 = vmatpush.bf16.msra.mxu0 %v13815_v18 }
 0x51a   : > { %vm7847_vm5 = vcmp.ge.f32.partialorder %v7763_v4, 0.0  ;;  %v7852_v57 = vmul.f32 %v16384_v38, %v7763_v4 }
 0x51c   : > { %v7856_v13 = vsel %vm7847_vm5, %v7763_v4, %v7852_v57  ;;  %8349 = vmatpush.bf16.msrb.mxu3 %v12683_v9  ;;  %v13812_v4 = vld [vmem:[%s16521_s1 + $0x20] sm:$0xff]  ;;  %v13823_v57 = vld [vmem:[%s16521_s1 + $0x78] sm:$0xff] }
 0x51d   : > { %v7775_v63 = vpop.f32.mrf.mxu2  ;;  %v7860_v49 = vpack.c.bf16 %v7856_v13, %v7856_v13  ;;  %v7751_v34 = vpop.f32.mrf.mxu0  ;;  %8499 = vmatpush.bf16.msra.mxu0 %v13814_v19  ;;  %8511 = vmatpush.bf16.msra.mxu1 %v13823_v57 }
 0x51e   : > { %v7788_v15 = vpop.f32.mrf.mxu3  ;;  %v7764_v30 = vpop.f32.mrf.mxu1  ;;  %v7776_v14 = vadd.f32 %v7775_v63, %v6567_v21  ;;  %v13809_v63 = vld [vmem:[%s16521_s1 + $0x8] sm:$0xff]  ;;  %v13808_v34 = vld [vmem:[%s16521_s1] sm:$0xff] }
 0x51f   : > { %8286 = vmatmul.bf16.vlgmr.msra.gmra.mxu2 %v7860_v49  ;;  %v13820_v30 = vld [vmem:[%s16521_s1 + $0x60] sm:$0xff] }
 0x520   : > { %8350 = vmatpush.bf16.msrb.mxu3 %v12675_v50  ;;  %v7789_v43 = vadd.f32 %v7788_v15, %v7776_v14 }
 0x521   : > { %8500 = vmatpush.bf16.msra.mxu0 %v13813_v28  ;;  %8512 = vmatpush.bf16.msra.mxu1 %v13822_v53 }
 0x525   : > { %v7777_v47 = vpop.f32.mrf.mxu2  ;;  %8501 = vmatpush.bf16.msra.mxu0 %v13812_v4 }
 0x526   : > { %v7790_v29 = vpop.f32.mrf.mxu3  ;;  %v8359_v47 = vstv %s12732_s29 }
 0x529   : > { %8502 = vmatpush.bf16.msra.mxu0 %v13811_v35 }
 0x52d   : > { %8503 = vmatpush.bf16.msra.mxu0 %v13810_v42 }
 0x52f   : > { %8338 = vmatmul.bf16.vlgmr.msrb.gmra.mxu2 %v7860_v49  ;;  %v13821_v49 = vld [vmem:[%s16521_s1 + $0x68] sm:$0xff] }
 0x530   : > { %8513 = vmatpush.bf16.msra.mxu1 %v13821_v49 }
 0x531   : > { %8504 = vmatpush.bf16.msra.mxu0 %v13809_v63 }
 0x534   : > { %8514 = vmatpush.bf16.msra.mxu1 %v13820_v30 }
 0x535   : > { %v7801_v32 = vpop.f32.mrf.mxu0  ;;  %8505 = vmatpush.bf16.msra.mxu0 %v13808_v34 }
 0x536   : > { %v7814_v25 = vpop.f32.mrf.mxu1  ;;  %v7802_v48 = vadd.f32 %v7801_v32, %v7789_v43 }
 0x538   : > { %v7815_v33 = vadd.f32 %v7814_v25, %v7802_v48  ;;  %8515 = vmatpush.bf16.msra.mxu1 %v13819_v22 }
 0x53c   : > { %8516 = vmatpush.bf16.msra.mxu1 %v13818_v12 }
 0x53d   : > { %v7827_v37 = vpop.f32.mrf.mxu2  ;;  %v7803_v16 = vpop.f32.mrf.mxu0 }
 0x53e   : > { %v7828_v1 = vadd.f32 %v7827_v37, %v7815_v33  ;;  %v7840_v24 = vpop.f32.mrf.mxu3  ;;  %v7816_v8 = vpop.f32.mrf.mxu1  ;;  %v13954_v33 = vld [vmem:[#allocation16] ss:$0 sm:$0xff] }
 0x540   : > { %v7841_v59 = vadd.f32 %v7840_v24, %v7828_v1  ;;  %8517 = vmatpush.bf16.msra.mxu1 %v13817_v52 }
 0x542   : > { %vm7848_vm6 = vcmp.ge.f32.partialorder %v7841_v59, 0.0  ;;  %v7853_v5 = vmul.f32 %v16384_v38, %v7841_v59 }
 0x544   : > { %v7857_v31 = vsel %vm7848_vm6, %v7841_v59, %v7853_v5  ;;  %8518 = vmatpush.bf16.msra.mxu1 %v13816_v51 }
 0x545   : > { %v7861_v11 = vpack.c.bf16 %v7857_v31, %v7857_v31  ;;  %v7829_v54 = vpop.f32.mrf.mxu2 }
 0x546   : > { %v7842_v17 = vpop.f32.mrf.mxu3 }
 0x547   : > { %8299 = vmatmul.bf16.vlgmr.msra.gmra.mxu3 %v7861_v11 }
 0x555   : > { %v8261_v46 = vpop.f32.mrf.mxu0 }
 0x556   : > { %v8262_v0 = vadd.f32 %v8261_v46, %v7928_v41 }
 0x557   : > { %8351 = vmatmul.bf16.vlgmr.msrb.gmra.mxu3 %v7861_v11 }
 0x55d   : > { %v8263_v2 = vpop.f32.mrf.mxu0 }
 0x564   : > { %v8274_v27 = vpop.f32.mrf.mxu1 }
 0x565   : > { %v8275_v3 = vadd.f32 %v8274_v27, %v8262_v0 }
 0x56c   : > { %v8276_v26 = vpop.f32.mrf.mxu1 }
 0x575   : > { %v8313_v20 = vpop.f32.mrf.mxu0 }
 0x576   : > { %v8314_v40 = vadd.f32 %v8313_v20, %v7929_v10  ;;  %v8326_v23 = vpop.f32.mrf.mxu1 }
 0x578   : > { %v8327_v38 = vadd.f32 %v8326_v23, %v8314_v40 }
 0x57d   : > { %v8315_v61 = vpop.f32.mrf.mxu0 }
 0x57e   : > { %v8328_v44 = vpop.f32.mrf.mxu1 }
 0x5a2   : > { %v8287_v13 = vpop.f32.mrf.mxu2 }
 0x5a3   : > { %v8288_v55 = vadd.f32 %v8287_v13, %v8275_v3 }
 0x5aa   : > { %v8289_v15 = vpop.f32.mrf.mxu2 }
 0x5b2   : > { %v8339_v6 = vpop.f32.mrf.mxu2 }
 0x5b3   : > { %v8340_v21 = vadd.f32 %v8339_v6, %v8327_v38 }
 0x5ba   : > { %v8341_v39 = vpop.f32.mrf.mxu2 }
 0x5ca   : > { %v8300_v7 = vpop.f32.mrf.mxu3 }
 0x5cb   : > { %v8301_v29 = vadd.f32 %v8300_v7, %v8288_v55 }
 0x5cd   : > { %vm8357_vm7 = vcmp.ge.f32.partialorder %v8301_v29, 0.0  ;;  %v8360_v60 = vmul.f32 %v8359_v47, %v8301_v29 }
 0x5cf   : > { %v8362_v62 = vsel %vm8357_vm7, %v8301_v29, %v8360_v60 }
 0x5d0   : > { %v8364_v36 = vpack.c.bf16 %v8362_v62, %v8362_v62 }
 0x5d2   : > { %v8302_v9 = vpop.f32.mrf.mxu3  ;;  %8506 = vmatmul.bf16.vlgmr.msra.gmra.mxu0 %v8364_v36 }
 0x5da   : > { %v8352_v14 = vpop.f32.mrf.mxu3 }
 0x5db   : > { %v8353_v58 = vadd.f32 %v8352_v14, %v8340_v21 }
 0x5dd   : > { %vm8358_vm8 = vcmp.ge.f32.partialorder %v8353_v58, 0.0  ;;  %v8361_v56 = vmul.f32 %v8359_v47, %v8353_v58 }
 0x5df   : > { %v8363_v50 = vsel %vm8358_vm8, %v8353_v58, %v8361_v56 }
 0x5e0   : > { %v8365_v43 = vpack.c.bf16 %v8363_v50, %v8363_v50 }
 0x5e2   : > { %v8354_v32 = vpop.f32.mrf.mxu3  ;;  %8519 = vmatmul.bf16.vlgmr.msra.gmra.mxu1 %v8365_v43 }
 0x64f   : > { %v8507_v25 = vpop.f32.mrf.mxu0 }
 0x650   : > { %v8508_v37 = vadd.f32 %v13954_v33, %v8507_v25 }
 0x657   : > { %v8509_v48 = vpop.f32.mrf.mxu0 }
 0x65f   : > { %v8520_v1 = vpop.f32.mrf.mxu1 }
 0x660   : > { %v8521_v24 = vadd.f32 %v8520_v1, %v8508_v37 }
 0x662   : > { %8525 = vst.msk [vmem:[#allocation19] sm:$0xff] %vm8524_vm9, %v8521_v24 }
 0x667   : > { %v8522_v16 = vpop.f32.mrf.mxu1 }
 0x668 PF: > { %p13906_p3 = scmp.eq.s32.totalorder %s14390_s20, 2  ;;  %s14310_s12 = smov [#allocation19]  }
 0x669   : > { %s8532_s3 = sshll.u32 %s14310_s12, 4  ;;  %s16522_s30 = sld [smem:[#allocation41_spill]]  ;;  %s8533_s3 = int_to_ptr.vmem [resolvable:$true] %s8532_s3 }
 0x66f   : > { %s8534_s17 = sshll.u32 %s16522_s30, 4  ;;  %s8535_s17 = int_to_ptr.hbm [resolvable:$true] %s8534_s17 }
 0x670   : > { %13859 = dma.vmem_to_hbm [thread:$0]  (%p13906_p3), %s8533_s3, 128, %s8535_s17, [#allocation5]  }
 0x671   : > { %14279 = dma.done.wait (%p13906_p3), [#allocation5], 128  }
 0x672   : > { %14281 = vsyncadd (%p13906_p3), [#allocation5], 4294967168 }
 0x673 PF: > { %s16523_s16 = sld [smem:[#allocation27_spill]]  ;;  %s16525_s13 = smov %s14288_s14 }
 0x674   : > { %s16524_s19 = sld [smem:[#allocation28_spill]]  ;;  %s16526_s14 = smov %s14292_s15 }
 0x679   : > { %p26_p12 = scmp.ge.s32.totalorder %s16523_s16, 5  }
 0x67a   : > { %s16527_s15 = smov %s16524_s19 }
 0x67b   :  { %28 = sbr.rel (!%p26_p12) target bundleno = 15 (0xf), region = 143 }
 0x680   :  { %8548 = vsyncpa [#allocation4], 1 }
 0x681   :  { %8550 = vsyncpa [#allocation4 + $0x1], 1 }
 0x682   :  { %8551 = vsyncpa [#allocation8], 1 }
 0x683   :  { %8553 = vsyncpa [#allocation8 + $0x1], 1 }
 0x684   :  { %8554 = vsyncpa [#allocation11], 1 }
 0x685   :  { %8555 = vsyncpa [#allocation14], 1 }
 0x686   :  { %8556 = vsyncpa [#allocation17], 1 }
 0x687   :  { %8557 = vsyncpa [#allocation5], 1 }
 0x688   :  { %8559 = vsyncpa [#allocation5 + $0x1], 1 }
 0x689   :  { %8560 = vsyncpa [#allocation6], 1 }
 0x68a   :  { %8562 = vsyncpa [#allocation6 + $0x1], 1 }

</bundles_post_ra>
